<compile_context>
chip_gen: v6e
topology: v6e:2x2x1
jax: 0.10.0
libtpu: 0.0.40
codegen_flags: <defaults>
</compile_context>

<pallas_src>
import functools

import jax
import jax.numpy as jnp
from jax import lax
from jax.experimental import pallas as pl
from jax.experimental.pallas import tpu as pltpu


# ----------------------------------------------------------------------------
# Device-dependent defaults
# ----------------------------------------------------------------------------
def _device_kind():
    try:
        return jax.devices()[0].device_kind.lower()
    except Exception:
        return ""


def _default_block_k(K):
    """Whole problem in one block on 1-TC chips; 2-way split on v7x (2 TCs)."""
    kind = _device_kind()
    two_core = ("v7" in kind) or ("7x" in kind)
    if two_core and K % 2 == 0 and (K // 2) % 8 == 0:
        return K // 2
    return K


def _default_use_bf16():
    """bf16 VPU/EUP exist on v6e/v7x only; keep f32 elsewhere (incl. v5e)."""
    kind = _device_kind()
    return any(tag in kind for tag in ("v6", "v7", "7x"))


# ----------------------------------------------------------------------------
# Pallas kernel: drift MLP + fused Girsanov integral + exp + per-path max
# ----------------------------------------------------------------------------
def _girsanov_kernel(x_ref, det_ref, w1_ref, b1_ref, w2_ref, b2_ref,
                     es_ref, xmax_ref, *, use_bf16):
    """Per-path  exp(s_k)  with  s_k = a_k - 0.5*b_k,  and  max_i x_k,i.

    x_ref    : (block_k, n_e)  VMEM — excursion paths (tile of K samples)
    det_ref  : (1, n_e)        VMEM — time increments, last lane padded to 0
    w1/b1    : (H,)            SMEM — drift MLP layer 1 (Linear(1, H))
    w2       : (H,)            SMEM — drift MLP layer 2 (Linear(H, 1)) weight
    b2       : (1,)            SMEM — drift MLP layer 2 bias
    es_ref   : (block_k, 1)    VMEM — exp(s_k)
    xmax_ref : (block_k, 1)    VMEM — per-path max (for the eps filter)
    """
    x = x_ref[...]                        # (block_k, n_e) f32
    det = det_ref[...]                    # (1, n_e)       f32, last lane == 0
    n_e = x.shape[1]
    H = w1_ref.shape[0]

    # ---- drift mu(x): scalar-input MLP 1 -> H -> 1 with tanh, pointwise -----
    # Unrolled over the small static hidden width; VPU muls/adds + EUP tanh.
    # On v6e/v7x the affine + tanh run in bf16 (double EUP/VPU throughput);
    # mu and the Girsanov sums are always accumulated in f32 (cancellation).
    xb = x.astype(jnp.bfloat16) if use_bf16 else x
    mu = jnp.zeros(x.shape, jnp.float32) + b2_ref[0]
    for j in range(H):
        if use_bf16:
            w1j = jnp.full((1, 1), w1_ref[j], jnp.float32).astype(jnp.bfloat16)
            b1j = jnp.full((1, 1), b1_ref[j], jnp.float32).astype(jnp.bfloat16)
            h = jnp.tanh(xb * w1j + b1j)                    # bf16 VPU + EUP
        else:
            h = jnp.tanh(xb * w1_ref[j] + b1_ref[j])        # f32  VPU + EUP
        mu = mu + w2_ref[j] * h                             # f32 accumulation

    # ---- Girsanov integrals, fully lane-aligned (no 127-wide slices) --------
    # dx_i = x_{i+1} - x_i via an XLU lane rotation; the wrapped last lane and
    # the last b-term are killed by a 0/1 last-lane mask and the zero-padded det.
    lane = lax.broadcasted_iota(jnp.int32, (1, n_e), 1)
    not_last = (lane < (n_e - 1)).astype(jnp.float32)       # (1, n_e)
    x_next = pltpu.roll(x, shift=n_e - 1, axis=1)           # == jnp.roll(x,-1)
    dx = (x_next - x) * not_last                            # (block_k, n_e)

    # single fused row reduction:  s = sum_i mu_i*(dx_i - 0.5*mu_i*det_i)
    integrand = mu * (dx - 0.5 * mu * det)
    s = jnp.sum(integrand, axis=1, keepdims=True)           # (block_k, 1) f32

    es_ref[...] = jnp.exp(s)                                 # fused exp (EUP)
    xmax_ref[...] = jnp.max(x, axis=1, keepdims=True)        # fused row max


def girsanov_exp(x1, e_time, w1, b1, w2, b2, *, block_k=None, use_bf16=None):
    """Runs the kernel over all K paths; returns (exp(s), max(x1)) each (K, 1)."""
    K, n_e = x1.shape
    if block_k is None:
        block_k = _default_block_k(K)
    if use_bf16 is None:
        use_bf16 = _default_use_bf16()
    assert K % block_k == 0 and block_k % 8 == 0

    # time increments, padded with a trailing 0 so the block stays (1, n_e)
    det = jnp.concatenate(
        [e_time[1:] - e_time[:-1], jnp.zeros((1,), jnp.float32)]
    ).reshape(1, n_e).astype(jnp.float32)

    kernel = functools.partial(_girsanov_kernel, use_bf16=use_bf16)

    es, xmax = pl.pallas_call(
        kernel,
        out_shape=(jax.ShapeDtypeStruct((K, 1), jnp.float32),
                   jax.ShapeDtypeStruct((K, 1), jnp.float32)),
        grid=(K // block_k,),
        in_specs=[
            pl.BlockSpec((block_k, n_e), lambda i: (i, 0)),
            pl.BlockSpec((1, n_e), lambda i: (0, 0)),
            pl.BlockSpec(memory_space=pltpu.MemorySpace.SMEM),
            pl.BlockSpec(memory_space=pltpu.MemorySpace.SMEM),
            pl.BlockSpec(memory_space=pltpu.MemorySpace.SMEM),
            pl.BlockSpec(memory_space=pltpu.MemorySpace.SMEM),
        ],
        out_specs=(pl.BlockSpec((block_k, 1), lambda i: (i, 0)),
                   pl.BlockSpec((block_k, 1), lambda i: (i, 0))),
        compiler_params=pltpu.CompilerParams(
            dimension_semantics=("parallel",)),
    )(x1.astype(jnp.float32), det,
      w1.astype(jnp.float32), b1.astype(jnp.float32),
      w2.astype(jnp.float32), b2.astype(jnp.float32))
    return es, xmax


# ----------------------------------------------------------------------------
# Pure-JAX reference for the hot path (correctness check only)
# ----------------------------------------------------------------------------
def _girsanov_s_ref(x1, e_time, w1, b1, w2, b2):
    mu = jnp.tanh(x1[..., None] * w1 + b1) @ w2 + b2[0]      # (K, n_e)
    dx = x1[:, 1:] - x1[:, :-1]
    det = (e_time[1:] - e_time[:-1])[None, :]
    a = jnp.sum(mu[:, :-1] * dx, axis=1)
    b = jnp.sum(mu[:, :-1] ** 2 * det, axis=1)
    return (a - 0.5 * b)[:, None]


# ----------------------------------------------------------------------------
# Glue: full LocalTimePP.forward  (prior == None, use_time == False, d == 1)
# ----------------------------------------------------------------------------
def local_time_pp_forward(x, params, key, *, t0=1e-7, K=128, n_e=128):
    """x = (t, xt) as in the PyTorch module; returns logp(t).exp()."""
    t, _xt = x
    t = jnp.asarray(t, jnp.float32)
    eps = jnp.abs(params["eps"])

    # e_time = linspace(t0, t, n_e)
    e_time = jnp.linspace(jnp.float32(t0), t, n_e).astype(jnp.float32)

    # TODO(synk): `excursion()` is external to the module; approximated here by
    # a reflected Brownian bridge pinned to 0 at both ends (positive paths).
    dt = e_time[1:] - e_time[:-1]
    z = jax.random.normal(key, (K, n_e - 1), dtype=jnp.float32)
    bm = jnp.concatenate(
        [jnp.zeros((K, 1), jnp.float32),
         jnp.cumsum(z * jnp.sqrt(dt)[None, :], axis=1)], axis=1)   # (K, n_e)
    span = e_time[-1] - e_time[0]
    tau = (e_time - e_time[0]) / span
    x1 = jnp.abs(bm - tau[None, :] * bm[:, -1:])                   # (K, n_e) >= 0

    # Hot path: Pallas kernel (drift MLP + Girsanov integral + exp + row max).
    es, xmax = girsanov_exp(x1, e_time, params["w1"], params["b1"],
                            params["w2"], params["b2"])            # (K,1) each
    es = es[:, 0]
    xmax = xmax[:, 0]

    # `x1[indices]` boolean filter has dynamic shape; reproduce it with a
    # masked mean (falls back to all paths if none reach eps, as in the code).
    valid = xmax > eps                                             # (K,)
    wmask = jnp.where(jnp.any(valid),
                      valid.astype(jnp.float32),
                      jnp.ones((K,), jnp.float32))
    expect = jnp.sum(es * wmask) / jnp.sum(wmask)

    # prior == None branch of logp()
    prior = (jnp.log(eps) + jnp.log(jnp.sqrt(2.0 / jnp.pi))
             - 2.0 * eps ** 2 / t - jnp.log(t ** 1.5))

    out = jnp.exp(jnp.log(expect) + prior)
    return out, es, xmax, x1, e_time


# ----------------------------------------------------------------------------
if __name__ == "__main__":
    # Deterministic parameter init (module __init__: eps is an nn.Parameter,
    # mu is an nn.Module -> here a 1 -> H -> 1 tanh MLP).
    H = 32
    key = jax.random.PRNGKey(0)
    k_w1, k_b1, k_w2, k_path = jax.random.split(key, 4)
    params = {
        "w1": jax.random.normal(k_w1, (H,), jnp.float32) * 0.5,
        "b1": jax.random.normal(k_b1, (H,), jnp.float32) * 0.1,
        "w2": jax.random.normal(k_w2, (H,), jnp.float32) / jnp.sqrt(H),
        "b2": jnp.array([0.01], jnp.float32),
        "eps": jnp.float32(0.05),
    }

    # Small shapes: K = 128 Monte-Carlo paths, n_e = 128 time steps.
    t_hit = jnp.float32(1.0)                 # first-hitting time argument
    xt_dummy = jnp.zeros((8, 1), jnp.float32)

    fwd = jax.jit(functools.partial(local_time_pp_forward, K=128, n_e=128))
    out, es, xmax, x1, e_time = fwd((t_hit, xt_dummy), params, k_path)
    out = jax.block_until_ready(out)

    # Sanity: Pallas kernel vs pure-JAX f32 reference of the hot path.
    s_kernel = jnp.log(es)[:, None]
    s_ref = _girsanov_s_ref(x1, e_time, params["w1"], params["b1"],
                            params["w2"], params["b2"])
    if _default_use_bf16():
        rtol, atol = 2e-2, 1.5e-1   # bf16 tanh/affine vs f32 reference
    else:
        rtol, atol = 2e-3, 2e-3     # pure f32 path
    assert jnp.all(jnp.isfinite(out)), "non-finite forward output"
    assert jnp.allclose(s_kernel, s_ref, rtol=rtol, atol=atol), (
        "kernel/reference mismatch on Girsanov exponent")
    assert jnp.allclose(xmax, jnp.max(x1, axis=1), rtol=1e-6, atol=1e-6), (
        "kernel/reference mismatch on per-path max")

    print("KERNEL_OK")
</pallas_src>

<mosaic_0001>
module attributes {stable_mosaic.version = 11 : i64} {
  func.func @_girsanov_kernel(%arg0: i32, %arg1: memref<128x128xf32, #tpu.memory_space<vmem>>, %arg2: memref<1x128xf32, #tpu.memory_space<vmem>>, %arg3: memref<32xf32, #tpu.memory_space<smem>>, %arg4: memref<32xf32, #tpu.memory_space<smem>>, %arg5: memref<32xf32, #tpu.memory_space<smem>>, %arg6: memref<1xf32, #tpu.memory_space<smem>>, %arg7: memref<128x1xf32, #tpu.memory_space<vmem>>, %arg8: memref<128x1xf32, #tpu.memory_space<vmem>>) attributes {dimension_semantics = [#tpu.dimension_semantics<parallel>], iteration_bounds = array<i64: 1>, scalar_prefetch = 0 : i64, scratch_operands = 0 : i64, tpu.core_type = #tpu.core_type<tc>, window_params = [{transform_indices = @transform_0, window_bounds = array<i64: 128, 128>}, {pipeline_mode = #tpu.pipeline_mode<synchronous>, transform_indices = @transform_1, window_bounds = array<i64: 1, 128>}, {transform_indices = @transform_2, window_bounds = array<i64: 32>}, {transform_indices = @transform_3, window_bounds = array<i64: 32>}, {transform_indices = @transform_4, window_bounds = array<i64: 32>}, {transform_indices = @transform_5, window_bounds = array<i64: 1>}, {transform_indices = @transform_6, window_bounds = array<i64: 128, 1>}, {transform_indices = @transform_7, window_bounds = array<i64: 128, 1>}]} {
    %c0 = arith.constant 0 : index
    %c0_0 = arith.constant 0 : index
    %0 = vector.load %arg1[%c0, %c0_0] : memref<128x128xf32, #tpu.memory_space<vmem>>, vector<128x128xf32>
    %c0_1 = arith.constant 0 : index
    %c0_2 = arith.constant 0 : index
    %1 = vector.load %arg2[%c0_1, %c0_2] : memref<1x128xf32, #tpu.memory_space<vmem>>, vector<1x128xf32>
    %cst = arith.constant 0.000000e+00 : f32
    %2 = vector.broadcast %cst : f32 to vector<128x128xf32>
    %c0_3 = arith.constant 0 : index
    %3 = memref.load %arg6[%c0_3] : memref<1xf32, #tpu.memory_space<smem>>
    %4 = vector.broadcast %3 : f32 to vector<128x128xf32>
    %5 = arith.addf %2, %4 : vector<128x128xf32>
    %c0_4 = arith.constant 0 : index
    %6 = memref.load %arg3[%c0_4] : memref<32xf32, #tpu.memory_space<smem>>
    %7 = vector.broadcast %6 : f32 to vector<128x128xf32>
    %8 = arith.mulf %0, %7 : vector<128x128xf32>
    %c0_5 = arith.constant 0 : index
    %9 = memref.load %arg4[%c0_5] : memref<32xf32, #tpu.memory_space<smem>>
    %10 = vector.broadcast %9 : f32 to vector<128x128xf32>
    %11 = arith.addf %8, %10 : vector<128x128xf32>
    %12 = math.tanh %11 : vector<128x128xf32>
    %c0_6 = arith.constant 0 : index
    %13 = memref.load %arg5[%c0_6] : memref<32xf32, #tpu.memory_space<smem>>
    %14 = vector.broadcast %13 : f32 to vector<128x128xf32>
    %15 = arith.mulf %14, %12 : vector<128x128xf32>
    %16 = arith.addf %5, %15 : vector<128x128xf32>
    %c1 = arith.constant 1 : index
    %17 = memref.load %arg3[%c1] : memref<32xf32, #tpu.memory_space<smem>>
    %18 = vector.broadcast %17 : f32 to vector<128x128xf32>
    %19 = arith.mulf %0, %18 : vector<128x128xf32>
    %c1_7 = arith.constant 1 : index
    %20 = memref.load %arg4[%c1_7] : memref<32xf32, #tpu.memory_space<smem>>
    %21 = vector.broadcast %20 : f32 to vector<128x128xf32>
    %22 = arith.addf %19, %21 : vector<128x128xf32>
    %23 = math.tanh %22 : vector<128x128xf32>
    %c1_8 = arith.constant 1 : index
    %24 = memref.load %arg5[%c1_8] : memref<32xf32, #tpu.memory_space<smem>>
    %25 = vector.broadcast %24 : f32 to vector<128x128xf32>
    %26 = arith.mulf %25, %23 : vector<128x128xf32>
    %27 = arith.addf %16, %26 : vector<128x128xf32>
    %c2 = arith.constant 2 : index
    %28 = memref.load %arg3[%c2] : memref<32xf32, #tpu.memory_space<smem>>
    %29 = vector.broadcast %28 : f32 to vector<128x128xf32>
    %30 = arith.mulf %0, %29 : vector<128x128xf32>
    %c2_9 = arith.constant 2 : index
    %31 = memref.load %arg4[%c2_9] : memref<32xf32, #tpu.memory_space<smem>>
    %32 = vector.broadcast %31 : f32 to vector<128x128xf32>
    %33 = arith.addf %30, %32 : vector<128x128xf32>
    %34 = math.tanh %33 : vector<128x128xf32>
    %c2_10 = arith.constant 2 : index
    %35 = memref.load %arg5[%c2_10] : memref<32xf32, #tpu.memory_space<smem>>
    %36 = vector.broadcast %35 : f32 to vector<128x128xf32>
    %37 = arith.mulf %36, %34 : vector<128x128xf32>
    %38 = arith.addf %27, %37 : vector<128x128xf32>
    %c3 = arith.constant 3 : index
    %39 = memref.load %arg3[%c3] : memref<32xf32, #tpu.memory_space<smem>>
    %40 = vector.broadcast %39 : f32 to vector<128x128xf32>
    %41 = arith.mulf %0, %40 : vector<128x128xf32>
    %c3_11 = arith.constant 3 : index
    %42 = memref.load %arg4[%c3_11] : memref<32xf32, #tpu.memory_space<smem>>
    %43 = vector.broadcast %42 : f32 to vector<128x128xf32>
    %44 = arith.addf %41, %43 : vector<128x128xf32>
    %45 = math.tanh %44 : vector<128x128xf32>
    %c3_12 = arith.constant 3 : index
    %46 = memref.load %arg5[%c3_12] : memref<32xf32, #tpu.memory_space<smem>>
    %47 = vector.broadcast %46 : f32 to vector<128x128xf32>
    %48 = arith.mulf %47, %45 : vector<128x128xf32>
    %49 = arith.addf %38, %48 : vector<128x128xf32>
    %c4 = arith.constant 4 : index
    %50 = memref.load %arg3[%c4] : memref<32xf32, #tpu.memory_space<smem>>
    %51 = vector.broadcast %50 : f32 to vector<128x128xf32>
    %52 = arith.mulf %0, %51 : vector<128x128xf32>
    %c4_13 = arith.constant 4 : index
    %53 = memref.load %arg4[%c4_13] : memref<32xf32, #tpu.memory_space<smem>>
    %54 = vector.broadcast %53 : f32 to vector<128x128xf32>
    %55 = arith.addf %52, %54 : vector<128x128xf32>
    %56 = math.tanh %55 : vector<128x128xf32>
    %c4_14 = arith.constant 4 : index
    %57 = memref.load %arg5[%c4_14] : memref<32xf32, #tpu.memory_space<smem>>
    %58 = vector.broadcast %57 : f32 to vector<128x128xf32>
    %59 = arith.mulf %58, %56 : vector<128x128xf32>
    %60 = arith.addf %49, %59 : vector<128x128xf32>
    %c5 = arith.constant 5 : index
    %61 = memref.load %arg3[%c5] : memref<32xf32, #tpu.memory_space<smem>>
    %62 = vector.broadcast %61 : f32 to vector<128x128xf32>
    %63 = arith.mulf %0, %62 : vector<128x128xf32>
    %c5_15 = arith.constant 5 : index
    %64 = memref.load %arg4[%c5_15] : memref<32xf32, #tpu.memory_space<smem>>
    %65 = vector.broadcast %64 : f32 to vector<128x128xf32>
    %66 = arith.addf %63, %65 : vector<128x128xf32>
    %67 = math.tanh %66 : vector<128x128xf32>
    %c5_16 = arith.constant 5 : index
    %68 = memref.load %arg5[%c5_16] : memref<32xf32, #tpu.memory_space<smem>>
    %69 = vector.broadcast %68 : f32 to vector<128x128xf32>
    %70 = arith.mulf %69, %67 : vector<128x128xf32>
    %71 = arith.addf %60, %70 : vector<128x128xf32>
    %c6 = arith.constant 6 : index
    %72 = memref.load %arg3[%c6] : memref<32xf32, #tpu.memory_space<smem>>
    %73 = vector.broadcast %72 : f32 to vector<128x128xf32>
    %74 = arith.mulf %0, %73 : vector<128x128xf32>
    %c6_17 = arith.constant 6 : index
    %75 = memref.load %arg4[%c6_17] : memref<32xf32, #tpu.memory_space<smem>>
    %76 = vector.broadcast %75 : f32 to vector<128x128xf32>
    %77 = arith.addf %74, %76 : vector<128x128xf32>
    %78 = math.tanh %77 : vector<128x128xf32>
    %c6_18 = arith.constant 6 : index
    %79 = memref.load %arg5[%c6_18] : memref<32xf32, #tpu.memory_space<smem>>
    %80 = vector.broadcast %79 : f32 to vector<128x128xf32>
    %81 = arith.mulf %80, %78 : vector<128x128xf32>
    %82 = arith.addf %71, %81 : vector<128x128xf32>
    %c7 = arith.constant 7 : index
    %83 = memref.load %arg3[%c7] : memref<32xf32, #tpu.memory_space<smem>>
    %84 = vector.broadcast %83 : f32 to vector<128x128xf32>
    %85 = arith.mulf %0, %84 : vector<128x128xf32>
    %c7_19 = arith.constant 7 : index
    %86 = memref.load %arg4[%c7_19] : memref<32xf32, #tpu.memory_space<smem>>
    %87 = vector.broadcast %86 : f32 to vector<128x128xf32>
    %88 = arith.addf %85, %87 : vector<128x128xf32>
    %89 = math.tanh %88 : vector<128x128xf32>
    %c7_20 = arith.constant 7 : index
    %90 = memref.load %arg5[%c7_20] : memref<32xf32, #tpu.memory_space<smem>>
    %91 = vector.broadcast %90 : f32 to vector<128x128xf32>
    %92 = arith.mulf %91, %89 : vector<128x128xf32>
    %93 = arith.addf %82, %92 : vector<128x128xf32>
    %c8 = arith.constant 8 : index
    %94 = memref.load %arg3[%c8] : memref<32xf32, #tpu.memory_space<smem>>
    %95 = vector.broadcast %94 : f32 to vector<128x128xf32>
    %96 = arith.mulf %0, %95 : vector<128x128xf32>
    %c8_21 = arith.constant 8 : index
    %97 = memref.load %arg4[%c8_21] : memref<32xf32, #tpu.memory_space<smem>>
    %98 = vector.broadcast %97 : f32 to vector<128x128xf32>
    %99 = arith.addf %96, %98 : vector<128x128xf32>
    %100 = math.tanh %99 : vector<128x128xf32>
    %c8_22 = arith.constant 8 : index
    %101 = memref.load %arg5[%c8_22] : memref<32xf32, #tpu.memory_space<smem>>
    %102 = vector.broadcast %101 : f32 to vector<128x128xf32>
    %103 = arith.mulf %102, %100 : vector<128x128xf32>
    %104 = arith.addf %93, %103 : vector<128x128xf32>
    %c9 = arith.constant 9 : index
    %105 = memref.load %arg3[%c9] : memref<32xf32, #tpu.memory_space<smem>>
    %106 = vector.broadcast %105 : f32 to vector<128x128xf32>
    %107 = arith.mulf %0, %106 : vector<128x128xf32>
    %c9_23 = arith.constant 9 : index
    %108 = memref.load %arg4[%c9_23] : memref<32xf32, #tpu.memory_space<smem>>
    %109 = vector.broadcast %108 : f32 to vector<128x128xf32>
    %110 = arith.addf %107, %109 : vector<128x128xf32>
    %111 = math.tanh %110 : vector<128x128xf32>
    %c9_24 = arith.constant 9 : index
    %112 = memref.load %arg5[%c9_24] : memref<32xf32, #tpu.memory_space<smem>>
    %113 = vector.broadcast %112 : f32 to vector<128x128xf32>
    %114 = arith.mulf %113, %111 : vector<128x128xf32>
    %115 = arith.addf %104, %114 : vector<128x128xf32>
    %c10 = arith.constant 10 : index
    %116 = memref.load %arg3[%c10] : memref<32xf32, #tpu.memory_space<smem>>
    %117 = vector.broadcast %116 : f32 to vector<128x128xf32>
    %118 = arith.mulf %0, %117 : vector<128x128xf32>
    %c10_25 = arith.constant 10 : index
    %119 = memref.load %arg4[%c10_25] : memref<32xf32, #tpu.memory_space<smem>>
    %120 = vector.broadcast %119 : f32 to vector<128x128xf32>
    %121 = arith.addf %118, %120 : vector<128x128xf32>
    %122 = math.tanh %121 : vector<128x128xf32>
    %c10_26 = arith.constant 10 : index
    %123 = memref.load %arg5[%c10_26] : memref<32xf32, #tpu.memory_space<smem>>
    %124 = vector.broadcast %123 : f32 to vector<128x128xf32>
    %125 = arith.mulf %124, %122 : vector<128x128xf32>
    %126 = arith.addf %115, %125 : vector<128x128xf32>
    %c11 = arith.constant 11 : index
    %127 = memref.load %arg3[%c11] : memref<32xf32, #tpu.memory_space<smem>>
    %128 = vector.broadcast %127 : f32 to vector<128x128xf32>
    %129 = arith.mulf %0, %128 : vector<128x128xf32>
    %c11_27 = arith.constant 11 : index
    %130 = memref.load %arg4[%c11_27] : memref<32xf32, #tpu.memory_space<smem>>
    %131 = vector.broadcast %130 : f32 to vector<128x128xf32>
    %132 = arith.addf %129, %131 : vector<128x128xf32>
    %133 = math.tanh %132 : vector<128x128xf32>
    %c11_28 = arith.constant 11 : index
    %134 = memref.load %arg5[%c11_28] : memref<32xf32, #tpu.memory_space<smem>>
    %135 = vector.broadcast %134 : f32 to vector<128x128xf32>
    %136 = arith.mulf %135, %133 : vector<128x128xf32>
    %137 = arith.addf %126, %136 : vector<128x128xf32>
    %c12 = arith.constant 12 : index
    %138 = memref.load %arg3[%c12] : memref<32xf32, #tpu.memory_space<smem>>
    %139 = vector.broadcast %138 : f32 to vector<128x128xf32>
    %140 = arith.mulf %0, %139 : vector<128x128xf32>
    %c12_29 = arith.constant 12 : index
    %141 = memref.load %arg4[%c12_29] : memref<32xf32, #tpu.memory_space<smem>>
    %142 = vector.broadcast %141 : f32 to vector<128x128xf32>
    %143 = arith.addf %140, %142 : vector<128x128xf32>
    %144 = math.tanh %143 : vector<128x128xf32>
    %c12_30 = arith.constant 12 : index
    %145 = memref.load %arg5[%c12_30] : memref<32xf32, #tpu.memory_space<smem>>
    %146 = vector.broadcast %145 : f32 to vector<128x128xf32>
    %147 = arith.mulf %146, %144 : vector<128x128xf32>
    %148 = arith.addf %137, %147 : vector<128x128xf32>
    %c13 = arith.constant 13 : index
    %149 = memref.load %arg3[%c13] : memref<32xf32, #tpu.memory_space<smem>>
    %150 = vector.broadcast %149 : f32 to vector<128x128xf32>
    %151 = arith.mulf %0, %150 : vector<128x128xf32>
    %c13_31 = arith.constant 13 : index
    %152 = memref.load %arg4[%c13_31] : memref<32xf32, #tpu.memory_space<smem>>
    %153 = vector.broadcast %152 : f32 to vector<128x128xf32>
    %154 = arith.addf %151, %153 : vector<128x128xf32>
    %155 = math.tanh %154 : vector<128x128xf32>
    %c13_32 = arith.constant 13 : index
    %156 = memref.load %arg5[%c13_32] : memref<32xf32, #tpu.memory_space<smem>>
    %157 = vector.broadcast %156 : f32 to vector<128x128xf32>
    %158 = arith.mulf %157, %155 : vector<128x128xf32>
    %159 = arith.addf %148, %158 : vector<128x128xf32>
    %c14 = arith.constant 14 : index
    %160 = memref.load %arg3[%c14] : memref<32xf32, #tpu.memory_space<smem>>
    %161 = vector.broadcast %160 : f32 to vector<128x128xf32>
    %162 = arith.mulf %0, %161 : vector<128x128xf32>
    %c14_33 = arith.constant 14 : index
    %163 = memref.load %arg4[%c14_33] : memref<32xf32, #tpu.memory_space<smem>>
    %164 = vector.broadcast %163 : f32 to vector<128x128xf32>
    %165 = arith.addf %162, %164 : vector<128x128xf32>
    %166 = math.tanh %165 : vector<128x128xf32>
    %c14_34 = arith.constant 14 : index
    %167 = memref.load %arg5[%c14_34] : memref<32xf32, #tpu.memory_space<smem>>
    %168 = vector.broadcast %167 : f32 to vector<128x128xf32>
    %169 = arith.mulf %168, %166 : vector<128x128xf32>
    %170 = arith.addf %159, %169 : vector<128x128xf32>
    %c15 = arith.constant 15 : index
    %171 = memref.load %arg3[%c15] : memref<32xf32, #tpu.memory_space<smem>>
    %172 = vector.broadcast %171 : f32 to vector<128x128xf32>
    %173 = arith.mulf %0, %172 : vector<128x128xf32>
    %c15_35 = arith.constant 15 : index
    %174 = memref.load %arg4[%c15_35] : memref<32xf32, #tpu.memory_space<smem>>
    %175 = vector.broadcast %174 : f32 to vector<128x128xf32>
    %176 = arith.addf %173, %175 : vector<128x128xf32>
    %177 = math.tanh %176 : vector<128x128xf32>
    %c15_36 = arith.constant 15 : index
    %178 = memref.load %arg5[%c15_36] : memref<32xf32, #tpu.memory_space<smem>>
    %179 = vector.broadcast %178 : f32 to vector<128x128xf32>
    %180 = arith.mulf %179, %177 : vector<128x128xf32>
    %181 = arith.addf %170, %180 : vector<128x128xf32>
    %c16 = arith.constant 16 : index
    %182 = memref.load %arg3[%c16] : memref<32xf32, #tpu.memory_space<smem>>
    %183 = vector.broadcast %182 : f32 to vector<128x128xf32>
    %184 = arith.mulf %0, %183 : vector<128x128xf32>
    %c16_37 = arith.constant 16 : index
    %185 = memref.load %arg4[%c16_37] : memref<32xf32, #tpu.memory_space<smem>>
    %186 = vector.broadcast %185 : f32 to vector<128x128xf32>
    %187 = arith.addf %184, %186 : vector<128x128xf32>
    %188 = math.tanh %187 : vector<128x128xf32>
    %c16_38 = arith.constant 16 : index
    %189 = memref.load %arg5[%c16_38] : memref<32xf32, #tpu.memory_space<smem>>
    %190 = vector.broadcast %189 : f32 to vector<128x128xf32>
    %191 = arith.mulf %190, %188 : vector<128x128xf32>
    %192 = arith.addf %181, %191 : vector<128x128xf32>
    %c17 = arith.constant 17 : index
    %193 = memref.load %arg3[%c17] : memref<32xf32, #tpu.memory_space<smem>>
    %194 = vector.broadcast %193 : f32 to vector<128x128xf32>
    %195 = arith.mulf %0, %194 : vector<128x128xf32>
    %c17_39 = arith.constant 17 : index
    %196 = memref.load %arg4[%c17_39] : memref<32xf32, #tpu.memory_space<smem>>
    %197 = vector.broadcast %196 : f32 to vector<128x128xf32>
    %198 = arith.addf %195, %197 : vector<128x128xf32>
    %199 = math.tanh %198 : vector<128x128xf32>
    %c17_40 = arith.constant 17 : index
    %200 = memref.load %arg5[%c17_40] : memref<32xf32, #tpu.memory_space<smem>>
    %201 = vector.broadcast %200 : f32 to vector<128x128xf32>
    %202 = arith.mulf %201, %199 : vector<128x128xf32>
    %203 = arith.addf %192, %202 : vector<128x128xf32>
    %c18 = arith.constant 18 : index
    %204 = memref.load %arg3[%c18] : memref<32xf32, #tpu.memory_space<smem>>
    %205 = vector.broadcast %204 : f32 to vector<128x128xf32>
    %206 = arith.mulf %0, %205 : vector<128x128xf32>
    %c18_41 = arith.constant 18 : index
    %207 = memref.load %arg4[%c18_41] : memref<32xf32, #tpu.memory_space<smem>>
    %208 = vector.broadcast %207 : f32 to vector<128x128xf32>
    %209 = arith.addf %206, %208 : vector<128x128xf32>
    %210 = math.tanh %209 : vector<128x128xf32>
    %c18_42 = arith.constant 18 : index
    %211 = memref.load %arg5[%c18_42] : memref<32xf32, #tpu.memory_space<smem>>
    %212 = vector.broadcast %211 : f32 to vector<128x128xf32>
    %213 = arith.mulf %212, %210 : vector<128x128xf32>
    %214 = arith.addf %203, %213 : vector<128x128xf32>
    %c19 = arith.constant 19 : index
    %215 = memref.load %arg3[%c19] : memref<32xf32, #tpu.memory_space<smem>>
    %216 = vector.broadcast %215 : f32 to vector<128x128xf32>
    %217 = arith.mulf %0, %216 : vector<128x128xf32>
    %c19_43 = arith.constant 19 : index
    %218 = memref.load %arg4[%c19_43] : memref<32xf32, #tpu.memory_space<smem>>
    %219 = vector.broadcast %218 : f32 to vector<128x128xf32>
    %220 = arith.addf %217, %219 : vector<128x128xf32>
    %221 = math.tanh %220 : vector<128x128xf32>
    %c19_44 = arith.constant 19 : index
    %222 = memref.load %arg5[%c19_44] : memref<32xf32, #tpu.memory_space<smem>>
    %223 = vector.broadcast %222 : f32 to vector<128x128xf32>
    %224 = arith.mulf %223, %221 : vector<128x128xf32>
    %225 = arith.addf %214, %224 : vector<128x128xf32>
    %c20 = arith.constant 20 : index
    %226 = memref.load %arg3[%c20] : memref<32xf32, #tpu.memory_space<smem>>
    %227 = vector.broadcast %226 : f32 to vector<128x128xf32>
    %228 = arith.mulf %0, %227 : vector<128x128xf32>
    %c20_45 = arith.constant 20 : index
    %229 = memref.load %arg4[%c20_45] : memref<32xf32, #tpu.memory_space<smem>>
    %230 = vector.broadcast %229 : f32 to vector<128x128xf32>
    %231 = arith.addf %228, %230 : vector<128x128xf32>
    %232 = math.tanh %231 : vector<128x128xf32>
    %c20_46 = arith.constant 20 : index
    %233 = memref.load %arg5[%c20_46] : memref<32xf32, #tpu.memory_space<smem>>
    %234 = vector.broadcast %233 : f32 to vector<128x128xf32>
    %235 = arith.mulf %234, %232 : vector<128x128xf32>
    %236 = arith.addf %225, %235 : vector<128x128xf32>
    %c21 = arith.constant 21 : index
    %237 = memref.load %arg3[%c21] : memref<32xf32, #tpu.memory_space<smem>>
    %238 = vector.broadcast %237 : f32 to vector<128x128xf32>
    %239 = arith.mulf %0, %238 : vector<128x128xf32>
    %c21_47 = arith.constant 21 : index
    %240 = memref.load %arg4[%c21_47] : memref<32xf32, #tpu.memory_space<smem>>
    %241 = vector.broadcast %240 : f32 to vector<128x128xf32>
    %242 = arith.addf %239, %241 : vector<128x128xf32>
    %243 = math.tanh %242 : vector<128x128xf32>
    %c21_48 = arith.constant 21 : index
    %244 = memref.load %arg5[%c21_48] : memref<32xf32, #tpu.memory_space<smem>>
    %245 = vector.broadcast %244 : f32 to vector<128x128xf32>
    %246 = arith.mulf %245, %243 : vector<128x128xf32>
    %247 = arith.addf %236, %246 : vector<128x128xf32>
    %c22 = arith.constant 22 : index
    %248 = memref.load %arg3[%c22] : memref<32xf32, #tpu.memory_space<smem>>
    %249 = vector.broadcast %248 : f32 to vector<128x128xf32>
    %250 = arith.mulf %0, %249 : vector<128x128xf32>
    %c22_49 = arith.constant 22 : index
    %251 = memref.load %arg4[%c22_49] : memref<32xf32, #tpu.memory_space<smem>>
    %252 = vector.broadcast %251 : f32 to vector<128x128xf32>
    %253 = arith.addf %250, %252 : vector<128x128xf32>
    %254 = math.tanh %253 : vector<128x128xf32>
    %c22_50 = arith.constant 22 : index
    %255 = memref.load %arg5[%c22_50] : memref<32xf32, #tpu.memory_space<smem>>
    %256 = vector.broadcast %255 : f32 to vector<128x128xf32>
    %257 = arith.mulf %256, %254 : vector<128x128xf32>
    %258 = arith.addf %247, %257 : vector<128x128xf32>
    %c23 = arith.constant 23 : index
    %259 = memref.load %arg3[%c23] : memref<32xf32, #tpu.memory_space<smem>>
    %260 = vector.broadcast %259 : f32 to vector<128x128xf32>
    %261 = arith.mulf %0, %260 : vector<128x128xf32>
    %c23_51 = arith.constant 23 : index
    %262 = memref.load %arg4[%c23_51] : memref<32xf32, #tpu.memory_space<smem>>
    %263 = vector.broadcast %262 : f32 to vector<128x128xf32>
    %264 = arith.addf %261, %263 : vector<128x128xf32>
    %265 = math.tanh %264 : vector<128x128xf32>
    %c23_52 = arith.constant 23 : index
    %266 = memref.load %arg5[%c23_52] : memref<32xf32, #tpu.memory_space<smem>>
    %267 = vector.broadcast %266 : f32 to vector<128x128xf32>
    %268 = arith.mulf %267, %265 : vector<128x128xf32>
    %269 = arith.addf %258, %268 : vector<128x128xf32>
    %c24 = arith.constant 24 : index
    %270 = memref.load %arg3[%c24] : memref<32xf32, #tpu.memory_space<smem>>
    %271 = vector.broadcast %270 : f32 to vector<128x128xf32>
    %272 = arith.mulf %0, %271 : vector<128x128xf32>
    %c24_53 = arith.constant 24 : index
    %273 = memref.load %arg4[%c24_53] : memref<32xf32, #tpu.memory_space<smem>>
    %274 = vector.broadcast %273 : f32 to vector<128x128xf32>
    %275 = arith.addf %272, %274 : vector<128x128xf32>
    %276 = math.tanh %275 : vector<128x128xf32>
    %c24_54 = arith.constant 24 : index
    %277 = memref.load %arg5[%c24_54] : memref<32xf32, #tpu.memory_space<smem>>
    %278 = vector.broadcast %277 : f32 to vector<128x128xf32>
    %279 = arith.mulf %278, %276 : vector<128x128xf32>
    %280 = arith.addf %269, %279 : vector<128x128xf32>
    %c25 = arith.constant 25 : index
    %281 = memref.load %arg3[%c25] : memref<32xf32, #tpu.memory_space<smem>>
    %282 = vector.broadcast %281 : f32 to vector<128x128xf32>
    %283 = arith.mulf %0, %282 : vector<128x128xf32>
    %c25_55 = arith.constant 25 : index
    %284 = memref.load %arg4[%c25_55] : memref<32xf32, #tpu.memory_space<smem>>
    %285 = vector.broadcast %284 : f32 to vector<128x128xf32>
    %286 = arith.addf %283, %285 : vector<128x128xf32>
    %287 = math.tanh %286 : vector<128x128xf32>
    %c25_56 = arith.constant 25 : index
    %288 = memref.load %arg5[%c25_56] : memref<32xf32, #tpu.memory_space<smem>>
    %289 = vector.broadcast %288 : f32 to vector<128x128xf32>
    %290 = arith.mulf %289, %287 : vector<128x128xf32>
    %291 = arith.addf %280, %290 : vector<128x128xf32>
    %c26 = arith.constant 26 : index
    %292 = memref.load %arg3[%c26] : memref<32xf32, #tpu.memory_space<smem>>
    %293 = vector.broadcast %292 : f32 to vector<128x128xf32>
    %294 = arith.mulf %0, %293 : vector<128x128xf32>
    %c26_57 = arith.constant 26 : index
    %295 = memref.load %arg4[%c26_57] : memref<32xf32, #tpu.memory_space<smem>>
    %296 = vector.broadcast %295 : f32 to vector<128x128xf32>
    %297 = arith.addf %294, %296 : vector<128x128xf32>
    %298 = math.tanh %297 : vector<128x128xf32>
    %c26_58 = arith.constant 26 : index
    %299 = memref.load %arg5[%c26_58] : memref<32xf32, #tpu.memory_space<smem>>
    %300 = vector.broadcast %299 : f32 to vector<128x128xf32>
    %301 = arith.mulf %300, %298 : vector<128x128xf32>
    %302 = arith.addf %291, %301 : vector<128x128xf32>
    %c27 = arith.constant 27 : index
    %303 = memref.load %arg3[%c27] : memref<32xf32, #tpu.memory_space<smem>>
    %304 = vector.broadcast %303 : f32 to vector<128x128xf32>
    %305 = arith.mulf %0, %304 : vector<128x128xf32>
    %c27_59 = arith.constant 27 : index
    %306 = memref.load %arg4[%c27_59] : memref<32xf32, #tpu.memory_space<smem>>
    %307 = vector.broadcast %306 : f32 to vector<128x128xf32>
    %308 = arith.addf %305, %307 : vector<128x128xf32>
    %309 = math.tanh %308 : vector<128x128xf32>
    %c27_60 = arith.constant 27 : index
    %310 = memref.load %arg5[%c27_60] : memref<32xf32, #tpu.memory_space<smem>>
    %311 = vector.broadcast %310 : f32 to vector<128x128xf32>
    %312 = arith.mulf %311, %309 : vector<128x128xf32>
    %313 = arith.addf %302, %312 : vector<128x128xf32>
    %c28 = arith.constant 28 : index
    %314 = memref.load %arg3[%c28] : memref<32xf32, #tpu.memory_space<smem>>
    %315 = vector.broadcast %314 : f32 to vector<128x128xf32>
    %316 = arith.mulf %0, %315 : vector<128x128xf32>
    %c28_61 = arith.constant 28 : index
    %317 = memref.load %arg4[%c28_61] : memref<32xf32, #tpu.memory_space<smem>>
    %318 = vector.broadcast %317 : f32 to vector<128x128xf32>
    %319 = arith.addf %316, %318 : vector<128x128xf32>
    %320 = math.tanh %319 : vector<128x128xf32>
    %c28_62 = arith.constant 28 : index
    %321 = memref.load %arg5[%c28_62] : memref<32xf32, #tpu.memory_space<smem>>
    %322 = vector.broadcast %321 : f32 to vector<128x128xf32>
    %323 = arith.mulf %322, %320 : vector<128x128xf32>
    %324 = arith.addf %313, %323 : vector<128x128xf32>
    %c29 = arith.constant 29 : index
    %325 = memref.load %arg3[%c29] : memref<32xf32, #tpu.memory_space<smem>>
    %326 = vector.broadcast %325 : f32 to vector<128x128xf32>
    %327 = arith.mulf %0, %326 : vector<128x128xf32>
    %c29_63 = arith.constant 29 : index
    %328 = memref.load %arg4[%c29_63] : memref<32xf32, #tpu.memory_space<smem>>
    %329 = vector.broadcast %328 : f32 to vector<128x128xf32>
    %330 = arith.addf %327, %329 : vector<128x128xf32>
    %331 = math.tanh %330 : vector<128x128xf32>
    %c29_64 = arith.constant 29 : index
    %332 = memref.load %arg5[%c29_64] : memref<32xf32, #tpu.memory_space<smem>>
    %333 = vector.broadcast %332 : f32 to vector<128x128xf32>
    %334 = arith.mulf %333, %331 : vector<128x128xf32>
    %335 = arith.addf %324, %334 : vector<128x128xf32>
    %c30 = arith.constant 30 : index
    %336 = memref.load %arg3[%c30] : memref<32xf32, #tpu.memory_space<smem>>
    %337 = vector.broadcast %336 : f32 to vector<128x128xf32>
    %338 = arith.mulf %0, %337 : vector<128x128xf32>
    %c30_65 = arith.constant 30 : index
    %339 = memref.load %arg4[%c30_65] : memref<32xf32, #tpu.memory_space<smem>>
    %340 = vector.broadcast %339 : f32 to vector<128x128xf32>
    %341 = arith.addf %338, %340 : vector<128x128xf32>
    %342 = math.tanh %341 : vector<128x128xf32>
    %c30_66 = arith.constant 30 : index
    %343 = memref.load %arg5[%c30_66] : memref<32xf32, #tpu.memory_space<smem>>
    %344 = vector.broadcast %343 : f32 to vector<128x128xf32>
    %345 = arith.mulf %344, %342 : vector<128x128xf32>
    %346 = arith.addf %335, %345 : vector<128x128xf32>
    %c31 = arith.constant 31 : index
    %347 = memref.load %arg3[%c31] : memref<32xf32, #tpu.memory_space<smem>>
    %348 = vector.broadcast %347 : f32 to vector<128x128xf32>
    %349 = arith.mulf %0, %348 : vector<128x128xf32>
    %c31_67 = arith.constant 31 : index
    %350 = memref.load %arg4[%c31_67] : memref<32xf32, #tpu.memory_space<smem>>
    %351 = vector.broadcast %350 : f32 to vector<128x128xf32>
    %352 = arith.addf %349, %351 : vector<128x128xf32>
    %353 = math.tanh %352 : vector<128x128xf32>
    %c31_68 = arith.constant 31 : index
    %354 = memref.load %arg5[%c31_68] : memref<32xf32, #tpu.memory_space<smem>>
    %355 = vector.broadcast %354 : f32 to vector<128x128xf32>
    %356 = arith.mulf %355, %353 : vector<128x128xf32>
    %357 = arith.addf %346, %356 : vector<128x128xf32>
    %358 = tpu.iota {dimensions = array<i32: 1>} : vector<1x128xi32>
    %c127_i32 = arith.constant 127 : i32
    %359 = vector.broadcast %c127_i32 : i32 to vector<1x128xi32>
    %360 = arith.cmpi slt, %358, %359 : vector<1x128xi32>
    %361 = arith.extui %360 : vector<1x128xi1> to vector<1x128xi32>
    %362 = arith.sitofp %361 : vector<1x128xi32> to vector<1x128xf32>
    %c127_i32_69 = arith.constant 127 : i32
    %363 = tpu.dynamic_rotate %0 by %c127_i32_69 dim 1 : vector<128x128xf32>, i32 -> vector<128x128xf32>
    %364 = arith.subf %363, %0 : vector<128x128xf32>
    %365 = vector.broadcast %362 : vector<1x128xf32> to vector<128x128xf32>
    %366 = arith.mulf %364, %365 : vector<128x128xf32>
    %cst_70 = arith.constant 5.000000e-01 : f32
    %367 = vector.broadcast %cst_70 : f32 to vector<128x128xf32>
    %368 = arith.mulf %367, %357 : vector<128x128xf32>
    %369 = vector.broadcast %1 : vector<1x128xf32> to vector<128x128xf32>
    %370 = arith.mulf %368, %369 : vector<128x128xf32>
    %371 = arith.subf %366, %370 : vector<128x128xf32>
    %372 = arith.mulf %357, %371 : vector<128x128xf32>
    %cst_71 = arith.constant dense<0.000000e+00> : vector<128xf32>
    %373 = vector.multi_reduction <add>, %372, %cst_71 [1] : vector<128x128xf32> to vector<128xf32>
    %374 = vector.shape_cast %373 : vector<128xf32> to vector<128x1xf32>
    %375 = math.exp %374 : vector<128x1xf32>
    %c0_72 = arith.constant 0 : index
    %c0_73 = arith.constant 0 : index
    %376 = vector.load %arg7[%c0_72, %c0_73] : memref<128x1xf32, #tpu.memory_space<vmem>>, vector<128x1xf32>
    tpu.vector_store %arg7[%c0_72, %c0_73], %375 {strides = array<i32>} : memref<128x1xf32, #tpu.memory_space<vmem>>, vector<128x1xf32>,
    %cst_74 = arith.constant dense<0xFF800000> : vector<128xf32>
    %377 = vector.multi_reduction <maximumf>, %0, %cst_74 [1] : vector<128x128xf32> to vector<128xf32>
    %378 = vector.shape_cast %377 : vector<128xf32> to vector<128x1xf32>
    %c0_75 = arith.constant 0 : index
    %c0_76 = arith.constant 0 : index
    %379 = vector.load %arg8[%c0_75, %c0_76] : memref<128x1xf32, #tpu.memory_space<vmem>>, vector<128x1xf32>
    tpu.vector_store %arg8[%c0_75, %c0_76], %378 {strides = array<i32>} : memref<128x1xf32, #tpu.memory_space<vmem>>, vector<128x1xf32>,
    return
  }
  func.func @transform_0(%arg0: i32) -> (i32, i32) {
    %c0_i32 = arith.constant 0 : i32
    %c0_i32_0 = arith.constant 0 : i32
    return %arg0, %c0_i32 : i32, i32
  }
  func.func @transform_1(%arg0: i32) -> (i32, i32) {
    %c0_i32 = arith.constant 0 : i32
    %c0_i32_0 = arith.constant 0 : i32
    %c0_i32_1 = arith.constant 0 : i32
    return %c0_i32, %c0_i32_0 : i32, i32
  }
  func.func @transform_2(%arg0: i32) -> i32 {
    %c0_i32 = arith.constant 0 : i32
    %c0_i32_0 = arith.constant 0 : i32
    return %c0_i32 : i32
  }
  func.func @transform_3(%arg0: i32) -> i32 {
    %c0_i32 = arith.constant 0 : i32
    %c0_i32_0 = arith.constant 0 : i32
    return %c0_i32 : i32
  }
  func.func @transform_4(%arg0: i32) -> i32 {
    %c0_i32 = arith.constant 0 : i32
    %c0_i32_0 = arith.constant 0 : i32
    return %c0_i32 : i32
  }
  func.func @transform_5(%arg0: i32) -> i32 {
    %c0_i32 = arith.constant 0 : i32
    %c0_i32_0 = arith.constant 0 : i32
    return %c0_i32 : i32
  }
  func.func @transform_6(%arg0: i32) -> (i32, i32) {
    %c0_i32 = arith.constant 0 : i32
    %c0_i32_0 = arith.constant 0 : i32
    return %arg0, %c0_i32 : i32, i32
  }
  func.func @transform_7(%arg0: i32) -> (i32, i32) {
    %c0_i32 = arith.constant 0 : i32
    %c0_i32_0 = arith.constant 0 : i32
    return %arg0, %c0_i32 : i32, i32
  }
}

</mosaic_0001>

<bundles_post_ra>
// kernel: local_time_pp_forward.1
= control target key start
LH: loop header
LB: loop body
LE: loop exit
PB: predicated region body
PF: predicated region fallthrough
CT: control target
= control target key end

     0   :  { %14 = vsyncpa [#allocation4], 0  ;;  %s7561_s0 = inlined_call_operand.vmem [shape: f32[128,128], index: 0, kind: input, shape index: {}]   ;;  %s7562_s1 = inlined_call_operand.vmem [shape: f32[1,128], index: 1, kind: input, shape index: {}]   ;;  %s7563_s2 = inlined_call_operand.vmem [shape: f32[32], index: 2, kind: input, shape index: {}]   ;;  %s7564_s3 = inlined_call_operand.vmem [shape: f32[32], index: 3, kind: input, shape index: {}]   ;;  %s7565_s4 = inlined_call_operand.vmem [shape: f32[32], index: 4, kind: input, shape index: {}]   ;;  %s7566_s5 = inlined_call_operand.<no memory space> [shape: f32[1], index: 5, kind: input, shape index: {}]   ;;  %s7567_s6 = inlined_call_operand.vmem [shape: f32[128,1], index: 6, kind: output, shape index: {0}]   ;;  %s7568_s7 = inlined_call_operand.vmem [shape: f32[128,1], index: 7, kind: output, shape index: {1}]  }
   0x1   :  { %15 = vsyncpa [#allocation6], 0  ;;  %s36_s26 = sshll.u32 %s7564_s3, 4  ;;  %s26_s29 = sshll.u32 %s7563_s2, 4  ;;  %s37_s26 = int_to_ptr.vmem [resolvable:$true] %s36_s26  ;;  %s27_s29 = int_to_ptr.vmem [resolvable:$true] %s26_s29 }
   0x2   :  { %s4304_s30 = scalar_lea.vmem %s37_s26, 16  ;;  %p4309_p1 = scmp.lt.s32.totalorder %s37_s26, %s37_s26 }
   0x3   :  { %p4305_p0 = scmp.ne.s32.totalorder %s37_s26, %s4304_s30  ;;  %p4310_p2 = scmp.lt.s32.totalorder %s4304_s30, %s4304_s30 }
   0x5   :  { %p4311_p3 = por %p4310_p2, %p4309_p1 }
   0x7   :  { %p4312_p4 = pnand %p4311_p3, %p4305_p0 }
   0x9   :  { %4315 = shalt.err (!%p4312_p4)
}
   0xa   :  { %s4344_s8 = smov [#allocation5]   ;;  %s4316_s9 = scalar_lea.vmem %s27_s29, 16 }
   0xb   :  { %39 = dma.vmem_to_smem %s37_s26, 16, %s4344_s8, [#allocation6]  }
   0xc   :  { %p4317_p5 = scmp.ne.s32.totalorder %s27_s29, %s4316_s9  ;;  %p4321_p6 = scmp.lt.s32.totalorder %s27_s29, %s27_s29 }
   0xd   :  { %p4322_p7 = scmp.lt.s32.totalorder %s4316_s9, %s4316_s9 }
   0xf   :  { %p4323_p8 = por %p4322_p7, %p4321_p6 }
  0x11   :  { %p4324_p9 = pnand %p4323_p8, %p4317_p5 }
  0x13   :  { %4327 = shalt.err (!%p4324_p9)
}
  0x14   :  { %s4345_s3 = smov [#allocation3]   ;;  %s46_s11 = sshll.u32 %s7565_s4, 4  ;;  %s47_s11 = int_to_ptr.vmem [resolvable:$true] %s46_s11 }
  0x15   :  { %29 = dma.vmem_to_smem %s27_s29, 16, %s4345_s3, [#allocation4]  }
  0x16   :  { %s4328_s12 = scalar_lea.vmem %s47_s11, 16  ;;  %p4333_p11 = scmp.lt.s32.totalorder %s47_s11, %s47_s11 }
  0x17   :  { %p4329_p10 = scmp.ne.s32.totalorder %s47_s11, %s4328_s12  ;;  %p4334_p12 = scmp.lt.s32.totalorder %s4328_s12, %s4328_s12 }
  0x19   :  { %p4335_p13 = por %p4334_p12, %p4333_p11 }
  0x1b   :  { %p4336_p0 = pnand %p4335_p13, %p4329_p10 }
  0x1d   :  { %4339 = shalt.err (!%p4336_p0)
}
  0x1e   :  { %s4346_s13 = smov [#allocation7]  }
  0x1f   :  { %49 = dma.vmem_to_smem %s47_s11, 16, %s4346_s13, [#allocation6]  }
  0x20   :  { %4340 = dma.done.wait [#allocation4], 16  }
  0x21   :  { %4341 = vsyncadd [#allocation4], 4294967280 }
  0x22   :  { %4342 = dma.done.wait [#allocation6], 32  }
  0x23   :  { %4343 = vsyncadd [#allocation6], 4294967264 }
  0x24   :  { %61 = sfence }
  0x25   :  { %v4401_v0 = vld [vmem:[%s7561_s0] sm:$0xff]  ;;  %v4406_v1 = vld [vmem:[%s7561_s0 + $0x10] sm:$0xff]  ;;  %s4347_s17 = smov 127   ;;  %s82_s18 = sld [smem:[#allocation3]]  ;;  %v4415_v2 = vld [vmem:[%s7561_s0 + $0x18] sm:$0xff]  ;;  %v2834_v21 = vlaneseq  ;;  %v4515_v30 = vstv %s7566_s5  ;;  %vm3037_vm1 = vcmask 7168  }
  0x26   :  { %2839 = vrot.lane.b32.xlu0 %v4401_v0, %s4347_s17  ;;  %2843 = vrot.lane.b32.xlu1 %v4406_v1, %s4347_s17  ;;  %v4420_v3 = vld [vmem:[%s7561_s0 + $0x8] sm:$0xff]  ;;  %s100_s23 = sld [smem:[#allocation5]]  ;;  %v4436_v5 = vld [vmem:[%s7561_s0 + $0x20] sm:$0xff]  ;;  %8022 = vst [vmem:[#allocation16_spill] sm:$0xff] %v4515_v30 }
  0x27   :  { %s4422_s24 = sld [smem:[#allocation7]]  ;;  %v4431_v4 = vld [vmem:[%s7561_s0 + $0x28] sm:$0xff]  ;;  %v4461_v11 = vld [vmem:[%s7561_s0 + $0x38] sm:$0xff]  ;;  %v4466_v12 = vld [vmem:[%s7561_s0 + $0x30] sm:$0xff]  ;;  %v4546_v41 = vand.u32 127, %v2834_v21 }
  0x28   :  { %s3112_s25 = sld [smem:[#allocation3 + $0x1]]  ;;  %v71_v25 = vld [vmem:[%s7561_s0 + $0x48] sm:$0xff]  ;;  %v70_v26 = vld [vmem:[%s7561_s0 + $0x40] sm:$0xff]  ;;  %v73_v39 = vld [vmem:[%s7561_s0 + $0x58] sm:$0xff] }
  0x29   :  { %s3113_s26 = sld [smem:[#allocation5 + $0x1]]  ;;  %v72_v40 = vld [vmem:[%s7561_s0 + $0x50] sm:$0xff]  ;;  %v75_v53 = vld [vmem:[%s7561_s0 + $0x68] sm:$0xff]  ;;  %v74_v54 = vld [vmem:[%s7561_s0 + $0x60] sm:$0xff]  ;;  %vm2836_vm0 = vcmp.lt.s32.totalorder %v4546_v41, 127 }
  0x2a   :  { %2845 = vrot.lane.b32.xlu1 %v4415_v2, %s4347_s17  ;;  %2841 = vrot.lane.b32.xlu0 %v4420_v3, %s4347_s17  ;;  %s4438_s8 = sld [smem:[#allocation7 + $0x1]] }
  0x2b   :  { %v4440_v6 = vstv %s82_s18  ;;  %s3115_s9 = sld [smem:[#allocation3 + $0x2]] }
  0x2c   :  { %8016 = vst [vmem:[#allocation10_spill] sm:$0xff] %v4440_v6  ;;  %v84_v7 = vmul.f32 %v4440_v6, %v4401_v0  ;;  %v4444_v8 = vstv %s100_s23  ;;  %s4446_s3 = sld [smem:[#allocation5 + $0x2]]  ;;  %v86_v9 = vmul.f32 %v4440_v6, %v4406_v1  ;;  %v85_v10 = vmul.f32 %v4440_v6, %v4420_v3 }
  0x2d   :  { %8017 = vst [vmem:[#allocation11_spill] sm:$0xff] %v4444_v8  ;;  %s4456_s2 = sld [smem:[#allocation7 + $0x2]]  ;;  %v4572_v50 = vstv %s4422_s24 }
  0x2e   :  { %2849 = vrot.lane.b32.xlu1 %v4431_v4, %s4347_s17  ;;  %2847 = vrot.lane.b32.xlu0 %v4436_v5, %s4347_s17  ;;  %v102_v13 = vadd.f32 %v4444_v8, %v84_v7  ;;  %v4469_v14 = vstv %s3112_s25  ;;  %s4471_s14 = sld [smem:[#allocation3 + $0x3]]  ;;  %v104_v15 = vadd.f32 %v4444_v8, %v86_v9  ;;  %v103_v16 = vadd.f32 %v4444_v8, %v85_v10 }
  0x2f   :  { %8018 = vst [vmem:[#allocation12_spill] sm:$0xff] %v4469_v14  ;;  %v170_v17 = vmul.f32 %v4469_v14, %v4401_v0  ;;  %v4477_v18 = vstv %s3113_s26  ;;  %s4479_s15 = sld [smem:[#allocation5 + $0x3]]  ;;  %v172_v19 = vmul.f32 %v4469_v14, %v4406_v1  ;;  %v171_v20 = vmul.f32 %v4469_v14, %v4420_v3  ;;  %8027 = vst [vmem:[#allocation21_spill] sm:$0xff] %v4572_v50 }
  0x30   :  { %8019 = vst [vmem:[#allocation13_spill] sm:$0xff] %v4477_v18  ;;  %3212 = vtanh.f32 %v102_v13  ;;  %s4485_s4 = sld [smem:[#allocation7 + $0x3]]  ;;  %v4575_v51 = vstv %s4438_s8 }
  0x31   :  { %v188_v22 = vadd.f32 %v4477_v18, %v170_v17  ;;  %v4492_v23 = vstv %s3115_s9  ;;  %s4494_s16 = sld [smem:[#allocation3 + $0x4]]  ;;  %3214 = vtanh.f32 %v104_v15  ;;  %v190_v24 = vadd.f32 %v4477_v18, %v172_v19  ;;  %8028 = vst [vmem:[#allocation22_spill] sm:$0xff] %v4575_v51  ;;  %v76_v17 = vld [vmem:[%s7561_s0 + $0x70] sm:$0xff] }
  0x32   :  { %2853 = vrot.lane.b32.xlu1 %v4461_v11, %s4347_s17  ;;  %2851 = vrot.lane.b32.xlu0 %v4466_v12, %s4347_s17  ;;  %8020 = vst [vmem:[#allocation14_spill] sm:$0xff] %v4492_v23  ;;  %v256_v27 = vmul.f32 %v4492_v23, %v4401_v0  ;;  %v4506_v28 = vstv %s4446_s3  ;;  %s4508_s22 = sld [smem:[#allocation5 + $0x4]]  ;;  %v258_v29 = vmul.f32 %v4492_v23, %v4406_v1  ;;  %3216 = vtanh.f32 %v103_v16  ;;  %v77_v16 = vld [vmem:[%s7561_s0 + $0x78] sm:$0xff] }
  0x33   :  { %8021 = vst [vmem:[#allocation15_spill] sm:$0xff] %v4506_v28  ;;  %3218 = vtanh.f32 %v188_v22  ;;  %s4517_s26 = sld [smem:[#allocation7 + $0x4]]  ;;  %v189_v31 = vadd.f32 %v4477_v18, %v171_v20  ;;  %v257_v32 = vmul.f32 %v4492_v23, %v4420_v3  ;;  %v4601_v61 = vstv %s4456_s2 }
  0x34   :  { %v274_v33 = vadd.f32 %v4506_v28, %v256_v27  ;;  %v4524_v34 = vstv %s4471_s14  ;;  %s4526_s27 = sld [smem:[#allocation3 + $0x5]]  ;;  %3220 = vtanh.f32 %v190_v24  ;;  %v276_v35 = vadd.f32 %v4506_v28, %v258_v29  ;;  %8031 = vst [vmem:[#allocation25_spill] sm:$0xff] %v4601_v61 }
  0x35   :  { %8023 = vst [vmem:[#allocation17_spill] sm:$0xff] %v4524_v34  ;;  %v342_v36 = vmul.f32 %v4524_v34, %v4401_v0  ;;  %v4534_v37 = vstv %s4479_s15  ;;  %s4536_s5 = sld [smem:[#allocation5 + $0x5]]  ;;  %v344_v38 = vmul.f32 %v4524_v34, %v4406_v1  ;;  %3222 = vtanh.f32 %v189_v31 }
  0x36   :  { %2857 = vrot.lane.b32.xlu1 %v71_v25, %s4347_s17  ;;  %2855 = vrot.lane.b32.xlu0 %v70_v26, %s4347_s17  ;;  %8024 = vst [vmem:[#allocation18_spill] sm:$0xff] %v4534_v37  ;;  %3224 = vtanh.f32 %v274_v33  ;;  %s4548_s3 = sld [smem:[#allocation7 + $0x5]]  ;;  %v275_v42 = vadd.f32 %v4506_v28, %v257_v32  ;;  %v343_v43 = vmul.f32 %v4524_v34, %v4420_v3  ;;  %v4604_v62 = vstv %s4485_s4 }
  0x37   :  { %v360_v44 = vadd.f32 %v4534_v37, %v342_v36  ;;  %v4555_v45 = vstv %s4494_s16  ;;  %s4557_s10 = sld [smem:[#allocation3 + $0x6]]  ;;  %3226 = vtanh.f32 %v276_v35  ;;  %v362_v46 = vadd.f32 %v4534_v37, %v344_v38  ;;  %8032 = vst [vmem:[#allocation26_spill] sm:$0xff] %v4604_v62 }
  0x38   :  { %8025 = vst [vmem:[#allocation19_spill] sm:$0xff] %v4555_v45  ;;  %v428_v47 = vmul.f32 %v4555_v45, %v4401_v0  ;;  %v4563_v48 = vstv %s4508_s22  ;;  %s4565_s11 = sld [smem:[#allocation5 + $0x6]]  ;;  %v430_v49 = vmul.f32 %v4555_v45, %v4406_v1  ;;  %3228 = vtanh.f32 %v275_v42 }
  0x39   :  { %8026 = vst [vmem:[#allocation20_spill] sm:$0xff] %v4563_v48  ;;  %3230 = vtanh.f32 %v360_v44  ;;  %v361_v52 = vadd.f32 %v4534_v37, %v343_v43  ;;  %s4588_s24 = sld [smem:[#allocation3 + $0x7]]  ;;  %v429_v63 = vmul.f32 %v4555_v45, %v4420_v3  ;;  %v4638_v25 = vstv %s4517_s26 }
  0x3a   :  { %2861 = vrot.lane.b32.xlu1 %v73_v39, %s4347_s17  ;;  %2859 = vrot.lane.b32.xlu0 %v72_v40, %s4347_s17  ;;  %v446_v55 = vadd.f32 %v4563_v48, %v428_v47  ;;  %v4586_v56 = vstv %s4526_s27  ;;  %3232 = vtanh.f32 %v362_v46  ;;  %v448_v57 = vadd.f32 %v4563_v48, %v430_v49  ;;  %s4596_s8 = sld [smem:[#allocation5 + $0x7]]  ;;  %8035 = vst [vmem:[#allocation29_spill] sm:$0xff] %v4638_v25 }
  0x3b   :  { %8029 = vst [vmem:[#allocation23_spill] sm:$0xff] %v4586_v56  ;;  %v514_v58 = vmul.f32 %v4586_v56, %v4401_v0  ;;  %v4594_v59 = vstv %s4536_s5  ;;  %v516_v60 = vmul.f32 %v4586_v56, %v4406_v1  ;;  %3234 = vtanh.f32 %v361_v52  ;;  %s4606_s16 = sld [smem:[#allocation7 + $0x6]] }
  0x3c   :  { %8030 = vst [vmem:[#allocation24_spill] sm:$0xff] %v4594_v59  ;;  %3236 = vtanh.f32 %v446_v55  ;;  %s4616_s2 = sld [smem:[#allocation3 + $0x8]]  ;;  %v4641_v26 = vstv %s4548_s3  ;;  %v4671_v46 = vadd.f32 %v4563_v48, %v429_v63 }
  0x3d   :  { %v3213_v7 = vpop.eup %3212  ;;  %v532_v9 = vadd.f32 %v4594_v59, %v514_v58  ;;  %v4614_v10 = vstv %s4557_s10  ;;  %3238 = vtanh.f32 %v448_v57  ;;  %v534_v13 = vadd.f32 %v4594_v59, %v516_v60  ;;  %s4631_s21 = sld [smem:[#allocation5 + $0x8]]  ;;  %8036 = vst [vmem:[#allocation30_spill] sm:$0xff] %v4641_v26 }
  0x3e   :  { %2865 = vrot.lane.b32.xlu1 %v75_v53, %s4347_s17  ;;  %2863 = vrot.lane.b32.xlu0 %v74_v54, %s4347_s17  ;;  %8033 = vst [vmem:[#allocation27_spill] sm:$0xff] %v4614_v10  ;;  %v3215_v15 = vpop.eup %3214  ;;  %v136_v19 = vmul.f32 %v3213_v7, %v4572_v50  ;;  %v600_v20 = vmul.f32 %v4614_v10, %v4401_v0  ;;  %v4629_v21 = vstv %s4565_s11  ;;  %s4643_s22 = sld [smem:[#allocation7 + $0x7]] }
  0x3f   :  { %8034 = vst [vmem:[#allocation28_spill] sm:$0xff] %v4629_v21  ;;  %v602_v22 = vmul.f32 %v4614_v10, %v4406_v1  ;;  %v4635_v24 = vpop.eup %3216  ;;  %3240 = vtanh.f32 %v532_v9  ;;  %v138_v27 = vmul.f32 %v3215_v15, %v4572_v50  ;;  %v4649_v33 = vstv %s4588_s24  ;;  %s4651_s23 = sld [smem:[#allocation3 + $0x9]] }
  0x40   :  { %v3219_v29 = vpop.eup %3218  ;;  %v152_v31 = vadd.f32 %v136_v19, %v4515_v30  ;;  %v618_v32 = vadd.f32 %v4629_v21, %v600_v20  ;;  %8037 = vst [vmem:[#allocation31_spill] sm:$0xff] %v4649_v33  ;;  %3242 = vtanh.f32 %v534_v13  ;;  %v686_v38 = vmul.f32 %v4649_v33, %v4401_v0  ;;  %s4661_s25 = sld [smem:[#allocation5 + $0x9]] }
  0x41   :  { %v3221_v35 = vpop.eup %3220  ;;  %v222_v36 = vmul.f32 %v3219_v29, %v4575_v51  ;;  %v4659_v39 = vstv %s4596_s8  ;;  %v154_v40 = vadd.f32 %v138_v27, %v4515_v30  ;;  %s4666_s26 = sld [smem:[#allocation7 + $0x8]]  ;;  %v620_v44 = vadd.f32 %v4629_v21, %v602_v22 }
  0x42   :  { %2869 = vrot.lane.b32.xlu1 %v77_v16, %s4347_s17  ;;  %2867 = vrot.lane.b32.xlu0 %v76_v17, %s4347_s17  ;;  %8038 = vst [vmem:[#allocation32_spill] sm:$0xff] %v4659_v39  ;;  %v4664_v42 = vpop.eup %3222  ;;  %3244 = vtanh.f32 %v618_v32  ;;  %v224_v43 = vmul.f32 %v3221_v35, %v4575_v51  ;;  %v704_v52 = vadd.f32 %v4659_v39, %v686_v38  ;;  %v4675_v53 = vstv %s4616_s2  ;;  %s4677_s17 = sld [smem:[#allocation3 + $0xa]] }
  0x43   :  { %v3225_v47 = vpop.eup %3224  ;;  %v238_v49 = vadd.f32 %v222_v36, %v152_v31  ;;  %8039 = vst [vmem:[#allocation33_spill] sm:$0xff] %v4675_v53  ;;  %v688_v54 = vmul.f32 %v4649_v33, %v4406_v1  ;;  %v772_v58 = vmul.f32 %v4675_v53, %v4401_v0  ;;  %v4685_v60 = vstv %s4631_s21  ;;  %s4687_s27 = sld [smem:[#allocation5 + $0xa]] }
  0x44   :  { %v3227_v55 = vpop.eup %3226  ;;  %v308_v57 = vmul.f32 %v3225_v47, %v4601_v61  ;;  %8040 = vst [vmem:[#allocation34_spill] sm:$0xff] %v4685_v60  ;;  %v240_v63 = vadd.f32 %v224_v43, %v154_v40  ;;  %3246 = vtanh.f32 %v704_v52  ;;  %s4691_s5 = sld [smem:[#allocation7 + $0x9]]  ;;  %v4697_v15 = vmul.f32 %v4586_v56, %v4420_v3 }
  0x45   :  { %v4689_v7 = vpop.eup %3228  ;;  %v310_v9 = vmul.f32 %v3227_v55, %v4601_v61  ;;  %v706_v13 = vadd.f32 %v4659_v39, %v688_v54  ;;  %v790_v19 = vadd.f32 %v4685_v60, %v772_v58  ;;  %v4701_v20 = vstv %s4651_s23  ;;  %s4703_s28 = sld [smem:[#allocation3 + $0xb]] }
  0x46   :  { %v3231_v16 = vpop.eup %3230  ;;  %v324_v17 = vadd.f32 %v308_v57, %v238_v49  ;;  %8041 = vst [vmem:[#allocation35_spill] sm:$0xff] %v4701_v20  ;;  %3248 = vtanh.f32 %v620_v44  ;;  %v858_v29 = vmul.f32 %v4701_v20, %v4401_v0  ;;  %v4709_v31 = vstv %s4661_s25  ;;  %s4711_s29 = sld [smem:[#allocation5 + $0xb]] }
  0x47   :  { %v3233_v22 = vpop.eup %3232  ;;  %v394_v27 = vmul.f32 %v3231_v16, %v4604_v62  ;;  %8042 = vst [vmem:[#allocation36_spill] sm:$0xff] %v4709_v31  ;;  %v326_v32 = vadd.f32 %v310_v9, %v240_v63  ;;  %v4716_v36 = vstv %s4606_s16  ;;  %3250 = vtanh.f32 %v790_v19  ;;  %s4718_s30 = sld [smem:[#allocation7 + $0xa]] }
  0x48   :  { %v4713_v35 = vpop.eup %3234  ;;  %8043 = vst [vmem:[#allocation37_spill] sm:$0xff] %v4716_v36  ;;  %v396_v38 = vmul.f32 %v3233_v22, %v4604_v62  ;;  %v774_v40 = vmul.f32 %v4675_v53, %v4406_v1  ;;  %v876_v47 = vadd.f32 %v4709_v31, %v858_v29  ;;  %v4725_v49 = vstv %s4677_s17  ;;  %s4727_s9 = sld [smem:[#allocation3 + $0xc]] }
  0x49   :  { %v3237_v43 = vpop.eup %3236  ;;  %v410_v44 = vadd.f32 %v394_v27, %v324_v17  ;;  %8044 = vst [vmem:[#allocation38_spill] sm:$0xff] %v4725_v49  ;;  %3252 = vtanh.f32 %v706_v13  ;;  %v944_v55 = vmul.f32 %v4725_v49, %v4401_v0  ;;  %v4733_v57 = vstv %s4687_s27  ;;  %s4735_s3 = sld [smem:[#allocation5 + $0xc]] }
  0x4a   :  { %v3239_v52 = vpop.eup %3238  ;;  %v480_v54 = vmul.f32 %v3237_v43, %v4638_v25  ;;  %8045 = vst [vmem:[#allocation39_spill] sm:$0xff] %v4733_v57  ;;  %v412_v58 = vadd.f32 %v396_v38, %v326_v32  ;;  %v4738_v63 = vstv %s4643_s22  ;;  %3254 = vtanh.f32 %v876_v47  ;;  %s4740_s10 = sld [smem:[#allocation7 + $0xb]] }
  0x4b   :  { %8046 = vst [vmem:[#allocation40_spill] sm:$0xff] %v4738_v63  ;;  %v482_v9 = vmul.f32 %v3239_v52, %v4638_v25  ;;  %v792_v13 = vadd.f32 %v4685_v60, %v774_v40  ;;  %v962_v19 = vadd.f32 %v4733_v57, %v944_v55  ;;  %v4746_v22 = vstv %s4703_s28  ;;  %s4748_s11 = sld [smem:[#allocation3 + $0xd]] }
  0x4c   :  { %v3241_v16 = vpop.eup %3240  ;;  %v496_v17 = vadd.f32 %v480_v54, %v410_v44  ;;  %8047 = vst [vmem:[#allocation41_spill] sm:$0xff] %v4746_v22  ;;  %v860_v27 = vmul.f32 %v4701_v20, %v4406_v1  ;;  %v1030_v38 = vmul.f32 %v4746_v22, %v4401_v0  ;;  %v4756_v40 = vstv %s4711_s29  ;;  %s4758_s12 = sld [smem:[#allocation5 + $0xd]] }
  0x4d   :  { %v3243_v29 = vpop.eup %3242  ;;  %v566_v32 = vmul.f32 %v3241_v16, %v4641_v26  ;;  %8048 = vst [vmem:[#allocation42_spill] sm:$0xff] %v4756_v40  ;;  %v498_v43 = vadd.f32 %v482_v9, %v412_v58  ;;  %v4761_v44 = vstv %s4666_s26  ;;  %3256 = vtanh.f32 %v962_v19  ;;  %s4763_s13 = sld [smem:[#allocation7 + $0xc]] }
  0x4e   :  { %8049 = vst [vmem:[#allocation43_spill] sm:$0xff] %v4761_v44  ;;  %v568_v47 = vmul.f32 %v3243_v29, %v4641_v26  ;;  %v878_v52 = vadd.f32 %v4709_v31, %v860_v27  ;;  %v1048_v16 = vadd.f32 %v4756_v40, %v1030_v38  ;;  %v4769_v48 = vstv %s4727_s9  ;;  %s4771_s14 = sld [smem:[#allocation3 + $0xe]] }
  0x4f   :  { %v3245_v54 = vpop.eup %3244  ;;  %v582_v55 = vadd.f32 %v566_v32, %v496_v17  ;;  %8050 = vst [vmem:[#allocation44_spill] sm:$0xff] %v4769_v48  ;;  %3258 = vtanh.f32 %v792_v13  ;;  %v4775_v9 = vstv %s4691_s5  ;;  %v1116_v19 = vmul.f32 %v4769_v48, %v4401_v0  ;;  %s4782_s15 = sld [smem:[#allocation5 + $0xe]] }
  0x50   :  { %v652_v58 = vmul.f32 %v3245_v54, %v4716_v36  ;;  %8051 = vst [vmem:[#allocation45_spill] sm:$0xff] %v4775_v9  ;;  %v4780_v29 = vstv %s4735_s3  ;;  %3260 = vtanh.f32 %v1048_v16  ;;  %s4784_s24 = sld [smem:[#allocation7 + $0xd]]  ;;  %v584_v17 = vadd.f32 %v568_v47, %v498_v43 }
  0x51   :  { %8052 = vst [vmem:[#allocation46_spill] sm:$0xff] %v4780_v29  ;;  %v946_v13 = vmul.f32 %v4725_v49, %v4406_v1  ;;  %v1032_v27 = vmul.f32 %v4746_v22, %v4406_v1  ;;  %v3247_v32 = vpop.eup %3246  ;;  %v1134_v54 = vadd.f32 %v4780_v29, %v1116_v19  ;;  %v4792_v56 = vstv %s4748_s11  ;;  %s4794_s8 = sld [smem:[#allocation3 + $0xf]] }
  0x52   :  { %v668_v38 = vadd.f32 %v652_v58, %v582_v55  ;;  %8053 = vst [vmem:[#allocation47_spill] sm:$0xff] %v4792_v56  ;;  %3262 = vtanh.f32 %v878_v52  ;;  %v738_v37 = vmul.f32 %v3247_v32, %v4738_v63  ;;  %v1202_v43 = vmul.f32 %v4792_v56, %v4401_v0  ;;  %s4802_s16 = sld [smem:[#allocation5 + $0xf]] }
  0x53   :  { %v3249_v16 = vpop.eup %3248  ;;  %v4800_v47 = vstv %s4758_s12  ;;  %v964_v55 = vadd.f32 %v4733_v57, %v946_v13  ;;  %v4806_v58 = vstv %s4718_s30  ;;  %3264 = vtanh.f32 %v1134_v54  ;;  %s4808_s2 = sld [smem:[#allocation7 + $0xe]] }
  0x54   :  { %8054 = vst [vmem:[#allocation48_spill] sm:$0xff] %v4800_v47  ;;  %8055 = vst [vmem:[#allocation49_spill] sm:$0xff] %v4806_v58  ;;  %v654_v52 = vmul.f32 %v3249_v16, %v4716_v36  ;;  %v1050_v19 = vadd.f32 %v4756_v40, %v1032_v27  ;;  %v3251_v32 = vpop.eup %3250  ;;  %v754_v45 = vadd.f32 %v738_v37, %v668_v38  ;;  %v4814_v34 = vstv %s4771_s14  ;;  %s4816_s4 = sld [smem:[#allocation3 + $0x10]] }
  0x55   :  { %v1220_v28 = vadd.f32 %v4800_v47, %v1202_v43  ;;  %8056 = vst [vmem:[#allocation50_spill] sm:$0xff] %v4814_v34  ;;  %3266 = vtanh.f32 %v964_v55  ;;  %v824_v54 = vmul.f32 %v3251_v32, %v4761_v44  ;;  %v1288_v18 = vmul.f32 %v4814_v34, %v4401_v0  ;;  %s4824_s18 = sld [smem:[#allocation5 + $0x10]] }
  0x56   :  { %v3253_v13 = vpop.eup %3252  ;;  %v4822_v16 = vstv %s4782_s15  ;;  %v670_v37 = vadd.f32 %v654_v52, %v584_v17  ;;  %v4827_v27 = vstv %s4740_s10  ;;  %v1118_v43 = vmul.f32 %v4769_v48, %v4406_v1  ;;  %s4836_s19 = sld [smem:[#allocation3 + $0x11]] }
  0x57   :  { %8057 = vst [vmem:[#allocation51_spill] sm:$0xff] %v4822_v16  ;;  %8058 = vst [vmem:[#allocation52_spill] sm:$0xff] %v4827_v27  ;;  %3268 = vtanh.f32 %v1220_v28  ;;  %v740_v38 = vmul.f32 %v3253_v13, %v4738_v63  ;;  %v3255_v55 = vpop.eup %3254  ;;  %v840_v32 = vadd.f32 %v824_v54, %v754_v45  ;;  %v1306_v23 = vadd.f32 %v4822_v16, %v1288_v18  ;;  %s4847_s20 = sld [smem:[#allocation5 + $0x11]] }
  0x58   :  { %v4834_v14 = vstv %s4794_s8  ;;  %3270 = vtanh.f32 %v1050_v19  ;;  %v910_v17 = vmul.f32 %v3255_v55, %v4775_v9  ;;  %v4840_v52 = vstv %s4763_s13  ;;  %s4849_s21 = sld [smem:[#allocation7 + $0xf]] }
  0x59   :  { %8059 = vst [vmem:[#allocation53_spill] sm:$0xff] %v4834_v14  ;;  %8060 = vst [vmem:[#allocation54_spill] sm:$0xff] %v4840_v52  ;;  %v1374_v28 = vmul.f32 %v4834_v14, %v4401_v0  ;;  %v4845_v13 = vstv %s4802_s16  ;;  %3272 = vtanh.f32 %v1306_v23  ;;  %v756_v18 = vadd.f32 %v740_v38, %v670_v37  ;;  %s4858_s22 = sld [smem:[#allocation3 + $0x12]] }
  0x5a   :  { %8061 = vst [vmem:[#allocation55_spill] sm:$0xff] %v4845_v13  ;;  %v1136_v45 = vadd.f32 %v4780_v29, %v1118_v43  ;;  %v1204_v19 = vmul.f32 %v4792_v56, %v4406_v1  ;;  %v3257_v54 = vpop.eup %3256  ;;  %v926_v55 = vadd.f32 %v910_v17, %v840_v32  ;;  %v4856_v63 = vstv %s4816_s4  ;;  %s4868_s23 = sld [smem:[#allocation5 + $0x12]] }
  0x5b   :  { %v1392_v8 = vadd.f32 %v4845_v13, %v1374_v28  ;;  %8062 = vst [vmem:[#allocation56_spill] sm:$0xff] %v4856_v63  ;;  %v1290_v23 = vmul.f32 %v4814_v34, %v4406_v1  ;;  %v996_v37 = vmul.f32 %v3257_v54, %v4806_v58  ;;  %v1460_v38 = vmul.f32 %v4856_v63, %v4401_v0  ;;  %s4873_s25 = sld [smem:[#allocation7 + $0x10]] }
  0x5c   :  { %v3259_v36 = vpop.eup %3258  ;;  %v4866_v43 = vstv %s4824_s18  ;;  %3274 = vtanh.f32 %v1136_v45  ;;  %v4871_v32 = vstv %s4784_s24  ;;  %v1222_v28 = vadd.f32 %v4800_v47, %v1204_v19  ;;  %s4884_s26 = sld [smem:[#allocation3 + $0x13]] }
  0x5d   :  { %8063 = vst [vmem:[#allocation57_spill] sm:$0xff] %v4866_v43  ;;  %8064 = vst [vmem:[#allocation58_spill] sm:$0xff] %v4871_v32  ;;  %3276 = vtanh.f32 %v1392_v8  ;;  %v826_v17 = vmul.f32 %v3259_v36, %v4761_v44  ;;  %v3261_v6 = vpop.eup %3260  ;;  %v1012_v54 = vadd.f32 %v996_v37, %v926_v55  ;;  %v4878_v34 = vstv %s4808_s2  ;;  %s4892_s17 = sld [smem:[#allocation5 + $0x13]] }
  0x5e   :  { %8065 = vst [vmem:[#allocation59_spill] sm:$0xff] %v4878_v34  ;;  %v1478_v26 = vadd.f32 %v4866_v43, %v1460_v38  ;;  %v4882_v29 = vstv %s4836_s19  ;;  %v1082_v8 = vmul.f32 %v3261_v6, %v4827_v27  ;;  %v4890_v36 = vstv %s4847_s20  ;;  %s4895_s27 = sld [smem:[#allocation7 + $0x11]] }
  0x5f   :  { %8066 = vst [vmem:[#allocation60_spill] sm:$0xff] %v4882_v29  ;;  %v3263_v45 = vpop.eup %3262  ;;  %v1546_v25 = vmul.f32 %v4882_v29, %v4401_v0  ;;  %8067 = vst [vmem:[#allocation61_spill] sm:$0xff] %v4890_v36  ;;  %v842_v19 = vadd.f32 %v826_v17, %v756_v18  ;;  %v1308_v37 = vadd.f32 %v4822_v16, %v1290_v23  ;;  %v4903_v56 = vstv %s4858_s22  ;;  %s4905_s5 = sld [smem:[#allocation3 + $0x14]] }
  0x60   :  { %3278 = vtanh.f32 %v1478_v26  ;;  %v912_v55 = vmul.f32 %v3263_v45, %v4775_v9  ;;  %v1376_v6 = vmul.f32 %v4834_v14, %v4406_v1  ;;  %v3265_v38 = vpop.eup %3264  ;;  %v1098_v44 = vadd.f32 %v1082_v8, %v1012_v54  ;;  %8068 = vst [vmem:[#allocation62_spill] sm:$0xff] %v4903_v56  ;;  %s4913_s28 = sld [smem:[#allocation5 + $0x14]] }
  0x61   :  { %3056 = vmax.xlane.f32.xlu0 %v4420_v3  ;;  %v1564_v47 = vadd.f32 %v4890_v36, %v1546_v25  ;;  %3280 = vtanh.f32 %v1222_v28  ;;  %v1168_v26 = vmul.f32 %v3265_v38, %v4840_v52  ;;  %v1632_v18 = vmul.f32 %v4903_v56, %v4401_v0  ;;  %s4918_s29 = sld [smem:[#allocation7 + $0x12]] }
  0x62   :  { %v3267_v3 = vpop.eup %3266  ;;  %v4911_v23 = vstv %s4868_s23  ;;  %v928_v17 = vadd.f32 %v912_v55, %v842_v19  ;;  %v4916_v54 = vstv %s4849_s21  ;;  %v1394_v28 = vadd.f32 %v4845_v13, %v1376_v6  ;;  %s4927_s30 = sld [smem:[#allocation3 + $0x15]] }
  0x63   :  { %8069 = vst [vmem:[#allocation63_spill] sm:$0xff] %v4911_v23  ;;  %8070 = vst [vmem:[#allocation64_spill] sm:$0xff] %v4916_v54  ;;  %3282 = vtanh.f32 %v1564_v47  ;;  %v998_v25 = vmul.f32 %v3267_v3, %v4806_v58  ;;  %v1184_v8 = vadd.f32 %v1168_v26, %v1098_v44  ;;  %v1650_v38 = vadd.f32 %v4911_v23, %v1632_v18  ;;  %s4936_s9 = sld [smem:[#allocation5 + $0x15]] }
  0x64   :  { %v3269_v45 = vpop.eup %3268  ;;  %v4925_v9 = vstv %s4884_s26  ;;  %3284 = vtanh.f32 %v1308_v37  ;;  %v4934_v6 = vstv %s4892_s17  ;;  %v4939_v44 = vstv %s4873_s25  ;;  %s4941_s3 = sld [smem:[#allocation7 + $0x13]] }
  0x65   :  { %3060 = vmax.xlane.f32.xlu0 %v4415_v2  ;;  %8071 = vst [vmem:[#allocation65_spill] sm:$0xff] %v4925_v9  ;;  %v3271_v47 = vpop.eup %3270  ;;  %v1254_v19 = vmul.f32 %v3269_v45, %v4871_v32  ;;  %v1718_v55 = vmul.f32 %v4925_v9, %v4401_v0  ;;  %8072 = vst [vmem:[#allocation66_spill] sm:$0xff] %v4934_v6  ;;  %v1014_v2 = vadd.f32 %v998_v25, %v928_v17  ;;  %s4950_s10 = sld [smem:[#allocation3 + $0x16]] }
  0x66   :  { %3054 = vmax.xlane.f32.xlu1 %v4401_v0  ;;  %8073 = vst [vmem:[#allocation67_spill] sm:$0xff] %v4939_v44  ;;  %3286 = vtanh.f32 %v1650_v38  ;;  %v1084_v37 = vmul.f32 %v3271_v47, %v4827_v27  ;;  %v1462_v3 = vmul.f32 %v4856_v63, %v4406_v1  ;;  %v3273_v26 = vpop.eup %3272  ;;  %v4948_v58 = vstv %s4905_s5  ;;  %s4959_s11 = sld [smem:[#allocation5 + $0x16]] }
  0x67   :  { %v1270_v18 = vadd.f32 %v1254_v19, %v1184_v8  ;;  %v1736_v45 = vadd.f32 %v4934_v6, %v1718_v55  ;;  %8074 = vst [vmem:[#allocation68_spill] sm:$0xff] %v4948_v58  ;;  %3288 = vtanh.f32 %v1394_v28  ;;  %v1340_v17 = vmul.f32 %v3273_v26, %v4878_v34  ;;  %s4965_s12 = sld [smem:[#allocation7 + $0x14]] }
  0x68   :  { %v1804_v25 = vmul.f32 %v4948_v58, %v4401_v0  ;;  %v4957_v38 = vstv %s4913_s28  ;;  %v1100_v8 = vadd.f32 %v1084_v37, %v1014_v2  ;;  %v4963_v19 = vstv %s4895_s27  ;;  %s4974_s13 = sld [smem:[#allocation3 + $0x17]] }
  0x69   :  { %3064 = vmax.xlane.f32.xlu0 %v4431_v4  ;;  %8075 = vst [vmem:[#allocation69_spill] sm:$0xff] %v4957_v38  ;;  %v3275_v47 = vpop.eup %3274  ;;  %8076 = vst [vmem:[#allocation70_spill] sm:$0xff] %v4963_v19  ;;  %3290 = vtanh.f32 %v1736_v45  ;;  %v1480_v4 = vadd.f32 %v4866_v43, %v1462_v3  ;;  %v1548_v28 = vmul.f32 %v4882_v29, %v4406_v1  ;;  %v4972_v2 = vstv %s4927_s30  ;;  %s4983_s14 = sld [smem:[#allocation5 + $0x17]] }
  0x6a   :  { %3058 = vmax.xlane.f32.xlu1 %v4406_v1  ;;  %v3277_v55 = vpop.eup %3276  ;;  %v1356_v26 = vadd.f32 %v1340_v17, %v1270_v18  ;;  %v1822_v27 = vadd.f32 %v4957_v38, %v1804_v25  ;;  %8077 = vst [vmem:[#allocation71_spill] sm:$0xff] %v4972_v2  ;;  %v1170_v37 = vmul.f32 %v3275_v47, %v4840_v52  ;;  %v4981_v3 = vstv %s4936_s9  ;;  %s4989_s15 = sld [smem:[#allocation7 + $0x15]] }
  0x6b   :  { %v1426_v45 = vmul.f32 %v3277_v55, %v4916_v54  ;;  %v1890_v13 = vmul.f32 %v4972_v2, %v4401_v0  ;;  %8078 = vst [vmem:[#allocation72_spill] sm:$0xff] %v4981_v3  ;;  %3292 = vtanh.f32 %v1480_v4  ;;  %v4987_v18 = vstv %s4918_s29  ;;  %s4997_s24 = sld [smem:[#allocation3 + $0x18]] }
  0x6c   :  { %8079 = vst [vmem:[#allocation73_spill] sm:$0xff] %v4987_v18  ;;  %3294 = vtanh.f32 %v1822_v27  ;;  %v1186_v17 = vadd.f32 %v1170_v37, %v1100_v8  ;;  %v1566_v25 = vadd.f32 %v4890_v36, %v1548_v28  ;;  %v4995_v43 = vstv %s4950_s10  ;;  %s5007_s8 = sld [smem:[#allocation5 + $0x18]] }
  0x6d   :  { %3068 = vmax.xlane.f32.xlu0 %v4461_v11  ;;  %v3279_v47 = vpop.eup %3278  ;;  %v1442_v55 = vadd.f32 %v1426_v45, %v1356_v26  ;;  %v1908_v52 = vadd.f32 %v4981_v3, %v1890_v13  ;;  %8080 = vst [vmem:[#allocation74_spill] sm:$0xff] %v4995_v43  ;;  %v1634_v11 = vmul.f32 %v4903_v56, %v4406_v1  ;;  %v5005_v28 = vstv %s4959_s11  ;;  %s5012_s16 = sld [smem:[#allocation7 + $0x16]] }
  0x6e   :  { %3062 = vmax.xlane.f32.xlu1 %v4436_v5  ;;  %v3281_v27 = vpop.eup %3280  ;;  %v1512_v4 = vmul.f32 %v3279_v47, %v4939_v44  ;;  %v1976_v8 = vmul.f32 %v4995_v43, %v4401_v0  ;;  %8081 = vst [vmem:[#allocation75_spill] sm:$0xff] %v5005_v28  ;;  %3296 = vtanh.f32 %v1566_v25  ;;  %v5010_v5 = vstv %s4941_s3  ;;  %s5020_s2 = sld [smem:[#allocation3 + $0x19]] }
  0x6f   :  { %8082 = vst [vmem:[#allocation76_spill] sm:$0xff] %v5010_v5  ;;  %3298 = vtanh.f32 %v1908_v52  ;;  %v1256_v13 = vmul.f32 %v3281_v27, %v4871_v32  ;;  %v1652_v26 = vadd.f32 %v4911_v23, %v1634_v11  ;;  %v5018_v36 = vstv %s4974_s13  ;;  %s5030_s4 = sld [smem:[#allocation5 + $0x19]] }
  0x70   :  { %v3283_v37 = vpop.eup %3282  ;;  %v1528_v45 = vadd.f32 %v1512_v4, %v1442_v55  ;;  %v1994_v47 = vadd.f32 %v5005_v28, %v1976_v8  ;;  %8083 = vst [vmem:[#allocation77_spill] sm:$0xff] %v5018_v36  ;;  %v1720_v25 = vmul.f32 %v4925_v9, %v4406_v1  ;;  %v2062_v27 = vmul.f32 %v5018_v36, %v4401_v0  ;;  %s5036_s18 = sld [smem:[#allocation7 + $0x17]] }
  0x71   :  { %v3285_v52 = vpop.eup %3284  ;;  %v1598_v56 = vmul.f32 %v3283_v37, %v4963_v19  ;;  %v5028_v32 = vstv %s4983_s14  ;;  %v1272_v55 = vadd.f32 %v1256_v13, %v1186_v17  ;;  %v5034_v11 = vstv %s4965_s12  ;;  %s5044_s19 = sld [smem:[#allocation3 + $0x1a]] }
  0x72   :  { %8084 = vst [vmem:[#allocation78_spill] sm:$0xff] %v5028_v32  ;;  %3066 = vmax.xlane.f32.xlu1 %v4466_v12  ;;  %8085 = vst [vmem:[#allocation79_spill] sm:$0xff] %v5034_v11  ;;  %3300 = vtanh.f32 %v1994_v47  ;;  %v1342_v4 = vmul.f32 %v3285_v52, %v4878_v34  ;;  %v1738_v8 = vadd.f32 %v4934_v6, %v1720_v25  ;;  %v5042_v29 = vstv %s4997_s24  ;;  %s5052_s20 = sld [smem:[#allocation5 + $0x1a]] }
  0x73   :  { %v3287_v37 = vpop.eup %3286  ;;  %v1614_v9 = vadd.f32 %v1598_v56, %v1528_v45  ;;  %v2080_v23 = vadd.f32 %v5028_v32, %v2062_v27  ;;  %8086 = vst [vmem:[#allocation80_spill] sm:$0xff] %v5042_v29  ;;  %3302 = vtanh.f32 %v1652_v26  ;;  %v2148_v13 = vmul.f32 %v5042_v29, %v4401_v0  ;;  %s5057_s21 = sld [smem:[#allocation7 + $0x18]] }
  0x74   :  { %v3289_v12 = vpop.eup %3288  ;;  %v1684_v17 = vmul.f32 %v3287_v37, %v4987_v18  ;;  %v5050_v47 = vstv %s5007_s8  ;;  %v1358_v56 = vadd.f32 %v1342_v4, %v1272_v55  ;;  %v5055_v45 = vstv %s4989_s15  ;;  %s5066_s22 = sld [smem:[#allocation3 + $0x1b]] }
  0x75   :  { %8087 = vst [vmem:[#allocation81_spill] sm:$0xff] %v5050_v47  ;;  %8088 = vst [vmem:[#allocation82_spill] sm:$0xff] %v5055_v45  ;;  %3304 = vtanh.f32 %v2080_v23  ;;  %v1428_v26 = vmul.f32 %v3289_v12, %v4916_v54  ;;  %v1806_v25 = vmul.f32 %v4948_v58, %v4406_v1  ;;  %v2166_v37 = vadd.f32 %v5050_v47, %v2148_v13  ;;  %s5074_s23 = sld [smem:[#allocation5 + $0x1b]] }
  0x76   :  { %v3291_v52 = vpop.eup %3290  ;;  %v1700_v27 = vadd.f32 %v1684_v17, %v1614_v9  ;;  %v5064_v34 = vstv %s5020_s2  ;;  %3306 = vtanh.f32 %v1738_v8  ;;  %v5072_v4 = vstv %s5030_s4  ;;  %s5079_s25 = sld [smem:[#allocation7 + $0x19]] }
  0x77   :  { %8089 = vst [vmem:[#allocation83_spill] sm:$0xff] %v5064_v34  ;;  %v1770_v23 = vmul.f32 %v3291_v52, %v5010_v5  ;;  %v2234_v55 = vmul.f32 %v5064_v34, %v4401_v0  ;;  %8090 = vst [vmem:[#allocation84_spill] sm:$0xff] %v5072_v4  ;;  %v1444_v12 = vadd.f32 %v1428_v26, %v1358_v56  ;;  %v5077_v17 = vstv %s5012_s16  ;;  %s5088_s26 = sld [smem:[#allocation3 + $0x1c]] }
  0x78   :  { %v3293_v9 = vpop.eup %3292  ;;  %8091 = vst [vmem:[#allocation85_spill] sm:$0xff] %v5077_v17  ;;  %3308 = vtanh.f32 %v2166_v37  ;;  %v1824_v8 = vadd.f32 %v4957_v38, %v1806_v25  ;;  %v1892_v13 = vmul.f32 %v4972_v2, %v4406_v1  ;;  %v5086_v58 = vstv %s5044_s19  ;;  %s5097_s17 = sld [smem:[#allocation5 + $0x1c]] }
  0x79   :  { %v3295_v52 = vpop.eup %3294  ;;  %v1786_v54 = vadd.f32 %v1770_v23, %v1700_v27  ;;  %v2252_v6 = vadd.f32 %v5072_v4, %v2234_v55  ;;  %8092 = vst [vmem:[#allocation86_spill] sm:$0xff] %v5086_v58  ;;  %v1514_v56 = vmul.f32 %v3293_v9, %v4939_v44  ;;  %v2320_v37 = vmul.f32 %v5086_v58, %v4401_v0  ;;  %s5102_s27 = sld [smem:[#allocation7 + $0x1a]] }
  0x7a   :  { %v1856_v26 = vmul.f32 %v3295_v52, %v5034_v11  ;;  %v5095_v25 = vstv %s5052_s20  ;;  %3310 = vtanh.f32 %v1824_v8  ;;  %v5100_v23 = vstv %s5036_s18  ;;  %s5109_s5 = sld [smem:[#allocation3 + $0x1d]] }
  0x7b   :  { %8093 = vst [vmem:[#allocation87_spill] sm:$0xff] %v5095_v25  ;;  %v3297_v27 = vpop.eup %3296  ;;  %8094 = vst [vmem:[#allocation88_spill] sm:$0xff] %v5100_v23  ;;  %3312 = vtanh.f32 %v2252_v6  ;;  %v1530_v55 = vadd.f32 %v1514_v56, %v1444_v12  ;;  %v1910_v9 = vadd.f32 %v4981_v3, %v1892_v13  ;;  %v2338_v2 = vadd.f32 %v5095_v25, %v2320_v37  ;;  %s5118_s28 = sld [smem:[#allocation5 + $0x1d]] }
  0x7c   :  { %v3299_v52 = vpop.eup %3298  ;;  %v1872_v44 = vadd.f32 %v1856_v26, %v1786_v54  ;;  %v5107_v38 = vstv %s5066_s22  ;;  %v1600_v8 = vmul.f32 %v3297_v27, %v4963_v19  ;;  %v5116_v16 = vstv %s5074_s23  ;;  %s5123_s29 = sld [smem:[#allocation7 + $0x1b]] }
  0x7d   :  { %8095 = vst [vmem:[#allocation89_spill] sm:$0xff] %v5107_v38  ;;  %v1942_v63 = vmul.f32 %v3299_v52, %v5055_v45  ;;  %v2406_v6 = vmul.f32 %v5107_v38, %v4401_v0  ;;  %8096 = vst [vmem:[#allocation90_spill] sm:$0xff] %v5116_v16  ;;  %3314 = vtanh.f32 %v1910_v9  ;;  %v5121_v54 = vstv %s5057_s21  ;;  %s5131_s30 = sld [smem:[#allocation3 + $0x1e]] }
  0x7e   :  { %8097 = vst [vmem:[#allocation91_spill] sm:$0xff] %v5121_v54  ;;  %3316 = vtanh.f32 %v2338_v2  ;;  %v1616_v12 = vadd.f32 %v1600_v8, %v1530_v55  ;;  %v1978_v13 = vmul.f32 %v4995_v43, %v4406_v1  ;;  %v5129_v27 = vstv %s5088_s26  ;;  %s5141_s9 = sld [smem:[#allocation5 + $0x1e]] }
  0x7f   :  { %v3301_v56 = vpop.eup %3300  ;;  %v1958_v26 = vadd.f32 %v1942_v63, %v1872_v44  ;;  %v2424_v37 = vadd.f32 %v5116_v16, %v2406_v6  ;;  %8098 = vst [vmem:[#allocation92_spill] sm:$0xff] %v5129_v27  ;;  %v2064_v9 = vmul.f32 %v5018_v36, %v4406_v1  ;;  %v2492_v55 = vmul.f32 %v5129_v27, %v4401_v0  ;;  %s5147_s3 = sld [smem:[#allocation7 + $0x1c]] }
  0x80   :  { %v3303_v2 = vpop.eup %3302  ;;  %v2028_v52 = vmul.f32 %v3301_v56, %v5077_v17  ;;  %v5139_v8 = vstv %s5097_s17  ;;  %v1996_v63 = vadd.f32 %v5005_v28, %v1978_v13  ;;  %v5145_v44 = vstv %s5079_s25  ;;  %s5155_s10 = sld [smem:[#allocation3 + $0x1f]]  ;;  %v5161_v28 = vld [vmem:[%s7561_s0] sm:$0xff] }
  0x81   :  { %8099 = vst [vmem:[#allocation93_spill] sm:$0xff] %v5139_v8  ;;  %8100 = vst [vmem:[#allocation94_spill] sm:$0xff] %v5145_v44  ;;  %3318 = vtanh.f32 %v2424_v37  ;;  %v1686_v1 = vmul.f32 %v3303_v2, %v4987_v18  ;;  %v2082_v6 = vadd.f32 %v5028_v32, %v2064_v9  ;;  %v2510_v0 = vadd.f32 %v5139_v8, %v2492_v55  ;;  %s3203_s13 = sld [smem:[#allocation5 + $0x1f]] }
  0x82   :  { %v3305_v56 = vpop.eup %3304  ;;  %v2044_v19 = vadd.f32 %v2028_v52, %v1958_v26  ;;  %v5153_v3 = vstv %s5109_s5  ;;  %3320 = vtanh.f32 %v1996_v63  ;;  %v5166_v26 = vstv %s5118_s28  ;;  %v5175_v63 = vld [vmem:[%s7561_s0 + $0x10] sm:$0xff]  ;;  %s5208_s24 = sld [smem:[#allocation7 + $0x1d]] }
  0x83   :  { %8101 = vst [vmem:[#allocation95_spill] sm:$0xff] %v5153_v3  ;;  %v3307_v13 = vpop.eup %3306  ;;  %v2114_v37 = vmul.f32 %v3305_v56, %v5100_v23  ;;  %v2578_v9 = vmul.f32 %v5161_v28, %v5153_v3  ;;  %8102 = vst [vmem:[#allocation96_spill] sm:$0xff] %v5166_v26  ;;  %v1702_v2 = vadd.f32 %v1686_v1, %v1616_v12  ;;  %v5169_v52 = vstv %s5102_s27  ;;  %s5211_s8 = sld [smem:[#allocation7 + $0x1e]] }
  0x84   :  { %8103 = vst [vmem:[#allocation97_spill] sm:$0xff] %v5169_v52  ;;  %3322 = vtanh.f32 %v2510_v0  ;;  %v1772_v55 = vmul.f32 %v3307_v13, %v5010_v5  ;;  %v2150_v56 = vmul.f32 %v5175_v63, %v5042_v29  ;;  %v5181_v12 = vstv %s5131_s30  ;;  %s5233_s16 = sld [smem:[#allocation7 + $0x1f]] }
  0x85   :  { %v3309_v18 = vpop.eup %3308  ;;  %v2130_v32 = vadd.f32 %v2114_v37, %v2044_v19  ;;  %v2596_v36 = vadd.f32 %v5166_v26, %v2578_v9  ;;  %8104 = vst [vmem:[#allocation98_spill] sm:$0xff] %v5181_v12  ;;  %3324 = vtanh.f32 %v2082_v6  ;;  %v2664_v0 = vmul.f32 %v5161_v28, %v5181_v12 }
  0x86   :  { %v2200_v1 = vmul.f32 %v3309_v18, %v5121_v54  ;;  %v5187_v13 = vstv %s5141_s9  ;;  %v1788_v5 = vadd.f32 %v1772_v55, %v1702_v2  ;;  %v5190_v14 = vstv %s5123_s29 }
  0x87   :  { %8105 = vst [vmem:[#allocation99_spill] sm:$0xff] %v5187_v13  ;;  %v3311_v43 = vpop.eup %3310  ;;  %8106 = vst [vmem:[#allocation100_spill] sm:$0xff] %v5190_v14  ;;  %3326 = vtanh.f32 %v2596_v36  ;;  %v2168_v19 = vadd.f32 %v5050_v47, %v2150_v56  ;;  %v2236_v37 = vmul.f32 %v5175_v63, %v5064_v34  ;;  %v2682_v18 = vadd.f32 %v5187_v13, %v2664_v0 }
  0x88   :  { %v3313_v9 = vpop.eup %3312  ;;  %v2216_v6 = vadd.f32 %v2200_v1, %v2130_v32  ;;  %v5197_v29 = vstv %s5155_s10  ;;  %v1858_v48 = vmul.f32 %v3311_v43, %v5034_v11  ;;  %v5203_v40 = vstv %s3203_s13 }
  0x89   :  { %8107 = vst [vmem:[#allocation101_spill] sm:$0xff] %v5197_v29  ;;  %v2286_v2 = vmul.f32 %v3313_v9, %v5145_v44  ;;  %v2750_v55 = vmul.f32 %v5161_v28, %v5197_v29  ;;  %8108 = vst [vmem:[#allocation102_spill] sm:$0xff] %v5203_v40  ;;  %3328 = vtanh.f32 %v2168_v19  ;;  %v5206_v56 = vstv %s5147_s3 }
  0x8a   :  { %v3315_v36 = vpop.eup %3314  ;;  %8109 = vst [vmem:[#allocation103_spill] sm:$0xff] %v5206_v56  ;;  %3330 = vtanh.f32 %v2682_v18  ;;  %v1874_v32 = vadd.f32 %v1858_v48, %v1788_v5  ;;  %v2254_v1 = vadd.f32 %v5072_v4, %v2236_v37  ;;  %v2322_v19 = vmul.f32 %v5175_v63, %v5086_v58 }
  0x8b   :  { %v3317_v0 = vpop.eup %3316  ;;  %v2302_v47 = vadd.f32 %v2286_v2, %v2216_v6  ;;  %v2768_v43 = vadd.f32 %v5203_v40, %v2750_v55  ;;  %v1944_v9 = vmul.f32 %v3315_v36, %v5055_v45  ;;  %v2408_v18 = vmul.f32 %v5175_v63, %v5107_v38 }
  0x8c   :  { %v2372_v11 = vmul.f32 %v3317_v0, %v5169_v52  ;;  %3332 = vtanh.f32 %v2254_v1  ;;  %v2494_v48 = vmul.f32 %v5175_v63, %v5129_v27  ;;  %v2340_v37 = vadd.f32 %v5095_v25, %v2322_v19 }
  0x8d   :  { %3334 = vtanh.f32 %v2768_v43  ;;  %v1960_v5 = vadd.f32 %v1944_v9, %v1874_v32  ;;  %v2580_v6 = vmul.f32 %v5175_v63, %v5153_v3  ;;  %v2426_v36 = vadd.f32 %v5116_v16, %v2408_v18 }
  0x8e   :  { %v3319_v2 = vpop.eup %3318  ;;  %v2388_v55 = vadd.f32 %v2372_v11, %v2302_v47  ;;  %v2512_v0 = vadd.f32 %v5139_v8, %v2494_v48  ;;  %v2666_v1 = vmul.f32 %v5175_v63, %v5181_v12  ;;  %3336 = vtanh.f32 %v2340_v37 }
  0x8f   :  { %v3321_v45 = vpop.eup %3320  ;;  %v2458_v38 = vmul.f32 %v3319_v2, %v5190_v14  ;;  %v2598_v32 = vadd.f32 %v5166_v26, %v2580_v6  ;;  %v2752_v43 = vmul.f32 %v5175_v63, %v5197_v29  ;;  %3338 = vtanh.f32 %v2426_v36 }
  0x90   :  { %v2030_v11 = vmul.f32 %v3321_v45, %v5077_v17  ;;  %v2684_v47 = vadd.f32 %v5187_v13, %v2666_v1  ;;  %v137_v9 = vmul.f32 %v4635_v24, %v4572_v50  ;;  %3340 = vtanh.f32 %v2512_v0  ;;  %v5256_v0 = vld [vmem:[%s7561_s0 + $0x8] sm:$0xff] }
  0x91   :  { %v3323_v19 = vpop.eup %3322  ;;  %v2474_v18 = vadd.f32 %v2458_v38, %v2388_v55  ;;  %v2770_v48 = vadd.f32 %v5203_v40, %v2752_v43  ;;  %v533_v37 = vadd.f32 %v4594_v59, %v4697_v15  ;;  %v5244_v29 = vstv %s5208_s24 }
  0x92   :  { %v3325_v6 = vpop.eup %3324  ;;  %v2544_v2 = vmul.f32 %v3323_v19, %v5206_v56  ;;  %8110 = vst [vmem:[#allocation104_spill] sm:$0xff] %v5244_v29  ;;  %v2046_v45 = vadd.f32 %v2030_v11, %v1960_v5  ;;  %3342 = vtanh.f32 %v2598_v32  ;;  %v5247_v36 = vstv %s5211_s8 }
  0x93   :  { %8111 = vst [vmem:[#allocation105_spill] sm:$0xff] %v5247_v36  ;;  %v2116_v1 = vmul.f32 %v3325_v6, %v5100_v23  ;;  %3344 = vtanh.f32 %v2684_v47  ;;  %v223_v24 = vmul.f32 %v4664_v42, %v4575_v51  ;;  %v153_v15 = vadd.f32 %v137_v9, %v4515_v30 }
  0x94   :  { %v3327_v38 = vpop.eup %3326  ;;  %v2560_v55 = vadd.f32 %v2544_v2, %v2474_v18  ;;  %3346 = vtanh.f32 %v2770_v48  ;;  %v601_v5 = vmul.f32 %v5256_v0, %v4614_v10  ;;  %v687_v42 = vmul.f32 %v5256_v0, %v4649_v33 }
  0x95   :  { %v2630_v32 = vmul.f32 %v3327_v38, %v5244_v29  ;;  %v2132_v43 = vadd.f32 %v2116_v1, %v2046_v45  ;;  %3348 = vtanh.f32 %v4671_v46  ;;  %v773_v9 = vmul.f32 %v5256_v0, %v4675_v53 }
  0x96   :  { %v3329_v11 = vpop.eup %3328  ;;  %3350 = vtanh.f32 %v533_v37  ;;  %v619_v47 = vadd.f32 %v4629_v21, %v601_v5  ;;  %v705_v2 = vadd.f32 %v4659_v39, %v687_v42  ;;  %v859_v46 = vmul.f32 %v5256_v0, %v4701_v20 }
  0x97   :  { %v3331_v19 = vpop.eup %3330  ;;  %v2646_v48 = vadd.f32 %v2630_v32, %v2560_v55  ;;  %v2202_v6 = vmul.f32 %v3329_v11, %v5121_v54  ;;  %v5274_v1 = vstv %s5233_s16  ;;  %v239_v37 = vadd.f32 %v223_v24, %v153_v15 }
  0x98   :  { %v2840_v18 = vpop.permute.xlu0 %2839  ;;  %v2716_v45 = vmul.f32 %v3331_v19, %v5247_v36  ;;  %8112 = vst [vmem:[#allocation106_spill] sm:$0xff] %v5274_v1  ;;  %v309_v38 = vmul.f32 %v4689_v7, %v4601_v61  ;;  %3352 = vtanh.f32 %v619_v47  ;;  %v791_v55 = vadd.f32 %v4685_v60, %v773_v9  ;;  %v8121_v61 = vld [vmem:[#allocation48_spill] sm:$0xff] }
  0x99   :  { %v3333_v5 = vpop.eup %3332  ;;  %v2218_v30 = vadd.f32 %v2202_v6, %v2132_v43  ;;  %v877_v32 = vadd.f32 %v4709_v31, %v859_v46  ;;  %v4348_v42 = vmov 0.0   ;;  %v2871_v19 = vsub.f32 %v2840_v18, %v5161_v28 }
  0x9a   :  { %v3335_v11 = vpop.eup %3334  ;;  %v5282_v51 = vsel %vm2836_vm0, 1.0, %v4348_v42  ;;  %v2732_v50 = vadd.f32 %v2716_v45, %v2646_v48  ;;  %v2288_v24 = vmul.f32 %v3333_v5, %v5145_v44  ;;  %3354 = vtanh.f32 %v705_v2  ;;  %v5299_v5 = vld [vmem:[%s7562_s1] ss:$0 sm:$0xff] }
  0x9b   :  { %8113 = vst [vmem:[#allocation107_spill] sm:$0xff] %v5282_v51  ;;  %v2802_v7 = vmul.f32 %v3335_v11, %v5274_v1  ;;  %v945_v15 = vmul.f32 %v5256_v0, %v4725_v49  ;;  %v1031_v43 = vmul.f32 %v5256_v0, %v4746_v22  ;;  %v3337_v47 = vpop.eup %3336  ;;  %v325_v6 = vadd.f32 %v309_v38, %v239_v37  ;;  %v8115_v37 = vld [vmem:[#allocation42_spill] sm:$0xff] }
  0x9c   :  { %v2304_v9 = vadd.f32 %v2288_v24, %v2218_v30  ;;  %v395_v41 = vmul.f32 %v4713_v35, %v4604_v62  ;;  %3356 = vtanh.f32 %v791_v55  ;;  %v3339_v28 = vpop.eup %3338  ;;  %v2374_v48 = vmul.f32 %v3337_v47, %v5169_v52  ;;  %8114 = vst [vmem:[#allocation108_spill] sm:$0xff] %v5299_v5  ;;  %v2844_v55 = vpop.permute.xlu1 %2843  ;;  %v8116_v62 = vld [vmem:[#allocation44_spill] sm:$0xff] }
  0x9d   :  { %v2818_v18 = vadd.f32 %v2802_v7, %v2732_v50  ;;  %3358 = vtanh.f32 %v877_v32  ;;  %v963_v2 = vadd.f32 %v4733_v57, %v945_v15  ;;  %v3341_v46 = vpop.eup %3340  ;;  %v2887_v45 = vmul.f32 %v5282_v51, %v2871_v19 }
  0x9e   :  { %v2460_v30 = vmul.f32 %v3339_v28, %v5190_v14  ;;  %v1049_v35 = vadd.f32 %v8115_v37, %v1031_v43  ;;  %v2390_v11 = vadd.f32 %v2374_v48, %v2304_v9  ;;  %v2546_v32 = vmul.f32 %v3341_v46, %v5206_v56  ;;  %v8117_v48 = vld [vmem:[#allocation47_spill] sm:$0xff] }
  0x9f   :  { %v3343_v38 = vpop.eup %3342  ;;  %v2903_v50 = vmul.f32 0.5, %v2818_v18  ;;  %3360 = vtanh.f32 %v963_v2  ;;  %v411_v24 = vadd.f32 %v395_v41, %v325_v6  ;;  %v1117_v28 = vmul.f32 %v5256_v0, %v8116_v62 }
  0xa0   :  { %v3345_v42 = vpop.eup %3344  ;;  %3362 = vtanh.f32 %v1049_v35  ;;  %v2476_v15 = vadd.f32 %v2460_v30, %v2390_v11  ;;  %v2632_v47 = vmul.f32 %v3343_v38, %v5244_v29  ;;  %v2873_v14 = vsub.f32 %v2844_v55, %v5175_v63  ;;  %v8118_v35 = vld [vmem:[#allocation29_spill] sm:$0xff]  ;;  %v8120_v11 = vld [vmem:[#allocation30_spill] sm:$0xff] }
  0xa1   :  { %v3347_v19 = vpop.eup %3346  ;;  %v2925_v7 = vmul.f32 %v5299_v5, %v2903_v50  ;;  %v2718_v9 = vmul.f32 %v3345_v42, %v5247_v36  ;;  %v1203_v2 = vmul.f32 %v5256_v0, %v8117_v48  ;;  %v8119_v50 = vld [vmem:[#allocation46_spill] sm:$0xff] }
  0xa2   :  { %v3349_v43 = vpop.eup %3348  ;;  %v2562_v41 = vadd.f32 %v2546_v32, %v2476_v15  ;;  %v1135_v30 = vadd.f32 %v8119_v50, %v1117_v28  ;;  %v2804_v38 = vmul.f32 %v3347_v19, %v5274_v1  ;;  %v2889_v36 = vmul.f32 %v5282_v51, %v2873_v14  ;;  %v8123_v19 = vld [vmem:[#allocation10_spill] sm:$0xff]  ;;  %v8125_v28 = vld [vmem:[#allocation53_spill] sm:$0xff] }
  0xa3   :  { %v3351_v46 = vpop.eup %3350  ;;  %v2941_v6 = vsub.f32 %v2887_v45, %v2925_v7  ;;  %v481_v56 = vmul.f32 %v3349_v43, %v8118_v35  ;;  %v1221_v52 = vadd.f32 %v8121_v61, %v1203_v2  ;;  %v8122_v45 = vld [vmem:[#allocation50_spill] sm:$0xff]  ;;  %v5323_v7 = vld [vmem:[%s7561_s0 + $0x18] sm:$0xff]  ;;  %v1375_v14 = vmul.f32 %v5256_v0, %v8125_v28  ;;  %v8126_v43 = vld [vmem:[#allocation51_spill] sm:$0xff] }
  0xa4   :  { %v567_v29 = vmul.f32 %v3351_v46, %v8120_v11  ;;  %v2648_v63 = vadd.f32 %v2632_v47, %v2562_v41  ;;  %3364 = vtanh.f32 %v1135_v30  ;;  %v1289_v32 = vmul.f32 %v5256_v0, %v8122_v45  ;;  %v8127_v46 = vld [vmem:[#allocation56_spill] sm:$0xff]  ;;  %v8129_v1 = vld [vmem:[#allocation62_spill] sm:$0xff]  ;;  %v8132_v35 = vld [vmem:[#allocation43_spill] sm:$0xff] }
  0xa5   :  { %v2957_v44 = vmul.f32 %v2941_v6, %v2818_v18  ;;  %v497_v55 = vadd.f32 %v481_v56, %v411_v24  ;;  %v3353_v42 = vpop.eup %3352  ;;  %3366 = vtanh.f32 %v1221_v52  ;;  %v5327_v15 = vmul.f32 %v5323_v7, %v8123_v19  ;;  %v8124_v24 = vld [vmem:[#allocation37_spill] sm:$0xff]  ;;  %v8128_v41 = vld [vmem:[#allocation60_spill] sm:$0xff] }
  0xa6   :  { %v2734_v18 = vadd.f32 %v2718_v9, %v2648_v63  ;;  %v653_v47 = vmul.f32 %v3353_v42, %v8124_v24  ;;  %v1307_v2 = vadd.f32 %v8126_v43, %v1289_v32  ;;  %v1461_v6 = vmul.f32 %v5256_v0, %v8127_v46  ;;  %v8130_v63 = vld [vmem:[#allocation40_spill] sm:$0xff]  ;;  %v8131_v42 = vld [vmem:[#allocation55_spill] sm:$0xff]  ;;  %v8133_v32 = vld [vmem:[#allocation57_spill] sm:$0xff] }
  0xa7   :  { %2973 = vadd.xlane.f32.xlu0 %v2957_v44  ;;  %v583_v56 = vadd.f32 %v567_v29, %v497_v55  ;;  %v3355_v52 = vpop.eup %3354  ;;  %v1547_v30 = vmul.f32 %v5256_v0, %v8128_v41  ;;  %v1633_v19 = vmul.f32 %v5256_v0, %v8129_v1  ;;  %v1393_v24 = vadd.f32 %v8131_v42, %v1375_v14  ;;  %v8134_v46 = vld [vmem:[#allocation61_spill] sm:$0xff]  ;;  %v8138_v14 = vld [vmem:[#allocation68_spill] sm:$0xff] }
  0xa8   :  { %v2820_v9 = vadd.f32 %v2804_v38, %v2734_v18  ;;  %v739_v55 = vmul.f32 %v3355_v52, %v8130_v63  ;;  %3368 = vtanh.f32 %v1307_v2  ;;  %v1479_v43 = vadd.f32 %v8133_v32, %v1461_v6  ;;  %v8135_v45 = vld [vmem:[#allocation45_spill] sm:$0xff]  ;;  %v8136_v38 = vld [vmem:[#allocation63_spill] sm:$0xff] }
  0xa9   :  { %v3357_v44 = vpop.eup %3356  ;;  %v669_v29 = vadd.f32 %v653_v47, %v583_v56  ;;  %v1565_v28 = vadd.f32 %v8134_v46, %v1547_v30  ;;  %3370 = vtanh.f32 %v1393_v24  ;;  %v1651_v18 = vadd.f32 %v8136_v38, %v1633_v19  ;;  %v8137_v56 = vld [vmem:[#allocation65_spill] sm:$0xff]  ;;  %v8141_v24 = vld [vmem:[#allocation66_spill] sm:$0xff] }
  0xaa   :  { %v3359_v11 = vpop.eup %3358  ;;  %v825_v61 = vmul.f32 %v3357_v44, %v8132_v35  ;;  %v2905_v54 = vmul.f32 0.5, %v2820_v9  ;;  %3372 = vtanh.f32 %v1479_v43  ;;  %v1719_v47 = vmul.f32 %v5256_v0, %v8137_v56  ;;  %v8139_v30 = vld [vmem:[#allocation49_spill] sm:$0xff]  ;;  %v8143_v56 = vld [vmem:[#allocation71_spill] sm:$0xff]  ;;  %v8144_v46 = vld [vmem:[#allocation74_spill] sm:$0xff] }
  0xab   :  { %v755_v41 = vadd.f32 %v739_v55, %v669_v29  ;;  %v911_v50 = vmul.f32 %v3359_v11, %v8135_v45  ;;  %v1805_v52 = vmul.f32 %v5256_v0, %v8138_v14  ;;  %3374 = vtanh.f32 %v1565_v28  ;;  %v8140_v29 = vld [vmem:[#allocation52_spill] sm:$0xff]  ;;  %v8142_v55 = vld [vmem:[#allocation69_spill] sm:$0xff]  ;;  %v2846_v45 = vpop.permute.xlu1 %2845 }
  0xac   :  { %v3361_v1 = vpop.eup %3360  ;;  %v2927_v6 = vmul.f32 %v5299_v5, %v2905_v54  ;;  %3376 = vtanh.f32 %v1651_v18  ;;  %v1737_v43 = vadd.f32 %v8141_v24, %v1719_v47  ;;  %v1891_v14 = vmul.f32 %v5256_v0, %v8143_v56  ;;  %v8146_v28 = vld [vmem:[#allocation80_spill] sm:$0xff]  ;;  %v8151_v24 = vld [vmem:[#allocation54_spill] sm:$0xff] }
  0xad   :  { %v3363_v2 = vpop.eup %3362  ;;  %v841_v44 = vadd.f32 %v825_v61, %v755_v41  ;;  %v997_v35 = vmul.f32 %v3361_v1, %v8139_v30  ;;  %v1823_v19 = vadd.f32 %v8142_v55, %v1805_v52  ;;  %v1977_v54 = vmul.f32 %v5256_v0, %v8144_v46  ;;  %v8145_v61 = vld [vmem:[#allocation77_spill] sm:$0xff] }
  0xae   :  { %v1083_v11 = vmul.f32 %v3363_v2, %v8140_v29  ;;  %v2943_v63 = vsub.f32 %v2889_v36, %v2927_v6  ;;  %3378 = vtanh.f32 %v1737_v43  ;;  %v2063_v1 = vmul.f32 %v5256_v0, %v8145_v61  ;;  %v8147_v36 = vld [vmem:[#allocation72_spill] sm:$0xff]  ;;  %v8149_v43 = vld [vmem:[#allocation78_spill] sm:$0xff]  ;;  %v8150_v30 = vld [vmem:[#allocation81_spill] sm:$0xff] }
  0xaf   :  { %v927_v38 = vadd.f32 %v911_v50, %v841_v44  ;;  %v2149_v41 = vmul.f32 %v5256_v0, %v8146_v28  ;;  %v2235_v18 = vmul.f32 %v5256_v0, %v5064_v34  ;;  %3380 = vtanh.f32 %v1823_v19  ;;  %v8148_v44 = vld [vmem:[#allocation75_spill] sm:$0xff] }
  0xb0   :  { %v2959_v47 = vmul.f32 %v2943_v63, %v2820_v9  ;;  %v1909_v50 = vadd.f32 %v8147_v36, %v1891_v14  ;;  %v2874_v6 = vsub.f32 %v2846_v45, %v5323_v7  ;;  %v1995_v5 = vadd.f32 %v8148_v44, %v1977_v54  ;;  %v2842_v63 = vpop.permute.xlu0 %2841  ;;  %v8153_v45 = vld [vmem:[#allocation89_spill] sm:$0xff] }
  0xb1   :  { %v1013_v52 = vadd.f32 %v997_v35, %v927_v38  ;;  %v3365_v2 = vpop.eup %3364  ;;  %v2081_v29 = vadd.f32 %v8149_v43, %v2063_v1  ;;  %v2167_v55 = vadd.f32 %v8150_v30, %v2149_v41  ;;  %v2253_v9 = vadd.f32 %v5072_v4, %v2235_v18  ;;  %v8152_v38 = vld [vmem:[#allocation58_spill] sm:$0xff] }
  0xb2   :  { %v3367_v61 = vpop.eup %3366  ;;  %2977 = vadd.xlane.f32.xlu0 %v2959_v47  ;;  %v1169_v46 = vmul.f32 %v3365_v2, %v8151_v24  ;;  %v2321_v35 = vmul.f32 %v5256_v0, %v5086_v58  ;;  %3382 = vtanh.f32 %v1909_v50  ;;  %v2407_v19 = vmul.f32 %v5256_v0, %v8153_v45  ;;  %v8154_v47 = vld [vmem:[#allocation11_spill] sm:$0xff] }
  0xb3   :  { %v1099_v28 = vadd.f32 %v1083_v11, %v1013_v52  ;;  %v1255_v14 = vmul.f32 %v3367_v61, %v8152_v38  ;;  %v2493_v54 = vmul.f32 %v5256_v0, %v5129_v27  ;;  %3384 = vtanh.f32 %v1995_v5 }
  0xb4   :  { %v2339_v11 = vadd.f32 %v5095_v25, %v2321_v35  ;;  %v2579_v41 = vmul.f32 %v5256_v0, %v5153_v3  ;;  %3386 = vtanh.f32 %v2081_v29  ;;  %v2425_v18 = vadd.f32 %v5116_v16, %v2407_v19  ;;  %v8157_v29 = vld [vmem:[#allocation12_spill] sm:$0xff] }
  0xb5   :  { %v1185_v1 = vadd.f32 %v1169_v46, %v1099_v28  ;;  %v105_v61 = vadd.f32 %v8154_v47, %v5327_v15  ;;  %v3369_v52 = vpop.eup %3368  ;;  %v2872_v50 = vsub.f32 %v2842_v63, %v5256_v0  ;;  %3388 = vtanh.f32 %v2167_v55  ;;  %v8156_v28 = vld [vmem:[#allocation59_spill] sm:$0xff]  ;;  %v8158_v16 = vld [vmem:[#allocation64_spill] sm:$0xff] }
  0xb6   :  { %v2511_v38 = vadd.f32 %v5139_v8, %v2493_v54  ;;  %v3371_v46 = vpop.eup %3370  ;;  %v5388_v5 = vmul.f32 %v5282_v51, %v2874_v6  ;;  %v1341_v35 = vmul.f32 %v3369_v52, %v8156_v28  ;;  %3390 = vtanh.f32 %v2253_v9  ;;  %v8160_v47 = vld [vmem:[#allocation67_spill] sm:$0xff] }
  0xb7   :  { %v1271_v2 = vadd.f32 %v1255_v14, %v1185_v1  ;;  %v173_v19 = vmul.f32 %v5323_v7, %v8157_v29  ;;  %v3373_v3 = vpop.eup %3372  ;;  %v1427_v15 = vmul.f32 %v3371_v46, %v8158_v16  ;;  %3392 = vtanh.f32 %v2339_v11  ;;  %v8159_v14 = vld [vmem:[#allocation14_spill] sm:$0xff]  ;;  %v8162_v46 = vld [vmem:[#allocation13_spill] sm:$0xff] }
  0xb8   :  { %8155 = vst [vmem:[#allocation109_spill] sm:$0xff] %v5388_v5  ;;  %v2597_v63 = vadd.f32 %v5166_v26, %v2579_v41  ;;  %v259_v55 = vmul.f32 %v5323_v7, %v8159_v14  ;;  %v3375_v54 = vpop.eup %3374  ;;  %v1513_v6 = vmul.f32 %v3373_v3, %v8160_v47  ;;  %3394 = vtanh.f32 %v2425_v18  ;;  %v8161_v5 = vld [vmem:[#allocation101_spill] sm:$0xff]  ;;  %v8164_v14 = vld [vmem:[#allocation70_spill] sm:$0xff]  ;;  %v8166_v3 = vld [vmem:[#allocation19_spill] sm:$0xff] }
  0xb9   :  { %v1357_v1 = vadd.f32 %v1341_v35, %v1271_v2  ;;  %v2665_v9 = vmul.f32 %v5256_v0, %v5181_v12  ;;  %v3377_v52 = vpop.eup %3376  ;;  %3396 = vtanh.f32 %v2511_v38  ;;  %v2751_v29 = vmul.f32 %v5256_v0, %v8161_v5  ;;  %v8163_v16 = vld [vmem:[#allocation17_spill] sm:$0xff]  ;;  %v8165_v2 = vld [vmem:[#allocation15_spill] sm:$0xff]  ;;  %v8168_v38 = vld [vmem:[#allocation18_spill] sm:$0xff] }
  0xba   :  { %v191_v11 = vadd.f32 %v8162_v46, %v173_v19  ;;  %v345_v41 = vmul.f32 %v5323_v7, %v8163_v16  ;;  %v1599_v8 = vmul.f32 %v3375_v54, %v8164_v14  ;;  %v277_v35 = vadd.f32 %v8165_v2, %v259_v55  ;;  %v8167_v12 = vld [vmem:[#allocation73_spill] sm:$0xff]  ;;  %v8169_v0 = vld [vmem:[#allocation23_spill] sm:$0xff] }
  0xbb   :  { %v1443_v26 = vadd.f32 %v1427_v15, %v1357_v1  ;;  %v431_v18 = vmul.f32 %v5323_v7, %v8166_v3  ;;  %v3379_v47 = vpop.eup %3378  ;;  %v1685_v28 = vmul.f32 %v3377_v52, %v8167_v12  ;;  %3398 = vtanh.f32 %v2597_v63  ;;  %v8170_v15 = vld [vmem:[#allocation20_spill] sm:$0xff]  ;;  %v2850_v52 = vpop.permute.xlu1 %2849 }
  0xbc   :  { %v363_v24 = vadd.f32 %v8168_v38, %v345_v41  ;;  %v517_v19 = vmul.f32 %v5323_v7, %v8169_v0  ;;  %v3381_v46 = vpop.eup %3380  ;;  %3400 = vtanh.f32 %v105_v61  ;;  %v603_v55 = vmul.f32 %v5323_v7, %v4614_v10  ;;  %v8171_v12 = vld [vmem:[#allocation76_spill] sm:$0xff] }
  0xbd   :  { %v1529_v5 = vadd.f32 %v1513_v6, %v1443_v26  ;;  %v449_v1 = vadd.f32 %v8170_v15, %v431_v18  ;;  %v5417_v54 = vmul.f32 %v5282_v51, %v2872_v50  ;;  %v2683_v2 = vadd.f32 %v5187_v13, %v2665_v9  ;;  %v2848_v6 = vpop.permute.xlu0 %2847  ;;  %v8172_v18 = vld [vmem:[#allocation79_spill] sm:$0xff] }
  0xbe   :  { %3402 = vtanh.f32 %v191_v11  ;;  %v535_v63 = vadd.f32 %v4594_v59, %v517_v19  ;;  %v1771_v38 = vmul.f32 %v3379_v47, %v8171_v12  ;;  %v689_v26 = vmul.f32 %v5323_v7, %v4649_v33 }
  0xbf   :  { %v1615_v41 = vadd.f32 %v1599_v8, %v1529_v5  ;;  %3404 = vtanh.f32 %v277_v35  ;;  %v3383_v61 = vpop.eup %3382  ;;  %v1857_v10 = vmul.f32 %v3381_v46, %v8172_v18  ;;  %v2769_v50 = vadd.f32 %v5203_v40, %v2751_v29  ;;  %v5434_v35 = vld [vmem:[%s7561_s0 + $0x28] sm:$0xff]  ;;  %v8174_v18 = vld [vmem:[#allocation82_spill] sm:$0xff] }
  0xc0   :  { %3406 = vtanh.f32 %v363_v24  ;;  %v775_v9 = vmul.f32 %v5323_v7, %v4675_v53  ;;  %v3385_v11 = vpop.eup %3384  ;;  %v621_v8 = vadd.f32 %v4629_v21, %v603_v55  ;;  %v861_v47 = vmul.f32 %v5323_v7, %v4701_v20  ;;  %8173 = vst [vmem:[#allocation110_spill] sm:$0xff] %v5434_v35 }
  0xc1   :  { %v1701_v19 = vadd.f32 %v1685_v28, %v1615_v41  ;;  %3408 = vtanh.f32 %v449_v1  ;;  %v3387_v5 = vpop.eup %3386  ;;  %v2876_v29 = vsub.f32 %v2850_v52, %v5434_v35  ;;  %v707_v24 = vadd.f32 %v4659_v39, %v689_v26  ;;  %v5443_v1 = vld [vmem:[%s7561_s0 + $0x20] sm:$0xff] }
  0xc2   :  { %3410 = vtanh.f32 %v535_v63  ;;  %v947_v28 = vmul.f32 %v5323_v7, %v4725_v49  ;;  %v3389_v46 = vpop.eup %3388  ;;  %v2875_v55 = vsub.f32 %v2848_v6, %v5443_v1  ;;  %v1943_v20 = vmul.f32 %v3383_v61, %v8174_v18  ;;  %v2854_v49 = vpop.permute.xlu1 %2853  ;;  %v8187_v18 = vld [vmem:[#allocation22_spill] sm:$0xff] }
  0xc3   :  { %v1787_v41 = vadd.f32 %v1771_v38, %v1701_v19  ;;  %3412 = vtanh.f32 %v2683_v2  ;;  %v3391_v40 = vpop.eup %3390  ;;  %v793_v63 = vadd.f32 %v4685_v60, %v775_v9  ;;  %v1033_v52 = vmul.f32 %v5323_v7, %v4746_v22 }
  0xc4   :  { %3414 = vtanh.f32 %v2769_v50  ;;  %v1119_v26 = vmul.f32 %v5323_v7, %v8116_v62  ;;  %v3393_v35 = vpop.eup %3392  ;;  %v2029_v53 = vmul.f32 %v3385_v11, %v5077_v17  ;;  %v879_v38 = vadd.f32 %v4709_v31, %v861_v47  ;;  %v4274_v47 = vld [vmem:[%s7561_s0 + $0x38] sm:$0xff] }
  0xc5   :  { %v1873_v39 = vadd.f32 %v1857_v10, %v1787_v41  ;;  %3416 = vtanh.f32 %v621_v8  ;;  %v3395_v61 = vpop.eup %3394  ;;  %v5455_v2 = vmul.f32 %v5282_v51, %v2876_v29  ;;  %v965_v6 = vadd.f32 %v4733_v57, %v947_v28  ;;  %v8178_v41 = vld [vmem:[#allocation50_spill] sm:$0xff]  ;;  %v8184_v57 = vld [vmem:[#allocation21_spill] sm:$0xff] }
  0xc6   :  { %3418 = vtanh.f32 %v707_v24  ;;  %v1205_v50 = vmul.f32 %v5323_v7, %v8117_v48  ;;  %v3397_v9 = vpop.eup %3396  ;;  %v5461_v19 = vmul.f32 %v5282_v51, %v2875_v55  ;;  %v2115_v11 = vmul.f32 %v3387_v5, %v5100_v23  ;;  %v8177_v24 = vld [vmem:[#allocation46_spill] sm:$0xff]  ;;  %v8179_v55 = vld [vmem:[#allocation91_spill] sm:$0xff]  ;;  %v8190_v62 = vld [vmem:[#allocation25_spill] sm:$0xff] }
  0xc7   :  { %8175 = vst [vmem:[#allocation111_spill] sm:$0xff] %v5455_v2  ;;  %v1959_v10 = vadd.f32 %v1943_v20, %v1873_v39  ;;  %v1051_v8 = vadd.f32 %v8115_v37, %v1033_v52  ;;  %v2878_v29 = vsub.f32 %v2854_v49, %v4274_v47  ;;  %3420 = vtanh.f32 %v793_v63  ;;  %v8180_v39 = vld [vmem:[#allocation53_spill] sm:$0xff]  ;;  %v8181_v52 = vld [vmem:[#allocation94_spill] sm:$0xff]  ;;  %v8182_v37 = vld [vmem:[#allocation48_spill] sm:$0xff] }
  0xc8   :  { %8176 = vst [vmem:[#allocation112_spill] sm:$0xff] %v5461_v19  ;;  %v1137_v28 = vadd.f32 %v8177_v24, %v1119_v26  ;;  %v1291_v2 = vmul.f32 %v5323_v7, %v8178_v41  ;;  %v3399_v17 = vpop.eup %3398  ;;  %v2201_v19 = vmul.f32 %v3389_v46, %v8179_v55  ;;  %3422 = vtanh.f32 %v879_v38  ;;  %v8183_v63 = vld [vmem:[#allocation56_spill] sm:$0xff]  ;;  %v2852_v24 = vpop.permute.xlu0 %2851  ;;  %v8186_v55 = vld [vmem:[#allocation97_spill] sm:$0xff] }
  0xc9   :  { %v2045_v48 = vadd.f32 %v2029_v53, %v1959_v10  ;;  %v1377_v20 = vmul.f32 %v5323_v7, %v8180_v39  ;;  %v3401_v5 = vpop.eup %3400  ;;  %v2287_v23 = vmul.f32 %v3391_v40, %v8181_v52  ;;  %3424 = vtanh.f32 %v965_v6  ;;  %v8185_v46 = vld [vmem:[#allocation60_spill] sm:$0xff]  ;;  %v8188_v6 = vld [vmem:[#allocation51_spill] sm:$0xff] }
  0xca   :  { %v1223_v49 = vadd.f32 %v8182_v37, %v1205_v50  ;;  %v1463_v26 = vmul.f32 %v5323_v7, %v8183_v63  ;;  %v139_v53 = vmul.f32 %v3401_v5, %v8184_v57  ;;  %3426 = vtanh.f32 %v1051_v8  ;;  %v8189_v63 = vld [vmem:[#allocation16_spill] sm:$0xff] }
  0xcb   :  { %v3403_v47 = vpop.eup %3402  ;;  %v2131_v41 = vadd.f32 %v2115_v11, %v2045_v48  ;;  %v1549_v38 = vmul.f32 %v5323_v7, %v8185_v46  ;;  %v2373_v39 = vmul.f32 %v3393_v35, %v8186_v55  ;;  %3428 = vtanh.f32 %v1137_v28  ;;  %v5490_v5 = vld [vmem:[%s7561_s0 + $0x30] sm:$0xff]  ;;  %v8193_v55 = vld [vmem:[#allocation26_spill] sm:$0xff] }
  0xcc   :  { %v3405_v10 = vpop.eup %3404  ;;  %v225_v40 = vmul.f32 %v3403_v47, %v8187_v18  ;;  %v1309_v50 = vadd.f32 %v8188_v6, %v1291_v2  ;;  %v155_v31 = vadd.f32 %v139_v53, %v8189_v63  ;;  %v1395_v11 = vadd.f32 %v8131_v42, %v1377_v20  ;;  %8191 = vst [vmem:[#allocation113_spill] sm:$0xff] %v5490_v5  ;;  %v8192_v47 = vld [vmem:[#allocation100_spill] sm:$0xff]  ;;  %v8196_v63 = vld [vmem:[#allocation103_spill] sm:$0xff] }
  0xcd   :  { %v3407_v52 = vpop.eup %3406  ;;  %v2217_v37 = vadd.f32 %v2201_v19, %v2131_v41  ;;  %v311_v48 = vmul.f32 %v3405_v10, %v8190_v62  ;;  %v2877_v35 = vsub.f32 %v2852_v24, %v5490_v5  ;;  %v2459_v28 = vmul.f32 %v3395_v61, %v8192_v47  ;;  %v8194_v62 = vld [vmem:[#allocation61_spill] sm:$0xff]  ;;  %v8197_v24 = vld [vmem:[#allocation62_spill] sm:$0xff] }
  0xce   :  { %v3409_v8 = vpop.eup %3408  ;;  %3430 = vtanh.f32 %v1223_v49  ;;  %v1481_v2 = vadd.f32 %v8133_v32, %v1463_v26  ;;  %v241_v53 = vadd.f32 %v225_v40, %v155_v31  ;;  %v397_v10 = vmul.f32 %v3407_v52, %v8193_v55  ;;  %v8198_v47 = vld [vmem:[#allocation29_spill] sm:$0xff] }
  0xcf   :  { %v3411_v19 = vpop.eup %3410  ;;  %v2303_v41 = vadd.f32 %v2287_v23, %v2217_v37  ;;  %v1567_v20 = vadd.f32 %v8194_v62, %v1549_v38  ;;  %v5498_v18 = vmul.f32 %v5282_v51, %v2878_v29  ;;  %v2545_v6 = vmul.f32 %v3397_v9, %v8196_v63  ;;  %v8199_v37 = vld [vmem:[#allocation104_spill] sm:$0xff]  ;;  %v8200_v38 = vld [vmem:[#allocation30_spill] sm:$0xff]  ;;  %v8201_v29 = vld [vmem:[#allocation65_spill] sm:$0xff] }
  0xd0   :  { %v3413_v42 = vpop.eup %3412  ;;  %3432 = vtanh.f32 %v1309_v50  ;;  %v1635_v61 = vmul.f32 %v5323_v7, %v8197_v24  ;;  %v327_v26 = vadd.f32 %v311_v48, %v241_v53  ;;  %v483_v23 = vmul.f32 %v3409_v8, %v8198_v47  ;;  %v8202_v62 = vld [vmem:[#allocation68_spill] sm:$0xff]  ;;  %v8210_v47 = vld [vmem:[#allocation66_spill] sm:$0xff] }
  0xd1   :  { %8195 = vst [vmem:[#allocation114_spill] sm:$0xff] %v5498_v18  ;;  %v3415_v49 = vpop.eup %3414  ;;  %v2389_v5 = vadd.f32 %v2373_v39, %v2303_v41  ;;  %3434 = vtanh.f32 %v1395_v11  ;;  %v2631_v52 = vmul.f32 %v3399_v17, %v8199_v37  ;;  %v569_v40 = vmul.f32 %v3411_v19, %v8200_v38  ;;  %v8204_v11 = vld [vmem:[#allocation105_spill] sm:$0xff]  ;;  %v8205_v41 = vld [vmem:[#allocation63_spill] sm:$0xff] }
  0xd2   :  { %v3417_v31 = vpop.eup %3416  ;;  %3436 = vtanh.f32 %v1481_v2  ;;  %v1721_v18 = vmul.f32 %v5323_v7, %v8201_v29  ;;  %v413_v63 = vadd.f32 %v397_v10, %v327_v26  ;;  %v1807_v39 = vmul.f32 %v5323_v7, %v8202_v62  ;;  %v8206_v38 = vld [vmem:[#allocation37_spill] sm:$0xff]  ;;  %v8208_v26 = vld [vmem:[#allocation106_spill] sm:$0xff] }
  0xd3   :  { %v3419_v9 = vpop.eup %3418  ;;  %v2475_v50 = vadd.f32 %v2459_v28, %v2389_v5  ;;  %3438 = vtanh.f32 %v1567_v20  ;;  %v5511_v48 = vmul.f32 %v5282_v51, %v2877_v35  ;;  %v2717_v8 = vmul.f32 %v3413_v42, %v8204_v11  ;;  %v8207_v28 = vld [vmem:[#allocation74_spill] sm:$0xff]  ;;  %v8209_v35 = vld [vmem:[#allocation40_spill] sm:$0xff]  ;;  %v8211_v11 = vld [vmem:[#allocation77_spill] sm:$0xff] }
  0xd4   :  { %v1653_v17 = vadd.f32 %v8205_v41, %v1635_v61  ;;  %v1893_v2 = vmul.f32 %v5323_v7, %v8143_v56  ;;  %v3421_v19 = vpop.eup %3420  ;;  %v499_v37 = vadd.f32 %v483_v23, %v413_v63  ;;  %v655_v5 = vmul.f32 %v3417_v31, %v8206_v38  ;;  %v8213_v23 = vld [vmem:[#allocation80_spill] sm:$0xff] }
  0xd5   :  { %8203 = vst [vmem:[#allocation115_spill] sm:$0xff] %v5511_v48  ;;  %v2561_v53 = vadd.f32 %v2545_v6, %v2475_v50  ;;  %v1979_v10 = vmul.f32 %v5323_v7, %v8207_v28  ;;  %v3423_v20 = vpop.eup %3422  ;;  %v2803_v62 = vmul.f32 %v3415_v49, %v8208_v26  ;;  %v741_v48 = vmul.f32 %v3419_v9, %v8209_v35  ;;  %v8212_v6 = vld [vmem:[#allocation69_spill] sm:$0xff]  ;;  %v8214_v28 = vld [vmem:[#allocation43_spill] sm:$0xff] }
  0xd6   :  { %v1739_v42 = vadd.f32 %v8210_v47, %v1721_v18  ;;  %v2065_v61 = vmul.f32 %v5323_v7, %v8211_v11  ;;  %v3425_v41 = vpop.eup %3424  ;;  %v585_v29 = vadd.f32 %v569_v40, %v499_v37  ;;  %v1825_v63 = vadd.f32 %v8212_v6, %v1807_v39  ;;  %v8215_v40 = vld [vmem:[#allocation45_spill] sm:$0xff] }
  0xd7   :  { %v2647_v56 = vadd.f32 %v2631_v52, %v2561_v53  ;;  %v2151_v31 = vmul.f32 %v5323_v7, %v8213_v23  ;;  %v3427_v50 = vpop.eup %3426  ;;  %v827_v38 = vmul.f32 %v3421_v19, %v8214_v28  ;;  %3440 = vtanh.f32 %v1653_v17 }
  0xd8   :  { %v1911_v49 = vadd.f32 %v8147_v36, %v1893_v2  ;;  %v2237_v18 = vmul.f32 %v5323_v7, %v5064_v34  ;;  %v3429_v9 = vpop.eup %3428  ;;  %v671_v35 = vadd.f32 %v655_v5, %v585_v29  ;;  %v1997_v52 = vadd.f32 %v8148_v44, %v1979_v10  ;;  %v8216_v29 = vld [vmem:[#allocation49_spill] sm:$0xff] }
  0xd9   :  { %v2733_v26 = vadd.f32 %v2717_v8, %v2647_v56  ;;  %v2323_v37 = vmul.f32 %v5323_v7, %v5086_v58  ;;  %v913_v39 = vmul.f32 %v3423_v20, %v8215_v40  ;;  %3442 = vtanh.f32 %v1739_v42 }
  0xda   :  { %v2083_v53 = vadd.f32 %v8149_v43, %v2065_v61  ;;  %v2409_v17 = vmul.f32 %v5323_v7, %v8153_v45  ;;  %v757_v28 = vadd.f32 %v741_v48, %v671_v35  ;;  %3444 = vtanh.f32 %v1825_v63  ;;  %v8219_v63 = vld [vmem:[#allocation90_spill] sm:$0xff] }
  0xdb   :  { %v3431_v2 = vpop.eup %3430  ;;  %v2819_v19 = vadd.f32 %v2803_v62, %v2733_v26  ;;  %v2169_v56 = vadd.f32 %v8150_v30, %v2151_v31  ;;  %v999_v8 = vmul.f32 %v3425_v41, %v8216_v29  ;;  %3446 = vtanh.f32 %v1911_v49  ;;  %v8217_v62 = vld [vmem:[#allocation52_spill] sm:$0xff]  ;;  %v8218_v26 = vld [vmem:[#allocation54_spill] sm:$0xff] }
  0xdc   :  { %v2255_v5 = vadd.f32 %v5072_v4, %v2237_v18  ;;  %v2495_v10 = vmul.f32 %v5323_v7, %v5129_v27  ;;  %v843_v61 = vadd.f32 %v827_v38, %v757_v28  ;;  %3448 = vtanh.f32 %v1997_v52  ;;  %v8220_v49 = vld [vmem:[#allocation108_spill] sm:$0xff]  ;;  %v8221_v27 = vld [vmem:[#allocation95_spill] sm:$0xff]  ;;  %v8222_v28 = vld [vmem:[#allocation58_spill] sm:$0xff] }
  0xdd   :  { %v3433_v20 = vpop.eup %3432  ;;  %v2904_v42 = vmul.f32 0.5, %v2819_v19  ;;  %v2341_v40 = vadd.f32 %v5095_v25, %v2323_v37  ;;  %v1085_v48 = vmul.f32 %v3427_v50, %v8217_v62  ;;  %v1171_v35 = vmul.f32 %v3429_v9, %v8218_v26  ;;  %v8223_v37 = vld [vmem:[#allocation59_spill] sm:$0xff]  ;;  %v8224_v50 = vld [vmem:[#allocation93_spill] sm:$0xff] }
  0xde   :  { %v3435_v45 = vpop.eup %3434  ;;  %3450 = vtanh.f32 %v2083_v53  ;;  %v2427_v41 = vadd.f32 %v8219_v63, %v2409_v17  ;;  %v929_v4 = vadd.f32 %v913_v39, %v843_v61  ;;  %v2581_v29 = vmul.f32 %v5323_v7, %v8221_v27  ;;  %v8225_v17 = vld [vmem:[#allocation64_spill] sm:$0xff] }
  0xdf   :  { %v3437_v31 = vpop.eup %3436  ;;  %v2926_v18 = vmul.f32 %v8220_v49, %v2904_v42  ;;  %3452 = vtanh.f32 %v2169_v56  ;;  %v1257_v52 = vmul.f32 %v3431_v2, %v8222_v28  ;;  %v1343_v25 = vmul.f32 %v3433_v20, %v8223_v37  ;;  %v8226_v42 = vld [vmem:[#allocation67_spill] sm:$0xff]  ;;  %v8227_v56 = vld [vmem:[#allocation98_spill] sm:$0xff] }
  0xe0   :  { %v3439_v38 = vpop.eup %3438  ;;  %3454 = vtanh.f32 %v2255_v5  ;;  %v2513_v62 = vadd.f32 %v8224_v50, %v2495_v10  ;;  %v1015_v53 = vadd.f32 %v999_v8, %v929_v4  ;;  %v1429_v63 = vmul.f32 %v3435_v45, %v8225_v17  ;;  %v8228_v49 = vld [vmem:[#allocation10_spill] sm:$0xff]  ;;  %v8229_v10 = vld [vmem:[#allocation96_spill] sm:$0xff]  ;;  %v8230_v4 = vld [vmem:[#allocation11_spill] sm:$0xff] }
  0xe1   :  { %v2942_v9 = vsub.f32 %v5417_v54, %v2926_v18  ;;  %3456 = vtanh.f32 %v2341_v40  ;;  %v1515_v39 = vmul.f32 %v3437_v31, %v8226_v42  ;;  %v2667_v61 = vmul.f32 %v5323_v7, %v8227_v56  ;;  %v8231_v45 = vld [vmem:[#allocation12_spill] sm:$0xff]  ;;  %v8232_v8 = vld [vmem:[#allocation14_spill] sm:$0xff] }
  0xe2   :  { %3458 = vtanh.f32 %v2427_v41  ;;  %v88_v2 = vmul.f32 %v5443_v1, %v8228_v49  ;;  %v1101_v20 = vadd.f32 %v1085_v48, %v1015_v53  ;;  %v1601_v5 = vmul.f32 %v3439_v38, %v8164_v14 }
  0xe3   :  { %v2958_v27 = vmul.f32 %v2942_v9, %v2819_v19  ;;  %v2599_v37 = vadd.f32 %v8229_v10, %v2581_v29  ;;  %3460 = vtanh.f32 %v2513_v62  ;;  %v174_v40 = vmul.f32 %v5443_v1, %v8231_v45  ;;  %v8233_v62 = vld [vmem:[#allocation101_spill] sm:$0xff] }
  0xe4   :  { %v106_v54 = vadd.f32 %v8230_v4, %v88_v2  ;;  %v260_v41 = vmul.f32 %v5443_v1, %v8232_v8  ;;  %v3441_v31 = vpop.eup %3440  ;;  %v1187_v18 = vadd.f32 %v1171_v35, %v1101_v20  ;;  %v346_v19 = vmul.f32 %v5443_v1, %v8163_v16  ;;  %v8234_v9 = vld [vmem:[#allocation13_spill] sm:$0xff]  ;;  %v8235_v2 = vld [vmem:[#allocation15_spill] sm:$0xff]  ;;  %v8236_v35 = vld [vmem:[#allocation18_spill] sm:$0xff]  ;;  %v2858_v4 = vpop.permute.xlu1 %2857 }
  0xe5   :  { %2975 = vadd.xlane.f32.xlu1 %v2958_v27  ;;  %v432_v48 = vmul.f32 %v5443_v1, %v8166_v3  ;;  %v518_v29 = vmul.f32 %v5443_v1, %v8169_v0  ;;  %v2753_v38 = vmul.f32 %v5323_v7, %v8233_v62  ;;  %v192_v53 = vadd.f32 %v8234_v9, %v174_v40  ;;  %v8237_v3 = vld [vmem:[#allocation73_spill] sm:$0xff]  ;;  %v8238_v7 = vld [vmem:[#allocation27_spill] sm:$0xff] }
  0xe6   :  { %3462 = vtanh.f32 %v106_v54  ;;  %v278_v10 = vadd.f32 %v8235_v2, %v260_v41  ;;  %v3443_v56 = vpop.eup %3442  ;;  %v1273_v27 = vadd.f32 %v1257_v52, %v1187_v18  ;;  %v364_v20 = vadd.f32 %v8236_v35, %v346_v19  ;;  %v5588_v19 = vpop.permute.xlu0 %2855 }
  0xe7   :  { %3464 = vtanh.f32 %v2599_v37  ;;  %v450_v16 = vadd.f32 %v8170_v15, %v432_v48  ;;  %v3445_v8 = vpop.eup %3444  ;;  %v1687_v14 = vmul.f32 %v3441_v31, %v8237_v3  ;;  %v536_v0 = vadd.f32 %v4594_v59, %v518_v29  ;;  %8239 = vst [vmem:[#allocation108_spill] sm:$0xff] %v5588_v19  ;;  %v8240_v48 = vld [vmem:[#allocation33_spill] sm:$0xff]  ;;  %v8254_v15 = vld [vmem:[#allocation42_spill] sm:$0xff] }
  0xe8   :  { %3466 = vtanh.f32 %v192_v53  ;;  %v604_v54 = vmul.f32 %v5443_v1, %v8238_v7  ;;  %v3447_v40 = vpop.eup %3446  ;;  %v1359_v62 = vadd.f32 %v1343_v25, %v1273_v27  ;;  %v2685_v41 = vadd.f32 %v5187_v13, %v2667_v61  ;;  %v8241_v25 = vld [vmem:[#allocation102_spill] sm:$0xff]  ;;  %v4276_v61 = vld [vmem:[%s7561_s0 + $0x48] sm:$0xff] }
  0xe9   :  { %3468 = vtanh.f32 %v278_v10  ;;  %v690_v52 = vmul.f32 %v5443_v1, %v4649_v33  ;;  %v3449_v37 = vpop.eup %3448  ;;  %v1773_v18 = vmul.f32 %v3443_v56, %v8171_v12  ;;  %v776_v29 = vmul.f32 %v5443_v1, %v8240_v48  ;;  %v8242_v56 = vld [vmem:[#allocation32_spill] sm:$0xff] }
  0xea   :  { %3470 = vtanh.f32 %v364_v20  ;;  %v622_v31 = vadd.f32 %v4629_v21, %v604_v54  ;;  %v1445_v3 = vadd.f32 %v1429_v63, %v1359_v62  ;;  %v2771_v27 = vadd.f32 %v8241_v25, %v2753_v38  ;;  %v8243_v20 = vld [vmem:[#allocation35_spill] sm:$0xff]  ;;  %v8244_v21 = vld [vmem:[#allocation38_spill] sm:$0xff]  ;;  %v8247_v25 = vld [vmem:[#allocation44_spill] sm:$0xff] }
  0xeb   :  { %v3451_v53 = vpop.eup %3450  ;;  %v2880_v10 = vsub.f32 %v2858_v4, %v4276_v61  ;;  %3472 = vtanh.f32 %v450_v16  ;;  %v708_v12 = vadd.f32 %v8242_v56, %v690_v52  ;;  %v862_v54 = vmul.f32 %v5443_v1, %v8243_v20  ;;  %v5605_v62 = vld [vmem:[%s7561_s0 + $0x40] sm:$0xff]  ;;  %v8246_v38 = vld [vmem:[#allocation79_spill] sm:$0xff]  ;;  %v8249_v20 = vld [vmem:[#allocation36_spill] sm:$0xff] }
  0xec   :  { %v3453_v13 = vpop.eup %3452  ;;  %3474 = vtanh.f32 %v536_v0  ;;  %v948_v48 = vmul.f32 %v5443_v1, %v8244_v21  ;;  %v1531_v63 = vadd.f32 %v1515_v39, %v1445_v3  ;;  %8245 = vst [vmem:[#allocation116_spill] sm:$0xff] %v5605_v62  ;;  %v1034_v0 = vmul.f32 %v5443_v1, %v4746_v22  ;;  %v8250_v62 = vld [vmem:[#allocation82_spill] sm:$0xff]  ;;  %v8251_v22 = vld [vmem:[#allocation39_spill] sm:$0xff] }
  0xed   :  { %v3455_v59 = vpop.eup %3454  ;;  %3476 = vtanh.f32 %v2685_v41  ;;  %v1859_v52 = vmul.f32 %v3445_v8, %v8246_v38  ;;  %v794_v61 = vadd.f32 %v4685_v60, %v776_v29  ;;  %v1120_v3 = vmul.f32 %v5443_v1, %v8247_v25  ;;  %v8252_v8 = vld [vmem:[#allocation47_spill] sm:$0xff]  ;;  %v8253_v60 = vld [vmem:[#allocation85_spill] sm:$0xff] }
  0xee   :  { %v3457_v4 = vpop.eup %3456  ;;  %3478 = vtanh.f32 %v622_v31  ;;  %v1617_v41 = vadd.f32 %v1601_v5, %v1531_v63  ;;  %v5616_v21 = vmul.f32 %v5282_v51, %v2880_v10  ;;  %v880_v16 = vadd.f32 %v8249_v20, %v862_v54  ;;  %v8256_v63 = vld [vmem:[#allocation88_spill] sm:$0xff]  ;;  %v8257_v54 = vld [vmem:[#allocation46_spill] sm:$0xff] }
  0xef   :  { %v3459_v39 = vpop.eup %3458  ;;  %3480 = vtanh.f32 %v2771_v27  ;;  %v1945_v19 = vmul.f32 %v3447_v40, %v8250_v62  ;;  %v966_v56 = vadd.f32 %v8251_v22, %v948_v48  ;;  %v1206_v31 = vmul.f32 %v5443_v1, %v8252_v8  ;;  %v8255_v27 = vld [vmem:[#allocation50_spill] sm:$0xff]  ;;  %v8259_v8 = vld [vmem:[#allocation91_spill] sm:$0xff] }
  0xf0   :  { %8248 = vst [vmem:[#allocation117_spill] sm:$0xff] %v5616_v21  ;;  %3482 = vtanh.f32 %v708_v12  ;;  %v3461_v29 = vpop.eup %3460  ;;  %v1703_v38 = vadd.f32 %v1687_v14, %v1617_v41  ;;  %v2031_v25 = vmul.f32 %v3449_v37, %v8253_v60  ;;  %v1052_v5 = vadd.f32 %v8254_v15, %v1034_v0  ;;  %v8258_v12 = vld [vmem:[#allocation53_spill] sm:$0xff]  ;;  %v8260_v14 = vld [vmem:[#allocation56_spill] sm:$0xff] }
  0xf1   :  { %v1292_v10 = vmul.f32 %v5443_v1, %v8255_v27  ;;  %v2117_v21 = vmul.f32 %v3451_v53, %v8256_v63  ;;  %3484 = vtanh.f32 %v794_v61  ;;  %v1138_v40 = vadd.f32 %v8257_v54, %v1120_v3  ;;  %v8261_v15 = vld [vmem:[#allocation48_spill] sm:$0xff]  ;;  %v8262_v54 = vld [vmem:[#allocation94_spill] sm:$0xff] }
  0xf2   :  { %v1378_v48 = vmul.f32 %v5443_v1, %v8258_v12  ;;  %v1789_v62 = vadd.f32 %v1773_v18, %v1703_v38  ;;  %v2203_v22 = vmul.f32 %v3453_v13, %v8259_v8  ;;  %3486 = vtanh.f32 %v880_v16  ;;  %v8263_v18 = vld [vmem:[#allocation51_spill] sm:$0xff]  ;;  %v8264_v38 = vld [vmem:[#allocation16_spill] sm:$0xff] }
  0xf3   :  { %v3463_v51 = vpop.eup %3462  ;;  %v1464_v37 = vmul.f32 %v5443_v1, %v8260_v14  ;;  %3488 = vtanh.f32 %v966_v56  ;;  %v1224_v53 = vadd.f32 %v8261_v15, %v1206_v31  ;;  %v1550_v61 = vmul.f32 %v5443_v1, %v8185_v46  ;;  %v8265_v14 = vld [vmem:[#allocation22_spill] sm:$0xff]  ;;  %v8267_v15 = vld [vmem:[#allocation25_spill] sm:$0xff] }
  0xf4   :  { %v3465_v0 = vpop.eup %3464  ;;  %v140_v41 = vmul.f32 %v3463_v51, %v8184_v57  ;;  %v1875_v63 = vadd.f32 %v1859_v52, %v1789_v62  ;;  %v2289_v12 = vmul.f32 %v3455_v59, %v8262_v54  ;;  %3490 = vtanh.f32 %v1052_v5  ;;  %v8266_v51 = vld [vmem:[#allocation55_spill] sm:$0xff]  ;;  %v8269_v54 = vld [vmem:[#allocation97_spill] sm:$0xff] }
  0xf5   :  { %v3467_v3 = vpop.eup %3466  ;;  %v1310_v13 = vadd.f32 %v8263_v18, %v1292_v10  ;;  %3492 = vtanh.f32 %v1138_v40  ;;  %v1396_v56 = vadd.f32 %v8266_v51, %v1378_v48  ;;  %v1482_v46 = vadd.f32 %v8133_v32, %v1464_v37  ;;  %v8268_v10 = vld [vmem:[#allocation61_spill] sm:$0xff]  ;;  %v8271_v37 = vld [vmem:[#allocation100_spill] sm:$0xff] }
  0xf6   :  { %v3469_v16 = vpop.eup %3468  ;;  %v156_v8 = vadd.f32 %v140_v41, %v8264_v38  ;;  %v226_v27 = vmul.f32 %v3467_v3, %v8265_v14  ;;  %v1961_v31 = vadd.f32 %v1945_v19, %v1875_v63  ;;  %v1636_v59 = vmul.f32 %v5443_v1, %v8197_v24  ;;  %v8270_v19 = vld [vmem:[#allocation65_spill] sm:$0xff] }
  0xf7   :  { %v3471_v57 = vpop.eup %3470  ;;  %v312_v60 = vmul.f32 %v3469_v16, %v8267_v15  ;;  %3494 = vtanh.f32 %v1224_v53  ;;  %v1568_v41 = vadd.f32 %v8268_v10, %v1550_v61  ;;  %v2375_v48 = vmul.f32 %v3457_v4, %v8269_v54  ;;  %v8272_v15 = vld [vmem:[#allocation29_spill] sm:$0xff]  ;;  %v8274_v61 = vld [vmem:[#allocation68_spill] sm:$0xff] }
  0xf8   :  { %v3473_v62 = vpop.eup %3472  ;;  %v242_v52 = vadd.f32 %v226_v27, %v156_v8  ;;  %v398_v5 = vmul.f32 %v3471_v57, %v8193_v55  ;;  %v2047_v40 = vadd.f32 %v2031_v25, %v1961_v31  ;;  %3496 = vtanh.f32 %v1310_v13  ;;  %v8273_v27 = vld [vmem:[#allocation63_spill] sm:$0xff]  ;;  %v8275_v31 = vld [vmem:[#allocation30_spill] sm:$0xff] }
  0xf9   :  { %v3475_v3 = vpop.eup %3474  ;;  %v1722_v63 = vmul.f32 %v5443_v1, %v8270_v19  ;;  %v2461_v32 = vmul.f32 %v3459_v39, %v8271_v37  ;;  %v484_v24 = vmul.f32 %v3473_v62, %v8272_v15  ;;  %3498 = vtanh.f32 %v1396_v56  ;;  %v8276_v19 = vld [vmem:[#allocation71_spill] sm:$0xff]  ;;  %v8278_v37 = vld [vmem:[#allocation104_spill] sm:$0xff] }
  0xfa   :  { %v3477_v16 = vpop.eup %3476  ;;  %v328_v51 = vadd.f32 %v312_v60, %v242_v52  ;;  %v2133_v57 = vadd.f32 %v2117_v21, %v2047_v40  ;;  %3500 = vtanh.f32 %v1482_v46  ;;  %v1654_v53 = vadd.f32 %v8273_v27, %v1636_v59  ;;  %v8277_v62 = vld [vmem:[#allocation103_spill] sm:$0xff]  ;;  %v8279_v59 = vld [vmem:[#allocation105_spill] sm:$0xff] }
  0xfb   :  { %v3479_v8 = vpop.eup %3478  ;;  %v1808_v25 = vmul.f32 %v5443_v1, %v8274_v61  ;;  %v570_v54 = vmul.f32 %v3475_v3, %v8275_v31  ;;  %3502 = vtanh.f32 %v1568_v41  ;;  %v1894_v39 = vmul.f32 %v5443_v1, %v8276_v19  ;;  %v8280_v61 = vld [vmem:[#allocation37_spill] sm:$0xff] }
  0xfc   :  { %v3481_v4 = vpop.eup %3480  ;;  %v414_v13 = vadd.f32 %v398_v5, %v328_v51  ;;  %v2219_v52 = vadd.f32 %v2203_v22, %v2133_v57  ;;  %v2547_v56 = vmul.f32 %v3461_v29, %v8277_v62  ;;  %v2633_v21 = vmul.f32 %v3465_v0, %v8278_v37  ;;  %v8281_v51 = vld [vmem:[#allocation74_spill] sm:$0xff]  ;;  %v8282_v57 = vld [vmem:[#allocation40_spill] sm:$0xff] }
  0xfd   :  { %v3483_v60 = vpop.eup %3482  ;;  %v1740_v46 = vadd.f32 %v8210_v47, %v1722_v63  ;;  %v2719_v40 = vmul.f32 %v3477_v16, %v8279_v59  ;;  %v656_v10 = vmul.f32 %v3479_v8, %v8280_v61  ;;  %v1980_v5 = vmul.f32 %v5443_v1, %v8281_v51  ;;  %v8283_v59 = vld [vmem:[#allocation106_spill] sm:$0xff] }
  0xfe   :  { %v500_v27 = vadd.f32 %v484_v24, %v414_v13  ;;  %v3485_v41 = vpop.eup %3484  ;;  %v2305_v3 = vadd.f32 %v2289_v12, %v2219_v52  ;;  %3504 = vtanh.f32 %v1654_v53  ;;  %v1826_v19 = vadd.f32 %v8212_v6, %v1808_v25  ;;  %v8284_v52 = vld [vmem:[#allocation43_spill] sm:$0xff] }
  0xff   :  { %v2066_v22 = vmul.f32 %v5443_v1, %v8211_v11  ;;  %v3487_v29 = vpop.eup %3486  ;;  %v742_v63 = vmul.f32 %v3483_v60, %v8282_v57  ;;  %v1912_v16 = vadd.f32 %v8147_v36, %v1894_v39  ;;  %v2152_v24 = vmul.f32 %v5443_v1, %v8213_v23  ;;  %v8288_v36 = vld [vmem:[#allocation84_spill] sm:$0xff] }
 0x100   :  { %v586_v0 = vadd.f32 %v570_v54, %v500_v27  ;;  %v3489_v8 = vpop.eup %3488  ;;  %v2391_v13 = vadd.f32 %v2375_v48, %v2305_v3  ;;  %v2805_v37 = vmul.f32 %v3481_v4, %v8283_v59  ;;  %3506 = vtanh.f32 %v1740_v46  ;;  %v8285_v3 = vld [vmem:[#allocation89_spill] sm:$0xff]  ;;  %v8289_v23 = vld [vmem:[#allocation92_spill] sm:$0xff] }
 0x101   :  { %v2238_v12 = vmul.f32 %v5443_v1, %v5064_v34  ;;  %v3491_v53 = vpop.eup %3490  ;;  %v828_v62 = vmul.f32 %v3485_v41, %v8284_v52  ;;  %v1998_v54 = vadd.f32 %v8148_v44, %v1980_v5  ;;  %v2324_v27 = vmul.f32 %v5443_v1, %v5086_v58  ;;  %v8286_v59 = vld [vmem:[#allocation45_spill] sm:$0xff] }
 0x102   :  { %v672_v25 = vadd.f32 %v656_v10, %v586_v0  ;;  %v3493_v39 = vpop.eup %3492  ;;  %v2477_v60 = vadd.f32 %v2461_v32, %v2391_v13  ;;  %3508 = vtanh.f32 %v1826_v19  ;;  %v2084_v48 = vadd.f32 %v8149_v43, %v2066_v22  ;;  %v8287_v5 = vld [vmem:[#allocation49_spill] sm:$0xff]  ;;  %v8290_v13 = vld [vmem:[#allocation52_spill] sm:$0xff] }
 0x103   :  { %v2410_v4 = vmul.f32 %v5443_v1, %v8285_v3  ;;  %v914_v34 = vmul.f32 %v3487_v29, %v8286_v59  ;;  %3510 = vtanh.f32 %v1912_v16  ;;  %v2170_v10 = vadd.f32 %v8150_v30, %v2152_v24 }
 0x104   :  { %v758_v46 = vadd.f32 %v742_v63, %v672_v25  ;;  %v3495_v41 = vpop.eup %3494  ;;  %v2563_v0 = vadd.f32 %v2547_v56, %v2477_v60  ;;  %v1000_v44 = vmul.f32 %v3489_v8, %v8287_v5  ;;  %v2256_v58 = vadd.f32 %v8288_v36, %v2238_v12  ;;  %v8291_v63 = vld [vmem:[#allocation87_spill] sm:$0xff]  ;;  %v8292_v56 = vld [vmem:[#allocation90_spill] sm:$0xff] }
 0x105   :  { %v2496_v32 = vmul.f32 %v5443_v1, %v8289_v23  ;;  %v3497_v19 = vpop.eup %3496  ;;  %v1086_v43 = vmul.f32 %v3491_v53, %v8290_v13  ;;  %3512 = vtanh.f32 %v1998_v54  ;;  %v2342_v25 = vadd.f32 %v8291_v63, %v2324_v27  ;;  %v8293_v53 = vld [vmem:[#allocation59_spill] sm:$0xff]  ;;  %v8294_v27 = vld [vmem:[#allocation110_spill] sm:$0xff] }
 0x106   :  { %v844_v22 = vadd.f32 %v828_v62, %v758_v46  ;;  %v3499_v29 = vpop.eup %3498  ;;  %v2649_v16 = vadd.f32 %v2633_v21, %v2563_v0  ;;  %v1172_v24 = vmul.f32 %v3493_v39, %v8218_v26  ;;  %3514 = vtanh.f32 %v2084_v48 }
 0x107   :  { %v2428_v60 = vadd.f32 %v8292_v56, %v2410_v4  ;;  %v3501_v8 = vpop.eup %3500  ;;  %v1258_v12 = vmul.f32 %v3495_v41, %v8222_v28  ;;  %3516 = vtanh.f32 %v2170_v10  ;;  %v2514_v23 = vadd.f32 %v8224_v50, %v2496_v32  ;;  %v8295_v10 = vld [vmem:[#allocation11_spill] sm:$0xff] }
 0x108   :  { %v930_v3 = vadd.f32 %v914_v34, %v844_v22  ;;  %v3503_v62 = vpop.eup %3502  ;;  %v2735_v46 = vadd.f32 %v2719_v40, %v2649_v16  ;;  %v1344_v54 = vmul.f32 %v3497_v19, %v8293_v53  ;;  %3518 = vtanh.f32 %v2256_v58  ;;  %v8296_v19 = vld [vmem:[#allocation70_spill] sm:$0xff] }
 0x109   :  { %v89_v21 = vmul.f32 %v8294_v27, %v8228_v49  ;;  %v1430_v39 = vmul.f32 %v3499_v29, %v8225_v17  ;;  %3520 = vtanh.f32 %v2342_v25  ;;  %v175_v34 = vmul.f32 %v8294_v27, %v8231_v45  ;;  %v8298_v29 = vld [vmem:[#allocation14_spill] sm:$0xff]  ;;  %v8309_v45 = vld [vmem:[#allocation73_spill] sm:$0xff] }
 0x10a   :  { %v1016_v0 = vadd.f32 %v1000_v44, %v930_v3  ;;  %v2821_v48 = vadd.f32 %v2805_v37, %v2735_v46  ;;  %v1516_v4 = vmul.f32 %v3501_v8, %v8226_v42  ;;  %3522 = vtanh.f32 %v2428_v60  ;;  %v8297_v3 = vld [vmem:[#allocation95_spill] sm:$0xff]  ;;  %v8299_v60 = vld [vmem:[#allocation98_spill] sm:$0xff] }
 0x10b   :  { %v107_v41 = vadd.f32 %v8295_v10, %v89_v21  ;;  %v3505_v40 = vpop.eup %3504  ;;  %v1602_v58 = vmul.f32 %v3503_v62, %v8296_v19  ;;  %3524 = vtanh.f32 %v2514_v23  ;;  %v193_v22 = vadd.f32 %v8234_v9, %v175_v34  ;;  %v5717_v23 = vld [vmem:[%s7562_s1] ss:$0 sm:$0xff]  ;;  %v8302_v34 = vld [vmem:[#allocation19_spill] sm:$0xff] }
 0x10c   :  { %v1102_v32 = vadd.f32 %v1086_v43, %v1016_v0  ;;  %v2906_v44 = vmul.f32 0.5, %v2821_v48  ;;  %v2582_v25 = vmul.f32 %v5443_v1, %v8297_v3  ;;  %v261_v37 = vmul.f32 %v8294_v27, %v8298_v29  ;;  %v8300_v43 = vld [vmem:[#allocation17_spill] sm:$0xff]  ;;  %8301 = vst [vmem:[#allocation110_spill] sm:$0xff] %v5717_v23 }
 0x10d   :  { %3526 = vtanh.f32 %v107_v41  ;;  %v3507_v16 = vpop.eup %3506  ;;  %v2668_v46 = vmul.f32 %v5443_v1, %v8299_v60  ;;  %v347_v62 = vmul.f32 %v8294_v27, %v8300_v43  ;;  %v433_v41 = vmul.f32 %v8294_v27, %v8302_v34  ;;  %v8306_v34 = vld [vmem:[#allocation20_spill] sm:$0xff] }
 0x10e   :  { %v1188_v8 = vadd.f32 %v1172_v24, %v1102_v32  ;;  %3528 = vtanh.f32 %v193_v22  ;;  %v2928_v21 = vmul.f32 %v5717_v23, %v2906_v44  ;;  %v279_v0 = vadd.f32 %v8235_v2, %v261_v37  ;;  %v8303_v24 = vld [vmem:[#allocation23_spill] sm:$0xff]  ;;  %v8304_v44 = vld [vmem:[#allocation109_spill] sm:$0xff]  ;;  %v8305_v37 = vld [vmem:[#allocation96_spill] sm:$0xff] }
 0x10f   :  { %v519_v32 = vmul.f32 %v8294_v27, %v8303_v24  ;;  %v3509_v29 = vpop.eup %3508  ;;  %v365_v9 = vadd.f32 %v8236_v35, %v347_v62  ;;  %v605_v43 = vmul.f32 %v8294_v27, %v8238_v7  ;;  %v691_v10 = vmul.f32 %v8294_v27, %v4649_v33  ;;  %v8307_v24 = vld [vmem:[#allocation101_spill] sm:$0xff]  ;;  %v8310_v33 = vld [vmem:[#allocation28_spill] sm:$0xff] }
 0x110   :  { %v1274_v22 = vadd.f32 %v1258_v12, %v1188_v8  ;;  %v3511_v60 = vpop.eup %3510  ;;  %v2944_v23 = vsub.f32 %v8304_v44, %v2928_v21  ;;  %v2600_v2 = vadd.f32 %v8305_v37, %v2582_v25  ;;  %3530 = vtanh.f32 %v279_v0  ;;  %v8308_v8 = vld [vmem:[#allocation24_spill] sm:$0xff]  ;;  %v8311_v25 = vld [vmem:[#allocation99_spill] sm:$0xff] }
 0x111   :  { %v451_v19 = vadd.f32 %v8306_v34, %v433_v41  ;;  %v2754_v12 = vmul.f32 %v5443_v1, %v8307_v24  ;;  %3532 = vtanh.f32 %v365_v9  ;;  %v537_v62 = vadd.f32 %v8308_v8, %v519_v32  ;;  %v8312_v41 = vld [vmem:[#allocation32_spill] sm:$0xff]  ;;  %v8313_v1 = vld [vmem:[#allocation33_spill] sm:$0xff]  ;;  %v8323_v8 = vld [vmem:[#allocation82_spill] sm:$0xff] }
 0x112   :  { %v1360_v42 = vadd.f32 %v1344_v54, %v1274_v22  ;;  %v3513_v35 = vpop.eup %3512  ;;  %v2960_v7 = vmul.f32 %v2944_v23, %v2821_v48  ;;  %v1688_v49 = vmul.f32 %v3505_v40, %v8309_v45  ;;  %v623_v50 = vadd.f32 %v8310_v33, %v605_v43  ;;  %v8314_v48 = vld [vmem:[#allocation35_spill] sm:$0xff]  ;;  %v8328_v34 = vld [vmem:[#allocation42_spill] sm:$0xff] }
 0x113   :  { %3534 = vtanh.f32 %v451_v19  ;;  %v3515_v21 = vpop.eup %3514  ;;  %v2686_v0 = vadd.f32 %v8311_v25, %v2668_v46  ;;  %v709_v54 = vadd.f32 %v8312_v41, %v691_v10  ;;  %v777_v9 = vmul.f32 %v8294_v27, %v8313_v1  ;;  %v8315_v19 = vld [vmem:[#allocation38_spill] sm:$0xff]  ;;  %v8319_v41 = vld [vmem:[#allocation41_spill] sm:$0xff] }
 0x114   :  { %v1446_v44 = vadd.f32 %v1430_v39, %v1360_v42  ;;  %3536 = vtanh.f32 %v537_v62  ;;  %v5740_v22 = vpop.eup %3516  ;;  %2979 = vadd.xlane.f32.xlu0 %v2960_v7  ;;  %v863_v40 = vmul.f32 %v8294_v27, %v8314_v48  ;;  %v949_v43 = vmul.f32 %v8294_v27, %v8315_v19  ;;  %v8316_v39 = vld [vmem:[#allocation76_spill] sm:$0xff]  ;;  %v8317_v10 = vld [vmem:[#allocation102_spill] sm:$0xff] }
 0x115   :  { %3538 = vtanh.f32 %v623_v50  ;;  %v5748_v23 = vpop.eup %3518  ;;  %v1774_v46 = vmul.f32 %v3507_v16, %v8316_v39  ;;  %v2772_v32 = vadd.f32 %v8317_v10, %v2754_v12  ;;  %v8318_v50 = vld [vmem:[#allocation34_spill] sm:$0xff]  ;;  %v1035_v48 = vmul.f32 %v8294_v27, %v8319_v41  ;;  %v8321_v16 = vld [vmem:[#allocation44_spill] sm:$0xff]  ;;  %v8322_v10 = vld [vmem:[#allocation79_spill] sm:$0xff] }
 0x116   :  { %v1532_v42 = vadd.f32 %v1516_v4, %v1446_v44  ;;  %3540 = vtanh.f32 %v2600_v2  ;;  %v5752_v62 = vpop.eup %3520  ;;  %v795_v7 = vadd.f32 %v8318_v50, %v777_v9  ;;  %v881_v1 = vadd.f32 %v8249_v20, %v863_v40  ;;  %v8320_v4 = vld [vmem:[#allocation39_spill] sm:$0xff]  ;;  %v8325_v39 = vld [vmem:[#allocation85_spill] sm:$0xff] }
 0x117   :  { %3542 = vtanh.f32 %v709_v54  ;;  %v5758_v33 = vpop.eup %3522  ;;  %v967_v44 = vadd.f32 %v8320_v4, %v949_v43  ;;  %v1121_v2 = vmul.f32 %v8294_v27, %v8321_v16  ;;  %v1860_v54 = vmul.f32 %v3509_v29, %v8322_v10  ;;  %v8324_v40 = vld [vmem:[#allocation47_spill] sm:$0xff]  ;;  %v8327_v4 = vld [vmem:[#allocation21_spill] sm:$0xff] }
 0x118   :  { %v1618_v19 = vadd.f32 %v1602_v58, %v1532_v42  ;;  %3544 = vtanh.f32 %v2686_v0  ;;  %v5763_v12 = vpop.eup %3524  ;;  %v1946_v9 = vmul.f32 %v3511_v60, %v8323_v8  ;;  %v1207_v20 = vmul.f32 %v8294_v27, %v8324_v40  ;;  %v8326_v0 = vld [vmem:[#allocation50_spill] sm:$0xff]  ;;  %v8329_v10 = vld [vmem:[#allocation53_spill] sm:$0xff] }
 0x119   :  { %3546 = vtanh.f32 %v795_v7  ;;  %v2032_v58 = vmul.f32 %v3513_v35, %v8325_v39  ;;  %v1293_v43 = vmul.f32 %v8294_v27, %v8326_v0  ;;  %v1053_v29 = vadd.f32 %v8328_v34, %v1035_v48  ;;  %v8332_v0 = vld [vmem:[#allocation56_spill] sm:$0xff] }
 0x11a   :  { %v3527_v41 = vpop.eup %3526  ;;  %v1704_v50 = vadd.f32 %v1688_v49, %v1618_v19  ;;  %3548 = vtanh.f32 %v2772_v32  ;;  %v1379_v60 = vmul.f32 %v8294_v27, %v8329_v10  ;;  %v8330_v49 = vld [vmem:[#allocation46_spill] sm:$0xff]  ;;  %v8331_v32 = vld [vmem:[#allocation48_spill] sm:$0xff]  ;;  %v1465_v8 = vmul.f32 %v8294_v27, %v8332_v0 }
 0x11b   :  { %v3529_v42 = vpop.eup %3528  ;;  %v141_v16 = vmul.f32 %v3527_v41, %v8327_v4  ;;  %3550 = vtanh.f32 %v881_v1  ;;  %v1139_v19 = vadd.f32 %v8330_v49, %v1121_v2  ;;  %v1225_v39 = vadd.f32 %v8331_v32, %v1207_v20  ;;  %v8333_v41 = vld [vmem:[#allocation60_spill] sm:$0xff]  ;;  %v8337_v20 = vld [vmem:[#allocation55_spill] sm:$0xff] }
 0x11c   :  { %v1790_v7 = vadd.f32 %v1774_v46, %v1704_v50  ;;  %v227_v40 = vmul.f32 %v3529_v42, %v8265_v14  ;;  %3552 = vtanh.f32 %v967_v44  ;;  %v1551_v1 = vmul.f32 %v8294_v27, %v8333_v41  ;;  %v8334_v34 = vld [vmem:[#allocation88_spill] sm:$0xff]  ;;  %v8335_v50 = vld [vmem:[#allocation62_spill] sm:$0xff] }
 0x11d   :  { %v157_v35 = vadd.f32 %v141_v16, %v8264_v38  ;;  %v3531_v48 = vpop.eup %3530  ;;  %v2118_v10 = vmul.f32 %v3515_v21, %v8334_v34  ;;  %v1311_v46 = vadd.f32 %v8263_v18, %v1293_v43  ;;  %v1637_v44 = vmul.f32 %v8294_v27, %v8335_v50  ;;  %v8336_v16 = vld [vmem:[#allocation25_spill] sm:$0xff] }
 0x11e   :  { %v1876_v4 = vadd.f32 %v1860_v54, %v1790_v7  ;;  %v3533_v2 = vpop.eup %3532  ;;  %v313_v38 = vmul.f32 %v3531_v48, %v8336_v16  ;;  %3554 = vtanh.f32 %v1053_v29  ;;  %v1397_v14 = vadd.f32 %v8337_v20, %v1379_v60  ;;  %v8338_v54 = vld [vmem:[#allocation57_spill] sm:$0xff]  ;;  %v8340_v48 = vld [vmem:[#allocation91_spill] sm:$0xff] }
 0x11f   :  { %v243_v42 = vadd.f32 %v227_v40, %v157_v35  ;;  %v399_v41 = vmul.f32 %v3533_v2, %v8193_v55  ;;  %3556 = vtanh.f32 %v1139_v19  ;;  %v1483_v7 = vadd.f32 %v8338_v54, %v1465_v8  ;;  %v8339_v50 = vld [vmem:[#allocation61_spill] sm:$0xff]  ;;  %v8341_v60 = vld [vmem:[#allocation63_spill] sm:$0xff] }
 0x120   :  { %v3535_v32 = vpop.eup %3534  ;;  %v1962_v0 = vadd.f32 %v1946_v9, %v1876_v4  ;;  %3558 = vtanh.f32 %v1225_v39  ;;  %v1569_v18 = vadd.f32 %v8339_v50, %v1551_v1  ;;  %v2204_v29 = vmul.f32 %v5740_v22, %v8340_v48  ;;  %v8342_v8 = vld [vmem:[#allocation65_spill] sm:$0xff] }
 0x121   :  { %v3537_v21 = vpop.eup %3536  ;;  %v329_v49 = vadd.f32 %v313_v38, %v243_v42  ;;  %v485_v43 = vmul.f32 %v3535_v32, %v8272_v15  ;;  %3560 = vtanh.f32 %v1311_v46  ;;  %v1655_v4 = vadd.f32 %v8341_v60, %v1637_v44  ;;  %v8343_v42 = vld [vmem:[#allocation94_spill] sm:$0xff]  ;;  %v8345_v46 = vld [vmem:[#allocation108_spill] sm:$0xff] }
 0x122   :  { %v3539_v40 = vpop.eup %3538  ;;  %v2048_v35 = vadd.f32 %v2032_v58, %v1962_v0  ;;  %v571_v19 = vmul.f32 %v3537_v21, %v8275_v31  ;;  %3562 = vtanh.f32 %v1397_v14  ;;  %v1723_v38 = vmul.f32 %v8294_v27, %v8342_v8  ;;  %v8344_v58 = vld [vmem:[#allocation68_spill] sm:$0xff] }
 0x123   :  { %v3541_v9 = vpop.eup %3540  ;;  %v415_v2 = vadd.f32 %v399_v41, %v329_v49  ;;  %v2290_v1 = vmul.f32 %v5748_v23, %v8343_v42  ;;  %3564 = vtanh.f32 %v1483_v7  ;;  %v1809_v22 = vmul.f32 %v8294_v27, %v8344_v58  ;;  %v8346_v44 = vld [vmem:[#allocation116_spill] sm:$0xff]  ;;  %v8348_v49 = vld [vmem:[#allocation107_spill] sm:$0xff] }
 0x124   :  { %v3543_v32 = vpop.eup %3542  ;;  %v2134_v39 = vadd.f32 %v2118_v10, %v2048_v35  ;;  %v8347_v60 = vsub.f32 %v8345_v46, %v8346_v44  ;;  %v657_v21 = vmul.f32 %v3539_v40, %v8280_v61  ;;  %3566 = vtanh.f32 %v1569_v18  ;;  %v8350_v35 = vld [vmem:[#allocation97_spill] sm:$0xff]  ;;  %v8351_v7 = vld [vmem:[#allocation71_spill] sm:$0xff] }
 0x125   :  { %v3545_v0 = vpop.eup %3544  ;;  %v501_v14 = vadd.f32 %v485_v43, %v415_v2  ;;  %v2376_v23 = vmul.f32 %v5752_v62, %v8350_v35  ;;  %3568 = vtanh.f32 %v1655_v4  ;;  %v1895_v58 = vmul.f32 %v8294_v27, %v8351_v7  ;;  %v8352_v2 = vld [vmem:[#allocation100_spill] sm:$0xff]  ;;  %v8353_v44 = vld [vmem:[#allocation103_spill] sm:$0xff] }
 0x126   :  { %v5808_v41 = vmul.f32 %v8348_v49, %v8347_v60  ;;  %v3547_v31 = vpop.eup %3546  ;;  %v2220_v10 = vadd.f32 %v2204_v29, %v2134_v39  ;;  %v743_v46 = vmul.f32 %v3543_v32, %v8282_v57  ;;  %v1741_v60 = vadd.f32 %v8210_v47, %v1723_v38  ;;  %v8356_v57 = vld [vmem:[#allocation72_spill] sm:$0xff]  ;;  %v8357_v61 = vld [vmem:[#allocation83_spill] sm:$0xff] }
 0x127   :  { %v3549_v15 = vpop.eup %3548  ;;  %v587_v8 = vadd.f32 %v571_v19, %v501_v14  ;;  %v1981_v43 = vmul.f32 %v8294_v27, %v8281_v51  ;;  %v2462_v29 = vmul.f32 %v5758_v33, %v8352_v2  ;;  %v1827_v62 = vadd.f32 %v8212_v6, %v1809_v22  ;;  %v8354_v14 = vld [vmem:[#allocation80_spill] sm:$0xff]  ;;  %v8358_v51 = vld [vmem:[#allocation75_spill] sm:$0xff] }
 0x128   :  { %8349 = vst [vmem:[#allocation109_spill] sm:$0xff] %v5808_v41  ;;  %v3551_v40 = vpop.eup %3550  ;;  %v2306_v18 = vadd.f32 %v2290_v1, %v2220_v10  ;;  %v2067_v4 = vmul.f32 %v8294_v27, %v8211_v11  ;;  %v2548_v19 = vmul.f32 %v5763_v12, %v8353_v44  ;;  %v829_v38 = vmul.f32 %v3547_v31, %v8284_v52  ;;  %v8355_v1 = vld [vmem:[#allocation104_spill] sm:$0xff]  ;;  %v8359_v31 = vld [vmem:[#allocation105_spill] sm:$0xff] }
 0x129   :  { %v3553_v39 = vpop.eup %3552  ;;  %v673_v32 = vadd.f32 %v657_v21, %v587_v8  ;;  %v2153_v41 = vmul.f32 %v8294_v27, %v8354_v14  ;;  %v2634_v10 = vmul.f32 %v3541_v9, %v8355_v1  ;;  %v1913_v33 = vadd.f32 %v8356_v57, %v1895_v58  ;;  %v8360_v14 = vld [vmem:[#allocation78_spill] sm:$0xff] }
 0x12a   :  { %v2392_v49 = vadd.f32 %v2376_v23, %v2306_v18  ;;  %v2239_v22 = vmul.f32 %v8294_v27, %v8357_v61  ;;  %v915_v11 = vmul.f32 %v3551_v40, %v8286_v59  ;;  %3570 = vtanh.f32 %v1741_v60  ;;  %v4279_v27 = vld [vmem:[%s7561_s0 + $0x28] sm:$0xff] }
 0x12b   :  { %v759_v6 = vadd.f32 %v743_v46, %v673_v32  ;;  %v1999_v12 = vadd.f32 %v8358_v51, %v1981_v43  ;;  %v3555_v8 = vpop.eup %3554  ;;  %v2720_v52 = vmul.f32 %v3545_v0, %v8359_v31  ;;  %3572 = vtanh.f32 %v1827_v62  ;;  %v8361_v46 = vld [vmem:[#allocation86_spill] sm:$0xff] }
 0x12c   :  { %v2478_v21 = vadd.f32 %v2462_v29, %v2392_v49  ;;  %v2085_v23 = vadd.f32 %v8360_v14, %v2067_v4  ;;  %v3557_v18 = vpop.eup %3556  ;;  %v1001_v58 = vmul.f32 %v3553_v39, %v8287_v5  ;;  %v2171_v57 = vadd.f32 %v8150_v30, %v2153_v41  ;;  %v8362_v49 = vld [vmem:[#allocation89_spill] sm:$0xff]  ;;  %v8363_v39 = vld [vmem:[#allocation92_spill] sm:$0xff]  ;;  %v8364_v5 = vld [vmem:[#allocation106_spill] sm:$0xff] }
 0x12d   :  { %v845_v9 = vadd.f32 %v829_v38, %v759_v6  ;;  %v2325_v60 = vmul.f32 %v4279_v27, %v8361_v46  ;;  %v3559_v43 = vpop.eup %3558  ;;  %3574 = vtanh.f32 %v1913_v33  ;;  %v2257_v0 = vadd.f32 %v8288_v36, %v2239_v22 }
 0x12e   :  { %v2564_v40 = vadd.f32 %v2548_v19, %v2478_v21  ;;  %v2411_v29 = vmul.f32 %v4279_v27, %v8362_v49  ;;  %v3561_v62 = vpop.eup %3560  ;;  %v1087_v6 = vmul.f32 %v3555_v8, %v8290_v13  ;;  %3576 = vtanh.f32 %v1999_v12 }
 0x12f   :  { %v931_v4 = vadd.f32 %v915_v11, %v845_v9  ;;  %v2497_v41 = vmul.f32 %v4279_v27, %v8363_v39  ;;  %v3563_v32 = vpop.eup %3562  ;;  %v2806_v59 = vmul.f32 %v3549_v15, %v8364_v5  ;;  %3578 = vtanh.f32 %v2085_v23 }
 0x130   :  { %v2650_v38 = vadd.f32 %v2634_v10, %v2564_v40  ;;  %v2583_v30 = vmul.f32 %v4279_v27, %v8297_v3  ;;  %v3565_v19 = vpop.eup %3564  ;;  %v1173_v22 = vmul.f32 %v3557_v18, %v8218_v26  ;;  %3580 = vtanh.f32 %v2171_v57  ;;  %v8365_v3 = vld [vmem:[#allocation93_spill] sm:$0xff]  ;;  %v8366_v18 = vld [vmem:[#allocation10_spill] sm:$0xff] }
 0x131   :  { %v1017_v33 = vadd.f32 %v1001_v58, %v931_v4  ;;  %v2343_v21 = vadd.f32 %v8291_v63, %v2325_v60  ;;  %v3567_v11 = vpop.eup %3566  ;;  %v1259_v12 = vmul.f32 %v3559_v43, %v8222_v28  ;;  %3582 = vtanh.f32 %v2257_v0  ;;  %v8367_v60 = vld [vmem:[#allocation113_spill] sm:$0xff]  ;;  %v8370_v28 = vld [vmem:[#allocation70_spill] sm:$0xff] }
 0x132   :  { %v2736_v9 = vadd.f32 %v2720_v52, %v2650_v38  ;;  %v2429_v8 = vadd.f32 %v8292_v56, %v2411_v29  ;;  %v3569_v10 = vpop.eup %3568  ;;  %v1345_v15 = vmul.f32 %v3561_v62, %v8293_v53  ;;  %v1431_v23 = vmul.f32 %v3563_v32, %v8225_v17  ;;  %v8368_v52 = vld [vmem:[#allocation12_spill] sm:$0xff]  ;;  %v8369_v38 = vld [vmem:[#allocation67_spill] sm:$0xff] }
 0x133   :  { %v1103_v40 = vadd.f32 %v1087_v6, %v1017_v33  ;;  %v2515_v58 = vadd.f32 %v8365_v3, %v2497_v41  ;;  %v2601_v57 = vadd.f32 %v8305_v37, %v2583_v30  ;;  %v90_v26 = vmul.f32 %v8367_v60, %v8366_v18  ;;  %v8371_v41 = vld [vmem:[#allocation98_spill] sm:$0xff]  ;;  %v8372_v30 = vld [vmem:[#allocation11_spill] sm:$0xff]  ;;  %v8373_v37 = vld [vmem:[#allocation13_spill] sm:$0xff] }
 0x134   :  { %v2822_v4 = vadd.f32 %v2806_v59, %v2736_v9  ;;  %v176_v43 = vmul.f32 %v8367_v60, %v8368_v52  ;;  %v1517_v29 = vmul.f32 %v3565_v19, %v8369_v38  ;;  %v1603_v6 = vmul.f32 %v3567_v11, %v8370_v28  ;;  %v8374_v52 = vld [vmem:[#allocation110_spill] sm:$0xff]  ;;  %v5883_v38 = vpop.permute.xlu1 %2861 }
 0x135   :  { %v1189_v0 = vadd.f32 %v1173_v22, %v1103_v40  ;;  %3584 = vtanh.f32 %v2343_v21  ;;  %v1689_v32 = vmul.f32 %v3569_v10, %v8309_v45  ;;  %v2669_v59 = vmul.f32 %v4279_v27, %v8371_v41  ;;  %v8375_v19 = vld [vmem:[#allocation14_spill] sm:$0xff]  ;;  %v5873_v21 = vld [vmem:[%s7561_s0 + $0x30] sm:$0xff]  ;;  %8380 = vst [vmem:[#allocation108_spill] sm:$0xff] %v5883_v38 }
 0x136   :  { %v2907_v62 = vmul.f32 0.5, %v2822_v4  ;;  %3586 = vtanh.f32 %v2429_v8  ;;  %v108_v9 = vadd.f32 %v8372_v30, %v90_v26  ;;  %v194_v17 = vadd.f32 %v8373_v37, %v176_v43  ;;  %v8376_v8 = vld [vmem:[#allocation17_spill] sm:$0xff] }
 0x137   :  { %v1275_v33 = vadd.f32 %v1259_v12, %v1189_v0  ;;  %3588 = vtanh.f32 %v2515_v58  ;;  %v3571_v18 = vpop.eup %3570  ;;  %v262_v11 = vmul.f32 %v8367_v60, %v8375_v19  ;;  %v348_v12 = vmul.f32 %v5873_v21, %v8376_v8  ;;  %v8377_v58 = vld [vmem:[#allocation19_spill] sm:$0xff]  ;;  %v8381_v8 = vld [vmem:[#allocation18_spill] sm:$0xff] }
 0x138   :  { %v2929_v22 = vmul.f32 %v8374_v52, %v2907_v62  ;;  %3590 = vtanh.f32 %v2601_v57  ;;  %v3573_v10 = vpop.eup %3572  ;;  %v2755_v26 = vmul.f32 %v4279_v27, %v8307_v24  ;;  %v434_v43 = vmul.f32 %v5873_v21, %v8377_v58  ;;  %v8378_v57 = vld [vmem:[#allocation112_spill] sm:$0xff]  ;;  %v8379_v62 = vld [vmem:[#allocation15_spill] sm:$0xff] }
 0x139   :  { %v1361_v40 = vadd.f32 %v1345_v15, %v1275_v33  ;;  %3592 = vtanh.f32 %v108_v9  ;;  %v2687_v60 = vadd.f32 %v8311_v25, %v2669_v59  ;;  %v280_v45 = vadd.f32 %v8379_v62, %v262_v11  ;;  %v8382_v15 = vld [vmem:[#allocation20_spill] sm:$0xff]  ;;  %v8383_v27 = vld [vmem:[#allocation23_spill] sm:$0xff] }
 0x13a   :  { %v2945_v0 = vsub.f32 %v8378_v57, %v2929_v22  ;;  %3594 = vtanh.f32 %v194_v17  ;;  %v3575_v28 = vpop.eup %3574  ;;  %v366_v19 = vadd.f32 %v8381_v8, %v348_v12  ;;  %v452_v33 = vadd.f32 %v8382_v15, %v434_v43  ;;  %v8384_v22 = vld [vmem:[#allocation27_spill] sm:$0xff]  ;;  %v8387_v12 = vld [vmem:[#allocation24_spill] sm:$0xff]  ;;  %v8388_v15 = vld [vmem:[#allocation102_spill] sm:$0xff] }
 0x13b   :  { %v1447_v37 = vadd.f32 %v1431_v23, %v1361_v40  ;;  %v520_v9 = vmul.f32 %v5873_v21, %v8383_v27  ;;  %v3577_v24 = vpop.eup %3576  ;;  %3596 = vtanh.f32 %v280_v45  ;;  %v606_v59 = vmul.f32 %v5873_v21, %v8384_v22  ;;  %v8385_v17 = vld [vmem:[#allocation31_spill] sm:$0xff]  ;;  %v8386_v40 = vld [vmem:[#allocation76_spill] sm:$0xff]  ;;  %v5899_v45 = vld [vmem:[%s7561_s0 + $0x58] sm:$0xff] }
 0x13c   :  { %v2961_v58 = vmul.f32 %v2945_v0, %v2822_v4  ;;  %v692_v11 = vmul.f32 %v5873_v21, %v8385_v17  ;;  %v3579_v57 = vpop.eup %3578  ;;  %v1775_v62 = vmul.f32 %v3571_v18, %v8386_v40  ;;  %3598 = vtanh.f32 %v366_v19  ;;  %8389 = vst [vmem:[#allocation116_spill] sm:$0xff] %v5899_v45  ;;  %v8390_v0 = vld [vmem:[#allocation28_spill] sm:$0xff]  ;;  %v8392_v40 = vld [vmem:[#allocation33_spill] sm:$0xff]  ;;  %v8395_v22 = vld [vmem:[#allocation38_spill] sm:$0xff] }
 0x13d   :  { %v1533_v23 = vadd.f32 %v1517_v29, %v1447_v37  ;;  %v538_v8 = vadd.f32 %v8387_v12, %v520_v9  ;;  %v3581_v43 = vpop.eup %3580  ;;  %v2773_v27 = vadd.f32 %v8388_v15, %v2755_v26  ;;  %3600 = vtanh.f32 %v452_v33  ;;  %v8391_v19 = vld [vmem:[#allocation32_spill] sm:$0xff]  ;;  %v8393_v26 = vld [vmem:[#allocation79_spill] sm:$0xff] }
 0x13e   :  { %2981 = vadd.xlane.f32.xlu1 %v2961_v58  ;;  %v624_v37 = vadd.f32 %v8390_v0, %v606_v59  ;;  %v3583_v29 = vpop.eup %3582  ;;  %v710_v9 = vadd.f32 %v8391_v19, %v692_v11  ;;  %v778_v58 = vmul.f32 %v5873_v21, %v8392_v40  ;;  %v1861_v12 = vmul.f32 %v3573_v10, %v8393_v26  ;;  %v8394_v15 = vld [vmem:[#allocation35_spill] sm:$0xff]  ;;  %v8396_v59 = vld [vmem:[#allocation34_spill] sm:$0xff]  ;;  %v8399_v19 = vld [vmem:[#allocation85_spill] sm:$0xff] }
 0x13f   :  { %v1619_v18 = vadd.f32 %v1603_v6, %v1533_v23  ;;  %3602 = vtanh.f32 %v538_v8  ;;  %v864_v17 = vmul.f32 %v5873_v21, %v8394_v15  ;;  %v950_v4 = vmul.f32 %v5873_v21, %v8395_v22  ;;  %v8397_v6 = vld [vmem:[#allocation41_spill] sm:$0xff]  ;;  %v8398_v23 = vld [vmem:[#allocation82_spill] sm:$0xff]  ;;  %v8400_v10 = vld [vmem:[#allocation44_spill] sm:$0xff] }
 0x140   :  { %3604 = vtanh.f32 %v2687_v60  ;;  %v796_v45 = vadd.f32 %v8396_v59, %v778_v58  ;;  %v1036_v8 = vmul.f32 %v5873_v21, %v8397_v6  ;;  %v1947_v38 = vmul.f32 %v3575_v28, %v8398_v23  ;;  %v8401_v22 = vld [vmem:[#allocation36_spill] sm:$0xff]  ;;  %v8403_v28 = vld [vmem:[#allocation39_spill] sm:$0xff]  ;;  %v8404_v23 = vld [vmem:[#allocation42_spill] sm:$0xff] }
 0x141   :  { %v1705_v33 = vadd.f32 %v1689_v32, %v1619_v18  ;;  %3606 = vtanh.f32 %v624_v37  ;;  %v2033_v0 = vmul.f32 %v3577_v24, %v8399_v19  ;;  %v1122_v60 = vmul.f32 %v5873_v21, %v8400_v10  ;;  %v8402_v37 = vld [vmem:[#allocation47_spill] sm:$0xff]  ;;  %v8405_v40 = vld [vmem:[#allocation50_spill] sm:$0xff] }
 0x142   :  { %v3585_v11 = vpop.eup %3584  ;;  %3608 = vtanh.f32 %v2773_v27  ;;  %v882_v32 = vadd.f32 %v8401_v22, %v864_v17  ;;  %v1208_v18 = vmul.f32 %v5873_v21, %v8402_v37  ;;  %v2119_v6 = vmul.f32 %v3579_v57, %v8334_v34  ;;  %v8407_v34 = vld [vmem:[#allocation46_spill] sm:$0xff] }
 0x143   :  { %v3587_v26 = vpop.eup %3586  ;;  %v1791_v15 = vadd.f32 %v1775_v62, %v1705_v33  ;;  %3610 = vtanh.f32 %v710_v9  ;;  %v2205_v59 = vmul.f32 %v3581_v43, %v8340_v48  ;;  %v968_v24 = vadd.f32 %v8403_v28, %v950_v4  ;;  %v8406_v9 = vld [vmem:[#allocation53_spill] sm:$0xff]  ;;  %v8411_v28 = vld [vmem:[#allocation22_spill] sm:$0xff] }
 0x144   :  { %v3589_v58 = vpop.eup %3588  ;;  %3612 = vtanh.f32 %v796_v45  ;;  %v1054_v10 = vadd.f32 %v8404_v23, %v1036_v8  ;;  %v1294_v62 = vmul.f32 %v5873_v21, %v8405_v40  ;;  %v1380_v17 = vmul.f32 %v5873_v21, %v8406_v9  ;;  %v8408_v45 = vld [vmem:[#allocation56_spill] sm:$0xff]  ;;  %v8412_v9 = vld [vmem:[#allocation51_spill] sm:$0xff] }
 0x145   :  { %v3591_v27 = vpop.eup %3590  ;;  %v1877_v19 = vadd.f32 %v1861_v12, %v1791_v15  ;;  %v2291_v37 = vmul.f32 %v3583_v29, %v8343_v42  ;;  %v2377_v57 = vmul.f32 %v3585_v11, %v8350_v35  ;;  %v1140_v43 = vadd.f32 %v8407_v34, %v1122_v60  ;;  %v8409_v12 = vld [vmem:[#allocation21_spill] sm:$0xff]  ;;  %v8410_v23 = vld [vmem:[#allocation48_spill] sm:$0xff] }
 0x146   :  { %v3593_v33 = vpop.eup %3592  ;;  %v1466_v4 = vmul.f32 %v5873_v21, %v8408_v45  ;;  %3614 = vtanh.f32 %v882_v32  ;;  %v1226_v40 = vadd.f32 %v8410_v23, %v1208_v18  ;;  %v1312_v25 = vadd.f32 %v8412_v9, %v1294_v62  ;;  %v8413_v29 = vld [vmem:[#allocation60_spill] sm:$0xff] }
 0x147   :  { %v3595_v48 = vpop.eup %3594  ;;  %v1963_v15 = vadd.f32 %v1947_v38, %v1877_v19  ;;  %v142_v8 = vmul.f32 %v3593_v33, %v8409_v12  ;;  %3616 = vtanh.f32 %v968_v24  ;;  %v1552_v11 = vmul.f32 %v5873_v21, %v8413_v29  ;;  %v8414_v42 = vld [vmem:[#allocation16_spill] sm:$0xff] }
 0x148   :  { %v228_v22 = vmul.f32 %v3595_v48, %v8411_v28  ;;  %v3597_v35 = vpop.eup %3596  ;;  %3618 = vtanh.f32 %v1054_v10  ;;  %v1398_v38 = vadd.f32 %v8337_v20, %v1380_v17  ;;  %v1484_v18 = vadd.f32 %v8338_v54, %v1466_v4  ;;  %v8415_v48 = vld [vmem:[#allocation62_spill] sm:$0xff]  ;;  %v8417_v54 = vld [vmem:[#allocation29_spill] sm:$0xff] }
 0x149   :  { %v2049_v60 = vadd.f32 %v2033_v0, %v1963_v15  ;;  %v158_v34 = vadd.f32 %v142_v8, %v8414_v42  ;;  %v3599_v19 = vpop.eup %3598  ;;  %v314_v32 = vmul.f32 %v3597_v35, %v8336_v16  ;;  %3620 = vtanh.f32 %v1140_v43  ;;  %v8416_v15 = vld [vmem:[#allocation65_spill] sm:$0xff] }
 0x14a   :  { %v1638_v24 = vmul.f32 %v5873_v21, %v8415_v48  ;;  %v3601_v62 = vpop.eup %3600  ;;  %v400_v29 = vmul.f32 %v3599_v19, %v8193_v55  ;;  %3622 = vtanh.f32 %v1226_v40  ;;  %v2463_v10 = vmul.f32 %v3587_v26, %v8352_v2  ;;  %v8420_v2 = vld [vmem:[#allocation30_spill] sm:$0xff] }
 0x14b   :  { %v2135_v33 = vadd.f32 %v2119_v6, %v2049_v60  ;;  %v244_v9 = vadd.f32 %v228_v22, %v158_v34  ;;  %3624 = vtanh.f32 %v1312_v25  ;;  %v1570_v17 = vadd.f32 %v8339_v50, %v1552_v11  ;;  %v8418_v22 = vld [vmem:[#allocation63_spill] sm:$0xff]  ;;  %v8419_v60 = vld [vmem:[#allocation68_spill] sm:$0xff] }
 0x14c   :  { %v3603_v0 = vpop.eup %3602  ;;  %v1724_v35 = vmul.f32 %v5873_v21, %v8416_v15  ;;  %v486_v48 = vmul.f32 %v3601_v62, %v8417_v54  ;;  %3626 = vtanh.f32 %v1398_v38  ;;  %v2549_v34 = vmul.f32 %v3589_v58, %v8353_v44  ;;  %v8422_v44 = vld [vmem:[#allocation37_spill] sm:$0xff] }
 0x14d   :  { %v3605_v43 = vpop.eup %3604  ;;  %v2221_v4 = vadd.f32 %v2205_v59, %v2135_v33  ;;  %v330_v8 = vadd.f32 %v314_v32, %v244_v9  ;;  %3628 = vtanh.f32 %v1484_v18  ;;  %v1656_v40 = vadd.f32 %v8418_v22, %v1638_v24  ;;  %v8421_v32 = vld [vmem:[#allocation74_spill] sm:$0xff] }
 0x14e   :  { %v3607_v6 = vpop.eup %3606  ;;  %v1810_v25 = vmul.f32 %v5873_v21, %v8419_v60  ;;  %v572_v15 = vmul.f32 %v3603_v0, %v8420_v2  ;;  %v1896_v59 = vmul.f32 %v5873_v21, %v8351_v7  ;;  %v2635_v38 = vmul.f32 %v3591_v27, %v8355_v1  ;;  %v8425_v27 = vld [vmem:[#allocation80_spill] sm:$0xff] }
 0x14f   :  { %v3609_v26 = vpop.eup %3608  ;;  %v2307_v11 = vadd.f32 %v2291_v37, %v2221_v4  ;;  %v416_v19 = vadd.f32 %v400_v29, %v330_v8  ;;  %3630 = vtanh.f32 %v1570_v17  ;;  %v1742_v58 = vadd.f32 %v8210_v47, %v1724_v35  ;;  %v8423_v29 = vld [vmem:[#allocation77_spill] sm:$0xff]  ;;  %v8426_v47 = vld [vmem:[#allocation40_spill] sm:$0xff] }
 0x150   :  { %v3611_v9 = vpop.eup %3610  ;;  %v1982_v18 = vmul.f32 %v5873_v21, %v8421_v32  ;;  %v658_v37 = vmul.f32 %v3607_v6, %v8422_v44  ;;  %v2068_v0 = vmul.f32 %v5873_v21, %v8423_v29  ;;  %v2721_v4 = vmul.f32 %v3605_v43, %v8359_v31  ;;  %v8424_v8 = vld [vmem:[#allocation69_spill] sm:$0xff]  ;;  %v8427_v2 = vld [vmem:[#allocation72_spill] sm:$0xff] }
 0x151   :  { %v3613_v24 = vpop.eup %3612  ;;  %v2393_v62 = vadd.f32 %v2377_v57, %v2307_v11  ;;  %v502_v33 = vadd.f32 %v486_v48, %v416_v19  ;;  %3632 = vtanh.f32 %v1656_v40  ;;  %v1828_v7 = vadd.f32 %v8424_v8, %v1810_v25  ;;  %v8428_v11 = vld [vmem:[#allocation43_spill] sm:$0xff] }
 0x152   :  { %v2154_v17 = vmul.f32 %v5873_v21, %v8425_v27  ;;  %v744_v32 = vmul.f32 %v3611_v9, %v8426_v47  ;;  %v1914_v57 = vadd.f32 %v8427_v2, %v1896_v59  ;;  %v830_v6 = vmul.f32 %v3613_v24, %v8428_v11  ;;  %v8429_v9 = vld [vmem:[#allocation81_spill] sm:$0xff] }
 0x153   :  { %v2479_v35 = vadd.f32 %v2463_v10, %v2393_v62  ;;  %v588_v1 = vadd.f32 %v572_v15, %v502_v33  ;;  %v3615_v48 = vpop.eup %3614  ;;  %3634 = vtanh.f32 %v1742_v58  ;;  %v2000_v19 = vadd.f32 %v8358_v51, %v1982_v18 }
 0x154   :  { %v2240_v43 = vmul.f32 %v5873_v21, %v8357_v61  ;;  %v3617_v40 = vpop.eup %3616  ;;  %v2086_v27 = vadd.f32 %v8360_v14, %v2068_v0  ;;  %v2326_v10 = vmul.f32 %v5873_v21, %v8361_v46  ;;  %v2807_v59 = vmul.f32 %v3609_v26, %v8364_v5  ;;  %v8430_v61 = vld [vmem:[#allocation45_spill] sm:$0xff] }
 0x155   :  { %v2565_v25 = vadd.f32 %v2549_v34, %v2479_v35  ;;  %v674_v31 = vadd.f32 %v658_v37, %v588_v1  ;;  %v3619_v15 = vpop.eup %3618  ;;  %3636 = vtanh.f32 %v1828_v7  ;;  %v2172_v24 = vadd.f32 %v8429_v9, %v2154_v17  ;;  %v8431_v37 = vld [vmem:[#allocation49_spill] sm:$0xff] }
 0x156   :  { %v2412_v58 = vmul.f32 %v5873_v21, %v8362_v49  ;;  %v3621_v18 = vpop.eup %3620  ;;  %v916_v34 = vmul.f32 %v3615_v48, %v8430_v61  ;;  %3638 = vtanh.f32 %v1914_v57  ;;  %v1002_v0 = vmul.f32 %v3617_v40, %v8431_v37 }
 0x157   :  { %v2651_v62 = vadd.f32 %v2635_v38, %v2565_v25  ;;  %v760_v33 = vadd.f32 %v744_v32, %v674_v31  ;;  %v3623_v1 = vpop.eup %3622  ;;  %3640 = vtanh.f32 %v2000_v19  ;;  %v2258_v35 = vadd.f32 %v8288_v36, %v2240_v43  ;;  %v8432_v32 = vld [vmem:[#allocation54_spill] sm:$0xff] }
 0x158   :  { %v2498_v7 = vmul.f32 %v5873_v21, %v8363_v39  ;;  %v3625_v26 = vpop.eup %3624  ;;  %3642 = vtanh.f32 %v2086_v27  ;;  %v2344_v9 = vadd.f32 %v8291_v63, %v2326_v10  ;;  %v1088_v31 = vmul.f32 %v3619_v15, %v8290_v13  ;;  %v8433_v25 = vld [vmem:[#allocation58_spill] sm:$0xff]  ;;  %v8434_v39 = vld [vmem:[#allocation95_spill] sm:$0xff]  ;;  %v6001_v10 = vld [vmem:[%s7561_s0 + $0x38] sm:$0xff] }
 0x159   :  { %v2737_v17 = vadd.f32 %v2721_v4, %v2651_v62  ;;  %v846_v5 = vadd.f32 %v830_v6, %v760_v33  ;;  %v3627_v38 = vpop.eup %3626  ;;  %v1174_v57 = vmul.f32 %v3621_v18, %v8432_v32  ;;  %3644 = vtanh.f32 %v2172_v24  ;;  %v8435_v15 = vld [vmem:[#allocation10_spill] sm:$0xff]  ;;  %v8436_v18 = vld [vmem:[#allocation64_spill] sm:$0xff] }
 0x15a   :  { %v2430_v48 = vadd.f32 %v8292_v56, %v2412_v58  ;;  %v3629_v19 = vpop.eup %3628  ;;  %v1260_v36 = vmul.f32 %v3623_v1, %v8433_v25  ;;  %v2584_v4 = vmul.f32 %v5873_v21, %v8434_v39  ;;  %v1346_v27 = vmul.f32 %v3625_v26, %v8293_v53  ;;  %v8437_v1 = vld [vmem:[#allocation12_spill] sm:$0xff]  ;;  %v8439_v25 = vld [vmem:[#allocation14_spill] sm:$0xff] }
 0x15b   :  { %v2823_v40 = vadd.f32 %v2807_v59, %v2737_v17  ;;  %v932_v43 = vadd.f32 %v916_v34, %v846_v5  ;;  %3646 = vtanh.f32 %v2258_v35  ;;  %v2516_v6 = vadd.f32 %v8365_v3, %v2498_v7  ;;  %v8444_v3 = vld [vmem:[#allocation101_spill] sm:$0xff] }
 0x15c   :  { %v91_v24 = vmul.f32 %v6001_v10, %v8435_v15  ;;  %v3631_v59 = vpop.eup %3630  ;;  %v1432_v62 = vmul.f32 %v3627_v38, %v8436_v18  ;;  %3648 = vtanh.f32 %v2344_v9  ;;  %v2670_v33 = vmul.f32 %v5873_v21, %v8371_v41  ;;  %v8438_v15 = vld [vmem:[#allocation96_spill] sm:$0xff]  ;;  %v8440_v38 = vld [vmem:[#allocation67_spill] sm:$0xff]  ;;  %v8442_v41 = vld [vmem:[#allocation17_spill] sm:$0xff] }
 0x15d   :  { %v2908_v5 = vmul.f32 0.5, %v2823_v40  ;;  %v1018_v58 = vadd.f32 %v1002_v0, %v932_v43  ;;  %3650 = vtanh.f32 %v2430_v48  ;;  %v177_v35 = vmul.f32 %v6001_v10, %v8437_v1  ;;  %v8441_v48 = vld [vmem:[#allocation13_spill] sm:$0xff]  ;;  %v8443_v18 = vld [vmem:[#allocation111_spill] sm:$0xff] }
 0x15e   :  { %v109_v34 = vadd.f32 %v8372_v30, %v91_v24  ;;  %v3633_v7 = vpop.eup %3632  ;;  %v2602_v53 = vadd.f32 %v8438_v15, %v2584_v4  ;;  %v263_v0 = vmul.f32 %v6001_v10, %v8439_v25  ;;  %v1518_v9 = vmul.f32 %v3629_v19, %v8440_v38  ;;  %v8447_v19 = vld [vmem:[#allocation18_spill] sm:$0xff] }
 0x15f   :  { %v2930_v26 = vmul.f32 %v8374_v52, %v2908_v5  ;;  %v1104_v17 = vadd.f32 %v1088_v31, %v1018_v58  ;;  %3652 = vtanh.f32 %v2516_v6  ;;  %v195_v43 = vadd.f32 %v8441_v48, %v177_v35  ;;  %v8445_v31 = vld [vmem:[#allocation99_spill] sm:$0xff] }
 0x160   :  { %v349_v24 = vmul.f32 %v6001_v10, %v8442_v41  ;;  %v3635_v30 = vpop.eup %3634  ;;  %v2756_v52 = vmul.f32 %v5873_v21, %v8444_v3  ;;  %3654 = vtanh.f32 %v109_v34  ;;  %v2688_v4 = vadd.f32 %v8445_v31, %v2670_v33  ;;  %v8446_v5 = vld [vmem:[#allocation15_spill] sm:$0xff]  ;;  %v8455_v31 = vld [vmem:[#allocation24_spill] sm:$0xff]  ;;  %v8470_v3 = vld [vmem:[#allocation82_spill] sm:$0xff] }
 0x161   :  { %v2946_v1 = vsub.f32 %v8443_v18, %v2930_v26  ;;  %v1190_v32 = vadd.f32 %v1174_v57, %v1104_v17  ;;  %3656 = vtanh.f32 %v195_v43  ;;  %v281_v58 = vadd.f32 %v8446_v5, %v263_v0  ;;  %v8448_v41 = vld [vmem:[#allocation19_spill] sm:$0xff]  ;;  %v6039_v5 = vpop.permute.xlu0 %2859 }
 0x162   :  { %v367_v6 = vadd.f32 %v8447_v19, %v349_v24  ;;  %v3637_v25 = vpop.eup %3636  ;;  %3658 = vtanh.f32 %v2602_v53  ;;  %v435_v38 = vmul.f32 %v6001_v10, %v8448_v41  ;;  %v8449_v57 = vld [vmem:[#allocation23_spill] sm:$0xff]  ;;  %v8454_v24 = vld [vmem:[#allocation102_spill] sm:$0xff]  ;;  %v8456_v41 = vld [vmem:[#allocation28_spill] sm:$0xff] }
 0x163   :  { %v2962_v35 = vmul.f32 %v2946_v1, %v2823_v40  ;;  %v1276_v48 = vadd.f32 %v1260_v36, %v1190_v32  ;;  %v3639_v18 = vpop.eup %3638  ;;  %3660 = vtanh.f32 %v281_v58  ;;  %v521_v21 = vmul.f32 %v6001_v10, %v8449_v57  ;;  %v8450_v34 = vld [vmem:[#allocation27_spill] sm:$0xff]  ;;  %v8452_v36 = vld [vmem:[#allocation20_spill] sm:$0xff]  ;;  %v8453_v32 = vld [vmem:[#allocation33_spill] sm:$0xff] }
 0x164   :  { %v607_v33 = vmul.f32 %v6001_v10, %v8450_v34  ;;  %v8451_v26 = vld [vmem:[#allocation31_spill] sm:$0xff]  ;;  %v3641_v0 = vpop.eup %3640  ;;  %3662 = vtanh.f32 %v367_v6  ;;  %v453_v53 = vadd.f32 %v8452_v36, %v435_v38  ;;  %v779_v40 = vmul.f32 %v6001_v10, %v8453_v32  ;;  %v8459_v6 = vld [vmem:[#allocation34_spill] sm:$0xff] }
 0x165   :  { %v693_v17 = vmul.f32 %v6001_v10, %v8451_v26  ;;  %2983 = vadd.xlane.f32.xlu0 %v2962_v35  ;;  %v1362_v43 = vadd.f32 %v1346_v27, %v1276_v48  ;;  %v3643_v1 = vpop.eup %3642  ;;  %3664 = vtanh.f32 %v2688_v4  ;;  %v2774_v58 = vadd.f32 %v8454_v24, %v2756_v52  ;;  %v8457_v35 = vld [vmem:[#allocation70_spill] sm:$0xff]  ;;  %v8458_v48 = vld [vmem:[#allocation32_spill] sm:$0xff]  ;;  %v8460_v36 = vld [vmem:[#allocation35_spill] sm:$0xff] }
 0x166   :  { %v539_v57 = vadd.f32 %v8455_v31, %v521_v21  ;;  %v625_v34 = vadd.f32 %v8456_v41, %v607_v33  ;;  %v3645_v19 = vpop.eup %3644  ;;  %v1604_v27 = vmul.f32 %v3631_v59, %v8457_v35  ;;  %3666 = vtanh.f32 %v453_v53  ;;  %v8461_v52 = vld [vmem:[#allocation38_spill] sm:$0xff]  ;;  %v8462_v41 = vld [vmem:[#allocation73_spill] sm:$0xff]  ;;  %v8465_v53 = vld [vmem:[#allocation36_spill] sm:$0xff] }
 0x167   :  { %v1448_v26 = vadd.f32 %v1432_v62, %v1362_v43  ;;  %v711_v38 = vadd.f32 %v8458_v48, %v693_v17  ;;  %v797_v32 = vadd.f32 %v8459_v6, %v779_v40  ;;  %v865_v4 = vmul.f32 %v6001_v10, %v8460_v36  ;;  %v8463_v62 = vld [vmem:[#allocation41_spill] sm:$0xff]  ;;  %v8466_v6 = vld [vmem:[#allocation44_spill] sm:$0xff]  ;;  %v8468_v48 = vld [vmem:[#allocation39_spill] sm:$0xff] }
 0x168   :  { %3668 = vtanh.f32 %v539_v57  ;;  %v951_v21 = vmul.f32 %v6001_v10, %v8461_v52  ;;  %v3647_v24 = vpop.eup %3646  ;;  %v1690_v31 = vmul.f32 %v3633_v7, %v8462_v41  ;;  %v1037_v59 = vmul.f32 %v6001_v10, %v8463_v62  ;;  %v6054_v57 = vld [vmem:[%s7561_s0 + $0x50] sm:$0xff]  ;;  %v8469_v36 = vld [vmem:[#allocation79_spill] sm:$0xff] }
 0x169   :  { %v1534_v33 = vadd.f32 %v1518_v9, %v1448_v26  ;;  %3670 = vtanh.f32 %v625_v34  ;;  %v3649_v43 = vpop.eup %3648  ;;  %8464 = vst [vmem:[#allocation113_spill] sm:$0xff] %v6054_v57  ;;  %v883_v40 = vadd.f32 %v8465_v53, %v865_v4  ;;  %v1123_v9 = vmul.f32 %v6001_v10, %v8466_v6  ;;  %v8467_v26 = vld [vmem:[#allocation76_spill] sm:$0xff]  ;;  %v8471_v17 = vld [vmem:[#allocation47_spill] sm:$0xff]  ;;  %v8472_v6 = vld [vmem:[#allocation85_spill] sm:$0xff] }
 0x16a   :  { %3672 = vtanh.f32 %v2774_v58  ;;  %v6061_v7 = vpop.eup %3650  ;;  %v1776_v62 = vmul.f32 %v3635_v30, %v8467_v26  ;;  %v969_v52 = vadd.f32 %v8468_v48, %v951_v21  ;;  %v1862_v41 = vmul.f32 %v3637_v25, %v8469_v36  ;;  %v8473_v57 = vld [vmem:[#allocation42_spill] sm:$0xff]  ;;  %v8475_v21 = vld [vmem:[#allocation88_spill] sm:$0xff]  ;;  %v8478_v26 = vld [vmem:[#allocation91_spill] sm:$0xff] }
 0x16b   :  { %v1620_v34 = vadd.f32 %v1604_v27, %v1534_v33  ;;  %3674 = vtanh.f32 %v711_v38  ;;  %v1948_v35 = vmul.f32 %v3639_v18, %v8470_v3  ;;  %v1209_v58 = vmul.f32 %v6001_v10, %v8471_v17  ;;  %v8474_v33 = vld [vmem:[#allocation50_spill] sm:$0xff] }
 0x16c   :  { %3676 = vtanh.f32 %v797_v32  ;;  %v6069_v4 = vpop.eup %3652  ;;  %v2034_v15 = vmul.f32 %v3641_v0, %v8472_v6  ;;  %v1055_v27 = vadd.f32 %v8473_v57, %v1037_v59  ;;  %v1295_v30 = vmul.f32 %v6001_v10, %v8474_v33  ;;  %v8476_v25 = vld [vmem:[#allocation46_spill] sm:$0xff]  ;;  %v8477_v32 = vld [vmem:[#allocation53_spill] sm:$0xff] }
 0x16d   :  { %v1706_v53 = vadd.f32 %v1690_v31, %v1620_v34  ;;  %v3655_v38 = vpop.eup %3654  ;;  %v2120_v48 = vmul.f32 %v3643_v1, %v8475_v21  ;;  %3678 = vtanh.f32 %v883_v40  ;;  %v1141_v18 = vadd.f32 %v8476_v25, %v1123_v9  ;;  %v8479_v40 = vld [vmem:[#allocation60_spill] sm:$0xff] }
 0x16e   :  { %v1381_v3 = vmul.f32 %v6001_v10, %v8477_v32  ;;  %v3657_v17 = vpop.eup %3656  ;;  %v2206_v31 = vmul.f32 %v3645_v19, %v8478_v26  ;;  %v143_v0 = vmul.f32 %v3655_v38, %v8409_v12  ;;  %3680 = vtanh.f32 %v969_v52  ;;  %v8480_v19 = vld [vmem:[#allocation51_spill] sm:$0xff] }
 0x16f   :  { %v1792_v36 = vadd.f32 %v1776_v62, %v1706_v53  ;;  %v3659_v59 = vpop.eup %3658  ;;  %v229_v34 = vmul.f32 %v3657_v17, %v8411_v28  ;;  %v1227_v57 = vadd.f32 %v8410_v23, %v1209_v58  ;;  %v1467_v1 = vmul.f32 %v6001_v10, %v8408_v45  ;;  %v8481_v58 = vld [vmem:[#allocation62_spill] sm:$0xff] }
 0x170   :  { %v1553_v9 = vmul.f32 %v6001_v10, %v8479_v40  ;;  %v3661_v25 = vpop.eup %3660  ;;  %v159_v62 = vadd.f32 %v143_v0, %v8414_v42  ;;  %3682 = vtanh.f32 %v1055_v27  ;;  %v1313_v53 = vadd.f32 %v8480_v19, %v1295_v30  ;;  %v8483_v27 = vld [vmem:[#allocation94_spill] sm:$0xff] }
 0x171   :  { %v1878_v32 = vadd.f32 %v1862_v41, %v1792_v36  ;;  %v3663_v38 = vpop.eup %3662  ;;  %v315_v52 = vmul.f32 %v3661_v25, %v8336_v16  ;;  %3684 = vtanh.f32 %v1141_v18  ;;  %v1399_v17 = vadd.f32 %v8337_v20, %v1381_v3  ;;  %v8482_v41 = vld [vmem:[#allocation57_spill] sm:$0xff] }
 0x172   :  { %v1639_v28 = vmul.f32 %v6001_v10, %v8481_v58  ;;  %v3665_v12 = vpop.eup %3664  ;;  %v245_v45 = vadd.f32 %v229_v34, %v159_v62  ;;  %v401_v40 = vmul.f32 %v3663_v38, %v8193_v55  ;;  %v1485_v36 = vadd.f32 %v8482_v41, %v1467_v1  ;;  %v8484_v25 = vld [vmem:[#allocation65_spill] sm:$0xff]  ;;  %v8486_v38 = vld [vmem:[#allocation30_spill] sm:$0xff] }
 0x173   :  { %v1964_v26 = vadd.f32 %v1948_v35, %v1878_v32  ;;  %v3667_v0 = vpop.eup %3666  ;;  %v2292_v42 = vmul.f32 %v3647_v24, %v8483_v27  ;;  %3686 = vtanh.f32 %v1227_v57  ;;  %v1571_v30 = vadd.f32 %v8339_v50, %v1553_v9  ;;  %v8485_v32 = vld [vmem:[#allocation97_spill] sm:$0xff] }
 0x174   :  { %v1725_v18 = vmul.f32 %v6001_v10, %v8484_v25  ;;  %v331_v20 = vadd.f32 %v315_v52, %v245_v45  ;;  %v487_v58 = vmul.f32 %v3667_v0, %v8417_v54  ;;  %3688 = vtanh.f32 %v1313_v53  ;;  %v8487_v45 = vld [vmem:[#allocation100_spill] sm:$0xff]  ;;  %v8488_v53 = vld [vmem:[#allocation66_spill] sm:$0xff] }
 0x175   :  { %v3669_v3 = vpop.eup %3668  ;;  %v2050_v16 = vadd.f32 %v2034_v15, %v1964_v26  ;;  %v2378_v34 = vmul.f32 %v3649_v43, %v8485_v32  ;;  %3690 = vtanh.f32 %v1399_v17  ;;  %v1657_v1 = vadd.f32 %v8418_v22, %v1639_v28  ;;  %v8489_v43 = vld [vmem:[#allocation71_spill] sm:$0xff] }
 0x176   :  { %v3671_v35 = vpop.eup %3670  ;;  %v1811_v24 = vmul.f32 %v6001_v10, %v8419_v60  ;;  %v417_v62 = vadd.f32 %v401_v40, %v331_v20  ;;  %v573_v25 = vmul.f32 %v3669_v3, %v8486_v38  ;;  %3692 = vtanh.f32 %v1485_v36  ;;  %v8492_v36 = vld [vmem:[#allocation104_spill] sm:$0xff] }
 0x177   :  { %v3673_v57 = vpop.eup %3672  ;;  %v2136_v9 = vadd.f32 %v2120_v48, %v2050_v16  ;;  %v2464_v26 = vmul.f32 %v6061_v7, %v8487_v45  ;;  %3694 = vtanh.f32 %v1571_v30  ;;  %v1743_v52 = vadd.f32 %v8488_v53, %v1725_v18  ;;  %v8490_v16 = vld [vmem:[#allocation74_spill] sm:$0xff]  ;;  %v8491_v48 = vld [vmem:[#allocation103_spill] sm:$0xff] }
 0x178   :  { %v3675_v15 = vpop.eup %3674  ;;  %v1897_v17 = vmul.f32 %v6001_v10, %v8489_v43  ;;  %v503_v22 = vadd.f32 %v487_v58, %v417_v62  ;;  %v659_v60 = vmul.f32 %v3671_v35, %v8422_v44  ;;  %v1983_v20 = vmul.f32 %v6001_v10, %v8490_v16 }
 0x179   :  { %v3677_v28 = vpop.eup %3676  ;;  %v2222_v0 = vadd.f32 %v2206_v31, %v2136_v9  ;;  %v2550_v40 = vmul.f32 %v6069_v4, %v8491_v48  ;;  %v2636_v3 = vmul.f32 %v3659_v59, %v8492_v36  ;;  %v1829_v7 = vadd.f32 %v8424_v8, %v1811_v24  ;;  %v8493_v4 = vld [vmem:[#allocation80_spill] sm:$0xff] }
 0x17a   :  { %v2069_v30 = vmul.f32 %v6001_v10, %v8423_v29  ;;  %v3679_v18 = vpop.eup %3678  ;;  %v589_v43 = vadd.f32 %v573_v25, %v503_v22  ;;  %v745_v31 = vmul.f32 %v3675_v15, %v8426_v47  ;;  %3696 = vtanh.f32 %v1657_v1  ;;  %v8494_v29 = vld [vmem:[#allocation83_spill] sm:$0xff]  ;;  %v8495_v25 = vld [vmem:[#allocation105_spill] sm:$0xff] }
 0x17b   :  { %v2308_v53 = vadd.f32 %v2292_v42, %v2222_v0  ;;  %v3681_v58 = vpop.eup %3680  ;;  %v831_v35 = vmul.f32 %v3677_v28, %v8428_v11  ;;  %3698 = vtanh.f32 %v1743_v52  ;;  %v1915_v9 = vadd.f32 %v8427_v2, %v1897_v17 }
 0x17c   :  { %v2155_v59 = vmul.f32 %v6001_v10, %v8493_v4  ;;  %v675_v24 = vadd.f32 %v659_v60, %v589_v43  ;;  %v2001_v8 = vadd.f32 %v8358_v51, %v1983_v20  ;;  %v2241_v42 = vmul.f32 %v6001_v10, %v8494_v29  ;;  %v8496_v43 = vld [vmem:[#allocation81_spill] sm:$0xff] }
 0x17d   :  { %v2394_v62 = vadd.f32 %v2378_v34, %v2308_v53  ;;  %v3683_v22 = vpop.eup %3682  ;;  %v2722_v15 = vmul.f32 %v3665_v12, %v8495_v25  ;;  %3700 = vtanh.f32 %v1829_v7  ;;  %v2087_v1 = vadd.f32 %v8360_v14, %v2069_v30  ;;  %v8497_v12 = vld [vmem:[#allocation92_spill] sm:$0xff] }
 0x17e   :  { %v2327_v52 = vmul.f32 %v6001_v10, %v8361_v46  ;;  %v3685_v17 = vpop.eup %3684  ;;  %v761_v0 = vadd.f32 %v745_v31, %v675_v24  ;;  %v917_v34 = vmul.f32 %v3679_v18, %v8430_v61  ;;  %v2413_v60 = vmul.f32 %v6001_v10, %v8362_v49  ;;  %v8498_v46 = vld [vmem:[#allocation84_spill] sm:$0xff] }
 0x17f   :  { %v2480_v28 = vadd.f32 %v2464_v26, %v2394_v62  ;;  %v1003_v53 = vmul.f32 %v3681_v58, %v8431_v37  ;;  %3702 = vtanh.f32 %v1915_v9  ;;  %v2173_v20 = vadd.f32 %v8496_v43, %v2155_v59  ;;  %v8499_v62 = vld [vmem:[#allocation106_spill] sm:$0xff] }
 0x180   :  { %v2499_v7 = vmul.f32 %v6001_v10, %v8497_v12  ;;  %v3687_v30 = vpop.eup %3686  ;;  %v847_v11 = vadd.f32 %v831_v35, %v761_v0  ;;  %3704 = vtanh.f32 %v2001_v8  ;;  %v2259_v26 = vadd.f32 %v8498_v46, %v2241_v42  ;;  %v8500_v8 = vld [vmem:[#allocation108_spill] sm:$0xff]  ;;  %v8503_v0 = vld [vmem:[#allocation107_spill] sm:$0xff] }
 0x181   :  { %v2566_v14 = vadd.f32 %v2550_v40, %v2480_v28  ;;  %v3689_v31 = vpop.eup %3688  ;;  %v2808_v18 = vmul.f32 %v3673_v57, %v8499_v62  ;;  %v1089_v24 = vmul.f32 %v3683_v22, %v8290_v13  ;;  %3706 = vtanh.f32 %v2087_v1  ;;  %v8501_v28 = vld [vmem:[#allocation116_spill] sm:$0xff]  ;;  %v8505_v57 = vld [vmem:[#allocation113_spill] sm:$0xff] }
 0x182   :  { %v2345_v58 = vadd.f32 %v8291_v63, %v2327_v52  ;;  %v3691_v9 = vpop.eup %3690  ;;  %v933_v59 = vadd.f32 %v917_v34, %v847_v11  ;;  %v2431_v61 = vadd.f32 %v8292_v56, %v2413_v60  ;;  %v2585_v40 = vmul.f32 %v6001_v10, %v8434_v39  ;;  %v8509_v60 = vld [vmem:[#allocation54_spill] sm:$0xff] }
 0x183   :  { %v2652_v37 = vadd.f32 %v2636_v3, %v2566_v14  ;;  %v3693_v35 = vpop.eup %3692  ;;  %v8502_v42 = vsub.f32 %v8500_v8, %v8501_v28  ;;  %v8506_v22 = vsub.f32 %v6039_v5, %v8505_v57  ;;  %3708 = vtanh.f32 %v2173_v20  ;;  %v8508_v14 = vld [vmem:[#allocation93_spill] sm:$0xff]  ;;  %v8510_v56 = vld [vmem:[#allocation58_spill] sm:$0xff]  ;;  %v8511_v28 = vld [vmem:[#allocation59_spill] sm:$0xff] }
 0x184   :  { %v2517_v11 = vadd.f32 %v8508_v14, %v2499_v7  ;;  %v3695_v3 = vpop.eup %3694  ;;  %v1019_v34 = vadd.f32 %v1003_v53, %v933_v59  ;;  %v1175_v39 = vmul.f32 %v3685_v17, %v8509_v60  ;;  %3710 = vtanh.f32 %v2259_v26  ;;  %v8514_v7 = vld [vmem:[#allocation67_spill] sm:$0xff]  ;;  %v6168_v17 = vld [vmem:[%s7561_s0 + $0x40] sm:$0xff]  ;;  %v8519_v59 = vld [vmem:[#allocation101_spill] sm:$0xff] }
 0x185   :  { %v6149_v12 = vmul.f32 %v8503_v0, %v8502_v42  ;;  %v6155_v1 = vmul.f32 %v8503_v0, %v8506_v22  ;;  %v2738_v52 = vadd.f32 %v2722_v15, %v2652_v37  ;;  %v1261_v8 = vmul.f32 %v3687_v30, %v8510_v56  ;;  %v8513_v22 = vld [vmem:[#allocation96_spill] sm:$0xff]  ;;  %v8515_v37 = vld [vmem:[#allocation70_spill] sm:$0xff]  ;;  %v6195_v56 = vpop.permute.xlu1 %2865 }
 0x186   :  { %v1347_v42 = vmul.f32 %v3689_v31, %v8511_v28  ;;  %3712 = vtanh.f32 %v2345_v58  ;;  %v1105_v57 = vadd.f32 %v1089_v24, %v1019_v34  ;;  %v2603_v20 = vadd.f32 %v8513_v22, %v2585_v40  ;;  %v8516_v53 = vld [vmem:[#allocation10_spill] sm:$0xff]  ;;  %v8518_v58 = vld [vmem:[#allocation12_spill] sm:$0xff]  ;;  %v8522_v34 = vld [vmem:[#allocation17_spill] sm:$0xff]  ;;  %8529 = vst [vmem:[#allocation108_spill] sm:$0xff] %v6195_v56 }
 0x187   :  { %8504 = vst [vmem:[#allocation110_spill] sm:$0xff] %v6149_v12  ;;  %8507 = vst [vmem:[#allocation112_spill] sm:$0xff] %v6155_v1  ;;  %v8512_v12 = vld [vmem:[#allocation64_spill] sm:$0xff]  ;;  %v2824_v5 = vadd.f32 %v2808_v18, %v2738_v52  ;;  %3714 = vtanh.f32 %v2431_v61  ;;  %v3697_v0 = vpop.eup %3696  ;;  %v1519_v1 = vmul.f32 %v3693_v35, %v8514_v7  ;;  %v1605_v15 = vmul.f32 %v3695_v3, %v8515_v37  ;;  %v8517_v61 = vld [vmem:[#allocation98_spill] sm:$0xff] }
 0x188   :  { %v1433_v63 = vmul.f32 %v3691_v9, %v8512_v12  ;;  %3716 = vtanh.f32 %v2517_v11  ;;  %v92_v30 = vmul.f32 %v6168_v17, %v8516_v53  ;;  %v3699_v26 = vpop.eup %3698  ;;  %v1191_v18 = vadd.f32 %v1175_v39, %v1105_v57  ;;  %v8520_v35 = vld [vmem:[#allocation11_spill] sm:$0xff]  ;;  %v8521_v3 = vld [vmem:[#allocation14_spill] sm:$0xff]  ;;  %v8524_v7 = vld [vmem:[#allocation13_spill] sm:$0xff] }
 0x189   :  { %v2909_v31 = vmul.f32 0.5, %v2824_v5  ;;  %v2671_v24 = vmul.f32 %v6001_v10, %v8517_v61  ;;  %v178_v9 = vmul.f32 %v6168_v17, %v8518_v58  ;;  %v2757_v40 = vmul.f32 %v6001_v10, %v8519_v59  ;;  %v6186_v39 = vld [vmem:[%s7562_s1] ss:$0 sm:$0xff]  ;;  %v8527_v58 = vld [vmem:[#allocation19_spill] sm:$0xff] }
 0x18a   :  { %v110_v11 = vadd.f32 %v8520_v35, %v92_v30  ;;  %v264_v52 = vmul.f32 %v6168_v17, %v8521_v3  ;;  %v350_v22 = vmul.f32 %v6168_v17, %v8522_v34  ;;  %v3701_v37 = vpop.eup %3700  ;;  %8523 = vst [vmem:[#allocation111_spill] sm:$0xff] %v6186_v39  ;;  %v1277_v61 = vadd.f32 %v1261_v8, %v1191_v18  ;;  %v8525_v30 = vld [vmem:[#allocation15_spill] sm:$0xff]  ;;  %v8526_v35 = vld [vmem:[#allocation18_spill] sm:$0xff]  ;;  %v8531_v18 = vld [vmem:[#allocation73_spill] sm:$0xff] }
 0x18b   :  { %v2931_v57 = vmul.f32 %v6186_v39, %v2909_v31  ;;  %3718 = vtanh.f32 %v2603_v20  ;;  %v196_v10 = vadd.f32 %v8524_v7, %v178_v9  ;;  %v436_v34 = vmul.f32 %v6168_v17, %v8527_v58  ;;  %v8528_v53 = vld [vmem:[#allocation115_spill] sm:$0xff] }
 0x18c   :  { %3720 = vtanh.f32 %v110_v11  ;;  %v282_v59 = vadd.f32 %v8525_v30, %v264_v52  ;;  %v368_v3 = vadd.f32 %v8526_v35, %v350_v22  ;;  %v3703_v12 = vpop.eup %3702  ;;  %v1363_v28 = vadd.f32 %v1347_v42, %v1277_v61  ;;  %v8530_v31 = vld [vmem:[#allocation23_spill] sm:$0xff]  ;;  %v8532_v11 = vld [vmem:[#allocation20_spill] sm:$0xff] }
 0x18d   :  { %v2947_v14 = vsub.f32 %v8528_v53, %v2931_v57  ;;  %3722 = vtanh.f32 %v196_v10  ;;  %v522_v8 = vmul.f32 %v6168_v17, %v8530_v31  ;;  %v3705_v20 = vpop.eup %3704  ;;  %v1691_v9 = vmul.f32 %v3697_v0, %v8531_v18  ;;  %v8533_v22 = vld [vmem:[#allocation27_spill] sm:$0xff]  ;;  %v8537_v57 = vld [vmem:[#allocation28_spill] sm:$0xff]  ;;  %v8543_v0 = vld [vmem:[#allocation38_spill] sm:$0xff] }
 0x18e   :  { %3724 = vtanh.f32 %v282_v59  ;;  %v454_v52 = vadd.f32 %v8532_v11, %v436_v34  ;;  %v608_v35 = vmul.f32 %v6168_v17, %v8533_v22  ;;  %v3707_v30 = vpop.eup %3706  ;;  %v1449_v39 = vadd.f32 %v1433_v63, %v1363_v28  ;;  %v8534_v53 = vld [vmem:[#allocation99_spill] sm:$0xff]  ;;  %v8536_v59 = vld [vmem:[#allocation24_spill] sm:$0xff]  ;;  %v8538_v63 = vld [vmem:[#allocation102_spill] sm:$0xff] }
 0x18f   :  { %v2963_v58 = vmul.f32 %v2947_v14, %v2824_v5  ;;  %v2689_v42 = vadd.f32 %v8534_v53, %v2671_v24  ;;  %3726 = vtanh.f32 %v368_v3  ;;  %v6207_v61 = vld [vmem:[%s7561_s0 + $0x68] sm:$0xff]  ;;  %v540_v34 = vadd.f32 %v8536_v59, %v522_v8  ;;  %v8540_v3 = vld [vmem:[#allocation33_spill] sm:$0xff]  ;;  %v8541_v31 = vld [vmem:[#allocation76_spill] sm:$0xff] }
 0x190   :  { %8535 = vst [vmem:[#allocation116_spill] sm:$0xff] %v6207_v61  ;;  %3728 = vtanh.f32 %v454_v52  ;;  %v626_v10 = vadd.f32 %v8537_v57, %v608_v35  ;;  %v3709_v18 = vpop.eup %3708  ;;  %v1535_v14 = vadd.f32 %v1519_v1, %v1449_v39  ;;  %v2775_v28 = vadd.f32 %v8538_v63, %v2757_v40  ;;  %v8539_v5 = vld [vmem:[#allocation31_spill] sm:$0xff]  ;;  %v8545_v61 = vld [vmem:[#allocation32_spill] sm:$0xff] }
 0x191   :  { %2985 = vadd.xlane.f32.xlu1 %v2963_v58  ;;  %v694_v24 = vmul.f32 %v6168_v17, %v8539_v5  ;;  %v780_v53 = vmul.f32 %v6168_v17, %v8540_v3  ;;  %v3711_v22 = vpop.eup %3710  ;;  %v1777_v11 = vmul.f32 %v3699_v26, %v8541_v31  ;;  %3730 = vtanh.f32 %v540_v34  ;;  %v8542_v52 = vld [vmem:[#allocation35_spill] sm:$0xff]  ;;  %v8546_v3 = vld [vmem:[#allocation34_spill] sm:$0xff]  ;;  %v8547_v59 = vld [vmem:[#allocation36_spill] sm:$0xff] }
 0x192   :  { %v866_v8 = vmul.f32 %v6168_v17, %v8542_v52  ;;  %v952_v35 = vmul.f32 %v6168_v17, %v8543_v0  ;;  %v1621_v1 = vadd.f32 %v1605_v15, %v1535_v14  ;;  %v8544_v39 = vld [vmem:[#allocation79_spill] sm:$0xff]  ;;  %3732 = vtanh.f32 %v2689_v42  ;;  %v8548_v34 = vld [vmem:[#allocation41_spill] sm:$0xff]  ;;  %v8549_v0 = vld [vmem:[#allocation44_spill] sm:$0xff] }
 0x193   :  { %v3713_v58 = vpop.eup %3712  ;;  %v1863_v40 = vmul.f32 %v3701_v37, %v8544_v39  ;;  %v712_v56 = vadd.f32 %v8545_v61, %v694_v24  ;;  %3734 = vtanh.f32 %v626_v10  ;;  %v798_v57 = vadd.f32 %v8546_v3, %v780_v53  ;;  %v8550_v14 = vld [vmem:[#allocation47_spill] sm:$0xff]  ;;  %v8551_v42 = vld [vmem:[#allocation82_spill] sm:$0xff]  ;;  %v8555_v3 = vld [vmem:[#allocation53_spill] sm:$0xff] }
 0x194   :  { %v3715_v63 = vpop.eup %3714  ;;  %v884_v26 = vadd.f32 %v8547_v59, %v866_v8  ;;  %v1038_v31 = vmul.f32 %v6168_v17, %v8548_v34  ;;  %v1707_v5 = vadd.f32 %v1691_v9, %v1621_v1  ;;  %3736 = vtanh.f32 %v2775_v28  ;;  %v8552_v10 = vld [vmem:[#allocation39_spill] sm:$0xff]  ;;  %v8553_v9 = vld [vmem:[#allocation42_spill] sm:$0xff] }
 0x195   :  { %v3717_v52 = vpop.eup %3716  ;;  %v1124_v15 = vmul.f32 %v6168_v17, %v8549_v0  ;;  %v1210_v37 = vmul.f32 %v6168_v17, %v8550_v14  ;;  %v1949_v24 = vmul.f32 %v3703_v12, %v8551_v42  ;;  %3738 = vtanh.f32 %v712_v56  ;;  %v8554_v34 = vld [vmem:[#allocation46_spill] sm:$0xff]  ;;  %v8563_v42 = vld [vmem:[#allocation25_spill] sm:$0xff] }
 0x196   :  { %v970_v39 = vadd.f32 %v8552_v10, %v952_v35  ;;  %v1296_v53 = vmul.f32 %v6168_v17, %v8474_v33  ;;  %v1793_v8 = vadd.f32 %v1777_v11, %v1707_v5  ;;  %v2035_v59 = vmul.f32 %v3705_v20, %v8472_v6  ;;  %v8556_v33 = vld [vmem:[#allocation56_spill] sm:$0xff]  ;;  %v8558_v5 = vld [vmem:[#allocation91_spill] sm:$0xff] }
 0x197   :  { %3740 = vtanh.f32 %v798_v57  ;;  %v1056_v28 = vadd.f32 %v8553_v9, %v1038_v31  ;;  %v2121_v0 = vmul.f32 %v3707_v30, %v8475_v21  ;;  %v1142_v14 = vadd.f32 %v8554_v34, %v1124_v15  ;;  %v8557_v20 = vld [vmem:[#allocation60_spill] sm:$0xff]  ;;  %v8559_v30 = vld [vmem:[#allocation21_spill] sm:$0xff]  ;;  %v8560_v21 = vld [vmem:[#allocation22_spill] sm:$0xff] }
 0x198   :  { %v3719_v1 = vpop.eup %3718  ;;  %3742 = vtanh.f32 %v884_v26  ;;  %v1382_v56 = vmul.f32 %v6168_v17, %v8555_v3  ;;  %v1879_v35 = vadd.f32 %v1863_v40, %v1793_v8  ;;  %v1228_v10 = vadd.f32 %v8410_v23, %v1210_v37  ;;  %v8561_v37 = vld [vmem:[#allocation55_spill] sm:$0xff] }
 0x199   :  { %v3721_v12 = vpop.eup %3720  ;;  %v1468_v11 = vmul.f32 %v6168_v17, %v8556_v33  ;;  %v1554_v57 = vmul.f32 %v6168_v17, %v8557_v20  ;;  %v2207_v9 = vmul.f32 %v3709_v18, %v8558_v5  ;;  %3744 = vtanh.f32 %v970_v39  ;;  %v8562_v33 = vld [vmem:[#allocation16_spill] sm:$0xff] }
 0x19a   :  { %v3723_v31 = vpop.eup %3722  ;;  %v144_v26 = vmul.f32 %v3721_v12, %v8559_v30  ;;  %v1314_v15 = vadd.f32 %v8480_v19, %v1296_v53  ;;  %v1965_v3 = vadd.f32 %v1949_v24, %v1879_v35  ;;  %3746 = vtanh.f32 %v1056_v28 }
 0x19b   :  { %v3725_v34 = vpop.eup %3724  ;;  %v230_v40 = vmul.f32 %v3723_v31, %v8560_v21  ;;  %v1400_v8 = vadd.f32 %v8561_v37, %v1382_v56  ;;  %3748 = vtanh.f32 %v1142_v14  ;;  %v1486_v18 = vadd.f32 %v8482_v41, %v1468_v11  ;;  %v8564_v56 = vld [vmem:[#allocation62_spill] sm:$0xff]  ;;  %v8565_v14 = vld [vmem:[#allocation65_spill] sm:$0xff] }
 0x19c   :  { %v3727_v23 = vpop.eup %3726  ;;  %v160_v6 = vadd.f32 %v144_v26, %v8562_v33  ;;  %v316_v20 = vmul.f32 %v3725_v34, %v8563_v42  ;;  %v2051_v12 = vadd.f32 %v2035_v59, %v1965_v3  ;;  %v2293_v39 = vmul.f32 %v3711_v22, %v8483_v27 }
 0x19d   :  { %v3729_v5 = vpop.eup %3728  ;;  %3750 = vtanh.f32 %v1228_v10  ;;  %v1572_v24 = vadd.f32 %v8339_v50, %v1554_v57  ;;  %v402_v28 = vmul.f32 %v3727_v23, %v8193_v55  ;;  %v1640_v35 = vmul.f32 %v6168_v17, %v8564_v56  ;;  %v8568_v50 = vld [vmem:[#allocation71_spill] sm:$0xff] }
 0x19e   :  { %v246_v53 = vadd.f32 %v230_v40, %v160_v6  ;;  %3752 = vtanh.f32 %v1314_v15  ;;  %v3731_v31 = vpop.eup %3730  ;;  %v2137_v26 = vadd.f32 %v2121_v0, %v2051_v12  ;;  %v2379_v34 = vmul.f32 %v3713_v58, %v8485_v32  ;;  %v8566_v15 = vld [vmem:[#allocation68_spill] sm:$0xff]  ;;  %v8567_v12 = vld [vmem:[#allocation63_spill] sm:$0xff] }
 0x19f   :  { %3754 = vtanh.f32 %v1400_v8  ;;  %v1726_v59 = vmul.f32 %v6168_v17, %v8565_v14  ;;  %v3733_v3 = vpop.eup %3732  ;;  %v2465_v22 = vmul.f32 %v3715_v63, %v8487_v45  ;;  %v488_v6 = vmul.f32 %v3729_v5, %v8417_v54 }
 0x1a0   :  { %v332_v10 = vadd.f32 %v316_v20, %v246_v53  ;;  %3756 = vtanh.f32 %v1486_v18  ;;  %v3735_v23 = vpop.eup %3734  ;;  %v2223_v11 = vadd.f32 %v2207_v9, %v2137_v26  ;;  %v2551_v57 = vmul.f32 %v3717_v52, %v8491_v48  ;;  %v8569_v9 = vld [vmem:[#allocation66_spill] sm:$0xff] }
 0x1a1   :  { %3758 = vtanh.f32 %v1572_v24  ;;  %v1812_v0 = vmul.f32 %v6168_v17, %v8566_v15  ;;  %v3737_v58 = vpop.eup %3736  ;;  %v574_v8 = vmul.f32 %v3731_v31, %v8486_v38  ;;  %v1658_v14 = vadd.f32 %v8567_v12, %v1640_v35 }
 0x1a2   :  { %v418_v40 = vadd.f32 %v402_v28, %v332_v10  ;;  %v1898_v63 = vmul.f32 %v6168_v17, %v8568_v50  ;;  %v3739_v20 = vpop.eup %3738  ;;  %v2309_v5 = vadd.f32 %v2293_v39, %v2223_v11  ;;  %v2637_v18 = vmul.f32 %v3719_v1, %v8492_v36  ;;  %v8570_v10 = vld [vmem:[#allocation77_spill] sm:$0xff] }
 0x1a3   :  { %v1744_v53 = vadd.f32 %v8569_v9, %v1726_v59  ;;  %v1984_v52 = vmul.f32 %v6168_v17, %v8490_v16  ;;  %v2723_v26 = vmul.f32 %v3733_v3, %v8495_v25  ;;  %v660_v31 = vmul.f32 %v3735_v23, %v8422_v44  ;;  %v8571_v11 = vld [vmem:[#allocation69_spill] sm:$0xff] }
 0x1a4   :  { %v3741_v24 = vpop.eup %3740  ;;  %v504_v28 = vadd.f32 %v488_v6, %v418_v40  ;;  %v2070_v35 = vmul.f32 %v6168_v17, %v8570_v10  ;;  %v2395_v50 = vadd.f32 %v2379_v34, %v2309_v5  ;;  %v2809_v39 = vmul.f32 %v3737_v58, %v8499_v62  ;;  %v8573_v10 = vld [vmem:[#allocation78_spill] sm:$0xff] }
 0x1a5   :  { %v3743_v48 = vpop.eup %3742  ;;  %v1830_v1 = vadd.f32 %v8571_v11, %v1812_v0  ;;  %v2156_v59 = vmul.f32 %v6168_v17, %v8493_v4  ;;  %v746_v16 = vmul.f32 %v3739_v20, %v8426_v47  ;;  %3760 = vtanh.f32 %v1658_v14  ;;  %v8572_v0 = vld [vmem:[#allocation43_spill] sm:$0xff] }
 0x1a6   :  { %v590_v36 = vadd.f32 %v574_v8, %v504_v28  ;;  %v1916_v3 = vadd.f32 %v8427_v2, %v1898_v63  ;;  %v3745_v6 = vpop.eup %3744  ;;  %v2481_v23 = vadd.f32 %v2465_v22, %v2395_v50  ;;  %3762 = vtanh.f32 %v1744_v53  ;;  %v8574_v8 = vld [vmem:[#allocation86_spill] sm:$0xff] }
 0x1a7   :  { %v2002_v40 = vadd.f32 %v8358_v51, %v1984_v52  ;;  %v2242_v34 = vmul.f32 %v6168_v17, %v8494_v29  ;;  %v3747_v58 = vpop.eup %3746  ;;  %v832_v62 = vmul.f32 %v3741_v24, %v8572_v0  ;;  %v2088_v4 = vadd.f32 %v8573_v10, %v2070_v35  ;;  %v8575_v52 = vld [vmem:[#allocation45_spill] sm:$0xff] }
 0x1a8   :  { %v676_v5 = vadd.f32 %v660_v31, %v590_v36  ;;  %v2328_v20 = vmul.f32 %v6168_v17, %v8574_v8  ;;  %v3749_v14 = vpop.eup %3748  ;;  %v2567_v28 = vadd.f32 %v2551_v57, %v2481_v23  ;;  %3764 = vtanh.f32 %v1830_v1  ;;  %v8576_v36 = vld [vmem:[#allocation49_spill] sm:$0xff]  ;;  %v8577_v8 = vld [vmem:[#allocation92_spill] sm:$0xff] }
 0x1a9   :  { %v2174_v50 = vadd.f32 %v8496_v43, %v2156_v59  ;;  %v2414_v22 = vmul.f32 %v6168_v17, %v8362_v49  ;;  %v918_v51 = vmul.f32 %v3743_v48, %v8575_v52  ;;  %v1004_v31 = vmul.f32 %v3745_v6, %v8576_v36  ;;  %v8578_v43 = vld [vmem:[#allocation87_spill] sm:$0xff] }
 0x1aa   :  { %v3751_v63 = vpop.eup %3750  ;;  %v762_v53 = vadd.f32 %v746_v16, %v676_v5  ;;  %3766 = vtanh.f32 %v1916_v3  ;;  %v2653_v35 = vadd.f32 %v2637_v18, %v2567_v28  ;;  %v2260_v10 = vadd.f32 %v8498_v46, %v2242_v34  ;;  %v8579_v3 = vld [vmem:[#allocation90_spill] sm:$0xff]  ;;  %v8581_v36 = vld [vmem:[#allocation59_spill] sm:$0xff] }
 0x1ab   :  { %v3753_v24 = vpop.eup %3752  ;;  %3768 = vtanh.f32 %v2002_v40  ;;  %v2500_v57 = vmul.f32 %v6168_v17, %v8577_v8  ;;  %v1090_v23 = vmul.f32 %v3747_v58, %v8290_v13  ;;  %v2346_v16 = vadd.f32 %v8578_v43, %v2328_v20  ;;  %v8580_v34 = vld [vmem:[#allocation58_spill] sm:$0xff]  ;;  %v8582_v49 = vld [vmem:[#allocation95_spill] sm:$0xff] }
 0x1ac   :  { %v3755_v1 = vpop.eup %3754  ;;  %v848_v59 = vadd.f32 %v832_v62, %v762_v53  ;;  %3770 = vtanh.f32 %v2088_v4  ;;  %v2739_v48 = vadd.f32 %v2723_v26, %v2653_v35  ;;  %v1176_v6 = vmul.f32 %v3749_v14, %v8509_v60  ;;  %v8583_v4 = vld [vmem:[#allocation93_spill] sm:$0xff]  ;;  %v6314_v26 = vld [vmem:[%s7561_s0 + $0x48] sm:$0xff]  ;;  %v8584_v14 = vld [vmem:[#allocation10_spill] sm:$0xff] }
 0x1ad   :  { %v3757_v5 = vpop.eup %3756  ;;  %3772 = vtanh.f32 %v2174_v50  ;;  %v2432_v18 = vadd.f32 %v8579_v3, %v2414_v22  ;;  %v1262_v46 = vmul.f32 %v3751_v63, %v8580_v34  ;;  %v1348_v8 = vmul.f32 %v3753_v24, %v8581_v36  ;;  %v8585_v22 = vld [vmem:[#allocation64_spill] sm:$0xff]  ;;  %v8590_v34 = vld [vmem:[#allocation11_spill] sm:$0xff] }
 0x1ae   :  { %v3759_v40 = vpop.eup %3758  ;;  %v934_v28 = vadd.f32 %v918_v51, %v848_v59  ;;  %v2586_v62 = vmul.f32 %v6168_v17, %v8582_v49  ;;  %v2825_v58 = vadd.f32 %v2809_v39, %v2739_v48  ;;  %3774 = vtanh.f32 %v2260_v10  ;;  %v8586_v53 = vld [vmem:[#allocation12_spill] sm:$0xff]  ;;  %v8587_v39 = vld [vmem:[#allocation67_spill] sm:$0xff]  ;;  %v8588_v59 = vld [vmem:[#allocation70_spill] sm:$0xff] }
 0x1af   :  { %v2518_v20 = vadd.f32 %v8583_v4, %v2500_v57  ;;  %v93_v50 = vmul.f32 %v6314_v26, %v8584_v14  ;;  %v1434_v63 = vmul.f32 %v3755_v1, %v8585_v22  ;;  %3776 = vtanh.f32 %v2346_v16  ;;  %v8589_v36 = vld [vmem:[#allocation96_spill] sm:$0xff]  ;;  %v8592_v16 = vld [vmem:[#allocation14_spill] sm:$0xff]  ;;  %v8593_v22 = vld [vmem:[#allocation17_spill] sm:$0xff] }
 0x1b0   :  { %v1020_v51 = vadd.f32 %v1004_v31, %v934_v28  ;;  %v179_v24 = vmul.f32 %v6314_v26, %v8586_v53  ;;  %v2910_v35 = vmul.f32 0.5, %v2825_v58  ;;  %v1520_v10 = vmul.f32 %v3757_v5, %v8587_v39  ;;  %v8591_v28 = vld [vmem:[#allocation111_spill] sm:$0xff] }
 0x1b1   :  { %v1606_v57 = vmul.f32 %v3759_v40, %v8588_v59  ;;  %3778 = vtanh.f32 %v2432_v18  ;;  %v2604_v4 = vadd.f32 %v8589_v36, %v2586_v62  ;;  %v111_v3 = vadd.f32 %v8590_v34, %v93_v50  ;;  %v8594_v18 = vld [vmem:[#allocation98_spill] sm:$0xff]  ;;  %v8595_v62 = vld [vmem:[#allocation19_spill] sm:$0xff] }
 0x1b2   :  { %v1106_v48 = vadd.f32 %v1090_v23, %v1020_v51  ;;  %v197_v14 = vadd.f32 %v8524_v7, %v179_v24  ;;  %v3761_v31 = vpop.eup %3760  ;;  %v2932_v1 = vmul.f32 %v8591_v28, %v2910_v35  ;;  %3780 = vtanh.f32 %v2518_v20  ;;  %v8596_v51 = vld [vmem:[#allocation114_spill] sm:$0xff]  ;;  %v8597_v7 = vld [vmem:[#allocation101_spill] sm:$0xff]  ;;  %v8598_v35 = vld [vmem:[#allocation15_spill] sm:$0xff] }
 0x1b3   :  { %v265_v53 = vmul.f32 %v6314_v26, %v8592_v16  ;;  %v351_v5 = vmul.f32 %v6314_v26, %v8593_v22  ;;  %v3763_v39 = vpop.eup %3762  ;;  %v2672_v23 = vmul.f32 %v6168_v17, %v8594_v18  ;;  %3782 = vtanh.f32 %v111_v3  ;;  %v8599_v22 = vld [vmem:[#allocation18_spill] sm:$0xff]  ;;  %v8601_v18 = vld [vmem:[#allocation23_spill] sm:$0xff] }
 0x1b4   :  { %v1192_v40 = vadd.f32 %v1176_v6, %v1106_v48  ;;  %v437_v50 = vmul.f32 %v6314_v26, %v8595_v62  ;;  %v2948_v24 = vsub.f32 %v8596_v51, %v2932_v1  ;;  %v2758_v20 = vmul.f32 %v6168_v17, %v8597_v7  ;;  %v8600_v48 = vld [vmem:[#allocation20_spill] sm:$0xff]  ;;  %v8602_v1 = vld [vmem:[#allocation27_spill] sm:$0xff]  ;;  %v8603_v7 = vld [vmem:[#allocation73_spill] sm:$0xff] }
 0x1b5   :  { %3784 = vtanh.f32 %v197_v14  ;;  %v283_v28 = vadd.f32 %v8598_v35, %v265_v53  ;;  %v3765_v16 = vpop.eup %3764  ;;  %v369_v6 = vadd.f32 %v8599_v22, %v351_v5  ;;  %v523_v62 = vmul.f32 %v6314_v26, %v8601_v18  ;;  %v8622_v43 = vld [vmem:[#allocation47_spill] sm:$0xff] }
 0x1b6   :  { %v1278_v34 = vadd.f32 %v1262_v46, %v1192_v40  ;;  %3786 = vtanh.f32 %v2604_v4  ;;  %v455_v59 = vadd.f32 %v8600_v48, %v437_v50  ;;  %v2964_v3 = vmul.f32 %v2948_v24, %v2825_v58  ;;  %v8604_v46 = vld [vmem:[#allocation31_spill] sm:$0xff]  ;;  %v8606_v58 = vld [vmem:[#allocation24_spill] sm:$0xff] }
 0x1b7   :  { %v3767_v36 = vpop.eup %3766  ;;  %3788 = vtanh.f32 %v283_v28  ;;  %v609_v51 = vmul.f32 %v6314_v26, %v8602_v1  ;;  %v1692_v53 = vmul.f32 %v3761_v31, %v8603_v7  ;;  %v695_v4 = vmul.f32 %v6314_v26, %v8604_v46  ;;  %v8605_v40 = vld [vmem:[#allocation99_spill] sm:$0xff]  ;;  %v8607_v24 = vld [vmem:[#allocation28_spill] sm:$0xff] }
 0x1b8   :  { %v3769_v17 = vpop.eup %3768  ;;  %v1364_v14 = vadd.f32 %v1348_v8, %v1278_v34  ;;  %3790 = vtanh.f32 %v369_v6  ;;  %2987 = vadd.xlane.f32.xlu0 %v2964_v3  ;;  %v2690_v50 = vadd.f32 %v8605_v40, %v2672_v23  ;;  %v541_v28 = vadd.f32 %v8606_v58, %v523_v62  ;;  %v8608_v8 = vld [vmem:[#allocation33_spill] sm:$0xff]  ;;  %v8609_v31 = vld [vmem:[#allocation35_spill] sm:$0xff]  ;;  %v8610_v46 = vld [vmem:[#allocation76_spill] sm:$0xff] }
 0x1b9   :  { %v3771_v5 = vpop.eup %3770  ;;  %3792 = vtanh.f32 %v455_v59  ;;  %v627_v48 = vadd.f32 %v8607_v24, %v609_v51  ;;  %v713_v1 = vadd.f32 %v8545_v61, %v695_v4  ;;  %v781_v34 = vmul.f32 %v6314_v26, %v8608_v8  ;;  %v8611_v3 = vld [vmem:[#allocation102_spill] sm:$0xff]  ;;  %v8614_v4 = vld [vmem:[#allocation41_spill] sm:$0xff]  ;;  %v8615_v24 = vld [vmem:[#allocation79_spill] sm:$0xff] }
 0x1ba   :  { %v3773_v18 = vpop.eup %3772  ;;  %v1450_v22 = vadd.f32 %v1434_v63, %v1364_v14  ;;  %v867_v6 = vmul.f32 %v6314_v26, %v8609_v31  ;;  %v1778_v7 = vmul.f32 %v3763_v39, %v8610_v46  ;;  %v2776_v35 = vadd.f32 %v8611_v3, %v2758_v20  ;;  %v8612_v59 = vld [vmem:[#allocation38_spill] sm:$0xff]  ;;  %v8617_v39 = vld [vmem:[#allocation36_spill] sm:$0xff] }
 0x1bb   :  { %3794 = vtanh.f32 %v541_v28  ;;  %v953_v23 = vmul.f32 %v6314_v26, %v8612_v59  ;;  %v3775_v62 = vpop.eup %3774  ;;  %v8613_v63 = vld [vmem:[#allocation34_spill] sm:$0xff]  ;;  %v1039_v61 = vmul.f32 %v6314_v26, %v8614_v4  ;;  %v1864_v58 = vmul.f32 %v3765_v16, %v8615_v24  ;;  %v8618_v59 = vld [vmem:[#allocation39_spill] sm:$0xff] }
 0x1bc   :  { %v1536_v51 = vadd.f32 %v1520_v10, %v1450_v22  ;;  %3796 = vtanh.f32 %v627_v48  ;;  %v799_v14 = vadd.f32 %v8613_v63, %v781_v34  ;;  %v3777_v8 = vpop.eup %3776  ;;  %v8616_v31 = vld [vmem:[#allocation82_spill] sm:$0xff]  ;;  %v885_v20 = vadd.f32 %v8617_v39, %v867_v6  ;;  %v8619_v22 = vld [vmem:[#allocation44_spill] sm:$0xff]  ;;  %v8620_v48 = vld [vmem:[#allocation85_spill] sm:$0xff] }
 0x1bd   :  { %v1950_v40 = vmul.f32 %v3767_v36, %v8616_v31  ;;  %3798 = vtanh.f32 %v2690_v50  ;;  %v971_v3 = vadd.f32 %v8618_v59, %v953_v23  ;;  %v1125_v10 = vmul.f32 %v6314_v26, %v8619_v22  ;;  %v8621_v63 = vld [vmem:[#allocation88_spill] sm:$0xff]  ;;  %v8623_v6 = vld [vmem:[#allocation42_spill] sm:$0xff] }
 0x1be   :  { %v3779_v28 = vpop.eup %3778  ;;  %v1622_v46 = vadd.f32 %v1606_v57, %v1536_v51  ;;  %3800 = vtanh.f32 %v713_v1  ;;  %v2036_v34 = vmul.f32 %v3769_v17, %v8620_v48  ;;  %v2122_v4 = vmul.f32 %v3771_v5, %v8621_v63  ;;  %v8624_v57 = vld [vmem:[#allocation50_spill] sm:$0xff]  ;;  %v8625_v51 = vld [vmem:[#allocation91_spill] sm:$0xff]  ;;  %v8627_v48 = vld [vmem:[#allocation53_spill] sm:$0xff] }
 0x1bf   :  { %3802 = vtanh.f32 %v2776_v35  ;;  %v1211_v16 = vmul.f32 %v6314_v26, %v8622_v43  ;;  %v3781_v36 = vpop.eup %3780  ;;  %v1057_v39 = vadd.f32 %v8623_v6, %v1039_v61  ;;  %v1297_v1 = vmul.f32 %v6314_v26, %v8624_v57  ;;  %v8626_v22 = vld [vmem:[#allocation46_spill] sm:$0xff]  ;;  %v8629_v6 = vld [vmem:[#allocation56_spill] sm:$0xff] }
 0x1c0   :  { %v1708_v50 = vadd.f32 %v1692_v53, %v1622_v46  ;;  %3804 = vtanh.f32 %v799_v14  ;;  %v3783_v23 = vpop.eup %3782  ;;  %v2208_v59 = vmul.f32 %v3773_v18, %v8625_v51  ;;  %v1143_v17 = vadd.f32 %v8626_v22, %v1125_v10  ;;  %v8628_v14 = vld [vmem:[#allocation48_spill] sm:$0xff] }
 0x1c1   :  { %3806 = vtanh.f32 %v885_v20  ;;  %v1383_v35 = vmul.f32 %v6314_v26, %v8627_v48  ;;  %v2294_v43 = vmul.f32 %v3775_v62, %v8483_v27  ;;  %v145_v53 = vmul.f32 %v3783_v23, %v8559_v30  ;;  %v8630_v20 = vld [vmem:[#allocation60_spill] sm:$0xff] }
 0x1c2   :  { %v3785_v5 = vpop.eup %3784  ;;  %v1794_v63 = vadd.f32 %v1778_v7, %v1708_v50  ;;  %3808 = vtanh.f32 %v971_v3  ;;  %v1229_v57 = vadd.f32 %v8628_v14, %v1211_v16  ;;  %v1469_v18 = vmul.f32 %v6314_v26, %v8629_v6 }
 0x1c3   :  { %v3787_v61 = vpop.eup %3786  ;;  %v231_v46 = vmul.f32 %v3785_v5, %v8560_v21  ;;  %v1555_v10 = vmul.f32 %v6314_v26, %v8630_v20  ;;  %v161_v7 = vadd.f32 %v145_v53, %v8562_v33  ;;  %3810 = vtanh.f32 %v1057_v39  ;;  %v8631_v39 = vld [vmem:[#allocation61_spill] sm:$0xff] }
 0x1c4   :  { %v3789_v22 = vpop.eup %3788  ;;  %v1880_v48 = vadd.f32 %v1864_v58, %v1794_v63  ;;  %v1315_v62 = vadd.f32 %v8480_v19, %v1297_v1  ;;  %3812 = vtanh.f32 %v1143_v17  ;;  %v1401_v23 = vadd.f32 %v8561_v37, %v1383_v35  ;;  %v8632_v53 = vld [vmem:[#allocation65_spill] sm:$0xff] }
 0x1c5   :  { %v3791_v50 = vpop.eup %3790  ;;  %v317_v3 = vmul.f32 %v3789_v22, %v8563_v42  ;;  %v1641_v16 = vmul.f32 %v6314_v26, %v8564_v56  ;;  %v247_v30 = vadd.f32 %v231_v46, %v161_v7  ;;  %v1487_v58 = vadd.f32 %v8482_v41, %v1469_v18 }
 0x1c6   :  { %v3793_v5 = vpop.eup %3792  ;;  %v1966_v21 = vadd.f32 %v1950_v40, %v1880_v48  ;;  %v403_v20 = vmul.f32 %v3791_v50, %v8193_v55  ;;  %v2380_v63 = vmul.f32 %v3777_v8, %v8485_v32  ;;  %3814 = vtanh.f32 %v1229_v57  ;;  %v8634_v50 = vld [vmem:[#allocation71_spill] sm:$0xff] }
 0x1c7   :  { %v1573_v1 = vadd.f32 %v8631_v39, %v1555_v10  ;;  %v1727_v22 = vmul.f32 %v6314_v26, %v8632_v53  ;;  %v333_v42 = vadd.f32 %v317_v3, %v247_v30  ;;  %v489_v56 = vmul.f32 %v3793_v5, %v8417_v54  ;;  %v8633_v30 = vld [vmem:[#allocation103_spill] sm:$0xff] }
 0x1c8   :  { %v3795_v17 = vpop.eup %3794  ;;  %v2052_v35 = vadd.f32 %v2036_v34, %v1966_v21  ;;  %3816 = vtanh.f32 %v1315_v62  ;;  %v2466_v48 = vmul.f32 %v3779_v28, %v8487_v45  ;;  %v1659_v46 = vadd.f32 %v8567_v12, %v1641_v16  ;;  %v8635_v16 = vld [vmem:[#allocation104_spill] sm:$0xff] }
 0x1c9   :  { %v3797_v40 = vpop.eup %3796  ;;  %3818 = vtanh.f32 %v1401_v23  ;;  %v1813_v8 = vmul.f32 %v6314_v26, %v8566_v15  ;;  %v419_v10 = vadd.f32 %v403_v20, %v333_v42  ;;  %v575_v7 = vmul.f32 %v3795_v17, %v8486_v38 }
 0x1ca   :  { %v3799_v57 = vpop.eup %3798  ;;  %v2138_v18 = vadd.f32 %v2122_v4, %v2052_v35  ;;  %3820 = vtanh.f32 %v1487_v58  ;;  %v2552_v34 = vmul.f32 %v3781_v36, %v8633_v30  ;;  %v1745_v62 = vadd.f32 %v8569_v9, %v1727_v22  ;;  %v8636_v36 = vld [vmem:[#allocation74_spill] sm:$0xff] }
 0x1cb   :  { %v3801_v21 = vpop.eup %3800  ;;  %3822 = vtanh.f32 %v1573_v1  ;;  %v1899_v28 = vmul.f32 %v6314_v26, %v8634_v50  ;;  %v2638_v5 = vmul.f32 %v3787_v61, %v8635_v16  ;;  %v505_v12 = vadd.f32 %v489_v56, %v419_v10 }
 0x1cc   :  { %v3803_v3 = vpop.eup %3802  ;;  %v2224_v23 = vadd.f32 %v2208_v59, %v2138_v18  ;;  %v661_v4 = vmul.f32 %v3797_v40, %v8422_v44  ;;  %v2724_v20 = vmul.f32 %v3799_v57, %v8495_v25  ;;  %3824 = vtanh.f32 %v1659_v46  ;;  %v8637_v59 = vld [vmem:[#allocation77_spill] sm:$0xff]  ;;  %v8638_v18 = vld [vmem:[#allocation106_spill] sm:$0xff]  ;;  %v8639_v46 = vld [vmem:[#allocation80_spill] sm:$0xff] }
 0x1cd   :  { %v3805_v42 = vpop.eup %3804  ;;  %v1831_v58 = vadd.f32 %v8571_v11, %v1813_v8  ;;  %v1985_v1 = vmul.f32 %v6314_v26, %v8636_v36  ;;  %v591_v35 = vadd.f32 %v575_v7, %v505_v12  ;;  %v747_v38 = vmul.f32 %v3801_v21, %v8426_v47  ;;  %v8640_v21 = vld [vmem:[#allocation75_spill] sm:$0xff] }
 0x1ce   :  { %v3807_v22 = vpop.eup %3806  ;;  %v2310_v17 = vadd.f32 %v2294_v43, %v2224_v23  ;;  %v2071_v61 = vmul.f32 %v6314_v26, %v8637_v59  ;;  %v2810_v40 = vmul.f32 %v3803_v3, %v8638_v18  ;;  %3826 = vtanh.f32 %v1745_v62  ;;  %v8641_v3 = vld [vmem:[#allocation86_spill] sm:$0xff] }
 0x1cf   :  { %v3809_v56 = vpop.eup %3808  ;;  %v1917_v57 = vadd.f32 %v8427_v2, %v1899_v28  ;;  %v2157_v8 = vmul.f32 %v6314_v26, %v8639_v46  ;;  %v677_v44 = vadd.f32 %v661_v4, %v591_v35  ;;  %v833_v11 = vmul.f32 %v3805_v42, %v8572_v0  ;;  %v8642_v2 = vld [vmem:[#allocation78_spill] sm:$0xff]  ;;  %v8643_v4 = vld [vmem:[#allocation89_spill] sm:$0xff] }
 0x1d0   :  { %v2396_v10 = vadd.f32 %v2380_v63, %v2310_v17  ;;  %v2243_v43 = vmul.f32 %v6314_v26, %v8494_v29  ;;  %v3811_v12 = vpop.eup %3810  ;;  %v919_v7 = vmul.f32 %v3807_v22, %v8575_v52  ;;  %3828 = vtanh.f32 %v1831_v58  ;;  %v8644_v17 = vld [vmem:[#allocation49_spill] sm:$0xff]  ;;  %v8646_v22 = vld [vmem:[#allocation92_spill] sm:$0xff] }
 0x1d1   :  { %v2003_v23 = vadd.f32 %v8640_v21, %v1985_v1  ;;  %v2329_v62 = vmul.f32 %v6314_v26, %v8641_v3  ;;  %v3813_v28 = vpop.eup %3812  ;;  %v763_v18 = vadd.f32 %v747_v38, %v677_v44  ;;  %v2089_v63 = vadd.f32 %v8642_v2, %v2071_v61  ;;  %v8645_v0 = vld [vmem:[#allocation81_spill] sm:$0xff]  ;;  %v8647_v3 = vld [vmem:[#allocation84_spill] sm:$0xff] }
 0x1d2   :  { %v2482_v47 = vadd.f32 %v2466_v48, %v2396_v10  ;;  %v2415_v42 = vmul.f32 %v6314_v26, %v8643_v4  ;;  %v1005_v35 = vmul.f32 %v3809_v56, %v8644_v17  ;;  %3830 = vtanh.f32 %v1917_v57  ;;  %v8648_v56 = vld [vmem:[#allocation87_spill] sm:$0xff]  ;;  %v8652_v4 = vld [vmem:[#allocation98_spill] sm:$0xff] }
 0x1d3   :  { %v2175_v29 = vadd.f32 %v8645_v0, %v2157_v8  ;;  %v2501_v58 = vmul.f32 %v6314_v26, %v8646_v22  ;;  %v3815_v1 = vpop.eup %3814  ;;  %v849_v21 = vadd.f32 %v833_v11, %v763_v18  ;;  %v2261_v46 = vadd.f32 %v8647_v3, %v2243_v43  ;;  %v8649_v22 = vld [vmem:[#allocation90_spill] sm:$0xff]  ;;  %v8651_v43 = vld [vmem:[#allocation93_spill] sm:$0xff] }
 0x1d4   :  { %v2568_v52 = vadd.f32 %v2552_v34, %v2482_v47  ;;  %v2587_v44 = vmul.f32 %v6314_v26, %v8582_v49  ;;  %v1091_v48 = vmul.f32 %v3811_v12, %v8290_v13  ;;  %v1177_v61 = vmul.f32 %v3813_v28, %v8509_v60  ;;  %v8650_v34 = vld [vmem:[#allocation58_spill] sm:$0xff] }
 0x1d5   :  { %v3817_v38 = vpop.eup %3816  ;;  %3832 = vtanh.f32 %v2003_v23  ;;  %v2347_v57 = vadd.f32 %v8648_v56, %v2329_v62  ;;  %v935_v17 = vadd.f32 %v919_v7, %v849_v21  ;;  %v2433_v47 = vadd.f32 %v8649_v22, %v2415_v42  ;;  %v8653_v62 = vld [vmem:[#allocation96_spill] sm:$0xff] }
 0x1d6   :  { %v3819_v8 = vpop.eup %3818  ;;  %v2654_v10 = vadd.f32 %v2638_v5, %v2568_v52  ;;  %3834 = vtanh.f32 %v2089_v63  ;;  %v1263_v18 = vmul.f32 %v3815_v1, %v8650_v34  ;;  %v2519_v49 = vadd.f32 %v8651_v43, %v2501_v58  ;;  %v8654_v52 = vld [vmem:[#allocation59_spill] sm:$0xff]  ;;  %v8655_v7 = vld [vmem:[#allocation64_spill] sm:$0xff]  ;;  %v8656_v63 = vld [vmem:[#allocation101_spill] sm:$0xff] }
 0x1d7   :  { %v3821_v11 = vpop.eup %3820  ;;  %3836 = vtanh.f32 %v2175_v29  ;;  %v2673_v12 = vmul.f32 %v6314_v26, %v8652_v4  ;;  %v1021_v23 = vadd.f32 %v1005_v35, %v935_v17  ;;  %v2605_v60 = vadd.f32 %v8653_v62, %v2587_v44  ;;  %v8657_v34 = vld [vmem:[#allocation99_spill] sm:$0xff]  ;;  %v8659_v17 = vld [vmem:[#allocation70_spill] sm:$0xff]  ;;  %v6459_v35 = vld [vmem:[%s7561_s0 + $0x50] sm:$0xff] }
 0x1d8   :  { %v3823_v13 = vpop.eup %3822  ;;  %v2740_v28 = vadd.f32 %v2724_v20, %v2654_v10  ;;  %3838 = vtanh.f32 %v2261_v46  ;;  %v1349_v5 = vmul.f32 %v3817_v38, %v8654_v52  ;;  %v1435_v21 = vmul.f32 %v3819_v8, %v8655_v7  ;;  %v8658_v43 = vld [vmem:[#allocation67_spill] sm:$0xff]  ;;  %v8660_v44 = vld [vmem:[#allocation10_spill] sm:$0xff] }
 0x1d9   :  { %3840 = vtanh.f32 %v2347_v57  ;;  %v2759_v42 = vmul.f32 %v6314_v26, %v8656_v63  ;;  %v3825_v29 = vpop.eup %3824  ;;  %v1107_v58 = vadd.f32 %v1091_v48, %v1021_v23  ;;  %v2691_v4 = vadd.f32 %v8657_v34, %v2673_v12  ;;  %v8661_v48 = vld [vmem:[#allocation12_spill] sm:$0xff]  ;;  %v8662_v10 = vld [vmem:[#allocation102_spill] sm:$0xff] }
 0x1da   :  { %v2826_v1 = vadd.f32 %v2810_v40, %v2740_v28  ;;  %3842 = vtanh.f32 %v2433_v47  ;;  %v1521_v20 = vmul.f32 %v3821_v11, %v8658_v43  ;;  %v1607_v46 = vmul.f32 %v3823_v13, %v8659_v17  ;;  %v8663_v11 = vld [vmem:[#allocation11_spill] sm:$0xff]  ;;  %v8665_v28 = vld [vmem:[#allocation17_spill] sm:$0xff] }
 0x1db   :  { %3844 = vtanh.f32 %v2519_v49  ;;  %v94_v38 = vmul.f32 %v6459_v35, %v8660_v44  ;;  %v3827_v26 = vpop.eup %3826  ;;  %v1193_v40 = vadd.f32 %v1177_v61, %v1107_v58  ;;  %v180_v8 = vmul.f32 %v6459_v35, %v8661_v48  ;;  %v8664_v49 = vld [vmem:[#allocation14_spill] sm:$0xff]  ;;  %v8666_v43 = vld [vmem:[#allocation111_spill] sm:$0xff]  ;;  %v8667_v61 = vld [vmem:[#allocation13_spill] sm:$0xff] }
 0x1dc   :  { %v2911_v57 = vmul.f32 0.5, %v2826_v1  ;;  %3846 = vtanh.f32 %v2605_v60  ;;  %v2777_v47 = vadd.f32 %v8662_v10, %v2759_v42  ;;  %v266_v12 = vmul.f32 %v6459_v35, %v8664_v49  ;;  %v8668_v58 = vld [vmem:[#allocation15_spill] sm:$0xff]  ;;  %v8669_v44 = vld [vmem:[#allocation18_spill] sm:$0xff]  ;;  %v8671_v49 = vld [vmem:[#allocation109_spill] sm:$0xff] }
 0x1dd   :  { %v112_v13 = vadd.f32 %v8663_v11, %v94_v38  ;;  %v352_v23 = vmul.f32 %v6459_v35, %v8665_v28  ;;  %v3829_v17 = vpop.eup %3828  ;;  %v1279_v52 = vadd.f32 %v1263_v18, %v1193_v40  ;;  %3848 = vtanh.f32 %v2691_v4  ;;  %v8670_v10 = vld [vmem:[#allocation19_spill] sm:$0xff]  ;;  %v8673_v18 = vld [vmem:[#allocation73_spill] sm:$0xff] }
 0x1de   :  { %v2933_v7 = vmul.f32 %v8666_v43, %v2911_v57  ;;  %v198_v60 = vadd.f32 %v8667_v61, %v180_v8  ;;  %v284_v48 = vadd.f32 %v8668_v58, %v266_v12  ;;  %v438_v38 = vmul.f32 %v6459_v35, %v8670_v10  ;;  %v8672_v28 = vld [vmem:[#allocation23_spill] sm:$0xff]  ;;  %v8674_v57 = vld [vmem:[#allocation20_spill] sm:$0xff] }
 0x1df   :  { %3850 = vtanh.f32 %v112_v13  ;;  %v370_v42 = vadd.f32 %v8669_v44, %v352_v23  ;;  %v3831_v11 = vpop.eup %3830  ;;  %v1365_v34 = vadd.f32 %v1349_v5, %v1279_v52  ;;  %v524_v43 = vmul.f32 %v6459_v35, %v8672_v28  ;;  %v8675_v8 = vld [vmem:[#allocation27_spill] sm:$0xff]  ;;  %v8676_v58 = vld [vmem:[#allocation76_spill] sm:$0xff] }
 0x1e0   :  { %v2949_v63 = vsub.f32 %v8671_v49, %v2933_v7  ;;  %3852 = vtanh.f32 %v198_v60  ;;  %v1693_v4 = vmul.f32 %v3825_v29, %v8673_v18  ;;  %v456_v40 = vadd.f32 %v8674_v57, %v438_v38  ;;  %v8677_v5 = vld [vmem:[#allocation24_spill] sm:$0xff]  ;;  %v8679_v18 = vld [vmem:[#allocation31_spill] sm:$0xff] }
 0x1e1   :  { %3854 = vtanh.f32 %v284_v48  ;;  %v610_v13 = vmul.f32 %v6459_v35, %v8675_v8  ;;  %v1451_v44 = vadd.f32 %v1435_v21, %v1365_v34  ;;  %v1779_v10 = vmul.f32 %v3827_v26, %v8676_v58  ;;  %v8678_v60 = vld [vmem:[#allocation28_spill] sm:$0xff] }
 0x1e2   :  { %v3833_v12 = vpop.eup %3832  ;;  %v2965_v23 = vmul.f32 %v2949_v63, %v2826_v1  ;;  %3856 = vtanh.f32 %v370_v42  ;;  %v1865_v52 = vmul.f32 %v3829_v17, %v8615_v24  ;;  %v542_v49 = vadd.f32 %v8677_v5, %v524_v43  ;;  %v8680_v63 = vld [vmem:[#allocation33_spill] sm:$0xff]  ;;  %v8681_v17 = vld [vmem:[#allocation35_spill] sm:$0xff]  ;;  %v8682_v42 = vld [vmem:[#allocation38_spill] sm:$0xff] }
 0x1e3   :  { %v3835_v7 = vpop.eup %3834  ;;  %3858 = vtanh.f32 %v456_v40  ;;  %v628_v29 = vadd.f32 %v8678_v60, %v610_v13  ;;  %v1537_v38 = vadd.f32 %v1521_v20, %v1451_v44  ;;  %v696_v8 = vmul.f32 %v6459_v35, %v8679_v18  ;;  %v8683_v20 = vld [vmem:[#allocation85_spill] sm:$0xff]  ;;  %v8685_v24 = vld [vmem:[#allocation32_spill] sm:$0xff] }
 0x1e4   :  { %v3837_v48 = vpop.eup %3836  ;;  %2989 = vadd.xlane.f32.xlu1 %v2965_v23  ;;  %3860 = vtanh.f32 %v2777_v47  ;;  %v782_v34 = vmul.f32 %v6459_v35, %v8680_v63  ;;  %v1951_v1 = vmul.f32 %v3831_v11, %v8616_v31  ;;  %v868_v26 = vmul.f32 %v6459_v35, %v8681_v17  ;;  %v8684_v47 = vld [vmem:[#allocation88_spill] sm:$0xff]  ;;  %v8686_v63 = vld [vmem:[#allocation34_spill] sm:$0xff]  ;;  %v8688_v31 = vld [vmem:[#allocation41_spill] sm:$0xff] }
 0x1e5   :  { %v3839_v21 = vpop.eup %3838  ;;  %3862 = vtanh.f32 %v542_v49  ;;  %v954_v43 = vmul.f32 %v6459_v35, %v8682_v42  ;;  %v1623_v13 = vadd.f32 %v1607_v46, %v1537_v38  ;;  %v2037_v44 = vmul.f32 %v3833_v12, %v8683_v20  ;;  %v8687_v11 = vld [vmem:[#allocation36_spill] sm:$0xff]  ;;  %v8689_v42 = vld [vmem:[#allocation39_spill] sm:$0xff] }
 0x1e6   :  { %v3841_v40 = vpop.eup %3840  ;;  %v2123_v23 = vmul.f32 %v3835_v7, %v8684_v47  ;;  %v714_v58 = vadd.f32 %v8685_v24, %v696_v8  ;;  %3864 = vtanh.f32 %v628_v29  ;;  %v800_v5 = vadd.f32 %v8686_v63, %v782_v34  ;;  %v8690_v46 = vld [vmem:[#allocation44_spill] sm:$0xff]  ;;  %v8691_v38 = vld [vmem:[#allocation47_spill] sm:$0xff]  ;;  %v8692_v34 = vld [vmem:[#allocation42_spill] sm:$0xff] }
 0x1e7   :  { %v3843_v60 = vpop.eup %3842  ;;  %v886_v49 = vadd.f32 %v8687_v11, %v868_v26  ;;  %v1040_v17 = vmul.f32 %v6459_v35, %v8688_v31  ;;  %v1709_v28 = vadd.f32 %v1693_v4, %v1623_v13  ;;  %v972_v57 = vadd.f32 %v8689_v42, %v954_v43  ;;  %v8693_v26 = vld [vmem:[#allocation50_spill] sm:$0xff] }
 0x1e8   :  { %v3845_v18 = vpop.eup %3844  ;;  %v1126_v12 = vmul.f32 %v6459_v35, %v8690_v46  ;;  %v1212_v7 = vmul.f32 %v6459_v35, %v8691_v38  ;;  %v2209_v29 = vmul.f32 %v3837_v48, %v8625_v51  ;;  %3866 = vtanh.f32 %v714_v58  ;;  %v8694_v38 = vld [vmem:[#allocation46_spill] sm:$0xff]  ;;  %v8695_v58 = vld [vmem:[#allocation53_spill] sm:$0xff] }
 0x1e9   :  { %v3847_v8 = vpop.eup %3846  ;;  %v1058_v47 = vadd.f32 %v8692_v34, %v1040_v17  ;;  %v1298_v20 = vmul.f32 %v6459_v35, %v8693_v26  ;;  %v1795_v11 = vadd.f32 %v1779_v10, %v1709_v28  ;;  %v2295_v4 = vmul.f32 %v3839_v21, %v8483_v27 }
 0x1ea   :  { %v6515_v43 = vmul.f32 %v3841_v40, %v8485_v32  ;;  %3868 = vtanh.f32 %v800_v5  ;;  %v3849_v13 = vpop.eup %3848  ;;  %v6518_v46 = vmul.f32 %v3843_v60, %v8487_v45  ;;  %v1144_v48 = vadd.f32 %v8694_v38, %v1126_v12  ;;  %v8696_v60 = vld [vmem:[#allocation21_spill] sm:$0xff]  ;;  %v8697_v38 = vld [vmem:[#allocation22_spill] sm:$0xff] }
 0x1eb   :  { %3870 = vtanh.f32 %v886_v49  ;;  %v1384_v17 = vmul.f32 %v6459_v35, %v8695_v58  ;;  %v1881_v51 = vadd.f32 %v1865_v52, %v1795_v11  ;;  %v1230_v10 = vadd.f32 %v8628_v14, %v1212_v7  ;;  %v8698_v52 = vld [vmem:[#allocation60_spill] sm:$0xff]  ;;  %v8699_v14 = vld [vmem:[#allocation25_spill] sm:$0xff] }
 0x1ec   :  { %v3851_v34 = vpop.eup %3850  ;;  %3872 = vtanh.f32 %v972_v57  ;;  %v1470_v28 = vmul.f32 %v6459_v35, %v8629_v6  ;;  %v6527_v5 = vmul.f32 %v3845_v18, %v8633_v30  ;;  %v1316_v49 = vadd.f32 %v8480_v19, %v1298_v20  ;;  %v8700_v30 = vld [vmem:[#allocation62_spill] sm:$0xff] }
 0x1ed   :  { %v3853_v21 = vpop.eup %3852  ;;  %v146_v40 = vmul.f32 %v3851_v34, %v8696_v60  ;;  %3874 = vtanh.f32 %v1058_v47  ;;  %v1967_v45 = vadd.f32 %v1951_v1, %v1881_v51  ;;  %v1402_v57 = vadd.f32 %v8561_v37, %v1384_v17 }
 0x1ee   :  { %v3855_v12 = vpop.eup %3854  ;;  %v232_v32 = vmul.f32 %v3853_v21, %v8697_v38  ;;  %v1556_v11 = vmul.f32 %v6459_v35, %v8698_v52  ;;  %3876 = vtanh.f32 %v1144_v48  ;;  %v1642_v47 = vmul.f32 %v6459_v35, %v8700_v30 }
 0x1ef   :  { %v3857_v7 = vpop.eup %3856  ;;  %v162_v6 = vadd.f32 %v146_v40, %v8562_v33  ;;  %v318_v18 = vmul.f32 %v3855_v12, %v8699_v14  ;;  %v2053_v20 = vadd.f32 %v2037_v44, %v1967_v45  ;;  %v6540_v51 = vmul.f32 %v3847_v8, %v8635_v16  ;;  %v8703_v16 = vld [vmem:[#allocation69_spill] sm:$0xff] }
 0x1f0   :  { %v3859_v34 = vpop.eup %3858  ;;  %3878 = vtanh.f32 %v1230_v10  ;;  %v1488_v1 = vadd.f32 %v8482_v41, %v1470_v28  ;;  %v404_v37 = vmul.f32 %v3857_v7, %v8193_v55  ;;  %v1728_v40 = vmul.f32 %v6459_v35, %v8632_v53  ;;  %v8701_v10 = vld [vmem:[#allocation63_spill] sm:$0xff] }
 0x1f1   :  { %v3861_v17 = vpop.eup %3860  ;;  %v248_v21 = vadd.f32 %v232_v32, %v162_v6  ;;  %3880 = vtanh.f32 %v1316_v49  ;;  %v2139_v12 = vadd.f32 %v2123_v23, %v2053_v20  ;;  %v1574_v30 = vadd.f32 %v8631_v39, %v1556_v11  ;;  %v8702_v11 = vld [vmem:[#allocation30_spill] sm:$0xff] }
 0x1f2   :  { %v3863_v48 = vpop.eup %3862  ;;  %3882 = vtanh.f32 %v1402_v57  ;;  %v1814_v45 = vmul.f32 %v6459_v35, %v8566_v15  ;;  %v490_v8 = vmul.f32 %v3859_v34, %v8417_v54  ;;  %v1660_v28 = vadd.f32 %v8701_v10, %v1642_v47 }
 0x1f3   :  { %v334_v44 = vadd.f32 %v318_v18, %v248_v21  ;;  %v1900_v32 = vmul.f32 %v6459_v35, %v8634_v50  ;;  %v3865_v6 = vpop.eup %3864  ;;  %v2225_v49 = vadd.f32 %v2209_v29, %v2139_v12  ;;  %v2725_v7 = vmul.f32 %v3849_v13, %v8495_v25  ;;  %v8704_v29 = vld [vmem:[#allocation80_spill] sm:$0xff] }
 0x1f4   :  { %3884 = vtanh.f32 %v1488_v1  ;;  %v1746_v23 = vadd.f32 %v8569_v9, %v1728_v40  ;;  %v576_v20 = vmul.f32 %v3863_v48, %v8702_v11  ;;  %v1986_v18 = vmul.f32 %v6459_v35, %v8636_v36  ;;  %v8705_v40 = vld [vmem:[#allocation37_spill] sm:$0xff]  ;;  %v8706_v48 = vld [vmem:[#allocation72_spill] sm:$0xff]  ;;  %v8707_v9 = vld [vmem:[#allocation106_spill] sm:$0xff] }
 0x1f5   :  { %v420_v57 = vadd.f32 %v404_v37, %v334_v44  ;;  %v2072_v34 = vmul.f32 %v6459_v35, %v8637_v59  ;;  %v3867_v47 = vpop.eup %3866  ;;  %v2311_v21 = vadd.f32 %v2295_v4, %v2225_v49  ;;  %3886 = vtanh.f32 %v1574_v30  ;;  %v8708_v4 = vld [vmem:[#allocation75_spill] sm:$0xff] }
 0x1f6   :  { %v1832_v50 = vadd.f32 %v8703_v16, %v1814_v45  ;;  %v2158_v13 = vmul.f32 %v6459_v35, %v8704_v29  ;;  %v662_v37 = vmul.f32 %v3865_v6, %v8705_v40  ;;  %3888 = vtanh.f32 %v1660_v28  ;;  %v8709_v16 = vld [vmem:[#allocation40_spill] sm:$0xff] }
 0x1f7   :  { %v3869_v1 = vpop.eup %3868  ;;  %v506_v12 = vadd.f32 %v490_v8, %v420_v57  ;;  %v1918_v44 = vadd.f32 %v8706_v48, %v1900_v32  ;;  %v2397_v36 = vadd.f32 %v6515_v43, %v2311_v21  ;;  %v2811_v59 = vmul.f32 %v3861_v17, %v8707_v9  ;;  %v8710_v8 = vld [vmem:[#allocation83_spill] sm:$0xff]  ;;  %v8711_v57 = vld [vmem:[#allocation86_spill] sm:$0xff]  ;;  %v8713_v9 = vld [vmem:[#allocation89_spill] sm:$0xff] }
 0x1f8   :  { %v3871_v25 = vpop.eup %3870  ;;  %3890 = vtanh.f32 %v1746_v23  ;;  %v2004_v30 = vadd.f32 %v8708_v4, %v1986_v18  ;;  %v748_v11 = vmul.f32 %v3867_v47, %v8709_v16  ;;  %v2090_v29 = vadd.f32 %v8642_v2, %v2072_v34  ;;  %v8712_v18 = vld [vmem:[#allocation43_spill] sm:$0xff] }
 0x1f9   :  { %v3873_v49 = vpop.eup %3872  ;;  %v592_v45 = vadd.f32 %v576_v20, %v506_v12  ;;  %v2244_v6 = vmul.f32 %v6459_v35, %v8710_v8  ;;  %v2483_v32 = vadd.f32 %v6518_v46, %v2397_v36  ;;  %3892 = vtanh.f32 %v1832_v50  ;;  %v6582_v46 = vpop.permute.xlu0 %2863 }
 0x1fa   :  { %v3875_v28 = vpop.eup %3874  ;;  %v2176_v43 = vadd.f32 %v8645_v0, %v2158_v13  ;;  %v2330_v17 = vmul.f32 %v6459_v35, %v8711_v57  ;;  %v834_v21 = vmul.f32 %v3869_v1, %v8712_v18  ;;  %3894 = vtanh.f32 %v1918_v44  ;;  %8714 = vst [vmem:[#allocation113_spill] sm:$0xff] %v6582_v46  ;;  %v8715_v0 = vld [vmem:[#allocation45_spill] sm:$0xff]  ;;  %v8716_v1 = vld [vmem:[#allocation92_spill] sm:$0xff]  ;;  %v8729_v46 = vld [vmem:[#allocation59_spill] sm:$0xff] }
 0x1fb   :  { %v678_v23 = vadd.f32 %v662_v37, %v592_v45  ;;  %v2262_v20 = vadd.f32 %v8647_v3, %v2244_v6  ;;  %v3877_v47 = vpop.eup %3876  ;;  %v2569_v34 = vadd.f32 %v6527_v5, %v2483_v32  ;;  %3896 = vtanh.f32 %v2004_v30  ;;  %v8717_v5 = vld [vmem:[#allocation49_spill] sm:$0xff] }
 0x1fc   :  { %v2348_v12 = vadd.f32 %v8648_v56, %v2330_v17  ;;  %v2416_v50 = vmul.f32 %v6459_v35, %v8713_v9  ;;  %v920_v37 = vmul.f32 %v3871_v25, %v8715_v0  ;;  %3898 = vtanh.f32 %v2090_v29  ;;  %v8718_v9 = vld [vmem:[#allocation93_spill] sm:$0xff]  ;;  %v6596_v29 = vld [vmem:[%s7561_s0 + $0x60] sm:$0xff] }
 0x1fd   :  { %v3879_v36 = vpop.eup %3878  ;;  %v764_v13 = vadd.f32 %v748_v11, %v678_v23  ;;  %v2502_v44 = vmul.f32 %v6459_v35, %v8716_v1  ;;  %v2655_v6 = vadd.f32 %v6540_v51, %v2569_v34  ;;  %v1006_v30 = vmul.f32 %v3873_v49, %v8717_v5  ;;  %v8719_v11 = vld [vmem:[#allocation95_spill] sm:$0xff]  ;;  %8720 = vst [vmem:[#allocation115_spill] sm:$0xff] %v6596_v29  ;;  %v8722_v34 = vld [vmem:[#allocation52_spill] sm:$0xff]  ;;  %v8728_v51 = vld [vmem:[#allocation58_spill] sm:$0xff] }
 0x1fe   :  { %v3881_v45 = vpop.eup %3880  ;;  %3900 = vtanh.f32 %v2176_v43  ;;  %v2434_v32 = vadd.f32 %v8649_v22, %v2416_v50  ;;  %v2588_v25 = vmul.f32 %v6459_v35, %v8719_v11  ;;  %v8721_v43 = vld [vmem:[#allocation98_spill] sm:$0xff]  ;;  %v1092_v50 = vmul.f32 %v3875_v28, %v8722_v34  ;;  %v8724_v11 = vld [vmem:[#allocation101_spill] sm:$0xff]  ;;  %v8743_v5 = vld [vmem:[#allocation27_spill] sm:$0xff] }
 0x1ff   :  { %v3883_v17 = vpop.eup %3882  ;;  %v850_v56 = vadd.f32 %v834_v21, %v764_v13  ;;  %3902 = vtanh.f32 %v2262_v20  ;;  %v2520_v3 = vadd.f32 %v8718_v9, %v2502_v44  ;;  %v2741_v49 = vadd.f32 %v2725_v7, %v2655_v6  ;;  %v8723_v9 = vld [vmem:[#allocation99_spill] sm:$0xff]  ;;  %v6610_v7 = vld [vmem:[%s7561_s0 + $0x58] sm:$0xff]  ;;  %v8726_v28 = vld [vmem:[#allocation54_spill] sm:$0xff] }
 0x200   :  { %3904 = vtanh.f32 %v2348_v12  ;;  %v2674_v23 = vmul.f32 %v6459_v35, %v8721_v43  ;;  %v2606_v13 = vadd.f32 %v8653_v62, %v2588_v25  ;;  %v2760_v1 = vmul.f32 %v6459_v35, %v8724_v11  ;;  %v8725_v12 = vld [vmem:[#allocation10_spill] sm:$0xff]  ;;  %v8727_v25 = vld [vmem:[#allocation12_spill] sm:$0xff] }
 0x201   :  { %v3885_v21 = vpop.eup %3884  ;;  %v936_v20 = vadd.f32 %v920_v37, %v850_v56  ;;  %3906 = vtanh.f32 %v2434_v32  ;;  %v2827_v44 = vadd.f32 %v2811_v59, %v2741_v49  ;;  %v95_v6 = vmul.f32 %v6610_v7, %v8725_v12  ;;  %v8730_v43 = vld [vmem:[#allocation102_spill] sm:$0xff]  ;;  %v8731_v12 = vld [vmem:[#allocation11_spill] sm:$0xff] }
 0x202   :  { %v2692_v22 = vadd.f32 %v8723_v9, %v2674_v23  ;;  %v3887_v56 = vpop.eup %3886  ;;  %v1178_v32 = vmul.f32 %v3877_v47, %v8726_v28  ;;  %3908 = vtanh.f32 %v2520_v3  ;;  %v181_v59 = vmul.f32 %v6610_v7, %v8727_v25  ;;  %v6625_v3 = vld [vmem:[%s7562_s1] ss:$0 sm:$0xff] }
 0x203   :  { %v1022_v37 = vadd.f32 %v1006_v30, %v936_v20  ;;  %v3889_v49 = vpop.eup %3888  ;;  %v2912_v23 = vmul.f32 0.5, %v2827_v44  ;;  %v1264_v35 = vmul.f32 %v3879_v36, %v8728_v51  ;;  %v1350_v11 = vmul.f32 %v3881_v45, %v8729_v46  ;;  %8732 = vst [vmem:[#allocation114_spill] sm:$0xff] %v6625_v3  ;;  %v8733_v36 = vld [vmem:[#allocation14_spill] sm:$0xff]  ;;  %v8734_v20 = vld [vmem:[#allocation17_spill] sm:$0xff]  ;;  %v8738_v46 = vld [vmem:[#allocation67_spill] sm:$0xff] }
 0x204   :  { %3910 = vtanh.f32 %v2606_v13  ;;  %v2778_v62 = vadd.f32 %v8730_v43, %v2760_v1  ;;  %v113_v34 = vadd.f32 %v8731_v12, %v95_v6  ;;  %v199_v30 = vadd.f32 %v8667_v61, %v181_v59  ;;  %v8736_v59 = vld [vmem:[#allocation19_spill] sm:$0xff]  ;;  %v8737_v12 = vld [vmem:[#allocation117_spill] sm:$0xff] }
 0x205   :  { %v3891_v9 = vpop.eup %3890  ;;  %v1108_v29 = vadd.f32 %v1092_v50, %v1022_v37  ;;  %v2934_v47 = vmul.f32 %v6625_v3, %v2912_v23  ;;  %3912 = vtanh.f32 %v2692_v22  ;;  %v267_v45 = vmul.f32 %v6610_v7, %v8733_v36  ;;  %v8735_v37 = vld [vmem:[#allocation64_spill] sm:$0xff]  ;;  %v8739_v22 = vld [vmem:[#allocation15_spill] sm:$0xff] }
 0x206   :  { %v353_v50 = vmul.f32 %v6610_v7, %v8734_v20  ;;  %v3893_v13 = vpop.eup %3892  ;;  %v1436_v6 = vmul.f32 %v3883_v17, %v8735_v37  ;;  %3914 = vtanh.f32 %v113_v34  ;;  %v439_v43 = vmul.f32 %v6610_v7, %v8736_v59  ;;  %v8740_v20 = vld [vmem:[#allocation18_spill] sm:$0xff]  ;;  %v8742_v37 = vld [vmem:[#allocation23_spill] sm:$0xff] }
 0x207   :  { %v1194_v1 = vadd.f32 %v1178_v32, %v1108_v29  ;;  %v3895_v61 = vpop.eup %3894  ;;  %v2950_v25 = vsub.f32 %v8737_v12, %v2934_v47  ;;  %v1522_v23 = vmul.f32 %v3885_v21, %v8738_v46  ;;  %3916 = vtanh.f32 %v199_v30  ;;  %v8741_v29 = vld [vmem:[#allocation20_spill] sm:$0xff]  ;;  %v8744_v47 = vld [vmem:[#allocation70_spill] sm:$0xff] }
 0x208   :  { %v285_v3 = vadd.f32 %v8739_v22, %v267_v45  ;;  %v3897_v36 = vpop.eup %3896  ;;  %3918 = vtanh.f32 %v2778_v62  ;;  %v371_v28 = vadd.f32 %v8740_v20, %v353_v50  ;;  %v457_v32 = vadd.f32 %v8741_v29, %v439_v43  ;;  %v8746_v43 = vld [vmem:[#allocation73_spill] sm:$0xff]  ;;  %v8752_v22 = vld [vmem:[#allocation79_spill] sm:$0xff] }
 0x209   :  { %v1280_v51 = vadd.f32 %v1264_v35, %v1194_v1  ;;  %v3899_v17 = vpop.eup %3898  ;;  %v2966_v34 = vmul.f32 %v2950_v25, %v2827_v44  ;;  %v525_v59 = vmul.f32 %v6610_v7, %v8742_v37  ;;  %v611_v12 = vmul.f32 %v6610_v7, %v8743_v5  ;;  %v8745_v35 = vld [vmem:[#allocation31_spill] sm:$0xff]  ;;  %v8747_v44 = vld [vmem:[#allocation24_spill] sm:$0xff] }
 0x20a   :  { %3920 = vtanh.f32 %v285_v3  ;;  %v1608_v45 = vmul.f32 %v3887_v56, %v8744_v47  ;;  %v697_v62 = vmul.f32 %v6610_v7, %v8745_v35  ;;  %v1694_v1 = vmul.f32 %v3889_v49, %v8746_v43  ;;  %v8748_v3 = vld [vmem:[#allocation28_spill] sm:$0xff]  ;;  %v8750_v56 = vld [vmem:[#allocation35_spill] sm:$0xff] }
 0x20b   :  { %v3901_v21 = vpop.eup %3900  ;;  %v1366_v30 = vadd.f32 %v1350_v11, %v1280_v51  ;;  %3922 = vtanh.f32 %v371_v28  ;;  %2991 = vadd.xlane.f32.xlu0 %v2966_v34  ;;  %v543_v25 = vadd.f32 %v8747_v44, %v525_v59  ;;  %v629_v37 = vadd.f32 %v8748_v3, %v611_v12  ;;  %v8749_v11 = vld [vmem:[#allocation33_spill] sm:$0xff]  ;;  %v8751_v35 = vld [vmem:[#allocation76_spill] sm:$0xff] }
 0x20c   :  { %v3903_v50 = vpop.eup %3902  ;;  %3924 = vtanh.f32 %v457_v32  ;;  %v715_v5 = vadd.f32 %v8685_v24, %v697_v62  ;;  %v783_v51 = vmul.f32 %v6610_v7, %v8749_v11  ;;  %v869_v28 = vmul.f32 %v6610_v7, %v8750_v56  ;;  %v8753_v32 = vld [vmem:[#allocation38_spill] sm:$0xff]  ;;  %v8755_v56 = vld [vmem:[#allocation36_spill] sm:$0xff] }
 0x20d   :  { %v3905_v29 = vpop.eup %3904  ;;  %v1452_v20 = vadd.f32 %v1436_v6, %v1366_v30  ;;  %v1780_v34 = vmul.f32 %v3891_v9, %v8751_v35  ;;  %v1866_v49 = vmul.f32 %v3893_v13, %v8752_v22  ;;  %3926 = vtanh.f32 %v543_v25  ;;  %v8754_v24 = vld [vmem:[#allocation82_spill] sm:$0xff]  ;;  %v8756_v22 = vld [vmem:[#allocation85_spill] sm:$0xff]  ;;  %v8759_v35 = vld [vmem:[#allocation91_spill] sm:$0xff] }
 0x20e   :  { %v3907_v47 = vpop.eup %3906  ;;  %v955_v59 = vmul.f32 %v6610_v7, %v8753_v32  ;;  %3928 = vtanh.f32 %v629_v37  ;;  %v801_v6 = vadd.f32 %v8686_v63, %v783_v51  ;;  %v1041_v30 = vmul.f32 %v6610_v7, %v8688_v31 }
 0x20f   :  { %v1538_v12 = vadd.f32 %v1522_v23, %v1452_v20  ;;  %v3909_v62 = vpop.eup %3908  ;;  %v1952_v3 = vmul.f32 %v3895_v61, %v8754_v24  ;;  %3930 = vtanh.f32 %v715_v5  ;;  %v887_v43 = vadd.f32 %v8755_v56, %v869_v28  ;;  %v8757_v20 = vld [vmem:[#allocation88_spill] sm:$0xff]  ;;  %v8760_v61 = vld [vmem:[#allocation47_spill] sm:$0xff] }
 0x210   :  { %v973_v9 = vadd.f32 %v8689_v42, %v955_v59  ;;  %v2038_v32 = vmul.f32 %v3897_v36, %v8756_v22  ;;  %v2124_v37 = vmul.f32 %v3899_v17, %v8757_v20  ;;  %v8758_v23 = vld [vmem:[#allocation44_spill] sm:$0xff]  ;;  %v6672_v31 = vmul.f32 %v3901_v21, %v8759_v35  ;;  %v8761_v36 = vld [vmem:[#allocation42_spill] sm:$0xff] }
 0x211   :  { %v6665_v13 = vpop.eup %3910  ;;  %v1624_v25 = vadd.f32 %v1608_v45, %v1538_v12  ;;  %v1127_v51 = vmul.f32 %v6610_v7, %v8758_v23  ;;  %3932 = vtanh.f32 %v801_v6  ;;  %v1213_v5 = vmul.f32 %v6610_v7, %v8760_v61  ;;  %v8762_v6 = vld [vmem:[#allocation97_spill] sm:$0xff]  ;;  %v8763_v22 = vld [vmem:[#allocation46_spill] sm:$0xff]  ;;  %v8764_v42 = vld [vmem:[#allocation100_spill] sm:$0xff] }
 0x212   :  { %v1299_v28 = vmul.f32 %v6610_v7, %v8693_v26  ;;  %v6678_v59 = vpop.eup %3912  ;;  %3934 = vtanh.f32 %v887_v43  ;;  %v1059_v12 = vadd.f32 %v8761_v36, %v1041_v30  ;;  %v1385_v17 = vmul.f32 %v6610_v7, %v8695_v58  ;;  %v8765_v30 = vld [vmem:[#allocation48_spill] sm:$0xff] }
 0x213   :  { %v1710_v45 = vadd.f32 %v1694_v1, %v1624_v25  ;;  %v3915_v20 = vpop.eup %3914  ;;  %v6684_v21 = vmul.f32 %v3903_v50, %v8483_v27  ;;  %v6687_v35 = vmul.f32 %v3905_v29, %v8762_v6  ;;  %3936 = vtanh.f32 %v973_v9  ;;  %v8766_v29 = vld [vmem:[#allocation56_spill] sm:$0xff] }
 0x214   :  { %v1145_v61 = vadd.f32 %v8763_v22, %v1127_v51  ;;  %v3917_v26 = vpop.eup %3916  ;;  %v6691_v1 = vmul.f32 %v3907_v47, %v8764_v42  ;;  %v147_v43 = vmul.f32 %v3915_v20, %v8696_v60  ;;  %v1231_v25 = vadd.f32 %v8765_v30, %v1213_v5  ;;  %v8767_v20 = vld [vmem:[#allocation55_spill] sm:$0xff] }
 0x215   :  { %v1796_v23 = vadd.f32 %v1780_v34, %v1710_v45  ;;  %v6695_v58 = vpop.eup %3918  ;;  %v233_v50 = vmul.f32 %v3917_v26, %v8697_v38  ;;  %v1317_v27 = vadd.f32 %v8480_v19, %v1299_v28  ;;  %v1471_v9 = vmul.f32 %v6610_v7, %v8766_v29  ;;  %v8768_v28 = vld [vmem:[#allocation62_spill] sm:$0xff] }
 0x216   :  { %v1557_v51 = vmul.f32 %v6610_v7, %v8698_v52  ;;  %v163_v47 = vadd.f32 %v147_v43, %v8562_v33  ;;  %3938 = vtanh.f32 %v1059_v12  ;;  %v1403_v42 = vadd.f32 %v8767_v20, %v1385_v17 }
 0x217   :  { %v3921_v34 = vpop.eup %3920  ;;  %v1882_v45 = vadd.f32 %v1866_v49, %v1796_v23  ;;  %3940 = vtanh.f32 %v1145_v61  ;;  %v1489_v26 = vadd.f32 %v8482_v41, %v1471_v9  ;;  %v1643_v19 = vmul.f32 %v6610_v7, %v8768_v28  ;;  %v8772_v41 = vld [vmem:[#allocation66_spill] sm:$0xff] }
 0x218   :  { %v3923_v5 = vpop.eup %3922  ;;  %v319_v30 = vmul.f32 %v3921_v34, %v8699_v14  ;;  %v249_v60 = vadd.f32 %v233_v50, %v163_v47  ;;  %3942 = vtanh.f32 %v1231_v25  ;;  %v1575_v49 = vadd.f32 %v8631_v39, %v1557_v51  ;;  %v8769_v50 = vld [vmem:[#allocation103_spill] sm:$0xff]  ;;  %v8771_v39 = vld [vmem:[#allocation30_spill] sm:$0xff] }
 0x219   :  { %v3925_v29 = vpop.eup %3924  ;;  %v1968_v38 = vadd.f32 %v1952_v3, %v1882_v45  ;;  %v405_v52 = vmul.f32 %v3923_v5, %v8193_v55  ;;  %3944 = vtanh.f32 %v1317_v27  ;;  %v1729_v23 = vmul.f32 %v6610_v7, %v8632_v53  ;;  %v8770_v25 = vld [vmem:[#allocation71_spill] sm:$0xff] }
 0x21a   :  { %v1815_v61 = vmul.f32 %v6610_v7, %v8566_v15  ;;  %v3927_v12 = vpop.eup %3926  ;;  %v335_v43 = vadd.f32 %v319_v30, %v249_v60  ;;  %v491_v9 = vmul.f32 %v3925_v29, %v8417_v54  ;;  %3946 = vtanh.f32 %v1403_v42  ;;  %v8773_v60 = vld [vmem:[#allocation104_spill] sm:$0xff]  ;;  %v8774_v42 = vld [vmem:[#allocation69_spill] sm:$0xff] }
 0x21b   :  { %v2054_v17 = vadd.f32 %v2038_v32, %v1968_v38  ;;  %v3929_v3 = vpop.eup %3928  ;;  %v2554_v34 = vmul.f32 %v3909_v62, %v8769_v50  ;;  %3948 = vtanh.f32 %v1489_v26  ;;  %v1661_v27 = vadd.f32 %v8701_v10, %v1643_v19  ;;  %v8775_v62 = vld [vmem:[#allocation74_spill] sm:$0xff] }
 0x21c   :  { %v1901_v51 = vmul.f32 %v6610_v7, %v8770_v25  ;;  %v3931_v45 = vpop.eup %3930  ;;  %v421_v5 = vadd.f32 %v405_v52, %v335_v43  ;;  %v577_v15 = vmul.f32 %v3927_v12, %v8771_v39  ;;  %v1747_v38 = vadd.f32 %v8772_v41, %v1729_v23  ;;  %v8776_v52 = vld [vmem:[#allocation77_spill] sm:$0xff] }
 0x21d   :  { %v2140_v47 = vadd.f32 %v2124_v37, %v2054_v17  ;;  %v2640_v32 = vmul.f32 %v6665_v13, %v8773_v60  ;;  %3950 = vtanh.f32 %v1575_v49  ;;  %v1833_v30 = vadd.f32 %v8774_v42, %v1815_v61  ;;  %v8777_v23 = vld [vmem:[#allocation105_spill] sm:$0xff] }
 0x21e   :  { %v1987_v29 = vmul.f32 %v6610_v7, %v8775_v62  ;;  %v3933_v19 = vpop.eup %3932  ;;  %v507_v25 = vadd.f32 %v491_v9, %v421_v5  ;;  %v663_v37 = vmul.f32 %v3929_v3, %v8705_v40  ;;  %v2073_v12 = vmul.f32 %v6610_v7, %v8776_v52  ;;  %v8779_v5 = vld [vmem:[#allocation49_spill] sm:$0xff] }
 0x21f   :  { %v2226_v26 = vadd.f32 %v6672_v31, %v2140_v47  ;;  %v3935_v17 = vpop.eup %3934  ;;  %v2726_v43 = vmul.f32 %v6678_v59, %v8777_v23  ;;  %v749_v13 = vmul.f32 %v3931_v45, %v8709_v16  ;;  %3952 = vtanh.f32 %v1661_v27  ;;  %v8778_v31 = vld [vmem:[#allocation80_spill] sm:$0xff] }
 0x220   :  { %v1919_v49 = vadd.f32 %v8706_v48, %v1901_v51  ;;  %v3937_v61 = vpop.eup %3936  ;;  %v593_v62 = vadd.f32 %v577_v15, %v507_v25  ;;  %3954 = vtanh.f32 %v1747_v38  ;;  %v2159_v9 = vmul.f32 %v6610_v7, %v8778_v31  ;;  %v8781_v48 = vld [vmem:[#allocation84_spill] sm:$0xff] }
 0x221   :  { %v2312_v42 = vadd.f32 %v6684_v21, %v2226_v26  ;;  %v835_v3 = vmul.f32 %v3933_v19, %v8712_v18  ;;  %v2005_v47 = vadd.f32 %v8708_v4, %v1987_v29  ;;  %v2245_v59 = vmul.f32 %v6610_v7, %v8710_v8  ;;  %v8780_v19 = vld [vmem:[#allocation81_spill] sm:$0xff] }
 0x222   :  { %v2331_v27 = vmul.f32 %v6610_v7, %v8711_v57  ;;  %v679_v45 = vadd.f32 %v663_v37, %v593_v62  ;;  %3956 = vtanh.f32 %v1833_v30  ;;  %v2091_v15 = vadd.f32 %v8642_v2, %v2073_v12  ;;  %v8782_v18 = vld [vmem:[#allocation89_spill] sm:$0xff]  ;;  %v8783_v30 = vld [vmem:[#allocation87_spill] sm:$0xff]  ;;  %v8784_v37 = vld [vmem:[#allocation92_spill] sm:$0xff] }
 0x223   :  { %v2398_v51 = vadd.f32 %v6687_v35, %v2312_v42  ;;  %v3939_v21 = vpop.eup %3938  ;;  %v921_v25 = vmul.f32 %v3935_v17, %v8715_v0  ;;  %v1007_v38 = vmul.f32 %v3937_v61, %v8779_v5  ;;  %3958 = vtanh.f32 %v1919_v49  ;;  %v8785_v17 = vld [vmem:[#allocation95_spill] sm:$0xff]  ;;  %v8790_v2 = vld [vmem:[#allocation54_spill] sm:$0xff] }
 0x224   :  { %v2177_v29 = vadd.f32 %v8780_v19, %v2159_v9  ;;  %v3941_v26 = vpop.eup %3940  ;;  %v765_v4 = vadd.f32 %v749_v13, %v679_v45  ;;  %v2263_v57 = vadd.f32 %v8781_v48, %v2245_v59  ;;  %v2417_v35 = vmul.f32 %v6610_v7, %v8782_v18  ;;  %v8788_v48 = vld [vmem:[#allocation52_spill] sm:$0xff] }
 0x225   :  { %v2484_v8 = vadd.f32 %v6691_v1, %v2398_v51  ;;  %v3943_v42 = vpop.eup %3942  ;;  %3960 = vtanh.f32 %v2005_v47  ;;  %v2349_v62 = vadd.f32 %v8783_v30, %v2331_v27  ;;  %v2503_v12 = vmul.f32 %v6610_v7, %v8784_v37  ;;  %v8786_v1 = vld [vmem:[#allocation90_spill] sm:$0xff]  ;;  %v8789_v27 = vld [vmem:[#allocation93_spill] sm:$0xff] }
 0x226   :  { %v2589_v49 = vmul.f32 %v6610_v7, %v8785_v17  ;;  %v3945_v61 = vpop.eup %3944  ;;  %v851_v19 = vadd.f32 %v835_v3, %v765_v4  ;;  %3962 = vtanh.f32 %v2091_v15  ;;  %v2435_v13 = vadd.f32 %v8786_v1, %v2417_v35  ;;  %v8787_v51 = vld [vmem:[#allocation106_spill] sm:$0xff] }
 0x227   :  { %v2570_v9 = vadd.f32 %v2554_v34, %v2484_v8  ;;  %v3947_v59 = vpop.eup %3946  ;;  %v2812_v45 = vmul.f32 %v6695_v58, %v8787_v51  ;;  %v1093_v47 = vmul.f32 %v3939_v21, %v8788_v48  ;;  %3964 = vtanh.f32 %v2177_v29  ;;  %v8791_v8 = vld [vmem:[#allocation58_spill] sm:$0xff]  ;;  %v8792_v34 = vld [vmem:[#allocation96_spill] sm:$0xff] }
 0x228   :  { %v2521_v30 = vadd.f32 %v8789_v27, %v2503_v12  ;;  %v3949_v18 = vpop.eup %3948  ;;  %v937_v5 = vadd.f32 %v921_v25, %v851_v19  ;;  %v1179_v17 = vmul.f32 %v3941_v26, %v8790_v2  ;;  %3966 = vtanh.f32 %v2263_v57  ;;  %v8793_v15 = vld [vmem:[#allocation98_spill] sm:$0xff]  ;;  %v8795_v12 = vld [vmem:[#allocation115_spill] sm:$0xff]  ;;  %v8798_v26 = vld [vmem:[#allocation12_spill] sm:$0xff] }
 0x229   :  { %v2656_v37 = vadd.f32 %v2640_v32, %v2570_v9  ;;  %v1265_v4 = vmul.f32 %v3943_v42, %v8791_v8  ;;  %3968 = vtanh.f32 %v2349_v62  ;;  %v2607_v3 = vadd.f32 %v8792_v34, %v2589_v49  ;;  %v8794_v29 = vld [vmem:[#allocation10_spill] sm:$0xff]  ;;  %v8796_v32 = vld [vmem:[#allocation59_spill] sm:$0xff]  ;;  %v8799_v34 = vld [vmem:[#allocation101_spill] sm:$0xff] }
 0x22a   :  { %v2675_v35 = vmul.f32 %v6610_v7, %v8793_v15  ;;  %v3951_v58 = vpop.eup %3950  ;;  %v1023_v21 = vadd.f32 %v1007_v38, %v937_v5  ;;  %3970 = vtanh.f32 %v2435_v13  ;;  %v96_v27 = vmul.f32 %v8795_v12, %v8794_v29  ;;  %v8797_v19 = vld [vmem:[#allocation99_spill] sm:$0xff]  ;;  %v8802_v29 = vld [vmem:[#allocation13_spill] sm:$0xff] }
 0x22b   :  { %v2742_v1 = vadd.f32 %v2726_v43, %v2656_v37  ;;  %v1351_v25 = vmul.f32 %v3945_v61, %v8796_v32  ;;  %3972 = vtanh.f32 %v2521_v30  ;;  %v182_v42 = vmul.f32 %v8795_v12, %v8798_v26  ;;  %v8800_v43 = vld [vmem:[#allocation11_spill] sm:$0xff]  ;;  %v8801_v37 = vld [vmem:[#allocation64_spill] sm:$0xff]  ;;  %v8803_v30 = vld [vmem:[#allocation14_spill] sm:$0xff] }
 0x22c   :  { %v2693_v57 = vadd.f32 %v8797_v19, %v2675_v35  ;;  %v3953_v62 = vpop.eup %3952  ;;  %v1109_v9 = vadd.f32 %v1093_v47, %v1023_v21  ;;  %v2761_v15 = vmul.f32 %v6610_v7, %v8799_v34  ;;  %v114_v5 = vadd.f32 %v8800_v43, %v96_v27  ;;  %v8804_v26 = vld [vmem:[#allocation17_spill] sm:$0xff]  ;;  %v8805_v47 = vld [vmem:[#allocation15_spill] sm:$0xff]  ;;  %v8808_v34 = vld [vmem:[#allocation102_spill] sm:$0xff] }
 0x22d   :  { %v2828_v49 = vadd.f32 %v2812_v45, %v2742_v1  ;;  %v3955_v38 = vpop.eup %3954  ;;  %v1437_v13 = vmul.f32 %v3947_v59, %v8801_v37  ;;  %3974 = vtanh.f32 %v2607_v3  ;;  %v200_v61 = vadd.f32 %v8802_v29, %v182_v42  ;;  %v8806_v21 = vld [vmem:[#allocation19_spill] sm:$0xff]  ;;  %v8807_v42 = vld [vmem:[#allocation114_spill] sm:$0xff] }
 0x22e   :  { %v268_v35 = vmul.f32 %v8795_v12, %v8803_v30  ;;  %v1195_v32 = vadd.f32 %v1179_v17, %v1109_v9  ;;  %3976 = vtanh.f32 %v2693_v57  ;;  %v354_v1 = vmul.f32 %v8795_v12, %v8804_v26  ;;  %v8809_v17 = vld [vmem:[#allocation18_spill] sm:$0xff]  ;;  %v8810_v9 = vld [vmem:[#allocation20_spill] sm:$0xff]  ;;  %v8811_v37 = vld [vmem:[#allocation23_spill] sm:$0xff] }
 0x22f   :  { %v2913_v19 = vmul.f32 0.5, %v2828_v49  ;;  %v3957_v45 = vpop.eup %3956  ;;  %v1523_v7 = vmul.f32 %v3949_v18, %v8738_v46  ;;  %3978 = vtanh.f32 %v114_v5  ;;  %v440_v59 = vmul.f32 %v8795_v12, %v8806_v21  ;;  %v8813_v21 = vld [vmem:[#allocation27_spill] sm:$0xff] }
 0x230   :  { %v286_v27 = vadd.f32 %v8805_v47, %v268_v35  ;;  %v3959_v3 = vpop.eup %3958  ;;  %v1281_v43 = vadd.f32 %v1265_v4, %v1195_v32  ;;  %v2779_v30 = vadd.f32 %v8808_v34, %v2761_v15  ;;  %3980 = vtanh.f32 %v200_v61  ;;  %v8812_v35 = vld [vmem:[#allocation112_spill] sm:$0xff]  ;;  %v8815_v32 = vld [vmem:[#allocation113_spill] sm:$0xff] }
 0x231   :  { %v2935_v29 = vmul.f32 %v8807_v42, %v2913_v19  ;;  %v372_v57 = vadd.f32 %v8809_v17, %v354_v1  ;;  %v458_v26 = vadd.f32 %v8810_v9, %v440_v59  ;;  %v526_v18 = vmul.f32 %v8795_v12, %v8811_v37  ;;  %v8814_v19 = vld [vmem:[#allocation31_spill] sm:$0xff]  ;;  %v8819_v9 = vld [vmem:[#allocation70_spill] sm:$0xff]  ;;  %v8820_v37 = vld [vmem:[#allocation73_spill] sm:$0xff] }
 0x232   :  { %3982 = vtanh.f32 %v286_v27  ;;  %v3961_v5 = vpop.eup %3960  ;;  %v1367_v46 = vadd.f32 %v1351_v25, %v1281_v43  ;;  %v612_v8 = vmul.f32 %v8795_v12, %v8813_v21  ;;  %v698_v4 = vmul.f32 %v8795_v12, %v8814_v19  ;;  %v8817_v1 = vld [vmem:[#allocation107_spill] sm:$0xff] }
 0x233   :  { %v2951_v47 = vsub.f32 %v8812_v35, %v2935_v29  ;;  %v3963_v15 = vpop.eup %3962  ;;  %v8816_v61 = vsub.f32 %v8815_v32, %v8795_v12  ;;  %3984 = vtanh.f32 %v372_v57  ;;  %v544_v59 = vadd.f32 %v8747_v44, %v526_v18  ;;  %v8821_v32 = vld [vmem:[#allocation28_spill] sm:$0xff]  ;;  %v8823_v44 = vld [vmem:[#allocation35_spill] sm:$0xff] }
 0x234   :  { %v784_v29 = vmul.f32 %v8795_v12, %v8749_v11  ;;  %v3965_v25 = vpop.eup %3964  ;;  %v1453_v35 = vadd.f32 %v1437_v13, %v1367_v46  ;;  %v1609_v21 = vmul.f32 %v3951_v58, %v8819_v9  ;;  %3986 = vtanh.f32 %v458_v26  ;;  %v8824_v58 = vld [vmem:[#allocation76_spill] sm:$0xff]  ;;  %v8825_v13 = vld [vmem:[#allocation38_spill] sm:$0xff] }
 0x235   :  { %v6802_v27 = vmul.f32 %v8817_v1, %v8816_v61  ;;  %v2967_v43 = vmul.f32 %v2951_v47, %v2828_v49  ;;  %v3967_v19 = vpop.eup %3966  ;;  %v1695_v34 = vmul.f32 %v3953_v62, %v8820_v37  ;;  %3988 = vtanh.f32 %v544_v59  ;;  %v8822_v61 = vld [vmem:[#allocation32_spill] sm:$0xff]  ;;  %v8826_v47 = vld [vmem:[#allocation41_spill] sm:$0xff] }
 0x236   :  { %v630_v17 = vadd.f32 %v8821_v32, %v612_v8  ;;  %v716_v1 = vadd.f32 %v8822_v61, %v698_v4  ;;  %v3969_v57 = vpop.eup %3968  ;;  %v1539_v18 = vadd.f32 %v1523_v7, %v1453_v35  ;;  %3990 = vtanh.f32 %v2779_v30  ;;  %v8828_v35 = vld [vmem:[#allocation39_spill] sm:$0xff] }
 0x237   :  { %8818 = vst [vmem:[#allocation111_spill] sm:$0xff] %v6802_v27  ;;  %2993 = vadd.xlane.f32.xlu1 %v2967_v43  ;;  %v802_v27 = vadd.f32 %v8686_v63, %v784_v29  ;;  %v870_v46 = vmul.f32 %v8795_v12, %v8823_v44  ;;  %v3971_v49 = vpop.eup %3970  ;;  %v1781_v26 = vmul.f32 %v3955_v38, %v8824_v58  ;;  %v8827_v43 = vld [vmem:[#allocation79_spill] sm:$0xff]  ;;  %v8829_v38 = vld [vmem:[#allocation44_spill] sm:$0xff]  ;;  %v8837_v58 = vld [vmem:[#allocation21_spill] sm:$0xff] }
 0x238   :  { %3992 = vtanh.f32 %v630_v17  ;;  %v956_v62 = vmul.f32 %v8795_v12, %v8825_v13  ;;  %v1042_v8 = vmul.f32 %v8795_v12, %v8826_v47  ;;  %v3973_v4 = vpop.eup %3972  ;;  %v1625_v59 = vadd.f32 %v1609_v21, %v1539_v18  ;;  %v8830_v47 = vld [vmem:[#allocation47_spill] sm:$0xff]  ;;  %v8831_v18 = vld [vmem:[#allocation50_spill] sm:$0xff] }
 0x239   :  { %v1867_v7 = vmul.f32 %v3957_v45, %v8827_v43  ;;  %3994 = vtanh.f32 %v716_v1  ;;  %v888_v30 = vadd.f32 %v8755_v56, %v870_v46  ;;  %v1953_v29 = vmul.f32 %v3959_v3, %v8754_v24  ;;  %v8832_v46 = vld [vmem:[#allocation85_spill] sm:$0xff]  ;;  %v8833_v3 = vld [vmem:[#allocation88_spill] sm:$0xff] }
 0x23a   :  { %3996 = vtanh.f32 %v802_v27  ;;  %v974_v44 = vadd.f32 %v8828_v35, %v956_v62  ;;  %v1128_v17 = vmul.f32 %v8795_v12, %v8829_v38  ;;  %v3975_v63 = vpop.eup %3974  ;;  %v1711_v13 = vadd.f32 %v1695_v34, %v1625_v59  ;;  %v8834_v62 = vld [vmem:[#allocation53_spill] sm:$0xff]  ;;  %v8835_v34 = vld [vmem:[#allocation91_spill] sm:$0xff] }
 0x23b   :  { %v1060_v61 = vadd.f32 %v8761_v36, %v1042_v8  ;;  %v1214_v21 = vmul.f32 %v8795_v12, %v8830_v47  ;;  %v1300_v45 = vmul.f32 %v8795_v12, %v8831_v18  ;;  %v3977_v1 = vpop.eup %3976  ;;  %v2039_v56 = vmul.f32 %v3961_v5, %v8832_v46  ;;  %v8836_v8 = vld [vmem:[#allocation94_spill] sm:$0xff]  ;;  %v8838_v5 = vld [vmem:[#allocation48_spill] sm:$0xff] }
 0x23c   :  { %v2125_v27 = vmul.f32 %v3963_v15, %v8833_v3  ;;  %3998 = vtanh.f32 %v888_v30  ;;  %v1386_v35 = vmul.f32 %v8795_v12, %v8834_v62  ;;  %v3979_v38 = vpop.eup %3978  ;;  %v1797_v24 = vadd.f32 %v1781_v26, %v1711_v13  ;;  %v8839_v46 = vld [vmem:[#allocation22_spill] sm:$0xff]  ;;  %v8840_v26 = vld [vmem:[#allocation51_spill] sm:$0xff] }
 0x23d   :  { %v2211_v59 = vmul.f32 %v3965_v25, %v8835_v34  ;;  %v2297_v36 = vmul.f32 %v3967_v19, %v8836_v8  ;;  %v1146_v47 = vadd.f32 %v8763_v22, %v1128_v17  ;;  %v3981_v43 = vpop.eup %3980  ;;  %v2383_v18 = vmul.f32 %v3969_v57, %v8762_v6  ;;  %v8841_v8 = vld [vmem:[#allocation56_spill] sm:$0xff] }
 0x23e   :  { %v148_v37 = vmul.f32 %v3979_v38, %v8837_v58  ;;  %4000 = vtanh.f32 %v974_v44  ;;  %v1232_v15 = vadd.f32 %v8838_v5, %v1214_v21  ;;  %v1883_v3 = vadd.f32 %v1867_v7, %v1797_v24  ;;  %v8842_v6 = vld [vmem:[#allocation100_spill] sm:$0xff] }
 0x23f   :  { %v3983_v30 = vpop.eup %3982  ;;  %v234_v62 = vmul.f32 %v3981_v43, %v8839_v46  ;;  %4002 = vtanh.f32 %v1060_v61  ;;  %v1318_v13 = vadd.f32 %v8840_v26, %v1300_v45  ;;  %v1404_v17 = vadd.f32 %v8767_v20, %v1386_v35  ;;  %v8843_v24 = vld [vmem:[#allocation60_spill] sm:$0xff] }
 0x240   :  { %v164_v25 = vadd.f32 %v148_v37, %v8562_v33  ;;  %v320_v19 = vmul.f32 %v3983_v30, %v8699_v14  ;;  %v1472_v57 = vmul.f32 %v8795_v12, %v8841_v8  ;;  %v3985_v38 = vpop.eup %3984  ;;  %v1969_v44 = vadd.f32 %v1953_v29, %v1883_v3 }
 0x241   :  { %v2469_v21 = vmul.f32 %v3971_v49, %v8842_v6  ;;  %4004 = vtanh.f32 %v1146_v47  ;;  %v1558_v43 = vmul.f32 %v8795_v12, %v8843_v24  ;;  %v3987_v61 = vpop.eup %3986  ;;  %v406_v45 = vmul.f32 %v3985_v38, %v8193_v55 }
 0x242   :  { %v250_v7 = vadd.f32 %v234_v62, %v164_v25  ;;  %4006 = vtanh.f32 %v1232_v15  ;;  %v1644_v37 = vmul.f32 %v8795_v12, %v8768_v28  ;;  %v3989_v35 = vpop.eup %3988  ;;  %v2055_v30 = vadd.f32 %v2039_v56, %v1969_v44  ;;  %v8844_v62 = vld [vmem:[#allocation57_spill] sm:$0xff]  ;;  %v8846_v56 = vld [vmem:[#allocation68_spill] sm:$0xff] }
 0x243   :  { %v2555_v20 = vmul.f32 %v3973_v4, %v8769_v50  ;;  %4008 = vtanh.f32 %v1318_v13  ;;  %v1730_v49 = vmul.f32 %v8795_v12, %v8632_v53  ;;  %v3991_v47 = vpop.eup %3990  ;;  %v492_v3 = vmul.f32 %v3987_v61, %v8417_v54  ;;  %v8845_v28 = vld [vmem:[#allocation61_spill] sm:$0xff] }
 0x244   :  { %v336_v29 = vadd.f32 %v320_v19, %v250_v7  ;;  %4010 = vtanh.f32 %v1404_v17  ;;  %v1490_v25 = vadd.f32 %v8844_v62, %v1472_v57  ;;  %v2141_v15 = vadd.f32 %v2125_v27, %v2055_v30  ;;  %v8847_v27 = vld [vmem:[#allocation71_spill] sm:$0xff] }
 0x245   :  { %v3993_v38 = vpop.eup %3992  ;;  %v2641_v6 = vmul.f32 %v3975_v63, %v8773_v60  ;;  %v1576_v55 = vadd.f32 %v8845_v28, %v1558_v43  ;;  %v1816_v4 = vmul.f32 %v8795_v12, %v8846_v56  ;;  %v2727_v44 = vmul.f32 %v3977_v1, %v8777_v23  ;;  %v8848_v1 = vld [vmem:[#allocation74_spill] sm:$0xff] }
 0x246   :  { %v3995_v13 = vpop.eup %3994  ;;  %v422_v50 = vadd.f32 %v406_v45, %v336_v29  ;;  %v578_v19 = vmul.f32 %v3989_v35, %v8771_v39  ;;  %v1662_v61 = vadd.f32 %v8701_v10, %v1644_v37  ;;  %v2227_v7 = vadd.f32 %v2211_v59, %v2141_v15  ;;  %v8849_v37 = vld [vmem:[#allocation69_spill] sm:$0xff] }
 0x247   :  { %v3997_v17 = vpop.eup %3996  ;;  %v6866_v57 = vmul.f32 %v3991_v47, %v8787_v51  ;;  %v1748_v63 = vadd.f32 %v8772_v41, %v1730_v49  ;;  %v1902_v43 = vmul.f32 %v8795_v12, %v8847_v27  ;;  %v664_v60 = vmul.f32 %v3993_v38, %v8705_v40  ;;  %v8850_v38 = vld [vmem:[#allocation43_spill] sm:$0xff]  ;;  %v8851_v40 = vld [vmem:[#allocation72_spill] sm:$0xff] }
 0x248   :  { %v508_v30 = vadd.f32 %v492_v3, %v422_v50  ;;  %4012 = vtanh.f32 %v1490_v25  ;;  %v1988_v45 = vmul.f32 %v8795_v12, %v8848_v1  ;;  %v2313_v29 = vadd.f32 %v2297_v36, %v2227_v7 }
 0x249   :  { %v3999_v35 = vpop.eup %3998  ;;  %4014 = vtanh.f32 %v1576_v55  ;;  %v1834_v59 = vadd.f32 %v8849_v37, %v1816_v4  ;;  %v2074_v47 = vmul.f32 %v8795_v12, %v8776_v52  ;;  %v750_v49 = vmul.f32 %v3995_v13, %v8709_v16  ;;  %v8852_v37 = vld [vmem:[#allocation75_spill] sm:$0xff]  ;;  %v8855_v16 = vld [vmem:[#allocation86_spill] sm:$0xff] }
 0x24a   :  { %v594_v15 = vadd.f32 %v578_v19, %v508_v30  ;;  %4016 = vtanh.f32 %v1662_v61  ;;  %v2160_v50 = vmul.f32 %v8795_v12, %v8778_v31  ;;  %v2399_v25 = vadd.f32 %v2383_v18, %v2313_v29  ;;  %v8853_v19 = vld [vmem:[#allocation83_spill] sm:$0xff]  ;;  %v8854_v30 = vld [vmem:[#allocation78_spill] sm:$0xff]  ;;  %v8856_v29 = vld [vmem:[#allocation49_spill] sm:$0xff] }
 0x24b   :  { %v4001_v3 = vpop.eup %4000  ;;  %v836_v51 = vmul.f32 %v3997_v17, %v8850_v38  ;;  %4018 = vtanh.f32 %v1748_v63  ;;  %v1920_v36 = vadd.f32 %v8851_v40, %v1902_v43  ;;  %v922_v4 = vmul.f32 %v3999_v35, %v8715_v0  ;;  %v8857_v38 = vld [vmem:[#allocation81_spill] sm:$0xff] }
 0x24c   :  { %v4003_v55 = vpop.eup %4002  ;;  %v680_v7 = vadd.f32 %v664_v60, %v594_v15  ;;  %v2006_v52 = vadd.f32 %v8852_v37, %v1988_v45  ;;  %v2246_v13 = vmul.f32 %v8795_v12, %v8853_v19  ;;  %v2485_v61 = vadd.f32 %v2469_v21, %v2399_v25  ;;  %v8858_v15 = vld [vmem:[#allocation89_spill] sm:$0xff]  ;;  %v8859_v19 = vld [vmem:[#allocation84_spill] sm:$0xff] }
 0x24d   :  { %4020 = vtanh.f32 %v1834_v59  ;;  %v2092_v31 = vadd.f32 %v8854_v30, %v2074_v47  ;;  %v2332_v18 = vmul.f32 %v8795_v12, %v8855_v16  ;;  %v1008_v43 = vmul.f32 %v4001_v3, %v8856_v29  ;;  %v8860_v59 = vld [vmem:[#allocation92_spill] sm:$0xff]  ;;  %v8861_v16 = vld [vmem:[#allocation87_spill] sm:$0xff] }
 0x24e   :  { %v4005_v17 = vpop.eup %4004  ;;  %v766_v63 = vadd.f32 %v750_v49, %v680_v7  ;;  %v2178_v60 = vadd.f32 %v8857_v38, %v2160_v50  ;;  %v2418_v35 = vmul.f32 %v8795_v12, %v8858_v15  ;;  %v2571_v0 = vadd.f32 %v2555_v20, %v2485_v61  ;;  %v8862_v7 = vld [vmem:[#allocation95_spill] sm:$0xff]  ;;  %v8863_v20 = vld [vmem:[#allocation90_spill] sm:$0xff]  ;;  %v8867_v29 = vld [vmem:[#allocation64_spill] sm:$0xff] }
 0x24f   :  { %v4007_v45 = vpop.eup %4006  ;;  %4022 = vtanh.f32 %v1920_v36  ;;  %v2264_v21 = vadd.f32 %v8859_v19, %v2246_v13  ;;  %v2504_v47 = vmul.f32 %v8795_v12, %v8860_v59  ;;  %v2350_v49 = vadd.f32 %v8861_v16, %v2332_v18  ;;  %v8864_v19 = vld [vmem:[#allocation58_spill] sm:$0xff]  ;;  %v8866_v18 = vld [vmem:[#allocation93_spill] sm:$0xff] }
 0x250   :  { %v4009_v25 = vpop.eup %4008  ;;  %v852_v30 = vadd.f32 %v836_v51, %v766_v63  ;;  %4024 = vtanh.f32 %v2006_v52  ;;  %v2590_v3 = vmul.f32 %v8795_v12, %v8862_v7  ;;  %v2657_v38 = vadd.f32 %v2641_v6, %v2571_v0  ;;  %v8865_v52 = vld [vmem:[#allocation59_spill] sm:$0xff]  ;;  %v8868_v6 = vld [vmem:[#allocation96_spill] sm:$0xff] }
 0x251   :  { %v4011_v50 = vpop.eup %4010  ;;  %v1094_v15 = vmul.f32 %v4003_v55, %v8788_v48  ;;  %4026 = vtanh.f32 %v2092_v31  ;;  %v2436_v36 = vadd.f32 %v8863_v20, %v2418_v35  ;;  %v1180_v13 = vmul.f32 %v4005_v17, %v8790_v2  ;;  %v8870_v17 = vld [vmem:[#allocation12_spill] sm:$0xff] }
 0x252   :  { %v938_v61 = vadd.f32 %v922_v4, %v852_v30  ;;  %v1266_v59 = vmul.f32 %v4007_v45, %v8864_v19  ;;  %4028 = vtanh.f32 %v2178_v60  ;;  %v2743_v51 = vadd.f32 %v2727_v44, %v2657_v38  ;;  %v6911_v30 = vld [vmem:[%s7561_s0 + $0x68] sm:$0xff]  ;;  %v8869_v44 = vld [vmem:[#allocation10_spill] sm:$0xff] }
 0x253   :  { %v1352_v63 = vmul.f32 %v4009_v25, %v8865_v52  ;;  %4030 = vtanh.f32 %v2264_v21  ;;  %v2522_v16 = vadd.f32 %v8866_v18, %v2504_v47  ;;  %v1438_v0 = vmul.f32 %v4011_v50, %v8867_v29  ;;  %v8871_v45 = vld [vmem:[#allocation98_spill] sm:$0xff]  ;;  %v8873_v25 = vld [vmem:[#allocation17_spill] sm:$0xff]  ;;  %v8879_v19 = vld [vmem:[#allocation99_spill] sm:$0xff] }
 0x254   :  { %v1024_v7 = vadd.f32 %v1008_v43, %v938_v61  ;;  %4032 = vtanh.f32 %v2350_v49  ;;  %v2608_v31 = vadd.f32 %v8868_v6, %v2590_v3  ;;  %v2829_v4 = vadd.f32 %v6866_v57, %v2743_v51  ;;  %v8872_v47 = vld [vmem:[#allocation14_spill] sm:$0xff]  ;;  %v8875_v51 = vld [vmem:[#allocation11_spill] sm:$0xff]  ;;  %v8877_v29 = vld [vmem:[#allocation13_spill] sm:$0xff] }
 0x255   :  { %v4013_v55 = vpop.eup %4012  ;;  %4034 = vtanh.f32 %v2436_v36  ;;  %v97_v38 = vmul.f32 %v6911_v30, %v8869_v44  ;;  %v183_v43 = vmul.f32 %v6911_v30, %v8870_v17  ;;  %v2676_v21 = vmul.f32 %v8795_v12, %v8871_v45  ;;  %v8874_v36 = vld [vmem:[#allocation101_spill] sm:$0xff] }
 0x256   :  { %v4015_v60 = vpop.eup %4014  ;;  %v1110_v35 = vadd.f32 %v1094_v15, %v1024_v7  ;;  %v269_v57 = vmul.f32 %v6911_v30, %v8872_v47  ;;  %v355_v49 = vmul.f32 %v6911_v30, %v8873_v25  ;;  %v2914_v50 = vmul.f32 0.5, %v2829_v4  ;;  %v8876_v15 = vld [vmem:[#allocation67_spill] sm:$0xff] }
 0x257   :  { %v4017_v3 = vpop.eup %4016  ;;  %4036 = vtanh.f32 %v2522_v16  ;;  %v2762_v61 = vmul.f32 %v8795_v12, %v8874_v36  ;;  %v115_v6 = vadd.f32 %v8875_v51, %v97_v38  ;;  %v1524_v7 = vmul.f32 %v4013_v55, %v8876_v15  ;;  %v8878_v25 = vld [vmem:[#allocation15_spill] sm:$0xff]  ;;  %v8880_v38 = vld [vmem:[#allocation18_spill] sm:$0xff] }
 0x258   :  { %v4019_v17 = vpop.eup %4018  ;;  %v1196_v44 = vadd.f32 %v1180_v13, %v1110_v35  ;;  %4038 = vtanh.f32 %v2608_v31  ;;  %v201_v18 = vadd.f32 %v8877_v29, %v183_v43  ;;  %v2936_v47 = vmul.f32 %v8807_v42, %v2914_v50  ;;  %v8881_v13 = vld [vmem:[#allocation110_spill] sm:$0xff]  ;;  %v8883_v43 = vld [vmem:[#allocation19_spill] sm:$0xff] }
 0x259   :  { %v1610_v52 = vmul.f32 %v4015_v60, %v8819_v9  ;;  %4040 = vtanh.f32 %v115_v6  ;;  %v287_v45 = vadd.f32 %v8878_v25, %v269_v57  ;;  %v2694_v12 = vadd.f32 %v8879_v19, %v2676_v21  ;;  %v8882_v55 = vld [vmem:[#allocation102_spill] sm:$0xff]  ;;  %v8884_v6 = vld [vmem:[#allocation23_spill] sm:$0xff] }
 0x25a   :  { %v4021_v16 = vpop.eup %4020  ;;  %v1282_v20 = vadd.f32 %v1266_v59, %v1196_v44  ;;  %4042 = vtanh.f32 %v201_v18  ;;  %v373_v36 = vadd.f32 %v8880_v38, %v355_v49  ;;  %v2952_v35 = vsub.f32 %v8881_v13, %v2936_v47  ;;  %v8885_v59 = vld [vmem:[#allocation27_spill] sm:$0xff]  ;;  %v8886_v49 = vld [vmem:[#allocation20_spill] sm:$0xff] }
 0x25b   :  { %v2780_v31 = vadd.f32 %v8882_v55, %v2762_v61  ;;  %4044 = vtanh.f32 %v287_v45  ;;  %v441_v42 = vmul.f32 %v6911_v30, %v8883_v43  ;;  %v527_v57 = vmul.f32 %v6911_v30, %v8884_v6  ;;  %v8887_v47 = vld [vmem:[#allocation31_spill] sm:$0xff] }
 0x25c   :  { %v4023_v50 = vpop.eup %4022  ;;  %v1368_v60 = vadd.f32 %v1352_v63, %v1282_v20  ;;  %4046 = vtanh.f32 %v373_v36  ;;  %v613_v44 = vmul.f32 %v6911_v30, %v8885_v59  ;;  %v2968_v21 = vmul.f32 %v2952_v35, %v2829_v4  ;;  %v8888_v20 = vld [vmem:[#allocation24_spill] sm:$0xff]  ;;  %v8889_v59 = vld [vmem:[#allocation73_spill] sm:$0xff] }
 0x25d   :  { %v4025_v18 = vpop.eup %4024  ;;  %v459_v9 = vadd.f32 %v8886_v49, %v441_v42  ;;  %v699_v61 = vmul.f32 %v6911_v30, %v8887_v47  ;;  %v785_v45 = vmul.f32 %v6911_v30, %v8749_v11  ;;  %4048 = vtanh.f32 %v2694_v12  ;;  %v8890_v4 = vld [vmem:[#allocation76_spill] sm:$0xff]  ;;  %v8892_v11 = vld [vmem:[#allocation34_spill] sm:$0xff] }
 0x25e   :  { %v4027_v13 = vpop.eup %4026  ;;  %v1454_v55 = vadd.f32 %v1438_v0, %v1368_v60  ;;  %v545_v63 = vadd.f32 %v8888_v20, %v527_v57  ;;  %v631_v36 = vadd.f32 %v8821_v32, %v613_v44  ;;  %2995 = vadd.xlane.f32.xlu0 %v2968_v21  ;;  %v1696_v38 = vmul.f32 %v4017_v3, %v8889_v59  ;;  %v8891_v42 = vld [vmem:[#allocation32_spill] sm:$0xff]  ;;  %v8893_v0 = vld [vmem:[#allocation35_spill] sm:$0xff]  ;;  %v8895_v21 = vld [vmem:[#allocation38_spill] sm:$0xff] }
 0x25f   :  { %v4029_v6 = vpop.eup %4028  ;;  %v1782_v35 = vmul.f32 %v4019_v17, %v8890_v4  ;;  %4050 = vtanh.f32 %v459_v9  ;;  %v717_v49 = vadd.f32 %v8891_v42, %v699_v61  ;;  %v803_v43 = vadd.f32 %v8892_v11, %v785_v45  ;;  %v8894_v57 = vld [vmem:[#allocation79_spill] sm:$0xff]  ;;  %v8896_v59 = vld [vmem:[#allocation41_spill] sm:$0xff]  ;;  %v8897_v4 = vld [vmem:[#allocation82_spill] sm:$0xff] }
 0x260   :  { %v4031_v47 = vpop.eup %4030  ;;  %v1540_v25 = vadd.f32 %v1524_v7, %v1454_v55  ;;  %4052 = vtanh.f32 %v545_v63  ;;  %v871_v12 = vmul.f32 %v6911_v30, %v8893_v0  ;;  %v1868_v44 = vmul.f32 %v4021_v16, %v8894_v57  ;;  %v8898_v55 = vld [vmem:[#allocation36_spill] sm:$0xff]  ;;  %v8899_v63 = vld [vmem:[#allocation39_spill] sm:$0xff]  ;;  %v8900_v42 = vld [vmem:[#allocation42_spill] sm:$0xff] }
 0x261   :  { %v4033_v60 = vpop.eup %4032  ;;  %4054 = vtanh.f32 %v631_v36  ;;  %v957_v3 = vmul.f32 %v6911_v30, %v8895_v21  ;;  %v1043_v9 = vmul.f32 %v6911_v30, %v8896_v59  ;;  %v1954_v7 = vmul.f32 %v4023_v50, %v8897_v4  ;;  %v8901_v16 = vld [vmem:[#allocation44_spill] sm:$0xff]  ;;  %v8902_v32 = vld [vmem:[#allocation47_spill] sm:$0xff]  ;;  %v8904_v50 = vld [vmem:[#allocation85_spill] sm:$0xff] }
 0x262   :  { %v4035_v17 = vpop.eup %4034  ;;  %v1626_v61 = vadd.f32 %v1610_v52, %v1540_v25  ;;  %4056 = vtanh.f32 %v2780_v31  ;;  %v889_v45 = vadd.f32 %v8898_v55, %v871_v12  ;;  %v1129_v36 = vmul.f32 %v6911_v30, %v8901_v16  ;;  %v8903_v52 = vld [vmem:[#allocation50_spill] sm:$0xff] }
 0x263   :  { %4058 = vtanh.f32 %v717_v49  ;;  %v975_v11 = vadd.f32 %v8899_v63, %v957_v3  ;;  %v1061_v0 = vadd.f32 %v8900_v42, %v1043_v9  ;;  %v1215_v59 = vmul.f32 %v6911_v30, %v8902_v32  ;;  %v8905_v3 = vld [vmem:[#allocation53_spill] sm:$0xff]  ;;  %v8906_v63 = vld [vmem:[#allocation88_spill] sm:$0xff]  ;;  %v8907_v32 = vld [vmem:[#allocation94_spill] sm:$0xff] }
 0x264   :  { %v4037_v57 = vpop.eup %4036  ;;  %v1712_v21 = vadd.f32 %v1696_v38, %v1626_v61  ;;  %4060 = vtanh.f32 %v803_v43  ;;  %v1301_v25 = vmul.f32 %v6911_v30, %v8903_v52  ;;  %v2040_v12 = vmul.f32 %v4025_v18, %v8904_v50 }
 0x265   :  { %v4039_v31 = vpop.eup %4038  ;;  %4062 = vtanh.f32 %v889_v45  ;;  %v1147_v49 = vadd.f32 %v8763_v22, %v1129_v36  ;;  %v1387_v9 = vmul.f32 %v6911_v30, %v8905_v3  ;;  %v2126_v38 = vmul.f32 %v4027_v13, %v8906_v63 }
 0x266   :  { %v4041_v4 = vpop.eup %4040  ;;  %v1798_v42 = vadd.f32 %v1782_v35, %v1712_v21  ;;  %v2212_v43 = vmul.f32 %v4029_v6, %v8835_v34  ;;  %4064 = vtanh.f32 %v975_v11  ;;  %v2298_v16 = vmul.f32 %v4031_v47, %v8907_v32  ;;  %v8908_v47 = vld [vmem:[#allocation55_spill] sm:$0xff]  ;;  %v8909_v21 = vld [vmem:[#allocation97_spill] sm:$0xff] }
 0x267   :  { %v4043_v61 = vpop.eup %4042  ;;  %v149_v52 = vmul.f32 %v4041_v4, %v8837_v58  ;;  %4066 = vtanh.f32 %v1061_v0  ;;  %v1233_v18 = vadd.f32 %v8838_v5, %v1215_v59  ;;  %v1319_v3 = vadd.f32 %v8840_v26, %v1301_v25  ;;  %v8910_v26 = vld [vmem:[#allocation26_spill] sm:$0xff] }
 0x268   :  { %v4045_v45 = vpop.eup %4044  ;;  %v1884_v36 = vadd.f32 %v1868_v44, %v1798_v42  ;;  %v235_v22 = vmul.f32 %v4043_v61, %v8839_v46  ;;  %v1473_v13 = vmul.f32 %v6911_v30, %v8841_v8  ;;  %4068 = vtanh.f32 %v1147_v49  ;;  %v8911_v8 = vld [vmem:[#allocation62_spill] sm:$0xff] }
 0x269   :  { %v4047_v35 = vpop.eup %4046  ;;  %v165_v11 = vadd.f32 %v149_v52, %v8562_v33  ;;  %v321_v6 = vmul.f32 %v4045_v45, %v8699_v14  ;;  %v1405_v4 = vadd.f32 %v8908_v47, %v1387_v9  ;;  %v2384_v59 = vmul.f32 %v4033_v60, %v8909_v21  ;;  %v8912_v14 = vld [vmem:[#allocation100_spill] sm:$0xff] }
 0x26a   :  { %v1970_v0 = vadd.f32 %v1954_v7, %v1884_v36  ;;  %v1491_v42 = vadd.f32 %v8844_v62, %v1473_v13  ;;  %v1559_v44 = vmul.f32 %v6911_v30, %v8843_v24  ;;  %v4049_v25 = vpop.eup %4048  ;;  %v407_v46 = vmul.f32 %v4047_v35, %v8910_v26 }
 0x26b   :  { %v251_v61 = vadd.f32 %v235_v22, %v165_v11  ;;  %4070 = vtanh.f32 %v1233_v18  ;;  %v1645_v52 = vmul.f32 %v6911_v30, %v8911_v8  ;;  %v2470_v9 = vmul.f32 %v4035_v17, %v8912_v14  ;;  %v8913_v11 = vld [vmem:[#allocation103_spill] sm:$0xff] }
 0x26c   :  { %v4051_v45 = vpop.eup %4050  ;;  %v2056_v49 = vadd.f32 %v2040_v12, %v1970_v0  ;;  %4072 = vtanh.f32 %v1319_v3  ;;  %v1731_v60 = vmul.f32 %v6911_v30, %v8632_v53  ;;  %v1817_v22 = vmul.f32 %v6911_v30, %v8846_v56 }
 0x26d   :  { %v4053_v7 = vpop.eup %4052  ;;  %v337_v36 = vadd.f32 %v321_v6, %v251_v61  ;;  %v493_v13 = vmul.f32 %v4051_v45, %v8417_v54  ;;  %4074 = vtanh.f32 %v1405_v4  ;;  %v2556_v62 = vmul.f32 %v4037_v57, %v8913_v11  ;;  %v8914_v45 = vld [vmem:[#allocation104_spill] sm:$0xff] }
 0x26e   :  { %v4055_v18 = vpop.eup %4054  ;;  %v2142_v35 = vadd.f32 %v2126_v38, %v2056_v49  ;;  %4076 = vtanh.f32 %v1491_v42  ;;  %v1577_v12 = vadd.f32 %v8845_v28, %v1559_v44  ;;  %v579_v0 = vmul.f32 %v4053_v7, %v8771_v39  ;;  %v8915_v49 = vld [vmem:[#allocation37_spill] sm:$0xff] }
 0x26f   :  { %v4057_v17 = vpop.eup %4056  ;;  %v423_v3 = vadd.f32 %v407_v46, %v337_v36  ;;  %v1663_v53 = vadd.f32 %v8701_v10, %v1645_v52  ;;  %v1903_v6 = vmul.f32 %v6911_v30, %v8847_v27  ;;  %v2642_v56 = vmul.f32 %v4039_v31, %v8914_v45  ;;  %v8916_v36 = vld [vmem:[#allocation69_spill] sm:$0xff]  ;;  %v8917_v27 = vld [vmem:[#allocation106_spill] sm:$0xff] }
 0x270   :  { %v4059_v4 = vpop.eup %4058  ;;  %v2228_v61 = vadd.f32 %v2212_v43, %v2142_v35  ;;  %v1749_v38 = vadd.f32 %v8772_v41, %v1731_v60  ;;  %v1989_v57 = vmul.f32 %v6911_v30, %v8848_v1  ;;  %v2728_v44 = vmul.f32 %v4049_v25, %v8777_v23  ;;  %v8918_v43 = vld [vmem:[#allocation77_spill] sm:$0xff]  ;;  %v8919_v41 = vld [vmem:[#allocation40_spill] sm:$0xff] }
 0x271   :  { %v4061_v42 = vpop.eup %4060  ;;  %v509_v46 = vadd.f32 %v493_v13, %v423_v3  ;;  %v665_v7 = vmul.f32 %v4055_v18, %v8915_v49  ;;  %v1835_v52 = vadd.f32 %v8916_v36, %v1817_v22  ;;  %v2814_v28 = vmul.f32 %v4057_v17, %v8917_v27  ;;  %v8920_v18 = vld [vmem:[#allocation80_spill] sm:$0xff]  ;;  %v8922_v27 = vld [vmem:[#allocation83_spill] sm:$0xff] }
 0x272   :  { %v4063_v10 = vpop.eup %4062  ;;  %v2314_v39 = vadd.f32 %v2298_v16, %v2228_v61  ;;  %4078 = vtanh.f32 %v1577_v12  ;;  %v2075_v31 = vmul.f32 %v6911_v30, %v8918_v43  ;;  %v751_v1 = vmul.f32 %v4059_v4, %v8919_v41  ;;  %v8921_v12 = vld [vmem:[#allocation43_spill] sm:$0xff] }
 0x273   :  { %v4065_v60 = vpop.eup %4064  ;;  %v595_v35 = vadd.f32 %v579_v0, %v509_v46  ;;  %4080 = vtanh.f32 %v1663_v53  ;;  %v1921_v25 = vadd.f32 %v8851_v40, %v1903_v6  ;;  %v2007_v22 = vadd.f32 %v8852_v37, %v1989_v57  ;;  %v8923_v53 = vld [vmem:[#allocation45_spill] sm:$0xff]  ;;  %v8924_v6 = vld [vmem:[#allocation78_spill] sm:$0xff] }
 0x274   :  { %v4067_v13 = vpop.eup %4066  ;;  %v2400_v3 = vadd.f32 %v2384_v59, %v2314_v39  ;;  %4082 = vtanh.f32 %v1749_v38  ;;  %v2161_v16 = vmul.f32 %v6911_v30, %v8920_v18  ;;  %v837_v61 = vmul.f32 %v4061_v42, %v8921_v12  ;;  %v8925_v39 = vld [vmem:[#allocation86_spill] sm:$0xff]  ;;  %v8926_v57 = vld [vmem:[#allocation49_spill] sm:$0xff] }
 0x275   :  { %v681_v17 = vadd.f32 %v665_v7, %v595_v35  ;;  %4084 = vtanh.f32 %v1835_v52  ;;  %v2247_v0 = vmul.f32 %v6911_v30, %v8922_v27  ;;  %v4069_v46 = vpop.eup %4068  ;;  %v923_v41 = vmul.f32 %v4063_v10, %v8923_v53  ;;  %v8927_v7 = vld [vmem:[#allocation89_spill] sm:$0xff] }
 0x276   :  { %v2486_v4 = vadd.f32 %v2470_v9, %v2400_v3  ;;  %v2093_v40 = vadd.f32 %v8924_v6, %v2075_v31  ;;  %v2333_v59 = vmul.f32 %v6911_v30, %v8925_v39  ;;  %v1009_v37 = vmul.f32 %v4065_v60, %v8926_v57  ;;  %v8928_v9 = vld [vmem:[#allocation81_spill] sm:$0xff]  ;;  %v8929_v6 = vld [vmem:[#allocation84_spill] sm:$0xff]  ;;  %v8931_v57 = vld [vmem:[#allocation87_spill] sm:$0xff] }
 0x277   :  { %v767_v38 = vadd.f32 %v751_v1, %v681_v17  ;;  %4086 = vtanh.f32 %v1921_v25  ;;  %v2419_v42 = vmul.f32 %v6911_v30, %v8927_v7  ;;  %v1095_v12 = vmul.f32 %v4067_v13, %v8788_v48  ;;  %v8930_v1 = vld [vmem:[#allocation92_spill] sm:$0xff] }
 0x278   :  { %v4071_v52 = vpop.eup %4070  ;;  %v2572_v35 = vadd.f32 %v2556_v62, %v2486_v4  ;;  %4088 = vtanh.f32 %v2007_v22  ;;  %v2179_v3 = vadd.f32 %v8928_v9, %v2161_v16  ;;  %v1181_v31 = vmul.f32 %v4069_v46, %v8790_v2  ;;  %v8932_v62 = vld [vmem:[#allocation95_spill] sm:$0xff]  ;;  %v8933_v16 = vld [vmem:[#allocation58_spill] sm:$0xff] }
 0x279   :  { %v4073_v10 = vpop.eup %4072  ;;  %v853_v53 = vadd.f32 %v837_v61, %v767_v38  ;;  %v2265_v39 = vadd.f32 %v8929_v6, %v2247_v0  ;;  %v2505_v60 = vmul.f32 %v6911_v30, %v8930_v1  ;;  %4090 = vtanh.f32 %v2093_v40  ;;  %v8934_v61 = vld [vmem:[#allocation90_spill] sm:$0xff]  ;;  %v8936_v6 = vld [vmem:[#allocation59_spill] sm:$0xff] }
 0x27a   :  { %v4075_v25 = vpop.eup %4074  ;;  %v2658_v17 = vadd.f32 %v2642_v56, %v2572_v35  ;;  %v2351_v7 = vadd.f32 %v8931_v57, %v2333_v59  ;;  %v2591_v13 = vmul.f32 %v6911_v30, %v8932_v62  ;;  %v1267_v48 = vmul.f32 %v4071_v52, %v8933_v16  ;;  %v8935_v46 = vld [vmem:[#allocation98_spill] sm:$0xff]  ;;  %v8937_v56 = vld [vmem:[#allocation93_spill] sm:$0xff]  ;;  %v8938_v59 = vld [vmem:[#allocation64_spill] sm:$0xff] }
 0x27b   :  { %v4077_v22 = vpop.eup %4076  ;;  %v939_v4 = vadd.f32 %v923_v41, %v853_v53  ;;  %v2437_v38 = vadd.f32 %v8934_v61, %v2419_v42  ;;  %v2677_v0 = vmul.f32 %v6911_v30, %v8935_v46  ;;  %v1353_v1 = vmul.f32 %v4073_v10, %v8936_v6  ;;  %v7048_v41 = vld [vmem:[%s7561_s0 + $0x70] sm:$0xff]  ;;  %v8939_v53 = vld [vmem:[#allocation10_spill] sm:$0xff] }
 0x27c   :  { %v2744_v2 = vadd.f32 %v2728_v44, %v2658_v17  ;;  %4092 = vtanh.f32 %v2179_v3  ;;  %v2523_v40 = vadd.f32 %v8937_v56, %v2505_v60  ;;  %v1439_v57 = vmul.f32 %v4075_v25, %v8938_v59  ;;  %v8940_v10 = vld [vmem:[#allocation96_spill] sm:$0xff]  ;;  %v8941_v59 = vld [vmem:[#allocation101_spill] sm:$0xff] }
 0x27d   :  { %v1025_v35 = vadd.f32 %v1009_v37, %v939_v4  ;;  %4094 = vtanh.f32 %v2265_v39  ;;  %v98_v42 = vmul.f32 %v7048_v41, %v8939_v53  ;;  %v1525_v44 = vmul.f32 %v4077_v22, %v8876_v15  ;;  %v8942_v46 = vld [vmem:[#allocation12_spill] sm:$0xff]  ;;  %v8944_v22 = vld [vmem:[#allocation17_spill] sm:$0xff] }
 0x27e   :  { %v2830_v52 = vadd.f32 %v2814_v28, %v2744_v2  ;;  %4096 = vtanh.f32 %v2351_v7  ;;  %v2609_v3 = vadd.f32 %v8940_v10, %v2591_v13  ;;  %v2695_v37 = vadd.f32 %v8879_v19, %v2677_v0  ;;  %v8943_v13 = vld [vmem:[#allocation14_spill] sm:$0xff]  ;;  %v8951_v10 = vld [vmem:[#allocation23_spill] sm:$0xff] }
 0x27f   :  { %v4079_v17 = vpop.eup %4078  ;;  %v1111_v60 = vadd.f32 %v1095_v12, %v1025_v35  ;;  %4098 = vtanh.f32 %v2437_v38  ;;  %v116_v39 = vadd.f32 %v8875_v51, %v98_v42  ;;  %v2763_v6 = vmul.f32 %v6911_v30, %v8941_v59  ;;  %v8946_v42 = vld [vmem:[#allocation19_spill] sm:$0xff]  ;;  %v8948_v19 = vld [vmem:[#allocation18_spill] sm:$0xff] }
 0x280   :  { %v4081_v25 = vpop.eup %4080  ;;  %v2915_v4 = vmul.f32 0.5, %v2830_v52  ;;  %4100 = vtanh.f32 %v2523_v40  ;;  %v184_v2 = vmul.f32 %v7048_v41, %v8942_v46  ;;  %v270_v12 = vmul.f32 %v7048_v41, %v8943_v13  ;;  %v7067_v40 = vld [vmem:[%s7562_s1] ss:$0 sm:$0xff]  ;;  %v8949_v13 = vld [vmem:[#allocation111_spill] sm:$0xff]  ;;  %v8950_v46 = vld [vmem:[#allocation20_spill] sm:$0xff] }
 0x281   :  { %v4083_v28 = vpop.eup %4082  ;;  %v1197_v7 = vadd.f32 %v1181_v31, %v1111_v60  ;;  %4102 = vtanh.f32 %v116_v39  ;;  %v356_v38 = vmul.f32 %v7048_v41, %v8944_v22  ;;  %8945 = vst [vmem:[#allocation109_spill] sm:$0xff] %v7067_v40  ;;  %v442_v31 = vmul.f32 %v7048_v41, %v8946_v42  ;;  %v8947_v39 = vld [vmem:[#allocation15_spill] sm:$0xff] }
 0x282   :  { %v4085_v0 = vpop.eup %4084  ;;  %v2937_v30 = vmul.f32 %v7067_v40, %v2915_v4  ;;  %4104 = vtanh.f32 %v2609_v3  ;;  %v202_v35 = vadd.f32 %v8877_v29, %v184_v2  ;;  %v288_v59 = vadd.f32 %v8947_v39, %v270_v12  ;;  %v8952_v40 = vld [vmem:[#allocation70_spill] sm:$0xff]  ;;  %v8960_v42 = vld [vmem:[#allocation107_spill] sm:$0xff] }
 0x283   :  { %v1283_v60 = vadd.f32 %v1267_v48, %v1197_v7  ;;  %4106 = vtanh.f32 %v2695_v37  ;;  %v374_v22 = vadd.f32 %v8948_v19, %v356_v38  ;;  %v460_v53 = vadd.f32 %v8950_v46, %v442_v31  ;;  %v8953_v48 = vld [vmem:[#allocation27_spill] sm:$0xff]  ;;  %v8954_v12 = vld [vmem:[#allocation102_spill] sm:$0xff]  ;;  %v8955_v31 = vld [vmem:[#allocation28_spill] sm:$0xff] }
 0x284   :  { %v4087_v15 = vpop.eup %4086  ;;  %v2953_v51 = vsub.f32 %v8949_v13, %v2937_v30  ;;  %4108 = vtanh.f32 %v202_v35  ;;  %v528_v3 = vmul.f32 %v7048_v41, %v8951_v10  ;;  %v1611_v29 = vmul.f32 %v4079_v17, %v8952_v40  ;;  %v8956_v10 = vld [vmem:[#allocation31_spill] sm:$0xff]  ;;  %v8958_v17 = vld [vmem:[#allocation116_spill] sm:$0xff] }
 0x285   :  { %v4089_v4 = vpop.eup %4088  ;;  %v1369_v2 = vadd.f32 %v1353_v1, %v1283_v60  ;;  %4110 = vtanh.f32 %v288_v59  ;;  %v614_v37 = vmul.f32 %v7048_v41, %v8953_v48  ;;  %v2781_v38 = vadd.f32 %v8954_v12, %v2763_v6  ;;  %v8957_v60 = vld [vmem:[#allocation108_spill] sm:$0xff]  ;;  %v8973_v48 = vld [vmem:[#allocation82_spill] sm:$0xff] }
 0x286   :  { %v2969_v7 = vmul.f32 %v2953_v51, %v2830_v52  ;;  %4112 = vtanh.f32 %v374_v22  ;;  %v546_v13 = vadd.f32 %v8888_v20, %v528_v3  ;;  %v4091_v30 = vpop.eup %4090  ;;  %v700_v1 = vmul.f32 %v7048_v41, %v8956_v10  ;;  %v8961_v51 = vld [vmem:[#allocation33_spill] sm:$0xff]  ;;  %v8962_v52 = vld [vmem:[#allocation35_spill] sm:$0xff]  ;;  %v8968_v20 = vld [vmem:[#allocation76_spill] sm:$0xff] }
 0x287   :  { %v1455_v35 = vadd.f32 %v1439_v57, %v1369_v2  ;;  %4114 = vtanh.f32 %v460_v53  ;;  %v632_v46 = vadd.f32 %v8955_v31, %v614_v37  ;;  %v8959_v59 = vsub.f32 %v8957_v60, %v8958_v17  ;;  %v8963_v3 = vld [vmem:[#allocation73_spill] sm:$0xff]  ;;  %v8964_v37 = vld [vmem:[#allocation32_spill] sm:$0xff]  ;;  %v8965_v60 = vld [vmem:[#allocation34_spill] sm:$0xff] }
 0x288   :  { %2997 = vadd.xlane.f32.xlu1 %v2969_v7  ;;  %4116 = vtanh.f32 %v546_v13  ;;  %v786_v6 = vmul.f32 %v7048_v41, %v8961_v51  ;;  %v872_v57 = vmul.f32 %v7048_v41, %v8962_v52  ;;  %v1697_v2 = vmul.f32 %v4081_v25, %v8963_v3  ;;  %v8966_v7 = vld [vmem:[#allocation38_spill] sm:$0xff]  ;;  %v8969_v25 = vld [vmem:[#allocation44_spill] sm:$0xff] }
 0x289   :  { %v7091_v19 = vmul.f32 %v8960_v42, %v8959_v59  ;;  %v4093_v53 = vpop.eup %4092  ;;  %v1541_v22 = vadd.f32 %v1525_v44, %v1455_v35  ;;  %4118 = vtanh.f32 %v632_v46  ;;  %v718_v12 = vadd.f32 %v8964_v37, %v700_v1  ;;  %v8967_v42 = vld [vmem:[#allocation41_spill] sm:$0xff]  ;;  %v8970_v1 = vld [vmem:[#allocation79_spill] sm:$0xff] }
 0x28a   :  { %v4095_v10 = vpop.eup %4094  ;;  %v804_v17 = vadd.f32 %v8965_v60, %v786_v6  ;;  %v890_v59 = vadd.f32 %v8898_v55, %v872_v57  ;;  %v958_v13 = vmul.f32 %v7048_v41, %v8966_v7  ;;  %v1044_v51 = vmul.f32 %v7048_v41, %v8967_v42  ;;  %v8971_v6 = vld [vmem:[#allocation39_spill] sm:$0xff]  ;;  %v8972_v55 = vld [vmem:[#allocation42_spill] sm:$0xff] }
 0x28b   :  { %v4097_v31 = vpop.eup %4096  ;;  %v1627_v52 = vadd.f32 %v1611_v29, %v1541_v22  ;;  %v1783_v44 = vmul.f32 %v4083_v28, %v8968_v20  ;;  %4120 = vtanh.f32 %v2781_v38  ;;  %v1130_v46 = vmul.f32 %v7048_v41, %v8969_v25  ;;  %v8974_v22 = vld [vmem:[#allocation46_spill] sm:$0xff]  ;;  %v8975_v20 = vld [vmem:[#allocation47_spill] sm:$0xff] }
 0x28c   :  { %v4099_v35 = vpop.eup %4098  ;;  %v1869_v37 = vmul.f32 %v4085_v0, %v8970_v1  ;;  %4122 = vtanh.f32 %v718_v12  ;;  %v976_v57 = vadd.f32 %v8971_v6, %v958_v13  ;;  %v1062_v60 = vadd.f32 %v8972_v55, %v1044_v51 }
 0x28d   :  { %v4101_v7 = vpop.eup %4100  ;;  %v1713_v3 = vadd.f32 %v1697_v2, %v1627_v52  ;;  %v1955_v42 = vmul.f32 %v4087_v15, %v8973_v48  ;;  %v2041_v29 = vmul.f32 %v4089_v4, %v8904_v50  ;;  %4124 = vtanh.f32 %v804_v17  ;;  %v8976_v52 = vld [vmem:[#allocation50_spill] sm:$0xff] }
 0x28e   :  { %v4103_v28 = vpop.eup %4102  ;;  %v2127_v38 = vmul.f32 %v4091_v30, %v8906_v63  ;;  %4126 = vtanh.f32 %v890_v59  ;;  %v1148_v25 = vadd.f32 %v8974_v22, %v1130_v46  ;;  %v1216_v0 = vmul.f32 %v7048_v41, %v8975_v20  ;;  %v8977_v30 = vld [vmem:[#allocation53_spill] sm:$0xff] }
 0x28f   :  { %v4105_v12 = vpop.eup %4104  ;;  %v1799_v13 = vadd.f32 %v1783_v44, %v1713_v3  ;;  %v150_v51 = vmul.f32 %v4103_v28, %v8837_v58  ;;  %4128 = vtanh.f32 %v976_v57  ;;  %v1302_v15 = vmul.f32 %v7048_v41, %v8976_v52  ;;  %v8978_v44 = vld [vmem:[#allocation56_spill] sm:$0xff]  ;;  %v8980_v58 = vld [vmem:[#allocation25_spill] sm:$0xff] }
 0x290   :  { %v4107_v2 = vpop.eup %4106  ;;  %v2213_v4 = vmul.f32 %v4093_v53, %v8835_v34  ;;  %v2299_v17 = vmul.f32 %v4095_v10, %v8907_v32  ;;  %4130 = vtanh.f32 %v1062_v60  ;;  %v1388_v59 = vmul.f32 %v7048_v41, %v8977_v30  ;;  %v8979_v10 = vld [vmem:[#allocation22_spill] sm:$0xff] }
 0x291   :  { %v4109_v46 = vpop.eup %4108  ;;  %v1885_v22 = vadd.f32 %v1869_v37, %v1799_v13  ;;  %v166_v55 = vadd.f32 %v150_v51, %v8562_v33  ;;  %v1234_v3 = vadd.f32 %v8838_v5, %v1216_v0  ;;  %v1474_v57 = vmul.f32 %v7048_v41, %v8978_v44  ;;  %v8981_v13 = vld [vmem:[#allocation51_spill] sm:$0xff] }
 0x292   :  { %v4111_v28 = vpop.eup %4110  ;;  %v2385_v52 = vmul.f32 %v4097_v31, %v8909_v21  ;;  %v7130_v53 = vmul.f32 %v4099_v35, %v8912_v14  ;;  %v236_v60 = vmul.f32 %v4109_v46, %v8979_v10  ;;  %4132 = vtanh.f32 %v1148_v25 }
 0x293   :  { %v4113_v32 = vpop.eup %4112  ;;  %v1971_v30 = vadd.f32 %v1955_v42, %v1885_v22  ;;  %v322_v37 = vmul.f32 %v4111_v28, %v8980_v58  ;;  %v1320_v51 = vadd.f32 %v8981_v13, %v1302_v15  ;;  %v1560_v0 = vmul.f32 %v7048_v41, %v8843_v24  ;;  %v8982_v42 = vld [vmem:[#allocation57_spill] sm:$0xff] }
 0x294   :  { %v4115_v5 = vpop.eup %4114  ;;  %v252_v44 = vadd.f32 %v236_v60, %v166_v55  ;;  %v408_v33 = vmul.f32 %v4113_v32, %v8910_v26  ;;  %v1406_v31 = vadd.f32 %v8908_v47, %v1388_v59  ;;  %v1646_v35 = vmul.f32 %v7048_v41, %v8911_v8  ;;  %v8983_v28 = vld [vmem:[#allocation65_spill] sm:$0xff]  ;;  %v8984_v32 = vld [vmem:[#allocation68_spill] sm:$0xff] }
 0x295   :  { %v4117_v46 = vpop.eup %4116  ;;  %v2057_v25 = vadd.f32 %v2041_v29, %v1971_v30  ;;  %4134 = vtanh.f32 %v1234_v3  ;;  %v1492_v22 = vadd.f32 %v8982_v42, %v1474_v57  ;;  %v1732_v15 = vmul.f32 %v7048_v41, %v8983_v28  ;;  %v8985_v29 = vld [vmem:[#allocation61_spill] sm:$0xff]  ;;  %v8986_v42 = vld [vmem:[#allocation30_spill] sm:$0xff]  ;;  %v8987_v28 = vld [vmem:[#allocation63_spill] sm:$0xff] }
 0x296   :  { %v4119_v13 = vpop.eup %4118  ;;  %v2557_v24 = vmul.f32 %v4101_v7, %v8913_v11  ;;  %v338_v14 = vadd.f32 %v322_v37, %v252_v44  ;;  %v494_v55 = vmul.f32 %v4115_v5, %v8417_v54  ;;  %v1818_v59 = vmul.f32 %v7048_v41, %v8984_v32  ;;  %v8988_v5 = vld [vmem:[#allocation66_spill] sm:$0xff]  ;;  %v8989_v54 = vld [vmem:[#allocation71_spill] sm:$0xff] }
 0x297   :  { %v2143_v60 = vadd.f32 %v2127_v38, %v2057_v25  ;;  %v2643_v8 = vmul.f32 %v4105_v12, %v8914_v45  ;;  %4136 = vtanh.f32 %v1320_v51  ;;  %v1578_v30 = vadd.f32 %v8985_v29, %v1560_v0 }
 0x298   :  { %v4121_v3 = vpop.eup %4120  ;;  %v424_v57 = vadd.f32 %v408_v33, %v338_v14  ;;  %v580_v47 = vmul.f32 %v4117_v46, %v8986_v42  ;;  %4138 = vtanh.f32 %v1406_v31  ;;  %v1664_v26 = vadd.f32 %v8987_v28, %v1646_v35  ;;  %v8990_v33 = vld [vmem:[#allocation74_spill] sm:$0xff]  ;;  %v7159_v46 = vpop.permute.xlu0 %2867 }
 0x299   :  { %v4123_v7 = vpop.eup %4122  ;;  %v2229_v44 = vadd.f32 %v2213_v4, %v2143_v60  ;;  %4140 = vtanh.f32 %v1492_v22  ;;  %v1750_v37 = vadd.f32 %v8988_v5, %v1732_v15  ;;  %v1904_v38 = vmul.f32 %v7048_v41, %v8989_v54  ;;  %v8992_v5 = vld [vmem:[#allocation72_spill] sm:$0xff] }
 0x29a   :  { %v4125_v25 = vpop.eup %4124  ;;  %v510_v12 = vadd.f32 %v494_v55, %v424_v57  ;;  %v666_v51 = vmul.f32 %v4119_v13, %v8915_v49  ;;  %v1836_v0 = vadd.f32 %v8916_v36, %v1818_v59  ;;  %v1990_v14 = vmul.f32 %v7048_v41, %v8990_v33  ;;  %v8991_v55 = vld [vmem:[#allocation40_spill] sm:$0xff] }
 0x29b   :  { %v4127_v31 = vpop.eup %4126  ;;  %v2315_v35 = vadd.f32 %v2299_v17, %v2229_v44  ;;  %v2729_v4 = vmul.f32 %v4107_v2, %v8777_v23  ;;  %4142 = vtanh.f32 %v1578_v30  ;;  %v2076_v22 = vmul.f32 %v7048_v41, %v8918_v43  ;;  %v8993_v30 = vld [vmem:[#allocation43_spill] sm:$0xff] }
 0x29c   :  { %v4129_v15 = vpop.eup %4128  ;;  %v596_v60 = vadd.f32 %v580_v47, %v510_v12  ;;  %v752_v57 = vmul.f32 %v4123_v7, %v8991_v55  ;;  %4144 = vtanh.f32 %v1664_v26  ;;  %v2162_v13 = vmul.f32 %v7048_v41, %v8920_v18  ;;  %v8994_v43 = vld [vmem:[#allocation75_spill] sm:$0xff]  ;;  %v8995_v7 = vld [vmem:[#allocation78_spill] sm:$0xff] }
 0x29d   :  { %v4131_v59 = vpop.eup %4130  ;;  %v2401_v36 = vadd.f32 %v2385_v52, %v2315_v35  ;;  %4146 = vtanh.f32 %v1750_v37  ;;  %v1922_v33 = vadd.f32 %v8992_v5, %v1904_v38  ;;  %v2248_v2 = vmul.f32 %v7048_v41, %v8922_v27  ;;  %v8996_v18 = vld [vmem:[#allocation86_spill] sm:$0xff]  ;;  %v8997_v37 = vld [vmem:[#allocation89_spill] sm:$0xff]  ;;  %v7178_v35 = vpop.xlane.xlu0 %3056 }
 0x29e   :  { %v682_v17 = vadd.f32 %v666_v51, %v596_v60  ;;  %v838_v44 = vmul.f32 %v4125_v25, %v8993_v30  ;;  %4148 = vtanh.f32 %v1836_v0  ;;  %v2008_v47 = vadd.f32 %v8994_v43, %v1990_v14  ;;  %8998 = vst [vmem:[#allocation117_spill] sm:$0xff] %v7178_v35  ;;  %v8999_v51 = vld [vmem:[#allocation45_spill] sm:$0xff]  ;;  %v9000_v0 = vld [vmem:[#allocation92_spill] sm:$0xff]  ;;  %v7186_v5 = vpop.permute.xlu1 %2869 }
 0x29f   :  { %v4133_v12 = vpop.eup %4132  ;;  %v2487_v26 = vadd.f32 %v7130_v53, %v2401_v36  ;;  %v2094_v55 = vadd.f32 %v8995_v7, %v2076_v22  ;;  %v2334_v52 = vmul.f32 %v7048_v41, %v8996_v18  ;;  %v2420_v38 = vmul.f32 %v7048_v41, %v8997_v37  ;;  %v9001_v36 = vld [vmem:[#allocation106_spill] sm:$0xff]  ;;  %v9002_v22 = vld [vmem:[#allocation84_spill] sm:$0xff]  ;;  %9003 = vst [vmem:[#allocation105_spill] sm:$0xff] %v7186_v5  ;;  %v9004_v30 = vld [vmem:[#allocation49_spill] sm:$0xff] }
 0x2a0   :  { %v768_v27 = vadd.f32 %v752_v57, %v682_v17  ;;  %v924_v60 = vmul.f32 %v4127_v31, %v8999_v51  ;;  %v2180_v25 = vadd.f32 %v8928_v9, %v2162_v13  ;;  %v2506_v14 = vmul.f32 %v7048_v41, %v9000_v0  ;;  %v9005_v57 = vld [vmem:[#allocation87_spill] sm:$0xff] }
 0x2a1   :  { %v2573_v43 = vadd.f32 %v2557_v24, %v2487_v26  ;;  %v2815_v53 = vmul.f32 %v4121_v3, %v9001_v36  ;;  %4150 = vtanh.f32 %v1922_v33  ;;  %v2266_v7 = vadd.f32 %v9002_v22, %v2248_v2  ;;  %v9006_v26 = vld [vmem:[#allocation52_spill] sm:$0xff] }
 0x2a2   :  { %v4135_v18 = vpop.eup %4134  ;;  %v854_v37 = vadd.f32 %v838_v44, %v768_v27  ;;  %v1010_v35 = vmul.f32 %v4129_v15, %v9004_v30  ;;  %4152 = vtanh.f32 %v2008_v47  ;;  %v2352_v31 = vadd.f32 %v9005_v57, %v2334_v52  ;;  %v9007_v15 = vld [vmem:[#allocation54_spill] sm:$0xff] }
 0x2a3   :  { %v2659_v17 = vadd.f32 %v2643_v8, %v2573_v43  ;;  %4154 = vtanh.f32 %v2094_v55  ;;  %v2438_v13 = vadd.f32 %v8934_v61, %v2420_v38  ;;  %v2592_v24 = vmul.f32 %v7048_v41, %v8932_v62  ;;  %v7197_v8 = vpop.xlane.xlu0 %3060  ;;  %v9009_v38 = vld [vmem:[#allocation96_spill] sm:$0xff] }
 0x2a4   :  { %v4137_v3 = vpop.eup %4136  ;;  %v940_v33 = vadd.f32 %v924_v60, %v854_v37  ;;  %v1096_v2 = vmul.f32 %v4131_v59, %v9006_v26  ;;  %4156 = vtanh.f32 %v2180_v25  ;;  %v2524_v5 = vadd.f32 %v8937_v56, %v2506_v14  ;;  %9008 = vst [vmem:[#allocation115_spill] sm:$0xff] %v7197_v8  ;;  %v7203_v59 = vld [vmem:[%s7561_s0 + $0x78] sm:$0xff]  ;;  %v9010_v37 = vld [vmem:[#allocation10_spill] sm:$0xff]  ;;  %v7207_v60 = vpop.xlane.xlu1 %3054  ;;  %v9013_v25 = vld [vmem:[#allocation12_spill] sm:$0xff] }
 0x2a5   :  { %v4139_v27 = vpop.eup %4138  ;;  %v2745_v44 = vadd.f32 %v2729_v4, %v2659_v17  ;;  %v1182_v47 = vmul.f32 %v4133_v12, %v9007_v15  ;;  %v1268_v52 = vmul.f32 %v4135_v18, %v8933_v16  ;;  %4158 = vtanh.f32 %v2266_v7  ;;  %9011 = vst [vmem:[#allocation114_spill] sm:$0xff] %v7207_v60  ;;  %v9012_v18 = vld [vmem:[#allocation98_spill] sm:$0xff]  ;;  %v9014_v17 = vld [vmem:[#allocation59_spill] sm:$0xff]  ;;  %v9017_v60 = vld [vmem:[#allocation13_spill] sm:$0xff] }
 0x2a6   :  { %v4141_v43 = vpop.eup %4140  ;;  %v1026_v55 = vadd.f32 %v1010_v35, %v940_v33  ;;  %4160 = vtanh.f32 %v2352_v31  ;;  %v2610_v62 = vadd.f32 %v9009_v38, %v2592_v24  ;;  %v99_v4 = vmul.f32 %v7203_v59, %v9010_v37  ;;  %v9015_v33 = vld [vmem:[#allocation64_spill] sm:$0xff]  ;;  %v9016_v37 = vld [vmem:[#allocation11_spill] sm:$0xff] }
 0x2a7   :  { %v2831_v12 = vadd.f32 %v2815_v53, %v2745_v44  ;;  %4162 = vtanh.f32 %v2438_v13  ;;  %v2678_v7 = vmul.f32 %v7048_v41, %v9012_v18  ;;  %v185_v35 = vmul.f32 %v7203_v59, %v9013_v25  ;;  %v9018_v13 = vld [vmem:[#allocation14_spill] sm:$0xff]  ;;  %v9019_v15 = vld [vmem:[#allocation67_spill] sm:$0xff] }
 0x2a8   :  { %v4143_v14 = vpop.eup %4142  ;;  %v1112_v31 = vadd.f32 %v1096_v2, %v1026_v55  ;;  %v1354_v24 = vmul.f32 %v4137_v3, %v9014_v17  ;;  %v1440_v38 = vmul.f32 %v4139_v27, %v9015_v33  ;;  %4164 = vtanh.f32 %v2524_v5  ;;  %v9020_v2 = vld [vmem:[#allocation17_spill] sm:$0xff]  ;;  %v9022_v33 = vld [vmem:[#allocation99_spill] sm:$0xff] }
 0x2a9   :  { %v4145_v56 = vpop.eup %4144  ;;  %v2916_v0 = vmul.f32 0.5, %v2831_v12  ;;  %v117_v8 = vadd.f32 %v9016_v37, %v99_v4  ;;  %v203_v53 = vadd.f32 %v9017_v60, %v185_v35  ;;  %v271_v44 = vmul.f32 %v7203_v59, %v9018_v13  ;;  %v9021_v27 = vld [vmem:[#allocation109_spill] sm:$0xff]  ;;  %v7225_v60 = vpop.xlane.xlu0 %3064  ;;  %v9025_v13 = vld [vmem:[#allocation19_spill] sm:$0xff] }
 0x2aa   :  { %v4147_v18 = vpop.eup %4146  ;;  %v1198_v16 = vadd.f32 %v1182_v47, %v1112_v31  ;;  %v1526_v25 = vmul.f32 %v4141_v43, %v9019_v15  ;;  %4166 = vtanh.f32 %v2610_v62  ;;  %v357_v3 = vmul.f32 %v7203_v59, %v9020_v2  ;;  %v9023_v47 = vld [vmem:[#allocation18_spill] sm:$0xff]  ;;  %v7229_v62 = vpop.xlane.xlu1 %3058  ;;  %v9027_v2 = vld [vmem:[#allocation101_spill] sm:$0xff]  ;;  %v9032_v15 = vld [vmem:[#allocation31_spill] sm:$0xff]  ;;  %3091 = vst.msk [vmem:[%s7568_s7 + $0x28] sm:$0xff] %vm3037_vm1, %v7225_v60 }
 0x2ab   :  { %v4149_v55 = vpop.eup %4148  ;;  %v2938_v5 = vmul.f32 %v9021_v27, %v2916_v0  ;;  %v2696_v17 = vadd.f32 %v9022_v33, %v2678_v7  ;;  %4168 = vtanh.f32 %v117_v8  ;;  %v289_v4 = vadd.f32 %v8947_v39, %v271_v44  ;;  %9024 = vst [vmem:[#allocation112_spill] sm:$0xff] %v7229_v62  ;;  %v9026_v7 = vld [vmem:[#allocation23_spill] sm:$0xff] }
 0x2ac   :  { %v1284_v35 = vadd.f32 %v1268_v52, %v1198_v16  ;;  %v1612_v37 = vmul.f32 %v4143_v14, %v8952_v40  ;;  %4170 = vtanh.f32 %v203_v53  ;;  %v375_v43 = vadd.f32 %v9023_v47, %v357_v3  ;;  %v9028_v52 = vld [vmem:[#allocation27_spill] sm:$0xff]  ;;  %v9031_v40 = vld [vmem:[#allocation28_spill] sm:$0xff] }
 0x2ad   :  { %v2954_v31 = vsub.f32 %v7091_v19, %v2938_v5  ;;  %4172 = vtanh.f32 %v289_v4  ;;  %v443_v0 = vmul.f32 %v7203_v59, %v9025_v13  ;;  %v529_v8 = vmul.f32 %v7203_v59, %v9026_v7  ;;  %v9029_v19 = vld [vmem:[#allocation20_spill] sm:$0xff] }
 0x2ae   :  { %v4151_v39 = vpop.eup %4150  ;;  %v1370_v44 = vadd.f32 %v1354_v24, %v1284_v35  ;;  %v2764_v16 = vmul.f32 %v7048_v41, %v9027_v2  ;;  %4174 = vtanh.f32 %v375_v43  ;;  %v615_v14 = vmul.f32 %v7203_v59, %v9028_v52  ;;  %v9030_v4 = vld [vmem:[#allocation24_spill] sm:$0xff]  ;;  %v9033_v35 = vld [vmem:[#allocation33_spill] sm:$0xff] }
 0x2af   :  { %v4153_v53 = vpop.eup %4152  ;;  %v2970_v3 = vmul.f32 %v2954_v31, %v2831_v12  ;;  %4176 = vtanh.f32 %v2696_v17  ;;  %v461_v5 = vadd.f32 %v9029_v19, %v443_v0  ;;  %v547_v47 = vadd.f32 %v9030_v4, %v529_v8  ;;  %v9034_v52 = vld [vmem:[#allocation73_spill] sm:$0xff]  ;;  %v9035_v12 = vld [vmem:[#allocation35_spill] sm:$0xff]  ;;  %v7250_v31 = vpop.xlane.xlu0 %3068  ;;  %v9037_v8 = vld [vmem:[#allocation102_spill] sm:$0xff] }
 0x2b0   :  { %v4155_v13 = vpop.eup %4154  ;;  %v1456_v33 = vadd.f32 %v1440_v38, %v1370_v44  ;;  %v633_v7 = vadd.f32 %v9031_v40, %v615_v14  ;;  %v701_v24 = vmul.f32 %v7203_v59, %v9032_v15  ;;  %v787_v43 = vmul.f32 %v7203_v59, %v9033_v35  ;;  %9036 = vst [vmem:[#allocation113_spill] sm:$0xff] %v7250_v31  ;;  %v9038_v44 = vld [vmem:[#allocation32_spill] sm:$0xff]  ;;  %v7254_v14 = vpop.xlane.xlu1 %3062 }
 0x2b1   :  { %v4157_v2 = vpop.eup %4156  ;;  %2999 = vadd.xlane.f32.xlu0 %v2970_v3  ;;  %v1698_v27 = vmul.f32 %v4145_v56, %v9034_v52  ;;  %4178 = vtanh.f32 %v461_v5  ;;  %v873_v17 = vmul.f32 %v7203_v59, %v9035_v12  ;;  %v2782_v40 = vadd.f32 %v9037_v8, %v2764_v16  ;;  %v9039_v3 = vld [vmem:[#allocation34_spill] sm:$0xff]  ;;  %v9041_v52 = vld [vmem:[#allocation76_spill] sm:$0xff]  ;;  %v9043_v16 = vld [vmem:[#allocation41_spill] sm:$0xff]  ;;  %3090 = vst.msk [vmem:[%s7568_s7 + $0x20] sm:$0xff] %vm3037_vm1, %v7254_v14 }
 0x2b2   :  { %v4159_v0 = vpop.eup %4158  ;;  %v1542_v38 = vadd.f32 %v1526_v25, %v1456_v33  ;;  %4180 = vtanh.f32 %v547_v47  ;;  %v719_v15 = vadd.f32 %v9038_v44, %v701_v24  ;;  %v805_v4 = vadd.f32 %v9039_v3, %v787_v43  ;;  %v9040_v56 = vld [vmem:[#allocation38_spill] sm:$0xff]  ;;  %v9042_v33 = vld [vmem:[#allocation36_spill] sm:$0xff] }
 0x2b3   :  { %v4161_v19 = vpop.eup %4160  ;;  %4182 = vtanh.f32 %v633_v7  ;;  %v959_v5 = vmul.f32 %v7203_v59, %v9040_v56  ;;  %v1784_v31 = vmul.f32 %v4147_v18, %v9041_v52  ;;  %v891_v25 = vadd.f32 %v9042_v33, %v873_v17  ;;  %v7270_v17 = vpop.xlane.xlu0 %2973 }
 0x2b4   :  { %v4163_v35 = vpop.eup %4162  ;;  %v1628_v12 = vadd.f32 %v1612_v37, %v1542_v38  ;;  %4184 = vtanh.f32 %v719_v15  ;;  %v1045_v47 = vmul.f32 %v7203_v59, %v9043_v16  ;;  %v1870_v43 = vmul.f32 %v4149_v55, %v8970_v1  ;;  %v9044_v37 = vld [vmem:[#allocation44_spill] sm:$0xff] }
 0x2b5   :  { %v4165_v62 = vpop.eup %4164  ;;  %4186 = vtanh.f32 %v2782_v40  ;;  %v1956_v3 = vmul.f32 %v4151_v39, %v8973_v48  ;;  %v977_v18 = vadd.f32 %v8971_v6, %v959_v5  ;;  %v1131_v38 = vmul.f32 %v7203_v59, %v9044_v37  ;;  %v7276_v40 = vpop.xlane.xlu1 %3066  ;;  %v9045_v6 = vld [vmem:[#allocation21_spill] sm:$0xff] }
 0x2b6   :  { %v1714_v7 = vadd.f32 %v1698_v27, %v1628_v12  ;;  %4188 = vtanh.f32 %v805_v4  ;;  %v2042_v33 = vmul.f32 %v4153_v53, %v8904_v50  ;;  %v2128_v27 = vmul.f32 %v4155_v13, %v8906_v63  ;;  %v9046_v12 = vld [vmem:[#allocation42_spill] sm:$0xff]  ;;  %v9049_v50 = vld [vmem:[#allocation16_spill] sm:$0xff]  ;;  %3092 = vst.msk [vmem:[%s7568_s7 + $0x30] sm:$0xff] %vm3037_vm1, %v7276_v40 }
 0x2b7   :  { %v4167_v44 = vpop.eup %4166  ;;  %v1217_v55 = vmul.f32 %v7203_v59, %v8975_v20  ;;  %v2214_v4 = vmul.f32 %v4157_v2, %v8835_v34  ;;  %4190 = vtanh.f32 %v891_v25  ;;  %v1063_v16 = vadd.f32 %v9046_v12, %v1045_v47  ;;  %v9048_v13 = vld [vmem:[#allocation50_spill] sm:$0xff] }
 0x2b8   :  { %v4169_v15 = vpop.eup %4168  ;;  %v1800_v56 = vadd.f32 %v1784_v31, %v1714_v7  ;;  %v9047_v31 = vld [vmem:[#allocation94_spill] sm:$0xff]  ;;  %v1303_v63 = vmul.f32 %v7203_v59, %v9048_v13  ;;  %4192 = vtanh.f32 %v977_v18  ;;  %v2386_v47 = vmul.f32 %v4161_v19, %v8909_v21 }
 0x2b9   :  { %v4171_v39 = vpop.eup %4170  ;;  %v151_v5 = vmul.f32 %v4169_v15, %v9045_v6  ;;  %v2300_v7 = vmul.f32 %v4159_v0, %v9047_v31  ;;  %v9050_v2 = vld [vmem:[#allocation46_spill] sm:$0xff]  ;;  %v9052_v0 = vld [vmem:[#allocation53_spill] sm:$0xff]  ;;  %4194 = vtanh.f32 %v1063_v16  ;;  %v9054_v31 = vld [vmem:[#allocation56_spill] sm:$0xff]  ;;  %v3005_v60 = vmul.f32 1.442695, %v7270_v17 }
 0x2ba   :  { %v4173_v37 = vpop.eup %4172  ;;  %v1886_v24 = vadd.f32 %v1870_v43, %v1800_v56  ;;  %v237_v53 = vmul.f32 %v4171_v39, %v8979_v10  ;;  %v1149_v15 = vadd.f32 %v9050_v2, %v1131_v38  ;;  %v9051_v43 = vld [vmem:[#allocation48_spill] sm:$0xff]  ;;  %v1389_v10 = vmul.f32 %v7203_v59, %v9052_v0  ;;  %v9053_v12 = vld [vmem:[#allocation26_spill] sm:$0xff]  ;;  %v7301_v2 = vpop.xlane.xlu1 %2975 }
 0x2bb   :  { %v4175_v20 = vpop.eup %4174  ;;  %v167_v8 = vadd.f32 %v151_v5, %v9049_v50  ;;  %v323_v48 = vmul.f32 %v4173_v37, %v8980_v58  ;;  %v1235_v56 = vadd.f32 %v9051_v43, %v1217_v55  ;;  %v1475_v50 = vmul.f32 %v7203_v59, %v9054_v31  ;;  %v7295_v58 = vpop.xlane.xlu0 %2977  ;;  %v9055_v5 = vld [vmem:[#allocation100_spill] sm:$0xff] }
 0x2bc   :  { %v4177_v25 = vpop.eup %4176  ;;  %v1972_v6 = vadd.f32 %v1956_v3, %v1886_v24  ;;  %v409_v13 = vmul.f32 %v4175_v20, %v9053_v12  ;;  %v2472_v24 = vmul.f32 %v4163_v35, %v9055_v5  ;;  %v9056_v3 = vld [vmem:[#allocation51_spill] sm:$0xff]  ;;  %v9057_v37 = vld [vmem:[#allocation60_spill] sm:$0xff]  ;;  %v9058_v20 = vld [vmem:[#allocation29_spill] sm:$0xff]  ;;  %4196 = vtanh.f32 %v1149_v15 }
 0x2bd   :  { %v253_v39 = vadd.f32 %v237_v53, %v167_v8  ;;  %v1321_v19 = vadd.f32 %v9056_v3, %v1303_v63  ;;  %v1561_v55 = vmul.f32 %v7203_v59, %v9057_v37  ;;  %v2558_v53 = vmul.f32 %v4165_v62, %v8913_v11  ;;  %v9060_v12 = vld [vmem:[#allocation62_spill] sm:$0xff]  ;;  %v9061_v5 = vld [vmem:[#allocation57_spill] sm:$0xff] }
 0x2be   :  { %v4179_v18 = vpop.eup %4178  ;;  %v2058_v38 = vadd.f32 %v2042_v33, %v1972_v6  ;;  %v2644_v33 = vmul.f32 %v4167_v44, %v8914_v45  ;;  %v9059_v6 = vld [vmem:[#allocation55_spill] sm:$0xff]  ;;  %v1647_v63 = vmul.f32 %v7203_v59, %v9060_v12  ;;  %4198 = vtanh.f32 %v1235_v56  ;;  %v9069_v12 = vld [vmem:[#allocation80_spill] sm:$0xff] }
 0x2bf   :  { %v4181_v8 = vpop.eup %4180  ;;  %v339_v16 = vadd.f32 %v323_v48, %v253_v39  ;;  %v495_v43 = vmul.f32 %v4179_v18, %v9058_v20  ;;  %v1407_v35 = vadd.f32 %v9059_v6, %v1389_v10  ;;  %v1493_v21 = vadd.f32 %v9061_v5, %v1475_v50  ;;  %v9062_v39 = vld [vmem:[#allocation65_spill] sm:$0xff]  ;;  %v7318_v56 = vpop.xlane.xlu0 %2979  ;;  %v9065_v20 = vld [vmem:[#allocation66_spill] sm:$0xff] }
 0x2c0   :  { %v4183_v31 = vpop.eup %4182  ;;  %v2144_v0 = vadd.f32 %v2128_v27, %v2058_v38  ;;  %v581_v37 = vmul.f32 %v4181_v8, %v8986_v42  ;;  %4200 = vtanh.f32 %v1321_v19  ;;  %v1579_v15 = vadd.f32 %v8985_v29, %v1561_v55  ;;  %v7323_v5 = vpop.xlane.xlu1 %2981  ;;  %v9068_v6 = vld [vmem:[#allocation69_spill] sm:$0xff] }
 0x2c1   :  { %v425_v3 = vadd.f32 %v409_v13, %v339_v16  ;;  %v4185_v62 = vpop.eup %4184  ;;  %v1733_v27 = vmul.f32 %v7203_v59, %v9062_v39  ;;  %v2730_v10 = vmul.f32 %v4177_v25, %v8777_v23  ;;  %v667_v38 = vmul.f32 %v4183_v31, %v8915_v49  ;;  %v9063_v25 = vld [vmem:[#allocation40_spill] sm:$0xff]  ;;  %v9064_v49 = vld [vmem:[#allocation74_spill] sm:$0xff] }
 0x2c2   :  { %v2230_v48 = vadd.f32 %v2214_v4, %v2144_v0  ;;  %v4187_v44 = vpop.eup %4186  ;;  %v1819_v42 = vmul.f32 %v7203_v59, %v8984_v32  ;;  %4202 = vtanh.f32 %v1407_v35  ;;  %v1665_v4 = vadd.f32 %v8987_v28, %v1647_v63  ;;  %v9067_v0 = vld [vmem:[#allocation43_spill] sm:$0xff] }
 0x2c3   :  { %v511_v18 = vadd.f32 %v495_v43, %v425_v3  ;;  %v4189_v13 = vpop.eup %4188  ;;  %v1905_v29 = vmul.f32 %v7203_v59, %v8989_v54  ;;  %v753_v55 = vmul.f32 %v4185_v62, %v9063_v25  ;;  %4204 = vtanh.f32 %v1493_v21  ;;  %v9066_v43 = vld [vmem:[#allocation77_spill] sm:$0xff] }
 0x2c4   :  { %v2316_v50 = vadd.f32 %v2300_v7, %v2230_v48  ;;  %v1991_v8 = vmul.f32 %v7203_v59, %v9064_v49  ;;  %v4191_v32 = vpop.eup %4190  ;;  %4206 = vtanh.f32 %v1579_v15  ;;  %v1751_v7 = vadd.f32 %v9065_v20, %v1733_v27  ;;  %v9072_v27 = vld [vmem:[#allocation75_spill] sm:$0xff]  ;;  %v9075_v25 = vld [vmem:[#allocation89_spill] sm:$0xff]  ;;  %v2986_v49 = vpop.xlane.xlu1 %2985 }
 0x2c5   :  { %v597_v19 = vadd.f32 %v581_v37, %v511_v18  ;;  %v2077_v28 = vmul.f32 %v7203_v59, %v9066_v43  ;;  %v839_v54 = vmul.f32 %v4189_v13, %v9067_v0  ;;  %v1837_v35 = vadd.f32 %v9068_v6, %v1819_v42  ;;  %v4193_v21 = vpop.eup %4192  ;;  %v9070_v37 = vld [vmem:[#allocation72_spill] sm:$0xff]  ;;  %v7342_v42 = vpop.xlane.xlu0 %2983  ;;  %v9076_v6 = vld [vmem:[#allocation54_spill] sm:$0xff] }
 0x2c6   :  { %v2402_v16 = vadd.f32 %v2386_v47, %v2316_v50  ;;  %v2163_v63 = vmul.f32 %v7203_v59, %v9069_v12  ;;  %4208 = vtanh.f32 %v1665_v4  ;;  %v1923_v62 = vadd.f32 %v9070_v37, %v1905_v29  ;;  %v9071_v47 = vld [vmem:[#allocation83_spill] sm:$0xff]  ;;  %v4195_v50 = vpop.eup %4194 }
 0x2c7   :  { %v683_v31 = vadd.f32 %v667_v38, %v597_v19  ;;  %v2249_v48 = vmul.f32 %v7203_v59, %v9071_v47  ;;  %v925_v39 = vmul.f32 %v4191_v32, %v8999_v51  ;;  %v2009_v18 = vadd.f32 %v9072_v27, %v1991_v8  ;;  %v9073_v38 = vld [vmem:[#allocation86_spill] sm:$0xff]  ;;  %v9081_v37 = vld [vmem:[#allocation115_spill] sm:$0xff] }
 0x2c8   :  { %v2488_v3 = vadd.f32 %v2472_v24, %v2402_v16  ;;  %v2335_v13 = vmul.f32 %v7203_v59, %v9073_v38  ;;  %4210 = vtanh.f32 %v1751_v7  ;;  %v9074_v24 = vld [vmem:[#allocation78_spill] sm:$0xff]  ;;  %v2421_v29 = vmul.f32 %v7203_v59, %v9075_v25  ;;  %3089 = vst.msk [vmem:[%s7568_s7 + $0x18] sm:$0xff] %vm3037_vm1, %v9081_v37 }
 0x2c9   :  { %v769_v15 = vadd.f32 %v753_v55, %v683_v31  ;;  %v2095_v4 = vadd.f32 %v9074_v24, %v2077_v28  ;;  %v1011_v55 = vmul.f32 %v4193_v21, %v9004_v30  ;;  %4212 = vtanh.f32 %v1837_v35  ;;  %v4197_v8 = vpop.eup %4196  ;;  %v9078_v35 = vld [vmem:[#allocation107_spill] sm:$0xff]  ;;  %v9079_v21 = vld [vmem:[#allocation58_spill] sm:$0xff] }
 0x2ca   :  { %v2574_v19 = vadd.f32 %v2558_v53, %v2488_v3  ;;  %v2181_v51 = vadd.f32 %v8928_v9, %v2163_v63  ;;  %v2816_v20 = vmul.f32 %v4187_v44, %v9001_v36  ;;  %4214 = vtanh.f32 %v1923_v62  ;;  %v2988_v44 = vpop.xlane.xlu0 %2987  ;;  %v9084_v62 = vld [vmem:[#allocation113_spill] sm:$0xff] }
 0x2cb   :  { %v855_v16 = vadd.f32 %v839_v54, %v769_v15  ;;  %v2267_v53 = vadd.f32 %v9002_v22, %v2249_v48  ;;  %v1097_v43 = vmul.f32 %v4195_v50, %v9006_v26  ;;  %4216 = vtanh.f32 %v2009_v18  ;;  %v4199_v31 = vpop.eup %4198  ;;  %3093 = vst.msk [vmem:[%s7568_s7 + $0x38] sm:$0xff] %vm3037_vm1, %v9084_v62  ;;  %v9085_v15 = vld [vmem:[#allocation59_spill] sm:$0xff] }
 0x2cc   :  { %v2660_v32 = vadd.f32 %v2644_v33, %v2574_v19  ;;  %v2353_v28 = vadd.f32 %v9005_v57, %v2335_v13  ;;  %4218 = vtanh.f32 %v2095_v4  ;;  %v2439_v30 = vadd.f32 %v8934_v61, %v2421_v29  ;;  %v2990_v57 = vpop.xlane.xlu1 %2989  ;;  %v9080_v61 = vld [vmem:[#allocation117_spill] sm:$0xff]  ;;  %v9087_v19 = vld [vmem:[#allocation64_spill] sm:$0xff]  ;;  %v9088_v29 = vld [vmem:[#allocation67_spill] sm:$0xff] }
 0x2cd   :  { %v941_v7 = vadd.f32 %v925_v39, %v855_v16  ;;  %v4201_v54 = vpop.eup %4200  ;;  %v1183_v33 = vmul.f32 %v4197_v8, %v9076_v6  ;;  %4220 = vtanh.f32 %v2181_v51  ;;  %v9077_v22 = vsub.f32 %v7159_v46, %v7048_v41  ;;  %3087 = vst.msk [vmem:[%s7568_s7 + $0x8] sm:$0xff] %vm3037_vm1, %v9080_v61  ;;  %v9082_v41 = vld [vmem:[#allocation114_spill] sm:$0xff]  ;;  %v9083_v46 = vld [vmem:[#allocation112_spill] sm:$0xff]  ;;  %v9086_v13 = vld [vmem:[#allocation109_spill] sm:$0xff] }
 0x2ce   :  { %v2746_v0 = vadd.f32 %v2730_v10, %v2660_v32  ;;  %4222 = vtanh.f32 %v2267_v53  ;;  %v1269_v3 = vmul.f32 %v4199_v31, %v9079_v21  ;;  %3086 = vst.msk [vmem:[%s7568_s7] sm:$0xff] %vm3037_vm1, %v9082_v41  ;;  %3088 = vst.msk [vmem:[%s7568_s7 + $0x10] sm:$0xff] %vm3037_vm1, %v9083_v46  ;;  %v1355_v39 = vmul.f32 %v4201_v54, %v9085_v15  ;;  %v9089_v53 = vld [vmem:[#allocation92_spill] sm:$0xff]  ;;  %v9090_v31 = vld [vmem:[#allocation95_spill] sm:$0xff] }
 0x2cf   :  { %v1027_v9 = vadd.f32 %v1011_v55, %v941_v7  ;;  %v2901_v12 = vmul.f32 %v9078_v35, %v9077_v22  ;;  %v4203_v63 = vpop.eup %4202  ;;  %4224 = vtanh.f32 %v2353_v28  ;;  %v3009_v27 = vmul.f32 1.442695, %v7295_v58  ;;  %v2992_v55 = vpop.xlane.xlu0 %2991  ;;  %v9095_v61 = vld [vmem:[#allocation101_spill] sm:$0xff]  ;;  %v4296_v15 = vld [vmem:[%s7561_s0 + $0x40] sm:$0xff] }
 0x2d0   :  { %v2832_v26 = vadd.f32 %v2816_v20, %v2746_v0  ;;  %v4205_v47 = vpop.eup %4204  ;;  %4226 = vtanh.f32 %v2439_v30  ;;  %v3007_v14 = vmul.f32 1.442695, %v7301_v2  ;;  %v3011_v17 = vmul.f32 1.442695, %v7318_v56  ;;  %v2994_v56 = vpop.xlane.xlu1 %2993 }
 0x2d1   :  { %v1113_v10 = vadd.f32 %v1097_v43, %v1027_v9  ;;  %v4207_v18 = vpop.eup %4206  ;;  %4228 = vpow2.f32 %v3005_v60  ;;  %v1441_v24 = vmul.f32 %v4203_v63, %v9087_v19  ;;  %v3013_v40 = vmul.f32 1.442695, %v7323_v5  ;;  %v9091_v9 = vld [vmem:[#allocation70_spill] sm:$0xff]  ;;  %v9096_v60 = vld [vmem:[#allocation96_spill] sm:$0xff] }
 0x2d2   :  { %v2917_v48 = vmul.f32 0.5, %v2832_v26  ;;  %4230 = vpow2.f32 %v3009_v27  ;;  %v1527_v16 = vmul.f32 %v4205_v47, %v9088_v29  ;;  %v3015_v58 = vmul.f32 1.442695, %v7342_v42 }
 0x2d3   :  { %v1199_v38 = vadd.f32 %v1183_v33, %v1113_v10  ;;  %v4209_v4 = vpop.eup %4208  ;;  %4232 = vpow2.f32 %v3007_v14  ;;  %v3017_v2 = vmul.f32 1.442695, %v2986_v49  ;;  %v3019_v8 = vmul.f32 1.442695, %v2988_v44  ;;  %v9092_v44 = vld [vmem:[#allocation98_spill] sm:$0xff]  ;;  %v9094_v10 = vld [vmem:[#allocation93_spill] sm:$0xff] }
 0x2d4   :  { %v2939_v50 = vmul.f32 %v9086_v13, %v2917_v48  ;;  %4234 = vpow2.f32 %v3011_v17  ;;  %v2507_v7 = vmul.f32 %v7203_v59, %v9089_v53  ;;  %v3021_v5 = vmul.f32 1.442695, %v2990_v57 }
 0x2d5   :  { %v1285_v25 = vadd.f32 %v1269_v3, %v1199_v38  ;;  %v4211_v32 = vpop.eup %4210  ;;  %4236 = vpow2.f32 %v3013_v40  ;;  %v2593_v0 = vmul.f32 %v7203_v59, %v9090_v31  ;;  %v3023_v42 = vmul.f32 1.442695, %v2992_v55  ;;  %v9097_v38 = vld [vmem:[#allocation99_spill] sm:$0xff] }
 0x2d6   :  { %v2955_v51 = vsub.f32 %v2901_v12, %v2939_v50  ;;  %v4213_v43 = vpop.eup %4212  ;;  %4238 = vpow2.f32 %v3015_v58  ;;  %v1613_v49 = vmul.f32 %v4207_v18, %v9091_v9  ;;  %v3025_v6 = vmul.f32 1.442695, %v2994_v56  ;;  %v4299_v9 = vld [vmem:[%s7561_s0 + $0x70] sm:$0xff] }
 0x2d7   :  { %v1371_v20 = vadd.f32 %v1355_v39, %v1285_v25  ;;  %v4215_v30 = vpop.eup %4214  ;;  %4240 = vpow2.f32 %v3017_v2  ;;  %v2679_v22 = vmul.f32 %v7203_v59, %v9092_v44  ;;  %v2525_v21 = vadd.f32 %v9094_v10, %v2507_v7 }
 0x2d8   :  { %v2971_v28 = vmul.f32 %v2955_v51, %v2832_v26  ;;  %v4217_v33 = vpop.eup %4216  ;;  %4242 = vpow2.f32 %v3019_v8  ;;  %v9093_v26 = vld [vmem:[#allocation73_spill] sm:$0xff]  ;;  %v2765_v37 = vmul.f32 %v7203_v59, %v9095_v61  ;;  %v1785_v62 = vmul.f32 %v4211_v32, %v9041_v52  ;;  %v9098_v52 = vld [vmem:[#allocation82_spill] sm:$0xff]  ;;  %v9101_v8 = vld [vmem:[#allocation88_spill] sm:$0xff] }
 0x2d9   :  { %v1457_v54 = vadd.f32 %v1441_v24, %v1371_v20  ;;  %v4219_v12 = vpop.eup %4218  ;;  %v1699_v63 = vmul.f32 %v4209_v4, %v9093_v26  ;;  %4244 = vpow2.f32 %v3021_v5  ;;  %v2611_v47 = vadd.f32 %v9096_v60, %v2593_v0  ;;  %v9099_v24 = vld [vmem:[#allocation102_spill] sm:$0xff] }
 0x2da   :  { %3001 = vadd.xlane.f32.xlu1 %v2971_v28  ;;  %v4221_v3 = vpop.eup %4220  ;;  %4246 = vpow2.f32 %v3023_v42  ;;  %v1871_v18 = vmul.f32 %v4213_v43, %v8970_v1  ;;  %v2697_v14 = vadd.f32 %v9097_v38, %v2679_v22  ;;  %v1957_v19 = vmul.f32 %v4215_v30, %v9098_v52  ;;  %v4297_v1 = vld [vmem:[%s7561_s0 + $0x50] sm:$0xff]  ;;  %v4298_v20 = vld [vmem:[%s7561_s0 + $0x60] sm:$0xff] }
 0x2db   :  { %v1543_v57 = vadd.f32 %v1527_v16, %v1457_v54  ;;  %v4223_v41 = vpop.eup %4222  ;;  %4248 = vpow2.f32 %v3025_v6  ;;  %v2783_v40 = vadd.f32 %v9099_v24, %v2765_v37  ;;  %v9100_v16 = vld [vmem:[#allocation85_spill] sm:$0xff]  ;;  %v2129_v56 = vmul.f32 %v4219_v12, %v9101_v8  ;;  %v9102_v42 = vld [vmem:[#allocation94_spill] sm:$0xff]  ;;  %v9104_v12 = vld [vmem:[#allocation100_spill] sm:$0xff] }
 0x2dc   :  { %v4225_v48 = vpop.eup %4224  ;;  %4250 = vtanh.f32 %v2525_v21  ;;  %v2043_v58 = vmul.f32 %v4217_v33, %v9100_v16  ;;  %v2215_v5 = vmul.f32 %v4221_v3, %v8835_v34  ;;  %v2301_v30 = vmul.f32 %v4223_v41, %v9102_v42  ;;  %v9103_v6 = vld [vmem:[#allocation97_spill] sm:$0xff] }
 0x2dd   :  { %v1629_v46 = vadd.f32 %v1613_v49, %v1543_v57  ;;  %v4227_v39 = vpop.eup %4226  ;;  %4252 = vtanh.f32 %v2611_v47  ;;  %v2387_v33 = vmul.f32 %v4225_v48, %v9103_v6  ;;  %v9105_v47 = vld [vmem:[#allocation105_spill] sm:$0xff] }
 0x2de   :  { %3070 = vmax.xlane.f32.xlu1 %v4296_v15  ;;  %v4229_v17 = vpop.eup %4228  ;;  %4254 = vtanh.f32 %v2697_v14  ;;  %v2473_v57 = vmul.f32 %v4227_v39, %v9104_v12  ;;  %v2886_v48 = vsub.f32 %v9105_v47, %v7203_v59  ;;  %v4301_v14 = vld [vmem:[%s7561_s0 + $0x48] sm:$0xff] }
 0x2df   :  { %v1715_v27 = vadd.f32 %v1699_v63, %v1629_v46  ;;  %v4231_v13 = vpop.eup %4230  ;;  %3038 = vst.msk [vmem:[%s7567_s6] sm:$0xff] %vm3037_vm1, %v4229_v17  ;;  %4256 = vtanh.f32 %v2783_v40  ;;  %v4302_v17 = vld [vmem:[%s7561_s0 + $0x58] sm:$0xff] }
 0x2e0   :  { %v4233_v4 = vpop.eup %4232  ;;  %3040 = vst.msk [vmem:[%s7567_s6 + $0x10] sm:$0xff] %vm3037_vm1, %v4231_v13 }
 0x2e1   :  { %v1801_v50 = vadd.f32 %v1785_v62, %v1715_v27  ;;  %v4235_v25 = vpop.eup %4234  ;;  %3039 = vst.msk [vmem:[%s7567_s6 + $0x8] sm:$0xff] %vm3037_vm1, %v4233_v4 }
 0x2e2   :  { %3074 = vmax.xlane.f32.xlu1 %v4297_v1  ;;  %v4237_v55 = vpop.eup %4236  ;;  %3041 = vst.msk [vmem:[%s7567_s6 + $0x18] sm:$0xff] %vm3037_vm1, %v4235_v25 }
 0x2e3   :  { %v1887_v29 = vadd.f32 %v1871_v18, %v1801_v50  ;;  %v4239_v51 = vpop.eup %4238  ;;  %3042 = vst.msk [vmem:[%s7567_s6 + $0x20] sm:$0xff] %vm3037_vm1, %v4237_v55 }
 0x2e4   :  { %v4241_v32 = vpop.eup %4240  ;;  %3043 = vst.msk [vmem:[%s7567_s6 + $0x28] sm:$0xff] %vm3037_vm1, %v4239_v51 }
 0x2e5   :  { %v1973_v2 = vadd.f32 %v1957_v19, %v1887_v29  ;;  %v4243_v53 = vpop.eup %4242  ;;  %3044 = vst.msk [vmem:[%s7567_s6 + $0x30] sm:$0xff] %vm3037_vm1, %v4241_v32 }
 0x2e6   :  { %3078 = vmax.xlane.f32.xlu1 %v4298_v20  ;;  %v4245_v43 = vpop.eup %4244  ;;  %3045 = vst.msk [vmem:[%s7567_s6 + $0x38] sm:$0xff] %vm3037_vm1, %v4243_v53 }
 0x2e7   :  { %v2059_v7 = vadd.f32 %v2043_v58, %v1973_v2  ;;  %v2996_v28 = vpop.xlane.xlu0 %2995  ;;  %v4247_v31 = vpop.eup %4246  ;;  %3046 = vst.msk [vmem:[%s7567_s6 + $0x40] sm:$0xff] %vm3037_vm1, %v4245_v43 }
 0x2e8   :  { %v3027_v34 = vmul.f32 1.442695, %v2996_v28  ;;  %v4249_v54 = vpop.eup %4248  ;;  %3047 = vst.msk [vmem:[%s7567_s6 + $0x48] sm:$0xff] %vm3037_vm1, %v4247_v31 }
 0x2e9   :  { %v2145_v0 = vadd.f32 %v2129_v56, %v2059_v7  ;;  %3048 = vst.msk [vmem:[%s7567_s6 + $0x50] sm:$0xff] %vm3037_vm1, %v4249_v54  ;;  %v4251_v44 = vpop.eup %4250 }
 0x2ea   :  { %3082 = vmax.xlane.f32.xlu1 %v4299_v9  ;;  %4258 = vpow2.f32 %v3027_v34  ;;  %v4253_v26 = vpop.eup %4252  ;;  %v2559_v10 = vmul.f32 %v4251_v44, %v8913_v11  ;;  %v2902_v11 = vmul.f32 %v9078_v35, %v2886_v48  ;;  %v4303_v35 = vld [vmem:[%s7561_s0 + $0x68] sm:$0xff] }
 0x2eb   :  { %v2231_v49 = vadd.f32 %v2215_v5, %v2145_v0  ;;  %v4255_v21 = vpop.eup %4254  ;;  %v2645_v61 = vmul.f32 %v4253_v26, %v8914_v45 }
 0x2ec   :  { %v4257_v37 = vpop.eup %4256  ;;  %v2731_v46 = vmul.f32 %v4255_v21, %v8777_v23  ;;  %v4300_v23 = vld [vmem:[%s7562_s1] ss:$0 sm:$0xff] }
 0x2ed   :  { %v2317_v22 = vadd.f32 %v2301_v30, %v2231_v49  ;;  %v2817_v60 = vmul.f32 %v4257_v37, %v9001_v36 }
 0x2ef   :  { %v2403_v63 = vadd.f32 %v2387_v33, %v2317_v22 }
 0x2f1   :  { %v2489_v3 = vadd.f32 %v2473_v57, %v2403_v63 }
 0x2f3   :  { %v2575_v41 = vadd.f32 %v2559_v10, %v2489_v3 }
 0x2f5   :  { %v2661_v62 = vadd.f32 %v2645_v61, %v2575_v41 }
 0x2f7   :  { %v2747_v15 = vadd.f32 %v2731_v46, %v2661_v62  ;;  %v4259_v39 = vpop.eup %4258 }
 0x2f8   :  { %3049 = vst.msk [vmem:[%s7567_s6 + $0x58] sm:$0xff] %vm3037_vm1, %v4259_v39 }
 0x2f9   :  { %v2833_v27 = vadd.f32 %v2817_v60, %v2747_v15 }
 0x2fb   :  { %v2918_v45 = vmul.f32 0.5, %v2833_v27 }
 0x2fd   :  { %v2940_v18 = vmul.f32 %v4300_v23, %v2918_v45 }
 0x2ff   :  { %v2956_v36 = vsub.f32 %v2902_v11, %v2940_v18 }
 0x301   :  { %v2972_v38 = vmul.f32 %v2956_v36, %v2833_v27 }
 0x303   :  { %3003 = vadd.xlane.f32.xlu0 %v2972_v38 }
 0x307   :  { %3072 = vmax.xlane.f32.xlu0 %v4301_v14 }
 0x30b   :  { %3076 = vmax.xlane.f32.xlu0 %v4302_v17 }
 0x30f   :  { %3080 = vmax.xlane.f32.xlu0 %v4303_v35 }
 0x311   :  { %v2998_v13 = vpop.xlane.xlu1 %2997 }
 0x312   :  { %v3029_v50 = vmul.f32 1.442695, %v2998_v13 }
 0x313   :  { %3084 = vmax.xlane.f32.xlu0 %v7203_v59 }
 0x314   :  { %4260 = vpow2.f32 %v3029_v50 }
 0x321   :  { %v4261_v52 = vpop.eup %4260 }
 0x322   :  { %3050 = vst.msk [vmem:[%s7567_s6 + $0x60] sm:$0xff] %vm3037_vm1, %v4261_v52 }
 0x33a   :  { %v3000_v19 = vpop.xlane.xlu0 %2999 }
 0x33b   :  { %v3031_v24 = vmul.f32 1.442695, %v3000_v19 }
 0x33d   :  { %4262 = vpow2.f32 %v3031_v24 }
 0x34a   :  { %v4263_v40 = vpop.eup %4262 }
 0x34b   :  { %3051 = vst.msk [vmem:[%s7567_s6 + $0x68] sm:$0xff] %vm3037_vm1, %v4263_v40 }
 0x363   :  { %v3002_v4 = vpop.xlane.xlu1 %3001 }
 0x364   :  { %v3033_v1 = vmul.f32 1.442695, %v3002_v4 }
 0x366   :  { %4264 = vpow2.f32 %v3033_v1 }
 0x367   :  { %v3071_v59 = vpop.xlane.xlu1 %3070 }
 0x368   :  { %3094 = vst.msk [vmem:[%s7568_s7 + $0x40] sm:$0xff] %vm3037_vm1, %v3071_v59 }
 0x36b   :  { %v3075_v25 = vpop.xlane.xlu1 %3074 }
 0x36c   :  { %3096 = vst.msk [vmem:[%s7568_s7 + $0x50] sm:$0xff] %vm3037_vm1, %v3075_v25 }
 0x36f   :  { %v3079_v29 = vpop.xlane.xlu1 %3078 }
 0x370   :  { %3098 = vst.msk [vmem:[%s7568_s7 + $0x60] sm:$0xff] %vm3037_vm1, %v3079_v29 }
 0x373   :  { %v4265_v16 = vpop.eup %4264  ;;  %v3083_v58 = vpop.xlane.xlu1 %3082 }
 0x374   :  { %3052 = vst.msk [vmem:[%s7567_s6 + $0x70] sm:$0xff] %vm3037_vm1, %v4265_v16  ;;  %3100 = vst.msk [vmem:[%s7568_s7 + $0x70] sm:$0xff] %vm3037_vm1, %v3083_v58 }
 0x38c   :  { %v3004_v55 = vpop.xlane.xlu0 %3003 }
 0x38d   :  { %v3035_v51 = vmul.f32 1.442695, %v3004_v55 }
 0x38f   :  { %4266 = vpow2.f32 %v3035_v51 }
 0x390   :  { %v3073_v2 = vpop.xlane.xlu0 %3072 }
 0x391   :  { %3095 = vst.msk [vmem:[%s7568_s7 + $0x48] sm:$0xff] %vm3037_vm1, %v3073_v2 }
 0x394   :  { %v3077_v8 = vpop.xlane.xlu0 %3076 }
 0x395   :  { %3097 = vst.msk [vmem:[%s7568_s7 + $0x58] sm:$0xff] %vm3037_vm1, %v3077_v8 }
 0x398   :  { %v3081_v56 = vpop.xlane.xlu0 %3080 }
 0x399   :  { %3099 = vst.msk [vmem:[%s7568_s7 + $0x68] sm:$0xff] %vm3037_vm1, %v3081_v56 }
 0x39c   :  { %v4267_v32 = vpop.eup %4266  ;;  %v3085_v20 = vpop.xlane.xlu0 %3084 }
 0x39d   :  { %3053 = vst.msk [vmem:[%s7567_s6 + $0x78] sm:$0xff] %vm3037_vm1, %v4267_v32  ;;  %3101 = vst.msk [vmem:[%s7568_s7 + $0x78] sm:$0xff] %vm3037_vm1, %v3085_v20 }
 0x39e   :  { %3110 = vsyncpa [#allocation4], 1 }
 0x39f   :  { %3111 = vsyncpa [#allocation6], 1 }

</bundles_post_ra>
